<compile_context>
chip_gen: v7x
topology: tpu7x:2x2x1
jax: 0.10.0
libtpu: 0.0.40
codegen_flags: <defaults>
</compile_context>

<pallas_src>
import math
import functools

import jax
import jax.numpy as jnp
from jax.experimental import pallas as pl
from jax.experimental.pallas import tpu as pltpu


LN_EPS = 1e-5  # PyTorch LayerNorm default


def _layer_norm(v, g, b, eps=LN_EPS):
    mu = jnp.mean(v, axis=-1, keepdims=True)
    d = v - mu
    var = jnp.mean(d * d, axis=-1, keepdims=True)
    return d * jax.lax.rsqrt(var + eps) * g + b


# ----------------------------------------------------------------------------
# Fused kernel: patch-embed + PE -> L x encoder layer -> mean over P -> fc
# grid = (patch_tiles [arbitrary], layers [arbitrary]); activation lives in a
# VMEM scratch across the layer axis; the (B, E) output is resident for the
# whole grid and only written at the final grid step.
# ----------------------------------------------------------------------------
def _fused_vit_kernel(xp_ref, pw_ref, peb_ref,
                      wqkv_ref, bqkv_ref, wo_ref, bo_ref,
                      g1_ref, be1_ref, w1_ref, b1_ref, w2_ref, b2_ref,
                      g2_ref, be2_ref, fcw_ref, fcb_ref,
                      out_ref,
                      h_ref, acc_ref,
                      *, num_heads, batch, inv_p):
    i = pl.program_id(0)
    l = pl.program_id(1)
    nt = pl.num_programs(0)
    L = pl.num_programs(1)

    T, E = h_ref.shape            # T = p_tile * batch rows, lane-dense E
    B = batch
    PT = T // B
    H = num_heads
    Dh = E // H

    # ---- prologue (per patch tile): patch embedding + conv bias + positional enc ----
    @pl.when(l == 0)
    def _():
        xb = xp_ref[...].astype(jnp.bfloat16)                         # (T, 128)
        h_ref[...] = (jnp.dot(xb, pw_ref[...],
                              preferred_element_type=jnp.float32)
                      + peb_ref[...])                                  # peb = pe + conv bias

    x = h_ref[...]                                                     # (T, E) f32
    xb16 = x.astype(jnp.bfloat16)

    # ---- self-attention over the image-batch axis, per (patch, head) ----
    # 1/sqrt(Dh) is folded into the Q columns of wqkv/bqkv at parameter-prep time.
    qkv = (jnp.dot(xb16, wqkv_ref[...], preferred_element_type=jnp.float32)
           + bqkv_ref[...])                                            # (T, 3E)
    q, k, v = qkv[:, :E], qkv[:, E:2 * E], qkv[:, 2 * E:]

    def split_heads(t):                                                # (T, E) -> (PT*H, B, Dh)
        return (t.reshape(PT, B, H, Dh)
                 .transpose(0, 2, 1, 3)
                 .reshape(PT * H, B, Dh))

    qh = split_heads(q).astype(jnp.bfloat16)
    kh = split_heads(k).astype(jnp.bfloat16)
    vh = split_heads(v).astype(jnp.bfloat16)

    # TODO(synk): at production sizes these contractions (K=Dh and K=B) under-fill the MXU
    # and the head split/merge costs XLU relayouts; a VPU broadcast-multiply/segment-reduce
    # path (or pltpu.einshape) for tiny B would free the MXU for the QKV/FFN matmuls.
    s = jnp.einsum('nsd,ntd->nst', qh, kh,
                   preferred_element_type=jnp.float32)                 # (PT*H, B, B)
    s = s - jnp.max(s, axis=-1, keepdims=True)
    e = jnp.exp(s)
    a = e * pl.reciprocal(jnp.sum(e, axis=-1, keepdims=True), approx=True)
    ctx = jnp.einsum('nst,ntd->nsd', a.astype(jnp.bfloat16), vh,
                     preferred_element_type=jnp.float32)               # (PT*H, B, Dh)
    ctx = (ctx.reshape(PT, H, B, Dh)
              .transpose(0, 2, 1, 3)
              .reshape(T, E))

    attn = (jnp.dot(ctx.astype(jnp.bfloat16), wo_ref[...],
                    preferred_element_type=jnp.float32) + bo_ref[...])

    # residual + LayerNorm 1 (post-norm)
    y = _layer_norm(x + attn, g1_ref[...], be1_ref[...])

    # ---- feed-forward (ReLU) ----
    # TODO(synk): for production E>=768 / F>=2048 on v7x (64 MiB VMEM) add an "arbitrary"
    # reduction grid axis over F and stream (E,f_tile)/(f_tile,E) weight blocks into an f32
    # accumulator; full per-layer FFN weight blocks fit v5e/v6e comfortably.
    h1 = jnp.maximum(
        jnp.dot(y.astype(jnp.bfloat16), w1_ref[...],
                preferred_element_type=jnp.float32) + b1_ref[...], 0.0)
    ff = (jnp.dot(h1.astype(jnp.bfloat16), w2_ref[...],
                  preferred_element_type=jnp.float32) + b2_ref[...])

    # residual + LayerNorm 2
    z = _layer_norm(y + ff, g2_ref[...], be2_ref[...])
    h_ref[...] = z

    # ---- epilogue: mean over patches + final fc, accumulated across patch tiles ----
    @pl.when(l == L - 1)
    def _():
        psum = jnp.sum(z.reshape(PT, B, E), axis=0)                    # (B, E)

        @pl.when(i == 0)
        def _():
            acc_ref[...] = jnp.zeros_like(acc_ref)

        acc_ref[...] += psum

        @pl.when(i == nt - 1)
        def _():
            m = (acc_ref[...] * inv_p).astype(jnp.bfloat16)
            out_ref[...] = (jnp.dot(m, fcw_ref[...],
                                    preferred_element_type=jnp.float32)
                            + fcb_ref[...])


# ----------------------------------------------------------------------------
# pallas_call wrapper
# ----------------------------------------------------------------------------
def _vmem_limit_bytes():
    # Generation-aware VMEM budget: ~3/4 of physical capacity (v7x 64 MiB -> 48 MiB,
    # v5e/v6e 128 MiB -> 96 MiB), conservative 48 MiB if the query is unavailable.
    cap = 64 * 1024 * 1024
    try:
        info = pltpu.get_tpu_info()
        cap = getattr(info, "vmem_capacity_bytes", cap) or cap
    except Exception:
        pass
    return int(min(100 * 1024 * 1024, cap * 3 // 4))


def _pick_p_tile(P, B, E, F, vmem_budget):
    """Largest patch tile (divisor of P, sublane-aligned rows) whose resident activations
    plus double-buffered per-layer weights fit the VMEM budget."""
    weight_bytes = 2 * (2 * (E * 3 * E + E * E + 2 * E * F)        # bf16 matmul weights, 2 buffers
                        + 4 * (3 * E + F + 8 * E))                 # f32 biases / LN params
    per_row = 4 * (E + 3 * E + F + 3 * E)                          # f32 activation + intermediates
    cands = [p for p in range(1, P + 1)
             if P % p == 0 and ((p * B) % 8 == 0 or p == P)]
    fits = [p for p in cands if weight_bytes + p * B * per_row <= vmem_budget]
    return max(fits) if fits else min(cands)


def fused_vit_call(xp_pad, peb, params, *, num_heads, batch, n_patches, p_tile, vmem_limit):
    TB, Kp = xp_pad.shape
    E = peb.shape[1]
    lp = params['layers']
    L = lp['wqkv'].shape[0]
    F = lp['w1'].shape[2]
    nt = n_patches // p_tile
    rows = p_tile * batch

    kernel = functools.partial(_fused_vit_kernel, num_heads=num_heads,
                               batch=batch, inv_p=1.0 / n_patches)

    # TODO(synk): on v5e/v6e (128 MiB VMEM) the full (L, ...) weight stacks could be kept
    # resident (index_map -> (0,0,0), in-kernel indexing by l) to remove the nt x weight
    # re-streaming; per-layer streaming is kept here for v7x portability (nt is small anyway).
    return pl.pallas_call(
        kernel,
        out_shape=jax.ShapeDtypeStruct((batch, E), jnp.float32),
        grid=(nt, L),
        in_specs=[
            pl.BlockSpec((rows, Kp), lambda i, l: (i, 0)),             # padded patches
            pl.BlockSpec((Kp, E), lambda i, l: (0, 0)),                # patch_w (padded K)
            pl.BlockSpec((rows, E), lambda i, l: (i, 0)),              # PE + conv bias
            pl.BlockSpec((None, E, 3 * E), lambda i, l: (l, 0, 0)),    # wqkv (scale folded)
            pl.BlockSpec((None, 1, 3 * E), lambda i, l: (l, 0, 0)),    # bqkv
            pl.BlockSpec((None, E, E), lambda i, l: (l, 0, 0)),        # wo
            pl.BlockSpec((None, 1, E), lambda i, l: (l, 0, 0)),        # bo
            pl.BlockSpec((None, 1, E), lambda i, l: (l, 0, 0)),        # ln1 gamma
            pl.BlockSpec((None, 1, E), lambda i, l: (l, 0, 0)),        # ln1 beta
            pl.BlockSpec((None, E, F), lambda i, l: (l, 0, 0)),        # w1
            pl.BlockSpec((None, 1, F), lambda i, l: (l, 0, 0)),        # b1
            pl.BlockSpec((None, F, E), lambda i, l: (l, 0, 0)),        # w2
            pl.BlockSpec((None, 1, E), lambda i, l: (l, 0, 0)),        # b2
            pl.BlockSpec((None, 1, E), lambda i, l: (l, 0, 0)),        # ln2 gamma
            pl.BlockSpec((None, 1, E), lambda i, l: (l, 0, 0)),        # ln2 beta
            pl.BlockSpec((E, E), lambda i, l: (0, 0)),                 # fc_w
            pl.BlockSpec((1, E), lambda i, l: (0, 0)),                 # fc_b
        ],
        out_specs=pl.BlockSpec((batch, E), lambda i, l: (0, 0)),
        scratch_shapes=[pltpu.VMEM((rows, E), jnp.float32),            # resident activation
                        pltpu.VMEM((batch, E), jnp.float32)],          # mean accumulator
        # axis 0 must be "arbitrary": the head accumulator + resident (B,E) output are shared
        # across patch tiles, so megacore splitting of that axis would race.
        compiler_params=pltpu.CompilerParams(
            dimension_semantics=("arbitrary", "arbitrary"),
            vmem_limit_bytes=vmem_limit),
    )(xp_pad, params['patch_w'], peb,
      lp['wqkv'], lp['bqkv'], lp['wo'], lp['bo'],
      lp['g1'], lp['be1'], lp['w1'], lp['b1'], lp['w2'], lp['b2'],
      lp['g2'], lp['be2'], params['fc_w'], params['fc_b'])


# ----------------------------------------------------------------------------
# Model glue: params, patchification, positional encoding
# ----------------------------------------------------------------------------
def make_params(key, patch_size, embed_dim, num_heads, num_layers, ffn_dim=2048):
    C = 3                                   # Conv2d(3, embed_dim, ...) in the reference
    E, F, L = embed_dim, ffn_dim, num_layers
    Dh = E // num_heads
    cpp = C * patch_size * patch_size
    k_pad = ((cpp + 127) // 128) * 128      # clean MXU K dimension
    counter = [0]

    def nxt():
        counter[0] += 1
        return jax.random.fold_in(key, counter[0])

    def nrm(shape, dtype=jnp.float32, scale=0.02):
        # f32 init, then cast (checkpoint porting: load f32, then cast to bf16)
        return (scale * jax.random.normal(nxt(), shape, jnp.float32)).astype(dtype)

    # Conv weight flattened to (C*p*p, E), zero-padded to (k_pad, E).
    # Checkpoint mapping: patch_w[:cpp] = conv.weight.reshape(E, cpp).T; wqkv = in_proj_weight.T;
    # wo = out_proj.weight.T; w1/w2 = linear1/2.weight.T; fc_w = fc.weight.T.
    pw = jnp.zeros((k_pad, E), jnp.float32).at[:cpp].set(
        0.02 * jax.random.normal(nxt(), (cpp, E), jnp.float32))

    # Fold the 1/sqrt(Dh) attention scale into the Q columns of the fused QKV weight/bias.
    qkv_scale = jnp.concatenate([
        jnp.full((E,), 1.0 / math.sqrt(Dh), jnp.float32),
        jnp.ones((2 * E,), jnp.float32)])

    params = {
        'patch_w': pw.astype(jnp.bfloat16),
        'patch_b': nrm((1, E)),
        'fc_w': nrm((E, E), jnp.bfloat16),
        'fc_b': nrm((1, E)),
        'layers': {
            'wqkv': (nrm((L, E, 3 * E)) * qkv_scale).astype(jnp.bfloat16),
            'bqkv': nrm((L, 1, 3 * E)) * qkv_scale,
            'wo': nrm((L, E, E), jnp.bfloat16),
            'bo': nrm((L, 1, E)),
            'w1': nrm((L, E, F), jnp.bfloat16),
            'b1': nrm((L, 1, F)),
            'w2': nrm((L, F, E), jnp.bfloat16),
            'b2': nrm((L, 1, E)),
            'g1': jnp.ones((L, 1, E), jnp.float32),
            'be1': jnp.zeros((L, 1, E), jnp.float32),
            'g2': jnp.ones((L, 1, E), jnp.float32),
            'be2': jnp.zeros((L, 1, E), jnp.float32),
        },
    }
    return params


def extract_patches(x, p, k_pad):
    # NCHW stride-p / kernel-p conv == patchify + matmul. Rows ordered (patch, image);
    # flattened patch channel ordering (c, i, j) matches conv.weight.reshape(E, -1).
    B, C, Hh, Ww = x.shape
    Hp, Wp = Hh // p, Ww // p
    xr = x.reshape(B, C, Hp, p, Wp, p)
    xr = jnp.transpose(xr, (2, 4, 0, 1, 3, 5))            # (Hp, Wp, B, C, p, p)
    xp = xr.reshape(Hp * Wp * B, C * p * p)               # (P*B, Cpp)
    pad = k_pad - C * p * p
    if pad > 0:
        xp = jnp.pad(xp, ((0, 0), (0, pad)))
    return xp, Hp * Wp


def sinusoidal_pe(seq_len, embed_dim):
    pos = jnp.arange(seq_len, dtype=jnp.float32)[:, None]
    div = jnp.exp(jnp.arange(0, embed_dim, 2, dtype=jnp.float32)
                  * (-math.log(10000.0) / embed_dim))
    pe = jnp.zeros((seq_len, embed_dim), jnp.float32)
    pe = pe.at[:, 0::2].set(jnp.sin(pos * div))
    pe = pe.at[:, 1::2].set(jnp.cos(pos * div))
    return pe


def flexible_vit_forward(params, x, patch_size, embed_dim, num_heads):
    B = x.shape[0]
    k_pad = params['patch_w'].shape[0]
    xp, P = extract_patches(x, patch_size, k_pad)           # (P*B, k_pad)
    pe = sinusoidal_pe(P, embed_dim)                        # (P, E)
    # PE per patch, replicated across the B images of each patch group, + conv bias.
    peb = jnp.repeat(pe, B, axis=0) + params['patch_b']     # (P*B, E)

    F = params['layers']['w1'].shape[2]
    vmem_limit = _vmem_limit_bytes()
    p_tile = _pick_p_tile(P, B, embed_dim, F, vmem_limit * 6 // 10)

    return fused_vit_call(xp, peb, params, num_heads=num_heads, batch=B,
                          n_patches=P, p_tile=p_tile, vmem_limit=vmem_limit)


# ----------------------------------------------------------------------------
# main
# ----------------------------------------------------------------------------
if __name__ == "__main__":
    patch_size = 4
    embed_dim = 128        # lane-dense last dim (multiple of 128)
    num_heads = 4
    num_layers = 2
    ffn_dim = 2048         # nn.TransformerEncoderLayer default dim_feedforward
    B, C, H, W = 2, 3, 16, 16   # Conv2d(3, ...) in the reference => C = 3

    key = jax.random.PRNGKey(0)
    k_x, k_p = jax.random.split(key)
    x = jax.random.normal(k_x, (B, C, H, W), dtype=jnp.float32)
    params = make_params(k_p, patch_size, embed_dim, num_heads, num_layers, ffn_dim)

    out = flexible_vit_forward(params, x, patch_size, embed_dim, num_heads)
    out = jax.block_until_ready(out)
    assert out.shape == (B, embed_dim)
    assert bool(jnp.all(jnp.isfinite(out)))
    print("KERNEL_OK")
</pallas_src>

<mosaic_0001>
module attributes {stable_mosaic.version = 11 : i64} {
  func.func @_fused_vit_kernel(%arg0: i32, %arg1: i32, %arg2: memref<32x128xf32, #tpu.memory_space<vmem>>, %arg3: memref<128x128xbf16, #tpu.memory_space<vmem>>, %arg4: memref<32x128xf32, #tpu.memory_space<vmem>>, %arg5: memref<1x128x384xbf16, #tpu.memory_space<vmem>>, %arg6: memref<1x1x384xf32, #tpu.memory_space<vmem>>, %arg7: memref<1x128x128xbf16, #tpu.memory_space<vmem>>, %arg8: memref<1x1x128xf32, #tpu.memory_space<vmem>>, %arg9: memref<1x1x128xf32, #tpu.memory_space<vmem>>, %arg10: memref<1x1x128xf32, #tpu.memory_space<vmem>>, %arg11: memref<1x128x2048xbf16, #tpu.memory_space<vmem>>, %arg12: memref<1x1x2048xf32, #tpu.memory_space<vmem>>, %arg13: memref<1x2048x128xbf16, #tpu.memory_space<vmem>>, %arg14: memref<1x1x128xf32, #tpu.memory_space<vmem>>, %arg15: memref<1x1x128xf32, #tpu.memory_space<vmem>>, %arg16: memref<1x1x128xf32, #tpu.memory_space<vmem>>, %arg17: memref<128x128xbf16, #tpu.memory_space<vmem>>, %arg18: memref<1x128xf32, #tpu.memory_space<vmem>>, %arg19: memref<2x128xf32, #tpu.memory_space<vmem>>, %arg20: memref<32x128xf32, #tpu.memory_space<vmem>>, %arg21: memref<2x128xf32, #tpu.memory_space<vmem>>) attributes {dimension_semantics = [#tpu.dimension_semantics<arbitrary>, #tpu.dimension_semantics<arbitrary>], iteration_bounds = array<i64: 1, 2>, scalar_prefetch = 0 : i64, scratch_operands = 2 : i64, tpu.core_type = #tpu.core_type<tc>, window_params = [{transform_indices = @transform_0, window_bounds = array<i64: 32, 128>}, {pipeline_mode = #tpu.pipeline_mode<synchronous>, transform_indices = @transform_1, window_bounds = array<i64: 128, 128>}, {transform_indices = @transform_2, window_bounds = array<i64: 32, 128>}, {transform_indices = @transform_3, window_bounds = array<i64: 1, 128, 384>}, {transform_indices = @transform_4, window_bounds = array<i64: 1, 1, 384>}, {transform_indices = @transform_5, window_bounds = array<i64: 1, 128, 128>}, {transform_indices = @transform_6, window_bounds = array<i64: 1, 1, 128>}, {transform_indices = @transform_7, window_bounds = array<i64: 1, 1, 128>}, {transform_indices = @transform_8, window_bounds = array<i64: 1, 1, 128>}, {transform_indices = @transform_9, window_bounds = array<i64: 1, 128, 2048>}, {transform_indices = @transform_10, window_bounds = array<i64: 1, 1, 2048>}, {transform_indices = @transform_11, window_bounds = array<i64: 1, 2048, 128>}, {transform_indices = @transform_12, window_bounds = array<i64: 1, 1, 128>}, {transform_indices = @transform_13, window_bounds = array<i64: 1, 1, 128>}, {transform_indices = @transform_14, window_bounds = array<i64: 1, 1, 128>}, {pipeline_mode = #tpu.pipeline_mode<synchronous>, transform_indices = @transform_15, window_bounds = array<i64: 128, 128>}, {pipeline_mode = #tpu.pipeline_mode<synchronous>, transform_indices = @transform_16, window_bounds = array<i64: 1, 128>}, {pipeline_mode = #tpu.pipeline_mode<synchronous>, transform_indices = @transform_17, window_bounds = array<i64: 2, 128>}]} {
    %c0_i32 = arith.constant 0 : i32
    %0 = arith.cmpi eq, %arg1, %c0_i32 : i32
    %1 = arith.extui %0 : i1 to i32
    %c0_i32_0 = arith.constant 0 : i32
    %2 = arith.cmpi ne, %1, %c0_i32_0 : i32
    scf.if %2 {
      %c0_59 = arith.constant 0 : index
      %c0_60 = arith.constant 0 : index
      %123 = vector.load %arg2[%c0_59, %c0_60] : memref<32x128xf32, #tpu.memory_space<vmem>>, vector<32x128xf32>
      %124 = arith.truncf %123 : vector<32x128xf32> to vector<32x128xbf16>
      %c0_61 = arith.constant 0 : index
      %c0_62 = arith.constant 0 : index
      %125 = vector.load %arg3[%c0_61, %c0_62] : memref<128x128xbf16, #tpu.memory_space<vmem>>, vector<128x128xbf16>
      %cst_63 = arith.constant dense<0.000000e+00> : vector<32x128xf32>
      %126 = tpu.matmul %124, %125, %cst_63 {dimension_numbers = #tpu.dot_dimension_numbers<[1], [0], [0], [1], [0, 0, 1, 1], [], []>} : vector<32x128xbf16>, vector<128x128xbf16>, vector<32x128xf32> -> vector<32x128xf32>
      %c0_64 = arith.constant 0 : index
      %c0_65 = arith.constant 0 : index
      %127 = vector.load %arg4[%c0_64, %c0_65] : memref<32x128xf32, #tpu.memory_space<vmem>>, vector<32x128xf32>
      %128 = arith.addf %126, %127 : vector<32x128xf32>
      %c0_66 = arith.constant 0 : index
      %c0_67 = arith.constant 0 : index
      %129 = vector.load %arg20[%c0_66, %c0_67] : memref<32x128xf32, #tpu.memory_space<vmem>>, vector<32x128xf32>
      tpu.vector_store %arg20[%c0_66, %c0_67], %128 {strides = array<i32>} : memref<32x128xf32, #tpu.memory_space<vmem>>, vector<32x128xf32>,
    } else {
    }
    %c0 = arith.constant 0 : index
    %c0_1 = arith.constant 0 : index
    %3 = vector.load %arg20[%c0, %c0_1] : memref<32x128xf32, #tpu.memory_space<vmem>>, vector<32x128xf32>
    %4 = arith.truncf %3 : vector<32x128xf32> to vector<32x128xbf16>
    %c0_2 = arith.constant 0 : index
    %c0_3 = arith.constant 0 : index
    %c0_4 = arith.constant 0 : index
    %5 = vector.load %arg5[%c0_2, %c0_3, %c0_4] : memref<1x128x384xbf16, #tpu.memory_space<vmem>>, vector<1x128x384xbf16>
    %6 = vector.shape_cast %5 : vector<1x128x384xbf16> to vector<128x384xbf16>
    %cst = arith.constant dense<0.000000e+00> : vector<32x384xf32>
    %7 = tpu.matmul %4, %6, %cst {dimension_numbers = #tpu.dot_dimension_numbers<[1], [0], [0], [1], [0, 0, 1, 1], [], []>} : vector<32x128xbf16>, vector<128x384xbf16>, vector<32x384xf32> -> vector<32x384xf32>
    %c0_5 = arith.constant 0 : index
    %c0_6 = arith.constant 0 : index
    %c0_7 = arith.constant 0 : index
    %8 = vector.load %arg6[%c0_5, %c0_6, %c0_7] : memref<1x1x384xf32, #tpu.memory_space<vmem>>, vector<1x1x384xf32>
    %9 = vector.shape_cast %8 : vector<1x1x384xf32> to vector<1x384xf32>
    %10 = vector.broadcast %9 : vector<1x384xf32> to vector<32x384xf32>
    %11 = arith.addf %7, %10 : vector<32x384xf32>
    %12 = vector.extract_strided_slice %11 {offsets = [0, 0], sizes = [32, 128], strides = [1, 1]} : vector<32x384xf32> to vector<32x128xf32>
    %13 = vector.extract_strided_slice %11 {offsets = [0, 128], sizes = [32, 128], strides = [1, 1]} : vector<32x384xf32> to vector<32x128xf32>
    %14 = vector.extract_strided_slice %11 {offsets = [0, 256], sizes = [32, 128], strides = [1, 1]} : vector<32x384xf32> to vector<32x128xf32>
    %15 = vector.shape_cast %12 : vector<32x128xf32> to vector<16x2x4x32xf32>
    %16 = tpu.transpose %15, [0, 2, 1, 3] : vector<16x2x4x32xf32> -> vector<16x4x2x32xf32>
    %17 = vector.shape_cast %16 : vector<16x4x2x32xf32> to vector<64x2x32xf32>
    %18 = arith.truncf %17 : vector<64x2x32xf32> to vector<64x2x32xbf16>
    %19 = vector.shape_cast %13 : vector<32x128xf32> to vector<16x2x4x32xf32>
    %20 = tpu.transpose %19, [0, 2, 1, 3] : vector<16x2x4x32xf32> -> vector<16x4x2x32xf32>
    %21 = vector.shape_cast %20 : vector<16x4x2x32xf32> to vector<64x2x32xf32>
    %22 = arith.truncf %21 : vector<64x2x32xf32> to vector<64x2x32xbf16>
    %23 = vector.shape_cast %14 : vector<32x128xf32> to vector<16x2x4x32xf32>
    %24 = tpu.transpose %23, [0, 2, 1, 3] : vector<16x2x4x32xf32> -> vector<16x4x2x32xf32>
    %25 = vector.shape_cast %24 : vector<16x4x2x32xf32> to vector<64x2x32xf32>
    %26 = arith.truncf %25 : vector<64x2x32xf32> to vector<64x2x32xbf16>
    "tpu.trace_start"() <{level = 10 : i32, message = "nsd,ntd->nst"}> : () -> ()
    %cst_8 = arith.constant dense<0.000000e+00> : vector<64x2x2xf32>
    %27 = tpu.matmul %18, %22, %cst_8 {dimension_numbers = #tpu.dot_dimension_numbers<[2], [2], [1], [1], [0, 0, 0, 1, 1, 1], [0], [0]>} : vector<64x2x32xbf16>, vector<64x2x32xbf16>, vector<64x2x2xf32> -> vector<64x2x2xf32>
    "tpu.trace_stop"() : () -> ()
    %cst_9 = arith.constant dense<0xFF800000> : vector<64x2xf32>
    %28 = vector.multi_reduction <maximumf>, %27, %cst_9 [2] : vector<64x2x2xf32> to vector<64x2xf32>
    %29 = vector.shape_cast %28 : vector<64x2xf32> to vector<64x2x1xf32>
    %30 = vector.broadcast %29 : vector<64x2x1xf32> to vector<64x2x2xf32>
    %31 = arith.subf %27, %30 : vector<64x2x2xf32>
    %32 = math.exp %31 : vector<64x2x2xf32>
    %cst_10 = arith.constant dense<0.000000e+00> : vector<64x2xf32>
    %33 = vector.multi_reduction <add>, %32, %cst_10 [2] : vector<64x2x2xf32> to vector<64x2xf32>
    %34 = vector.shape_cast %33 : vector<64x2xf32> to vector<64x2x1xf32>
    %35 = tpu.reciprocal %34 {approx = true} : vector<64x2x1xf32> -> vector<64x2x1xf32>
    %36 = vector.broadcast %35 : vector<64x2x1xf32> to vector<64x2x2xf32>
    %37 = arith.mulf %32, %36 : vector<64x2x2xf32>
    %38 = arith.truncf %37 : vector<64x2x2xf32> to vector<64x2x2xbf16>
    "tpu.trace_start"() <{level = 10 : i32, message = "nst,ntd->nsd"}> : () -> ()
    %cst_11 = arith.constant dense<0.000000e+00> : vector<64x2x32xf32>
    %39 = tpu.matmul %38, %26, %cst_11 {dimension_numbers = #tpu.dot_dimension_numbers<[2], [1], [1], [2], [0, 0, 0, 1, 1, 2], [0], [0]>} : vector<64x2x2xbf16>, vector<64x2x32xbf16>, vector<64x2x32xf32> -> vector<64x2x32xf32>
    "tpu.trace_stop"() : () -> ()
    %40 = vector.shape_cast %39 : vector<64x2x32xf32> to vector<16x4x2x32xf32>
    %41 = tpu.transpose %40, [0, 2, 1, 3] : vector<16x4x2x32xf32> -> vector<16x2x4x32xf32>
    %42 = vector.shape_cast %41 : vector<16x2x4x32xf32> to vector<32x128xf32>
    %43 = arith.truncf %42 : vector<32x128xf32> to vector<32x128xbf16>
    %c0_12 = arith.constant 0 : index
    %c0_13 = arith.constant 0 : index
    %c0_14 = arith.constant 0 : index
    %44 = vector.load %arg7[%c0_12, %c0_13, %c0_14] : memref<1x128x128xbf16, #tpu.memory_space<vmem>>, vector<1x128x128xbf16>
    %45 = vector.shape_cast %44 : vector<1x128x128xbf16> to vector<128x128xbf16>
    %cst_15 = arith.constant dense<0.000000e+00> : vector<32x128xf32>
    %46 = tpu.matmul %43, %45, %cst_15 {dimension_numbers = #tpu.dot_dimension_numbers<[1], [0], [0], [1], [0, 0, 1, 1], [], []>} : vector<32x128xbf16>, vector<128x128xbf16>, vector<32x128xf32> -> vector<32x128xf32>
    %c0_16 = arith.constant 0 : index
    %c0_17 = arith.constant 0 : index
    %c0_18 = arith.constant 0 : index
    %47 = vector.load %arg8[%c0_16, %c0_17, %c0_18] : memref<1x1x128xf32, #tpu.memory_space<vmem>>, vector<1x1x128xf32>
    %48 = vector.shape_cast %47 : vector<1x1x128xf32> to vector<1x128xf32>
    %49 = vector.broadcast %48 : vector<1x128xf32> to vector<32x128xf32>
    %50 = arith.addf %46, %49 : vector<32x128xf32>
    %51 = arith.addf %3, %50 : vector<32x128xf32>
    %c0_19 = arith.constant 0 : index
    %c0_20 = arith.constant 0 : index
    %c0_21 = arith.constant 0 : index
    %52 = vector.load %arg9[%c0_19, %c0_20, %c0_21] : memref<1x1x128xf32, #tpu.memory_space<vmem>>, vector<1x1x128xf32>
    %53 = vector.shape_cast %52 : vector<1x1x128xf32> to vector<1x128xf32>
    %c0_22 = arith.constant 0 : index
    %c0_23 = arith.constant 0 : index
    %c0_24 = arith.constant 0 : index
    %54 = vector.load %arg10[%c0_22, %c0_23, %c0_24] : memref<1x1x128xf32, #tpu.memory_space<vmem>>, vector<1x1x128xf32>
    %55 = vector.shape_cast %54 : vector<1x1x128xf32> to vector<1x128xf32>
    %cst_25 = arith.constant dense<0.000000e+00> : vector<32xf32>
    %56 = vector.multi_reduction <add>, %51, %cst_25 [1] : vector<32x128xf32> to vector<32xf32>
    %57 = vector.shape_cast %56 : vector<32xf32> to vector<32x1xf32>
    %cst_26 = arith.constant 1.280000e+02 : f32
    %58 = vector.broadcast %cst_26 : f32 to vector<32x1xf32>
    %59 = arith.divf %57, %58 : vector<32x1xf32>
    %60 = vector.broadcast %59 : vector<32x1xf32> to vector<32x128xf32>
    %61 = arith.subf %51, %60 : vector<32x128xf32>
    %62 = arith.mulf %61, %61 : vector<32x128xf32>
    %cst_27 = arith.constant dense<0.000000e+00> : vector<32xf32>
    %63 = vector.multi_reduction <add>, %62, %cst_27 [1] : vector<32x128xf32> to vector<32xf32>
    %64 = vector.shape_cast %63 : vector<32xf32> to vector<32x1xf32>
    %cst_28 = arith.constant 1.280000e+02 : f32
    %65 = vector.broadcast %cst_28 : f32 to vector<32x1xf32>
    %66 = arith.divf %64, %65 : vector<32x1xf32>
    %cst_29 = arith.constant 9.99999974E-6 : f32
    %67 = vector.broadcast %cst_29 : f32 to vector<32x1xf32>
    %68 = arith.addf %66, %67 : vector<32x1xf32>
    %69 = math.rsqrt %68 : vector<32x1xf32>
    %70 = vector.broadcast %69 : vector<32x1xf32> to vector<32x128xf32>
    %71 = arith.mulf %61, %70 : vector<32x128xf32>
    %72 = vector.broadcast %53 : vector<1x128xf32> to vector<32x128xf32>
    %73 = arith.mulf %71, %72 : vector<32x128xf32>
    %74 = vector.broadcast %55 : vector<1x128xf32> to vector<32x128xf32>
    %75 = arith.addf %73, %74 : vector<32x128xf32>
    %76 = arith.truncf %75 : vector<32x128xf32> to vector<32x128xbf16>
    %c0_30 = arith.constant 0 : index
    %c0_31 = arith.constant 0 : index
    %c0_32 = arith.constant 0 : index
    %77 = vector.load %arg11[%c0_30, %c0_31, %c0_32] : memref<1x128x2048xbf16, #tpu.memory_space<vmem>>, vector<1x128x2048xbf16>
    %78 = vector.shape_cast %77 : vector<1x128x2048xbf16> to vector<128x2048xbf16>
    %cst_33 = arith.constant dense<0.000000e+00> : vector<32x2048xf32>
    %79 = tpu.matmul %76, %78, %cst_33 {dimension_numbers = #tpu.dot_dimension_numbers<[1], [0], [0], [1], [0, 0, 1, 1], [], []>} : vector<32x128xbf16>, vector<128x2048xbf16>, vector<32x2048xf32> -> vector<32x2048xf32>
    %c0_34 = arith.constant 0 : index
    %c0_35 = arith.constant 0 : index
    %c0_36 = arith.constant 0 : index
    %80 = vector.load %arg12[%c0_34, %c0_35, %c0_36] : memref<1x1x2048xf32, #tpu.memory_space<vmem>>, vector<1x1x2048xf32>
    %81 = vector.shape_cast %80 : vector<1x1x2048xf32> to vector<1x2048xf32>
    %82 = vector.broadcast %81 : vector<1x2048xf32> to vector<32x2048xf32>
    %83 = arith.addf %79, %82 : vector<32x2048xf32>
    %cst_37 = arith.constant 0.000000e+00 : f32
    %84 = vector.broadcast %cst_37 : f32 to vector<32x2048xf32>
    %85 = arith.maximumf %83, %84 : vector<32x2048xf32>
    %86 = arith.truncf %85 : vector<32x2048xf32> to vector<32x2048xbf16>
    %c0_38 = arith.constant 0 : index
    %c0_39 = arith.constant 0 : index
    %c0_40 = arith.constant 0 : index
    %87 = vector.load %arg13[%c0_38, %c0_39, %c0_40] : memref<1x2048x128xbf16, #tpu.memory_space<vmem>>, vector<1x2048x128xbf16>
    %88 = vector.shape_cast %87 : vector<1x2048x128xbf16> to vector<2048x128xbf16>
    %cst_41 = arith.constant dense<0.000000e+00> : vector<32x128xf32>
    %89 = tpu.matmul %86, %88, %cst_41 {dimension_numbers = #tpu.dot_dimension_numbers<[1], [0], [0], [1], [0, 0, 1, 1], [], []>} : vector<32x2048xbf16>, vector<2048x128xbf16>, vector<32x128xf32> -> vector<32x128xf32>
    %c0_42 = arith.constant 0 : index
    %c0_43 = arith.constant 0 : index
    %c0_44 = arith.constant 0 : index
    %90 = vector.load %arg14[%c0_42, %c0_43, %c0_44] : memref<1x1x128xf32, #tpu.memory_space<vmem>>, vector<1x1x128xf32>
    %91 = vector.shape_cast %90 : vector<1x1x128xf32> to vector<1x128xf32>
    %92 = vector.broadcast %91 : vector<1x128xf32> to vector<32x128xf32>
    %93 = arith.addf %89, %92 : vector<32x128xf32>
    %94 = arith.addf %75, %93 : vector<32x128xf32>
    %c0_45 = arith.constant 0 : index
    %c0_46 = arith.constant 0 : index
    %c0_47 = arith.constant 0 : index
    %95 = vector.load %arg15[%c0_45, %c0_46, %c0_47] : memref<1x1x128xf32, #tpu.memory_space<vmem>>, vector<1x1x128xf32>
    %96 = vector.shape_cast %95 : vector<1x1x128xf32> to vector<1x128xf32>
    %c0_48 = arith.constant 0 : index
    %c0_49 = arith.constant 0 : index
    %c0_50 = arith.constant 0 : index
    %97 = vector.load %arg16[%c0_48, %c0_49, %c0_50] : memref<1x1x128xf32, #tpu.memory_space<vmem>>, vector<1x1x128xf32>
    %98 = vector.shape_cast %97 : vector<1x1x128xf32> to vector<1x128xf32>
    %cst_51 = arith.constant dense<0.000000e+00> : vector<32xf32>
    %99 = vector.multi_reduction <add>, %94, %cst_51 [1] : vector<32x128xf32> to vector<32xf32>
    %100 = vector.shape_cast %99 : vector<32xf32> to vector<32x1xf32>
    %cst_52 = arith.constant 1.280000e+02 : f32
    %101 = vector.broadcast %cst_52 : f32 to vector<32x1xf32>
    %102 = arith.divf %100, %101 : vector<32x1xf32>
    %103 = vector.broadcast %102 : vector<32x1xf32> to vector<32x128xf32>
    %104 = arith.subf %94, %103 : vector<32x128xf32>
    %105 = arith.mulf %104, %104 : vector<32x128xf32>
    %cst_53 = arith.constant dense<0.000000e+00> : vector<32xf32>
    %106 = vector.multi_reduction <add>, %105, %cst_53 [1] : vector<32x128xf32> to vector<32xf32>
    %107 = vector.shape_cast %106 : vector<32xf32> to vector<32x1xf32>
    %cst_54 = arith.constant 1.280000e+02 : f32
    %108 = vector.broadcast %cst_54 : f32 to vector<32x1xf32>
    %109 = arith.divf %107, %108 : vector<32x1xf32>
    %cst_55 = arith.constant 9.99999974E-6 : f32
    %110 = vector.broadcast %cst_55 : f32 to vector<32x1xf32>
    %111 = arith.addf %109, %110 : vector<32x1xf32>
    %112 = math.rsqrt %111 : vector<32x1xf32>
    %113 = vector.broadcast %112 : vector<32x1xf32> to vector<32x128xf32>
    %114 = arith.mulf %104, %113 : vector<32x128xf32>
    %115 = vector.broadcast %96 : vector<1x128xf32> to vector<32x128xf32>
    %116 = arith.mulf %114, %115 : vector<32x128xf32>
    %117 = vector.broadcast %98 : vector<1x128xf32> to vector<32x128xf32>
    %118 = arith.addf %116, %117 : vector<32x128xf32>
    %c0_56 = arith.constant 0 : index
    %c0_57 = arith.constant 0 : index
    %119 = vector.load %arg20[%c0_56, %c0_57] : memref<32x128xf32, #tpu.memory_space<vmem>>, vector<32x128xf32>
    tpu.vector_store %arg20[%c0_56, %c0_57], %118 {strides = array<i32>} : memref<32x128xf32, #tpu.memory_space<vmem>>, vector<32x128xf32>,
    %c1_i32 = arith.constant 1 : i32
    %120 = arith.cmpi eq, %arg1, %c1_i32 : i32
    %121 = arith.extui %120 : i1 to i32
    %c0_i32_58 = arith.constant 0 : i32
    %122 = arith.cmpi ne, %121, %c0_i32_58 : i32
    scf.if %122 {
      %123 = vector.shape_cast %118 : vector<32x128xf32> to vector<16x2x128xf32>
      %cst_59 = arith.constant dense<0.000000e+00> : vector<2x128xf32>
      %124 = vector.multi_reduction <add>, %123, %cst_59 [0] : vector<16x2x128xf32> to vector<2x128xf32>
      %c0_i32_60 = arith.constant 0 : i32
      %125 = arith.cmpi eq, %arg0, %c0_i32_60 : i32
      %126 = arith.extui %125 : i1 to i32
      %c0_i32_61 = arith.constant 0 : i32
      %127 = arith.cmpi ne, %126, %c0_i32_61 : i32
      scf.if %127 {
        %cst_68 = arith.constant 0.000000e+00 : f32
        %134 = vector.broadcast %cst_68 : f32 to vector<2x128xf32>
        %c0_69 = arith.constant 0 : index
        %c0_70 = arith.constant 0 : index
        %135 = vector.load %arg21[%c0_69, %c0_70] : memref<2x128xf32, #tpu.memory_space<vmem>>, vector<2x128xf32>
        tpu.vector_store %arg21[%c0_69, %c0_70], %134 {strides = array<i32>} : memref<2x128xf32, #tpu.memory_space<vmem>>, vector<2x128xf32>,
      } else {
      }
      %c0_62 = arith.constant 0 : index
      %c0_63 = arith.constant 0 : index
      %128 = vector.load %arg21[%c0_62, %c0_63] : memref<2x128xf32, #tpu.memory_space<vmem>>, vector<2x128xf32>
      %129 = arith.addf %128, %124 : vector<2x128xf32>
      %c0_64 = arith.constant 0 : index
      %c0_65 = arith.constant 0 : index
      %130 = vector.load %arg21[%c0_64, %c0_65] : memref<2x128xf32, #tpu.memory_space<vmem>>, vector<2x128xf32>
      tpu.vector_store %arg21[%c0_64, %c0_65], %129 {strides = array<i32>} : memref<2x128xf32, #tpu.memory_space<vmem>>, vector<2x128xf32>,
      %c0_i32_66 = arith.constant 0 : i32
      %131 = arith.cmpi eq, %arg0, %c0_i32_66 : i32
      %132 = arith.extui %131 : i1 to i32
      %c0_i32_67 = arith.constant 0 : i32
      %133 = arith.cmpi ne, %132, %c0_i32_67 : i32
      scf.if %133 {
        %c0_68 = arith.constant 0 : index
        %c0_69 = arith.constant 0 : index
        %134 = vector.load %arg21[%c0_68, %c0_69] : memref<2x128xf32, #tpu.memory_space<vmem>>, vector<2x128xf32>
        %cst_70 = arith.constant 6.250000e-02 : f32
        %135 = vector.broadcast %cst_70 : f32 to vector<2x128xf32>
        %136 = arith.mulf %134, %135 : vector<2x128xf32>
        %137 = arith.truncf %136 : vector<2x128xf32> to vector<2x128xbf16>
        %c0_71 = arith.constant 0 : index
        %c0_72 = arith.constant 0 : index
        %138 = vector.load %arg17[%c0_71, %c0_72] : memref<128x128xbf16, #tpu.memory_space<vmem>>, vector<128x128xbf16>
        %cst_73 = arith.constant dense<0.000000e+00> : vector<2x128xf32>
        %139 = tpu.matmul %137, %138, %cst_73 {dimension_numbers = #tpu.dot_dimension_numbers<[1], [0], [0], [1], [0, 0, 1, 1], [], []>} : vector<2x128xbf16>, vector<128x128xbf16>, vector<2x128xf32> -> vector<2x128xf32>
        %c0_74 = arith.constant 0 : index
        %c0_75 = arith.constant 0 : index
        %140 = vector.load %arg18[%c0_74, %c0_75] : memref<1x128xf32, #tpu.memory_space<vmem>>, vector<1x128xf32>
        %141 = vector.broadcast %140 : vector<1x128xf32> to vector<2x128xf32>
        %142 = arith.addf %139, %141 : vector<2x128xf32>
        %c0_76 = arith.constant 0 : index
        %c0_77 = arith.constant 0 : index
        %143 = vector.load %arg19[%c0_76, %c0_77] : memref<2x128xf32, #tpu.memory_space<vmem>>, vector<2x128xf32>
        tpu.vector_store %arg19[%c0_76, %c0_77], %142 {strides = array<i32>} : memref<2x128xf32, #tpu.memory_space<vmem>>, vector<2x128xf32>,
      } else {
      }
    } else {
    }
    return
  }
  func.func @transform_0(%arg0: i32, %arg1: i32) -> (i32, i32) {
    %c0_i32 = arith.constant 0 : i32
    %c0_i32_0 = arith.constant 0 : i32
    return %arg0, %c0_i32 : i32, i32
  }
  func.func @transform_1(%arg0: i32, %arg1: i32) -> (i32, i32) {
    %c0_i32 = arith.constant 0 : i32
    %c0_i32_0 = arith.constant 0 : i32
    %c0_i32_1 = arith.constant 0 : i32
    return %c0_i32, %c0_i32_0 : i32, i32
  }
  func.func @transform_2(%arg0: i32, %arg1: i32) -> (i32, i32) {
    %c0_i32 = arith.constant 0 : i32
    %c0_i32_0 = arith.constant 0 : i32
    return %arg0, %c0_i32 : i32, i32
  }
  func.func @transform_3(%arg0: i32, %arg1: i32) -> (i32, i32, i32) {
    %c0_i32 = arith.constant 0 : i32
    %c0_i32_0 = arith.constant 0 : i32
    %c0_i32_1 = arith.constant 0 : i32
    return %arg1, %c0_i32, %c0_i32_0 : i32, i32, i32
  }
  func.func @transform_4(%arg0: i32, %arg1: i32) -> (i32, i32, i32) {
    %c0_i32 = arith.constant 0 : i32
    %c0_i32_0 = arith.constant 0 : i32
    %c0_i32_1 = arith.constant 0 : i32
    return %arg1, %c0_i32, %c0_i32_0 : i32, i32, i32
  }
  func.func @transform_5(%arg0: i32, %arg1: i32) -> (i32, i32, i32) {
    %c0_i32 = arith.constant 0 : i32
    %c0_i32_0 = arith.constant 0 : i32
    %c0_i32_1 = arith.constant 0 : i32
    return %arg1, %c0_i32, %c0_i32_0 : i32, i32, i32
  }
  func.func @transform_6(%arg0: i32, %arg1: i32) -> (i32, i32, i32) {
    %c0_i32 = arith.constant 0 : i32
    %c0_i32_0 = arith.constant 0 : i32
    %c0_i32_1 = arith.constant 0 : i32
    return %arg1, %c0_i32, %c0_i32_0 : i32, i32, i32
  }
  func.func @transform_7(%arg0: i32, %arg1: i32) -> (i32, i32, i32) {
    %c0_i32 = arith.constant 0 : i32
    %c0_i32_0 = arith.constant 0 : i32
    %c0_i32_1 = arith.constant 0 : i32
    return %arg1, %c0_i32, %c0_i32_0 : i32, i32, i32
  }
  func.func @transform_8(%arg0: i32, %arg1: i32) -> (i32, i32, i32) {
    %c0_i32 = arith.constant 0 : i32
    %c0_i32_0 = arith.constant 0 : i32
    %c0_i32_1 = arith.constant 0 : i32
    return %arg1, %c0_i32, %c0_i32_0 : i32, i32, i32
  }
  func.func @transform_9(%arg0: i32, %arg1: i32) -> (i32, i32, i32) {
    %c0_i32 = arith.constant 0 : i32
    %c0_i32_0 = arith.constant 0 : i32
    %c0_i32_1 = arith.constant 0 : i32
    return %arg1, %c0_i32, %c0_i32_0 : i32, i32, i32
  }
  func.func @transform_10(%arg0: i32, %arg1: i32) -> (i32, i32, i32) {
    %c0_i32 = arith.constant 0 : i32
    %c0_i32_0 = arith.constant 0 : i32
    %c0_i32_1 = arith.constant 0 : i32
    return %arg1, %c0_i32, %c0_i32_0 : i32, i32, i32
  }
  func.func @transform_11(%arg0: i32, %arg1: i32) -> (i32, i32, i32) {
    %c0_i32 = arith.constant 0 : i32
    %c0_i32_0 = arith.constant 0 : i32
    %c0_i32_1 = arith.constant 0 : i32
    return %arg1, %c0_i32, %c0_i32_0 : i32, i32, i32
  }
  func.func @transform_12(%arg0: i32, %arg1: i32) -> (i32, i32, i32) {
    %c0_i32 = arith.constant 0 : i32
    %c0_i32_0 = arith.constant 0 : i32
    %c0_i32_1 = arith.constant 0 : i32
    return %arg1, %c0_i32, %c0_i32_0 : i32, i32, i32
  }
  func.func @transform_13(%arg0: i32, %arg1: i32) -> (i32, i32, i32) {
    %c0_i32 = arith.constant 0 : i32
    %c0_i32_0 = arith.constant 0 : i32
    %c0_i32_1 = arith.constant 0 : i32
    return %arg1, %c0_i32, %c0_i32_0 : i32, i32, i32
  }
  func.func @transform_14(%arg0: i32, %arg1: i32) -> (i32, i32, i32) {
    %c0_i32 = arith.constant 0 : i32
    %c0_i32_0 = arith.constant 0 : i32
    %c0_i32_1 = arith.constant 0 : i32
    return %arg1, %c0_i32, %c0_i32_0 : i32, i32, i32
  }
  func.func @transform_15(%arg0: i32, %arg1: i32) -> (i32, i32) {
    %c0_i32 = arith.constant 0 : i32
    %c0_i32_0 = arith.constant 0 : i32
    %c0_i32_1 = arith.constant 0 : i32
    return %c0_i32, %c0_i32_0 : i32, i32
  }
  func.func @transform_16(%arg0: i32, %arg1: i32) -> (i32, i32) {
    %c0_i32 = arith.constant 0 : i32
    %c0_i32_0 = arith.constant 0 : i32
    %c0_i32_1 = arith.constant 0 : i32
    return %c0_i32, %c0_i32_0 : i32, i32
  }
  func.func @transform_17(%arg0: i32, %arg1: i32) -> (i32, i32) {
    %c0_i32 = arith.constant 0 : i32
    %c0_i32_0 = arith.constant 0 : i32
    %c0_i32_1 = arith.constant 0 : i32
    return %c0_i32, %c0_i32_0 : i32, i32
  }
}

</mosaic_0001>

<bundles_post_ra>
// kernel: tpu_custom_call.1
= control target key start
LH: loop header
LB: loop body
LE: loop exit
PB: predicated region body
PF: predicated region fallthrough
CT: control target
= control target key end

     0   :  { %s21738_s0 = inlined_call_operand.hbm [shape: f32[32,128], index: 0, kind: input, shape index: {}]   ;;  %s21739_s1 = inlined_call_operand.hbm [shape: bf16[128,128], index: 1, kind: input, shape index: {}]   ;;  %s21740_s2 = inlined_call_operand.hbm [shape: f32[32,128], index: 2, kind: input, shape index: {}]   ;;  %s21741_s3 = inlined_call_operand.hbm [shape: bf16[2,128,384], index: 3, kind: input, shape index: {}]   ;;  %s21742_s4 = inlined_call_operand.hbm [shape: f32[2,1,384], index: 4, kind: input, shape index: {}]   ;;  %s21743_s5 = inlined_call_operand.hbm [shape: bf16[2,128,128], index: 5, kind: input, shape index: {}]   ;;  %s21744_s6 = inlined_call_operand.vmem [shape: f32[2,1,128], index: 6, kind: input, shape index: {}]   ;;  %s21745_s7 = inlined_call_operand.vmem [shape: f32[2,1,128], index: 7, kind: input, shape index: {}]   ;;  %s21746_s8 = inlined_call_operand.hbm [shape: f32[2,1,128], index: 8, kind: input, shape index: {}]   ;;  %s21747_s9 = inlined_call_operand.hbm [shape: bf16[2,128,2048], index: 9, kind: input, shape index: {}]   ;;  %s21748_s10 = inlined_call_operand.vmem [shape: f32[2,1,2048], index: 10, kind: input, shape index: {}]   ;;  %s21749_s11 = inlined_call_operand.hbm [shape: bf16[2,2048,128], index: 11, kind: input, shape index: {}]   ;;  %s21750_s12 = inlined_call_operand.vmem [shape: f32[2,1,128], index: 12, kind: input, shape index: {}]   ;;  %s21751_s13 = inlined_call_operand.vmem [shape: f32[2,1,128], index: 13, kind: input, shape index: {}]   ;;  %s21752_s14 = inlined_call_operand.vmem [shape: f32[2,1,128], index: 14, kind: input, shape index: {}]   ;;  %s21753_s15 = inlined_call_operand.hbm [shape: bf16[128,128], index: 15, kind: input, shape index: {}]   ;;  %s21754_s16 = inlined_call_operand.vmem [shape: f32[1,128], index: 16, kind: input, shape index: {}]   ;;  %s21755_s17 = inlined_call_operand.hbm [shape: f32[2,128], index: 17, kind: output, shape index: {}]  }
   0x1   :  { %21861 = sst [smem:[#allocation83_spill]] %s21738_s0 }
   0x2   :  { %21862 = sst [smem:[#allocation84_spill]] %s21739_s1 }
   0x3   :  { %21863 = sst [smem:[#allocation85_spill]] %s21740_s2 }
   0x4   :  { %21864 = sst [smem:[#allocation86_spill]] %s21741_s3 }
   0x5   :  { %21865 = sst [smem:[#allocation87_spill]] %s21742_s4 }
   0x6   :  { %21866 = sst [smem:[#allocation88_spill]] %s21743_s5 }
   0x7   :  { %21867 = sst [smem:[#allocation89_spill]] %s21744_s6 }
   0x8   :  { %21868 = sst [smem:[#allocation90_spill]] %s21745_s7 }
   0x9   :  { %21869 = sst [smem:[#allocation91_spill]] %s21746_s8 }
   0xa   :  { %21870 = sst [smem:[#allocation92_spill]] %s21747_s9 }
   0xb   :  { %21871 = sst [smem:[#allocation93_spill]] %s21748_s10 }
   0xc   :  { %21872 = sst [smem:[#allocation94_spill]] %s21749_s11 }
   0xd   :  { %21873 = sst [smem:[#allocation95_spill]] %s21750_s12 }
   0xe   :  { %21874 = sst [smem:[#allocation96_spill]] %s21751_s13 }
   0xf   :  { %21875 = sst [smem:[#allocation97_spill]] %s21752_s14 }
  0x10   :  { %21876 = sst [smem:[#allocation98_spill]] %s21754_s16 }
  0x11   :  { %21877 = sst [smem:[#allocation99_spill]] %s21755_s17 }
  0x12   :  { %22 = vsyncpa [#allocation5], 0 }
  0x13   :  { %23 = vsyncpa [#allocation8], 0 }
  0x14   :  { %24 = vsyncpa [#allocation11], 0 }
  0x15   :  { %26 = vsyncpa [#allocation11 + $0x1], 0 }
  0x16   :  { %27 = vsyncpa [#allocation14], 0 }
  0x17   :  { %29 = vsyncpa [#allocation14 + $0x1], 0 }
  0x18   :  { %30 = vsyncpa [#allocation17], 0 }
  0x19   :  { %32 = vsyncpa [#allocation17 + $0x1], 0 }
  0x1a   :  { %33 = vsyncpa [#allocation20], 0 }
  0x1b   :  { %34 = vsyncpa [#allocation6], 0  ;;  %s17978_s24 = smov 0   ;;  %s17980_s25 = smov 0  }
  0x1c   :  { %s17982_s26 = smov 0   ;;  %s17984_s27 = smov 0  }
  0x1d   :  { %s17986_s28 = smov 0   ;;  %s17988_s29 = smov 0  }
  0x1e LB: > { %21878 = sst [smem:[#allocation29_spill]] %s17842_s25  ;;  %s18007_s0 = sadd.s32 4294967295, %s17858_s29   ;;  %s17858_s29 = sphi %s17988_s29, %s40_s29   ;;  %s17854_s28 = sphi %s17986_s28, %s22075_s28   ;;  %s17850_s27 = sphi %s17984_s27, %s22074_s27   ;;  %s17846_s26 = sphi %s17982_s26, %s22072_s26   ;;  %s17842_s25 = sphi %s17980_s25, %s22071_s25   ;;  %s17838_s24 = sphi %s17978_s24, %s22070_s24  }
  0x1f   : > { %21879 = sst [smem:[#allocation30_spill]] %s17846_s26  ;;  %p145_p0 = scmp.ne.s32.totalorder %s17842_s25, %s17838_s24 }
  0x20   : > { %21880 = sst [smem:[#allocation31_spill]] %s17850_s27  ;;  %p21759_p1 = scmp.eq.s32.totalorder %s18007_s0, 0 }
  0x21   : > { %21881 = sst [smem:[#allocation32_spill]] %s17858_s29  ;;  %p14975_p2 = scmp.ge.s32.totalorder %s17858_s29, 1 }
  0x22   : > { %21882 = sst [smem:[#allocation33_spill]] %s18007_s0  ;;  %p505_p3 = scmp.lt.s32.totalorder %s17858_s29, 3 }
  0x23   : > { %p18015_p4 = por %p21759_p1, %p145_p0  ;;  %s17860_s19 = smov [#allocation7]  }
  0x24   : > { %p18019_p5 = pnand %p14975_p2, %p505_p3  ;;  %s533_s1 = sshll.u32 %s17860_s19, 4  ;;  %s534_s1 = int_to_ptr.vmem [resolvable:$true] %s533_s1 }
  0x25   : > { %s21883_s30 = scalar_select %p18015_p4, 1, 0 }
  0x26   : > { %s21885_s18 = scalar_select %p18019_p5, 1, 0 }
  0x27   : > { %21884 = sst [smem:[#allocation34_spill]] %s21883_s30  ;;  %p16863_p6 = pneg %p18019_p5 }
  0x28   : > { %21886 = sst [smem:[#allocation35_spill]] %s21885_s18  ;;  %s49_s21 = sadd.s32 1, %s17854_s28 }
  0x29   : > { %p18027_p7 = pnand %p16863_p6, %p21759_p1  ;;  %s21888_s24 = sld [smem:[#allocation84_spill]] }
  0x2b   : > { %s21887_s20 = scalar_select %p18027_p7, 1, 0 }
  0x2c   : > { %p18040_p9 = pneg %p18027_p7 }
  0x2e   : > { %s21890_s19 = scalar_select %p18040_p9, 1, 0 }
  0x2f   : > { %s21889_s17 = smov %s21888_s24  ;;  %s17466_s16 = scalar_lea.hbm %s21888_s24, 1024 }
  0x30   : > { %p17467_p8 = scmp.ne.s32.totalorder %s21889_s17, %s17466_s16  ;;  %p17473_p12 = scmp.lt.u32.totalorder %s17466_s16, %s21889_s17 }
  0x32   : > { %p17469_p10 = pnand %p18040_p9, %p17467_p8 }
  0x34   : > { %p17470_p11 = pneg %p17469_p10 }
  0x36   : > { %p17475_p13 = pnand %p17473_p12, %p17470_p11 }
  0x38   : > { %17478 = shalt.err (!%p17475_p13)
}
  0x39   : > { %s17479_s22 = scalar_lea.vmem %s534_s1, 1024  ;;  %p17487_p6 = scmp.lt.s32.totalorder %s534_s1, %s534_s1 }
  0x3a   : > { %p17480_p0 = scmp.ne.s32.totalorder %s534_s1, %s17479_s22  ;;  %p17488_p1 = scmp.lt.s32.totalorder %s17479_s22, %s17479_s22 }
  0x3c   : > { %p17482_p2 = pnand %p17480_p0, %p18040_p9  ;;  %p17489_p4 = por %p17488_p1, %p17487_p6 }
  0x3e   : > { %p17483_p3 = pneg %p17482_p2 }
  0x40   : > { %p17490_p5 = pnand %p17489_p4, %p17483_p3 }
  0x42   : > { %17493 = shalt.err (!%p17490_p5)
}
  0x43   : > { %s21762_s13 = smov 64   ;;  %s21764_s10 = smov 4  }
  0x44   : > { %16869 = dma.hbm_to_vmem [thread:$0]  (!%p18027_p7), %s21889_s17, 1024, %s534_s1, [#allocation8], %s21762_s13, %s21762_s13, %s21764_s10  }
  0x45   : > { %p50_p1 = scmp.ge.s32.totalorder %s49_s21, 2  ;;  %s132_s16 = sadd.s32 1, %s17846_s26 }
  0x46   : > { %p139_p4 = scmp.ne.s32.totalorder %s17846_s26, %s17842_s25  ;;  %p140_p5 = scmp.eq.s32.totalorder %s17858_s29, 0 }
  0x47   : > { %s22077_s21 = smov (%p50_p1, %s49_s21), 0  ;;  %p16899_p10 = scmp.lt.s32.totalorder %s17858_s29, 2 }
  0x48   : > { %21891 = sst [smem:[#allocation36_spill]] %s22077_s21  ;;  %p141_p8 = por %p140_p5, %p139_p4 }
  0x49   : > { %s129_s23 = ssub.s32 %s17854_s28, %s22077_s21  ;;  %s18069_s24 = sand.u32 1, %s17858_s29  }
  0x4a   : > { %p130_p11 = scmp.eq.s32.totalorder %s129_s23, 0  ;;  %s18072_s22 = sand.u32 1, %s17846_s26  }
  0x4b   : > { %s16826_s7 = smul.u32 3072, %s17854_s28  ;;  %s21893_s3 = sld [smem:[#allocation86_spill]] }
  0x4c   : > { %s18076_s12 = scalar_select %p130_p11, %s17846_s26, %s132_s16  }
  0x4d   : > { %s16825_s1 = smul.u32 192, %s18072_s22  ;;  %p18084_p12 = pnand %p16899_p10, %p141_p8 }
  0x4e   : > { %21892 = sst [smem:[#allocation37_spill]] %s18076_s12 }
  0x4f   : > { %s21894_s17 = scalar_select %p18084_p12, 1, 0 }
  0x50   : > { %s583_s23 = scalar_lea.vmem [#allocation10], %s16825_s1  ;;  %p18095_p0 = pneg %p18084_p12 }
  0x51   : > { %s18082_s10 = scalar_lea.hbm %s21893_s3, %s16826_s7  ;;  %s590_s21 = sshll.u32 %s583_s23, 4  ;;  %s18088_s21 = int_to_ptr.vmem [resolvable:$true] %s590_s21 }
  0x52   : > { %s17494_s12 = scalar_lea.hbm %s18082_s10, 3072  ;;  %s17499_s26 = scalar_lea.hbm %s21893_s3, 6144 }
  0x53   : > { %p17495_p13 = scmp.ne.s32.totalorder %s18082_s10, %s17494_s12  ;;  %p17500_p6 = scmp.lt.u32.totalorder %s18082_s10, %s21893_s3 }
  0x54   : > { %s21895_s7 = scalar_select %p18095_p0, 1, 0 }
  0x55   : > { %p17497_p2 = pnand %p18095_p0, %p17495_p13  ;;  %p17501_p1 = scmp.lt.u32.totalorder %s17499_s26, %s17494_s12 }
  0x56   : > { %p17503_p5 = scmp.lt.u32.totalorder %s17494_s12, %s18082_s10 }
  0x57   : > { %p17498_p3 = pneg %p17497_p2  ;;  %p17502_p4 = por %p17501_p1, %p17500_p6 }
  0x59   : > { %p17504_p8 = por %p17503_p5, %p17502_p4 }
  0x5b   : > { %p17505_p10 = pnand %p17504_p8, %p17498_p3 }
  0x5d   : > { %17508 = shalt.err (!%p17505_p10)
}
  0x5e   : > { %s17509_s16 = scalar_lea.vmem %s18088_s21, 3072  ;;  %s17863_s13 = smov [#allocation10]  }
  0x5f   : > { %p17510_p11 = scmp.ne.s32.totalorder %s18088_s21, %s17509_s16  ;;  %s17514_s14 = sshll.u32 %s17863_s13, 4  ;;  %s17515_s14 = int_to_ptr.vmem [resolvable:$false] %s17514_s14 }
  0x60   : > { %s17516_s1 = scalar_lea.vmem %s17515_s14, 6144  ;;  %p17517_p7 = scmp.lt.s32.totalorder %s18088_s21, %s17515_s14 }
  0x61   : > { %p17512_p13 = pnand %p17510_p11, %p18095_p0  ;;  %p17518_p9 = scmp.lt.s32.totalorder %s17516_s1, %s17509_s16 }
  0x63   : > { %p17513_p2 = pneg %p17512_p13  ;;  %p17519_p6 = por %p17518_p9, %p17517_p7 }
  0x65   : > { %p17520_p1 = pnand %p17519_p6, %p17513_p2 }
  0x67   : > { %17523 = shalt.err (!%p17520_p1)
}
  0x68   : > { %s17864_s26 = smov 192   ;;  %s17865_s12 = smov 12  }
  0x69   : > { %s21896_s23 = scalar_lea.sflag [#allocation11], %s18069_s24  ;;  %s14983_s13 = sshll.u32 %s18072_s22, 6 }
  0x6a   : > { %16879 = dma.hbm_to_vmem [thread:$0]  (!%p18084_p12), %s18082_s10, 3072, %s18088_s21, %s21896_s23, %s17864_s26, %s17864_s26, %s17865_s12  }
  0x6b   : > { %s15455_s14 = sshll.u32 %s17854_s28, 10  ;;  %s21897_s5 = sld [smem:[#allocation88_spill]] }
  0x6c   : > { %s623_s29 = scalar_lea.vmem [#allocation13], %s14983_s13  ;;  %s14987_s27 = sshll.u32 %s18072_s22, 10 }
  0x6d   : > { %s630_s6 = sshll.u32 %s623_s29, 4  ;;  %s21778_s30 = scalar_lea.sflag [#allocation14], %s18069_s24  ;;  %s18127_s6 = int_to_ptr.vmem [resolvable:$true] %s630_s6 }
  0x71   : > { %s18125_s3 = scalar_lea.hbm %s21897_s5, %s15455_s14  ;;  %s17529_s26 = scalar_lea.hbm %s21897_s5, 2048 }
  0x72   : > { %s17524_s25 = scalar_lea.hbm %s18125_s3, 1024  ;;  %p17530_p4 = scmp.lt.u32.totalorder %s18125_s3, %s21897_s5 }
  0x73   : > { %p17525_p7 = scmp.ne.s32.totalorder %s18125_s3, %s17524_s25  ;;  %p17531_p5 = scmp.lt.u32.totalorder %s17529_s26, %s17524_s25 }
  0x74   : > { %p17533_p10 = scmp.lt.u32.totalorder %s17524_s25, %s18125_s3 }
  0x75   : > { %p17527_p9 = pnand %p17525_p7, %p18095_p0  ;;  %p17532_p8 = por %p17531_p5, %p17530_p4 }
  0x77   : > { %p17528_p3 = pneg %p17527_p9  ;;  %p17534_p11 = por %p17533_p10, %p17532_p8 }
  0x79   : > { %p17535_p13 = pnand %p17534_p11, %p17528_p3 }
  0x7b   : > { %17538 = shalt.err (!%p17535_p13)
}
  0x7c   : > { %s17539_s29 = scalar_lea.vmem %s18127_s6, 1024  ;;  %s17866_s13 = smov [#allocation13]  }
  0x7d   : > { %p17540_p2 = scmp.ne.s32.totalorder %s18127_s6, %s17539_s29  ;;  %s17544_s14 = sshll.u32 %s17866_s13, 4  ;;  %s17545_s14 = int_to_ptr.vmem [resolvable:$false] %s17544_s14 }
  0x7e   : > { %s17546_s16 = scalar_lea.vmem %s17545_s14, 2048  ;;  %p17547_p7 = scmp.lt.s32.totalorder %s18127_s6, %s17545_s14 }
  0x7f   : > { %p17542_p6 = pnand %p17540_p2, %p18095_p0  ;;  %p17548_p9 = scmp.lt.s32.totalorder %s17546_s16, %s17539_s29 }
  0x81   : > { %p17543_p1 = pneg %p17542_p6  ;;  %p17549_p4 = por %p17548_p9, %p17547_p7 }
  0x83   : > { %p17550_p5 = pnand %p17549_p4, %p17543_p1 }
  0x85   : > { %17553 = shalt.err (!%p17550_p5)
}
  0x86   : > { %s21898_s25 = smov 4   ;;  %s21899_s1 = smov 64  }
  0x87   : > { %16885 = dma.hbm_to_vmem [thread:$0]  (!%p18084_p12), %s18125_s3, 1024, %s18127_s6, %s21778_s30, %s21899_s1, %s21899_s1, %s21898_s25  }
  0x88   : > { %s15456_s21 = sshll.u32 %s17854_s28, 14  ;;  %s21900_s9 = sld [smem:[#allocation92_spill]] }
  0x89   : > { %s673_s23 = scalar_lea.vmem [#allocation16], %s14987_s27  ;;  %s21786_s13 = scalar_lea.sflag [#allocation17], %s18069_s24 }
  0x8a   : > { %s680_s29 = sshll.u32 %s673_s23, 4  ;;  %s18167_s29 = int_to_ptr.vmem [resolvable:$true] %s680_s29 }
  0x8e   : > { %s18163_s12 = scalar_lea.hbm %s21900_s9, %s15456_s21  ;;  %s17559_s16 = scalar_lea.hbm %s21900_s9, 32768 }
  0x8f   : > { %s17554_s14 = scalar_lea.hbm %s18163_s12, 16384  ;;  %p17560_p11 = scmp.lt.u32.totalorder %s18163_s12, %s21900_s9 }
  0x90   : > { %p17555_p3 = scmp.ne.s32.totalorder %s18163_s12, %s17554_s14  ;;  %p17561_p13 = scmp.lt.u32.totalorder %s17559_s16, %s17554_s14 }
  0x91   : > { %p17563_p6 = scmp.lt.u32.totalorder %s17554_s14, %s18163_s12 }
  0x92   : > { %p17557_p8 = pnand %p17555_p3, %p18095_p0  ;;  %p17562_p2 = por %p17561_p13, %p17560_p11 }
  0x94   : > { %p17558_p10 = pneg %p17557_p8  ;;  %p17564_p1 = por %p17563_p6, %p17562_p2 }
  0x96   : > { %p17565_p7 = pnand %p17564_p1, %p17558_p10 }
  0x98   : > { %17568 = shalt.err (!%p17565_p7)
}
  0x99   : > { %s17569_s23 = scalar_lea.vmem %s18167_s29, 16384  ;;  %s17867_s3 = smov [#allocation16]  }
  0x9a   : > { %p17570_p9 = scmp.ne.s32.totalorder %s18167_s29, %s17569_s23  ;;  %s17574_s6 = sshll.u32 %s17867_s3, 4  ;;  %s17575_s6 = int_to_ptr.vmem [resolvable:$false] %s17574_s6 }
  0x9b   : > { %s17576_s10 = scalar_lea.vmem %s17575_s6, 32768  ;;  %p17577_p3 = scmp.lt.s32.totalorder %s18167_s29, %s17575_s6 }
  0x9c   : > { %p17572_p4 = pnand %p17570_p9, %p18095_p0  ;;  %p17578_p8 = scmp.lt.s32.totalorder %s17576_s10, %s17569_s23 }
  0x9e   : > { %p17573_p5 = pneg %p17572_p4  ;;  %p17579_p11 = por %p17578_p8, %p17577_p3 }
  0xa0   : > { %p17580_p13 = pnand %p17579_p11, %p17573_p5 }
  0xa2   : > { %17583 = shalt.err (!%p17580_p13)
}
  0xa3   : > { %s17868_s14 = smov 1024   ;;  %s21901_s11 = sld [smem:[#allocation94_spill]] }
  0xa4   : > { %16891 = dma.hbm_to_vmem [thread:$0]  (!%p18084_p12), %s18163_s12, 16384, %s18167_s29, %s21786_s13, %s17868_s14, %s17868_s14, %s21899_s1  }
  0xa5   : > { %s701_s3 = scalar_lea.vmem [#allocation18], %s14987_s27  ;;  %s17869_s10 = smov [#allocation4]  }
  0xa6   : > { %s708_s6 = sshll.u32 %s701_s3, 4  ;;  %s520_s30 = sshll.u32 %s17869_s10, 4  ;;  %s18203_s6 = int_to_ptr.vmem [resolvable:$true] %s708_s6  ;;  %s521_s30 = int_to_ptr.vmem [resolvable:$true] %s520_s30 }
  0xa7   : > { %21902 = sst [smem:[#allocation38_spill]] %s18203_s6  ;;  %s21903_s0 = sld [smem:[#allocation83_spill]] }
  0xa8   : > { %p21904_p2 = scmp.ne.s32.totalorder %s21890_s19, 0 }
  0xa9   : > { %s18199_s23 = scalar_lea.hbm %s21901_s11, %s15456_s21 }
  0xad   : > { %s17584_s18 = scalar_lea.hbm %s21903_s0, 512 }
  0xae   : > { %p17585_p10 = scmp.ne.s32.totalorder %s21903_s0, %s17584_s18  ;;  %p17591_p7 = scmp.lt.u32.totalorder %s17584_s18, %s21903_s0 }
  0xb0   : > { %p17587_p6 = pnand %p17585_p10, %p21904_p2 }
  0xb2   : > { %p17588_p1 = pneg %p17587_p6 }
  0xb4   : > { %p17593_p9 = pnand %p17591_p7, %p17588_p1 }
  0xb6   : > { %17596 = shalt.err (!%p17593_p9)
}
  0xb7   : > { %s17597_s27 = scalar_lea.vmem %s521_s30, 512  ;;  %p17605_p8 = scmp.lt.s32.totalorder %s521_s30, %s521_s30 }
  0xb8   : > { %p17598_p4 = scmp.ne.s32.totalorder %s521_s30, %s17597_s27  ;;  %p17606_p11 = scmp.lt.s32.totalorder %s17597_s27, %s17597_s27 }
  0xba   : > { %p17600_p5 = pnand %p17598_p4, %p21904_p2  ;;  %p17607_p13 = por %p17606_p11, %p17605_p8 }
  0xbc   : > { %p17601_p3 = pneg %p17600_p5 }
  0xbe   : > { %p17608_p12 = pnand %p17607_p13, %p17601_p3 }
  0xc0   : > { %17611 = shalt.err (!%p17608_p12)
}
  0xc1   : > { %s17870_s5 = smov 128   ;;  %s17871_s8 = smov 8  }
  0xc2   : > { %p21905_p10 = scmp.ne.s32.totalorder %s21887_s20, 0  ;;  %s17872_s14 = smov [#allocation9]  }
  0xc3   : > { %s549_s16 = sshll.u32 %s17872_s14, 4  ;;  %s17873_s26 = smov [#allocation19]   ;;  %s550_s16 = int_to_ptr.vmem [resolvable:$true] %s549_s16 }
  0xc4   : > { %16866 = dma.hbm_to_vmem [thread:$0]  (!%p21905_p10), %s21903_s0, 512, %s521_s30, [#allocation5], %s17870_s5, %s17870_s5, %s17871_s8  }
  0xc5   : > { %s562_s3 = sshll.u32 %s17873_s26, 4  ;;  %s21906_s2 = sld [smem:[#allocation85_spill]]  ;;  %s563_s3 = int_to_ptr.vmem [resolvable:$true] %s562_s3 }
  0xcb   : > { %s17612_s21 = scalar_lea.hbm %s21906_s2, 512 }
  0xcc   : > { %p17613_p12 = scmp.ne.s32.totalorder %s21906_s2, %s17612_s21  ;;  %p17619_p7 = scmp.lt.u32.totalorder %s17612_s21, %s21906_s2 }
  0xce   : > { %p17615_p6 = pnand %p17613_p12, %p21904_p2 }
  0xd0   : > { %p17616_p1 = pneg %p17615_p6 }
  0xd2   : > { %p17621_p9 = pnand %p17619_p7, %p17616_p1 }
  0xd4   : > { %17624 = shalt.err (!%p17621_p9)
}
  0xd5   : > { %s17625_s30 = scalar_lea.vmem %s550_s16, 512  ;;  %p17633_p8 = scmp.lt.s32.totalorder %s550_s16, %s550_s16 }
  0xd6   : > { %p17626_p4 = scmp.ne.s32.totalorder %s550_s16, %s17625_s30  ;;  %p17634_p11 = scmp.lt.s32.totalorder %s17625_s30, %s17625_s30 }
  0xd8   : > { %p17628_p5 = pnand %p17626_p4, %p21904_p2  ;;  %p17635_p13 = por %p17634_p11, %p17633_p8 }
  0xda   : > { %p17629_p3 = pneg %p17628_p5 }
  0xdc   : > { %p17636_p0 = pnand %p17635_p13, %p17629_p3 }
  0xde   : > { %17639 = shalt.err (!%p17636_p0)
}
  0xdf   : > { %16872 = dma.hbm_to_vmem [thread:$0]  (!%p21905_p10), %s21906_s2, 512, %s550_s16, [#allocation8], %s17870_s5, %s17870_s5, %s17871_s8  }
  0xe0   : > { %s16827_s13 = smul.u32 3, %s18072_s22  ;;  %s17640_s26 = scalar_lea.hbm %s21753_s15, 1024 }
  0xe1   : > { %p17641_p12 = scmp.ne.s32.totalorder %s21753_s15, %s17640_s26  ;;  %p17647_p1 = scmp.lt.u32.totalorder %s17640_s26, %s21753_s15 }
  0xe3   : > { %p17643_p0 = pnand %p17641_p12, %p21904_p2 }
  0xe5   : > { %p17644_p6 = pneg %p17643_p0 }
  0xe7   : > { %p17649_p7 = pnand %p17647_p1, %p17644_p6 }
  0xe9   : > { %17652 = shalt.err (!%p17649_p7)
}
  0xea   : > { %s17653_s5 = scalar_lea.vmem %s563_s3, 1024  ;;  %p17661_p3 = scmp.lt.s32.totalorder %s563_s3, %s563_s3 }
  0xeb   : > { %p17654_p9 = scmp.ne.s32.totalorder %s563_s3, %s17653_s5  ;;  %p17662_p8 = scmp.lt.s32.totalorder %s17653_s5, %s17653_s5 }
  0xed   : > { %p17656_p4 = pnand %p17654_p9, %p21904_p2  ;;  %p17663_p11 = por %p17662_p8, %p17661_p3 }
  0xef   : > { %p17657_p5 = pneg %p17656_p4 }
  0xf1   : > { %p17664_p13 = pnand %p17663_p11, %p17657_p5 }
  0xf3   : > { %17667 = shalt.err (!%p17664_p13)
}
  0xf4   : > { %16875 = dma.hbm_to_vmem [thread:$0]  (!%p21905_p10), %s21753_s15, 1024, %s563_s3, [#allocation20], %s21899_s1, %s21899_s1, %s21898_s25  }
  0xf5   : > { %s16828_s27 = smul.u32 48, %s17854_s28  ;;  %s604_s19 = scalar_lea.vmem [#allocation12], %s16827_s13 }
  0xf6   : > { %s612_s30 = sshll.u32 %s604_s19, 4  ;;  %s21907_s4 = sld [smem:[#allocation87_spill]]  ;;  %s613_s30 = int_to_ptr.vmem [resolvable:$true] %s612_s30 }
  0xf7   : > { %p21908_p12 = scmp.ne.s32.totalorder %s21895_s7, 0 }
  0xfc   : > { %s610_s6 = scalar_lea.hbm %s21907_s4, %s16828_s27  ;;  %s17673_s10 = scalar_lea.hbm %s21907_s4, 96 }
  0xfd   : > { %s17668_s14 = scalar_lea.hbm %s610_s6, 48  ;;  %p17674_p10 = scmp.lt.u32.totalorder %s610_s6, %s21907_s4 }
  0xfe   : > { %p17669_p2 = scmp.ne.s32.totalorder %s610_s6, %s17668_s14  ;;  %p17675_p1 = scmp.lt.u32.totalorder %s17673_s10, %s17668_s14 }
  0xff   : > { %p17677_p9 = scmp.lt.u32.totalorder %s17668_s14, %s610_s6 }
 0x100   : > { %p17671_p0 = pnand %p17669_p2, %p21908_p12  ;;  %p17676_p7 = por %p17675_p1, %p17674_p10 }
 0x102   : > { %p17672_p6 = pneg %p17671_p0  ;;  %p17678_p4 = por %p17677_p9, %p17676_p7 }
 0x104   : > { %p17679_p5 = pnand %p17678_p4, %p17672_p6 }
 0x106   : > { %17682 = shalt.err (!%p17679_p5)
}
 0x107   : > { %s17683_s3 = scalar_lea.vmem %s613_s30, 48  ;;  %s17874_s13 = smov [#allocation12]  }
 0x108   : > { %p17684_p3 = scmp.ne.s32.totalorder %s613_s30, %s17683_s3  ;;  %s17688_s29 = sshll.u32 %s17874_s13, 4  ;;  %s17689_s29 = int_to_ptr.vmem [resolvable:$false] %s17688_s29 }
 0x109   : > { %s17690_s5 = scalar_lea.vmem %s17689_s29, 96  ;;  %p17691_p13 = scmp.lt.s32.totalorder %s613_s30, %s17689_s29 }
 0x10a   : > { %p17686_p8 = pnand %p17684_p3, %p21908_p12  ;;  %p17692_p2 = scmp.lt.s32.totalorder %s17690_s5, %s17683_s3 }
 0x10c   : > { %p17687_p11 = pneg %p17686_p8  ;;  %p17693_p0 = por %p17692_p2, %p17691_p13 }
 0x10e   : > { %p17694_p1 = pnand %p17693_p0, %p17687_p11 }
 0x110   : > { %17697 = shalt.err (!%p17694_p1)
}
 0x111   : > { %p21909_p10 = scmp.ne.s32.totalorder %s21894_s17, 0  ;;  %s21910_s8 = scalar_lea.sflag [#allocation11], %s18069_s24 }
 0x112   : > { %s14986_s16 = sshll.u32 %s17854_s28, 4  ;;  %s655_s27 = scalar_lea.vmem [#allocation15], %s18072_s22 }
 0x113   : > { %16882 = dma.hbm_to_vmem [thread:$0]  (!%p21909_p10), %s610_s6, 48, %s613_s30, %s21910_s8  }
 0x114   : > { %s662_s19 = sshll.u32 %s655_s27, 4  ;;  %s21911_s14 = sld [smem:[#allocation91_spill]]  ;;  %s663_s19 = int_to_ptr.vmem [resolvable:$true] %s662_s19 }
 0x11a   : > { %s660_s20 = scalar_lea.hbm %s21911_s14, %s14986_s16  ;;  %s17703_s21 = scalar_lea.hbm %s21911_s14, 32 }
 0x11b   : > { %s17698_s26 = scalar_lea.hbm %s660_s20, 16  ;;  %p17704_p4 = scmp.lt.u32.totalorder %s660_s20, %s21911_s14 }
 0x11c   : > { %p17699_p6 = scmp.ne.s32.totalorder %s660_s20, %s17698_s26  ;;  %p17705_p5 = scmp.lt.u32.totalorder %s17703_s21, %s17698_s26 }
 0x11d   : > { %p17707_p8 = scmp.lt.u32.totalorder %s17698_s26, %s660_s20 }
 0x11e   : > { %p17701_p7 = pnand %p17699_p6, %p21908_p12  ;;  %p17706_p3 = por %p17705_p5, %p17704_p4 }
 0x120   : > { %p17702_p9 = pneg %p17701_p7  ;;  %p17708_p11 = por %p17707_p8, %p17706_p3 }
 0x122   : > { %p17709_p13 = pnand %p17708_p11, %p17702_p9 }
 0x124   : > { %17712 = shalt.err (!%p17709_p13)
}
 0x125   : > { %s17713_s22 = scalar_lea.vmem %s663_s19, 16  ;;  %s17875_s30 = smov [#allocation15]  }
 0x126   : > { %p17714_p2 = scmp.ne.s32.totalorder %s663_s19, %s17713_s22  ;;  %s17718_s6 = sshll.u32 %s17875_s30, 4  ;;  %s17719_s6 = int_to_ptr.vmem [resolvable:$false] %s17718_s6 }
 0x127   : > { %s17720_s29 = scalar_lea.vmem %s17719_s6, 32  ;;  %p17721_p6 = scmp.lt.s32.totalorder %s663_s19, %s17719_s6 }
 0x128   : > { %p17716_p0 = pnand %p17714_p2, %p21908_p12  ;;  %p17722_p7 = scmp.lt.s32.totalorder %s17720_s29, %s17713_s22 }
 0x12a   : > { %p17717_p1 = pneg %p17716_p0  ;;  %p17723_p10 = por %p17722_p7, %p17721_p6 }
 0x12c   : > { %p17724_p4 = pnand %p17723_p10, %p17717_p1 }
 0x12e   : > { %17727 = shalt.err (!%p17724_p4)
}
 0x12f   : > { %p21912_p5 = scmp.ne.s32.totalorder %s21894_s17, 0  ;;  %s21913_s5 = scalar_lea.sflag [#allocation14], %s18069_s24 }
 0x130   : > { %s17728_s8 = scalar_lea.hbm %s18199_s23, 16384  ;;  %s17733_s9 = scalar_lea.hbm %s21901_s11, 32768 }
 0x131   : > { %16888 = dma.hbm_to_vmem [thread:$0]  (!%p21912_p5), %s660_s20, 16, %s663_s19, %s21913_s5  }
 0x132   : > { %p17729_p9 = scmp.ne.s32.totalorder %s18199_s23, %s17728_s8  ;;  %p17734_p10 = scmp.lt.u32.totalorder %s18199_s23, %s21901_s11 }
 0x133   : > { %p17735_p11 = scmp.lt.u32.totalorder %s17733_s9, %s17728_s8  ;;  %p17737_p2 = scmp.lt.u32.totalorder %s17728_s8, %s18199_s23 }
 0x134   : > { %p17731_p3 = pnand %p17729_p9, %p21908_p12 }
 0x135   : > { %p17736_p13 = por %p17735_p11, %p17734_p10 }
 0x136   : > { %p17732_p8 = pneg %p17731_p3 }
 0x137   : > { %p17738_p0 = por %p17737_p2, %p17736_p13 }
 0x139   : > { %p17739_p1 = pnand %p17738_p0, %p17732_p8 }
 0x13b   : > { %17742 = shalt.err (!%p17739_p1)
}
 0x13c   : > { %s21914_s19 = sld [smem:[#allocation38_spill]]  ;;  %s17876_s10 = smov [#allocation18]  }
 0x13d   : > { %s17748_s12 = sshll.u32 %s17876_s10, 4  ;;  %s17749_s12 = int_to_ptr.vmem [resolvable:$false] %s17748_s12 }
 0x13e   : > { %s17750_s21 = scalar_lea.vmem %s17749_s12, 32768 }
 0x142   : > { %s17743_s20 = scalar_lea.vmem %s21914_s19, 16384  ;;  %p17751_p9 = scmp.lt.s32.totalorder %s21914_s19, %s17749_s12 }
 0x143   : > { %p17744_p6 = scmp.ne.s32.totalorder %s21914_s19, %s17743_s20  ;;  %p17752_p3 = scmp.lt.s32.totalorder %s17750_s21, %s17743_s20 }
 0x145   : > { %p17746_p7 = pnand %p17744_p6, %p21908_p12  ;;  %p17753_p10 = por %p17752_p3, %p17751_p9 }
 0x147   : > { %p17747_p4 = pneg %p17746_p7 }
 0x149   : > { %p17754_p11 = pnand %p17753_p10, %p17747_p4 }
 0x14b   : > { %17757 = shalt.err (!%p17754_p11)
}
 0x14c   : > { %s21915_s3 = scalar_lea.sflag [#allocation17], %s18069_s24  ;;  %s21916_s7 = sld [smem:[#allocation35_spill]] }
 0x14d   : > { %16894 = dma.hbm_to_vmem [thread:$0]  (!%p21912_p5), %s18199_s23, 16384, %s21914_s19, %s21915_s3, %s21899_s1, %s21899_s1, %s21898_s25  }
 0x152   : > { %p21917_p12 = scmp.ne.s32.totalorder %s21916_s7, 0 }
 0x154   : > { %738 = sbr.rel (%p21917_p12) target bundleno = 3992 (0xf98), region = 88 }
 0x15b   : > { %s21918_s13 = sld [smem:[#allocation33_spill]] }
 0x161   : > { %p21919_p8 = scmp.eq.s32.totalorder %s21918_s13, 0 }
 0x163   : > { %17809 = dma.done.wait (%p21919_p8), [#allocation5], 512   ;;  %p21920_p13 = pmov %p21919_p8 }
 0x164   : > { %p21921_p2 = pmov %p21919_p8 }
 0x165   : > { %17811 = vsyncadd (%p21920_p13), [#allocation5], 4294966784 }
 0x166   : > { %17813 = dma.done.wait (%p21921_p2), [#allocation8], 1536   ;;  %p21922_p0 = pmov %p21921_p2 }
 0x167   : > { %s21923_s17 = sld [smem:[#allocation29_spill]]  ;;  %s21924_s24 = sld [smem:[#allocation34_spill]] }
 0x168   : > { %17815 = vsyncadd (%p21922_p0), [#allocation8], 4294965760  ;;  %s752_s22 = sand.u32 1, %s21918_s13  }
 0x169   : > { %s753_s23 = scalar_lea.sflag [#allocation11], %s752_s22 }
 0x16d   : > { %s18338_s25 = sand.u32 1, %s21923_s17   ;;  %p21925_p5 = scmp.ne.s32.totalorder %s21924_s24, 0 }
 0x16e   : > { %s16829_s1 = smul.u32 192, %s18338_s25 }
 0x170   : > { %s18341_s30 = scalar_lea.vmem [#allocation10], %s16829_s1 }
 0x171   : > { %17817 = dma.done.wait (%p21925_p5), %s753_s23, 3120  }
 0x172   : > { %17819 = vsyncadd (%p21925_p5), %s753_s23, 4294964176  ;;  %s16830_s6 = smul.u32 3, %s18338_s25  ;;  %s14997_s29 = sshll.u32 %s18338_s25, 6 }
 0x173   : > { %s771_s8 = scalar_lea.sflag [#allocation14], %s752_s22  ;;  %s18351_s16 = scalar_lea.vmem [#allocation13], %s14997_s29 }
 0x174   : > { %s18349_s5 = scalar_lea.vmem [#allocation12], %s16830_s6 }
 0x175   : > { %17821 = dma.done.wait (%p21925_p5), %s771_s8, 1040  }
 0x176   : > { %17823 = vsyncadd (%p21925_p5), %s771_s8, 4294966256  ;;  %s14998_s27 = sshll.u32 %s18338_s25, 10  ;;  %s788_s18 = scalar_lea.sflag [#allocation17], %s752_s22 }
 0x177   : > { %s18359_s26 = scalar_lea.vmem [#allocation16], %s14998_s27 }
 0x178   : > { %17825 = dma.done.wait (%p21925_p5), %s788_s18, 32768  }
 0x179   : > { %17827 = vsyncadd (%p21925_p5), %s788_s18, 4294934528  ;;  %s18365_s19 = scalar_lea.vmem [#allocation18], %s14998_s27  ;;  %p21926_p1 = pmov %p21922_p0 }
 0x17a   : > { %p21927_p6 = pmov %p21922_p0 }
 0x17b   : > { %17829 = dma.done.wait (%p21926_p1), [#allocation20], 1024  }
 0x17c   : > { %17831 = vsyncadd (%p21927_p6), [#allocation20], 4294966272  ;;  %s21928_s20 = sld [smem:[#allocation31_spill]]  ;;  %s21930_s22 = sld [smem:[#allocation90_spill]] }
 0x17d   : > { %s21931_s29 = sld [smem:[#allocation95_spill]]  ;;  %s21932_s9 = sld [smem:[#allocation93_spill]] }
 0x17e   : > { %s21933_s2 = sld [smem:[#allocation96_spill]]  ;;  %s21934_s7 = sld [smem:[#allocation97_spill]] }
 0x182   : > { %p895_p7 = scmp.lt.s32.totalorder %s21928_s20, 1  ;;  %p15002_p4 = scmp.ne.s32.totalorder %s21928_s20, 0 }
 0x183   : > { %v16976_v0 = vld [vmem:[#allocation7] sm:$0xff] (!%p15002_p4)   ;;  %v16977_v1 = vld [vmem:[#allocation7 + $0x8] sm:$0xff] (!%p15002_p4)   ;;  %v16978_v2 = vld [vmem:[#allocation7 + $0x10] sm:$0xff] (!%p15002_p4)  }
 0x184   : > { %s18373_s10 = scalar_select %p895_p7, %s21928_s20, 1 }
 0x185   : > { %918 = sbr.rel (%p15002_p4) target bundleno = 639 (0x27f), region = 132  ;;  %15977 = vmatprep.subr.bf16.mxu0 (!%p15002_p4), %v16976_v0  ;;  %v16979_v3 = vld [vmem:[#allocation7 + $0x18] sm:$0xff] (!%p15002_p4)   ;;  %v919_v4 = vld [vmem:[#allocation4] sm:$0xff] (!%p15002_p4)  ;;  %v920_v5 = vld [vmem:[#allocation4 + $0x8] sm:$0xff] (!%p15002_p4) }
 0x186   : > { %s900_s13 = scalar_lea.vmem %s21930_s22, %s18373_s10  ;;  %s15001_s1 = sshll.u32 %s18373_s10, 4  ;;  %15978 = vmatpush3.bf16.msra.mxu0 (!%p15002_p4), %v16976_v0  ;;  %v923_v6 = vpack.c.bf16 (!%p15002_p4), %v920_v5, %v919_v4  ;;  %v16980_v7 = vld [vmem:[#allocation7 + $0x20] sm:$0xff] (!%p15002_p4)   ;;  %v16981_v8 = vld [vmem:[#allocation7 + $0x28] sm:$0xff] (!%p15002_p4)   ;;  %v16982_v9 = vld [vmem:[#allocation7 + $0x30] sm:$0xff] (!%p15002_p4)  }
 0x187   : > { %s907_s8 = scalar_lea.vmem %s21931_s29, %s18373_s10  ;;  %s18391_s0 = scalar_lea.vmem %s21932_s9, %s15001_s1  ;;  %15979 = vmatprep.subr.bf16.mxu0 (!%p15002_p4), %v16977_v1  ;;  %v16983_v10 = vld [vmem:[#allocation7 + $0x38] sm:$0xff] (!%p15002_p4)   ;;  %v921_v11 = vld [vmem:[#allocation4 + $0x10] sm:$0xff] (!%p15002_p4)  ;;  %v941_v15 = vld [vmem:[#allocation9] sm:$0xff] (!%p15002_p4) }
 0x188   : > { %s910_s4 = scalar_lea.vmem %s21933_s2, %s18373_s10  ;;  %s913_s14 = scalar_lea.vmem %s21934_s7, %s18373_s10  ;;  %15993 = vmatprep.mubr.bf16.mxu0 (!%p15002_p4), %v923_v6  ;;  %v922_v12 = vld [vmem:[#allocation4 + $0x18] sm:$0xff] (!%p15002_p4)  ;;  %v943_v14 = vld [vmem:[#allocation9 + $0x10] sm:$0xff] (!%p15002_p4)  ;;  %v942_v20 = vld [vmem:[#allocation9 + $0x8] sm:$0xff] (!%p15002_p4) }
 0x189   : > { %v924_v13 = vpack.c.bf16 (!%p15002_p4), %v922_v12, %v921_v11  ;;  %v944_v17 = vld [vmem:[#allocation9 + $0x18] sm:$0xff] (!%p15002_p4) }
 0x18a   : > { %15980 = vmatpush3.bf16.msra.mxu0 (!%p15002_p4), %v16977_v1 }
 0x18b   : > { %15981 = vmatprep.subr.bf16.mxu0 (!%p15002_p4), %v16978_v2 }
 0x18e   : > { %15982 = vmatpush3.bf16.msra.mxu0 %v16978_v2 }
 0x18f   : > { %15983 = vmatprep.subr.bf16.mxu0 %v16979_v3 }
 0x192   : > { %15984 = vmatpush3.bf16.msra.mxu0 %v16979_v3 }
 0x193   : > { %15985 = vmatprep.subr.bf16.mxu0 %v16980_v7 }
 0x196   : > { %15986 = vmatpush3.bf16.msra.mxu0 %v16980_v7 }
 0x197   : > { %15987 = vmatprep.subr.bf16.mxu0 %v16981_v8 }
 0x19a   : > { %15988 = vmatpush3.bf16.msra.mxu0 %v16981_v8 }
 0x19b   : > { %15989 = vmatprep.subr.bf16.mxu0 %v16982_v9 }
 0x19e   : > { %15990 = vmatpush3.bf16.msra.mxu0 %v16982_v9 }
 0x19f   : > { %15991 = vmatprep.subr.bf16.mxu0 %v16983_v10 }
 0x1a2   : > { %15992 = vmatpush3.bf16.msra.mxu0 %v16983_v10 }
 0x1a5   : > { %15994 = vmatmul.mubr.bf16.vlgmr.msra.gmra.mrb[0].mxu0 %v924_v13 }
 0x278   : > { %v15995_v16 = vpop.f32.mrb[0].mxu0 }
 0x279   : > { %v1036_v18 = vadd.f32 %v15995_v16, %v943_v14  ;;  %v1027_v19 = vpop.f32.mrb[1].mxu0 }
 0x27a   : > { %v1028_v21 = vadd.f32 %v1027_v19, %v941_v15  ;;  %v15996_v22 = vpop.f32.mrb[2].mxu0 }
 0x27b   : > { %1044 = vst [vmem:[#allocation2 + $0x10] sm:$0xff] %v1036_v18  ;;  %v1039_v23 = vadd.f32 %v15996_v22, %v944_v17  ;;  %v1030_v24 = vpop.f32.mrb[3].mxu0 }
 0x27c   : > { %1042 = vst [vmem:[#allocation2] sm:$0xff] %v1028_v21  ;;  %v1031_v25 = vadd.f32 %v1030_v24, %v942_v20 }
 0x27d   : > { %1045 = vst [vmem:[#allocation2 + $0x18] sm:$0xff] %v1039_v23 }
 0x27e   : > { %1043 = vst [vmem:[#allocation2 + $0x8] sm:$0xff] %v1031_v25 }
 0x27f PF: > { %v17014_v26 = vld [vmem:[%s18341_s30 + $0x4] ss:$12 sps:$4 sm:$0xff]   ;;  %v17016_v27 = vld [vmem:[%s18341_s30] ss:$12 sps:$4 sm:$0xff]   ;;  %v21792_v28 = vmov 0   ;;  %v1086_v57 = vlaneseq  ;;  %v21794_v60 = vmov 0.0  }
 0x280   : > { %1261 = vmatprep.mubr.bf16.mxu0 %v21792_v28  ;;  %1229 = vmatprep.subr.bf16.mxu0 %v17014_v26  ;;  %v17017_v29 = vld [vmem:[%s18341_s30 + $0x1c] ss:$12 sps:$4 sm:$0xff]   ;;  %v17019_v30 = vld [vmem:[%s18341_s30 + $0x18] ss:$12 sps:$4 sm:$0xff]   ;;  %v17020_v31 = vld [vmem:[%s18341_s30 + $0x34] ss:$12 sps:$4 sm:$0xff]  }
 0x281   : > { %1230 = vmatpush1.bf16.msra.mxu0 %v17016_v27  ;;  %v17022_v32 = vld [vmem:[%s18341_s30 + $0x30] ss:$12 sps:$4 sm:$0xff]   ;;  %v17023_v33 = vld [vmem:[%s18341_s30 + $0x4c] ss:$12 sps:$4 sm:$0xff]   ;;  %v17025_v35 = vld [vmem:[%s18341_s30 + $0x48] ss:$12 sps:$4 sm:$0xff]  }
 0x282   : > { %1231 = vmatprep.subr.bf16.mxu0 %v17017_v29  ;;  %v17026_v36 = vld [vmem:[%s18341_s30 + $0x64] ss:$12 sps:$4 sm:$0xff]   ;;  %v17038_v39 = vld [vmem:[%s18341_s30 + $0x8] ss:$12 sps:$4 sm:$0xff]   ;;  %v17039_v40 = vld [vmem:[%s18341_s30 + $0x20] ss:$12 sps:$4 sm:$0xff]  }
 0x283   : > { %v1046_v34 = vld [vmem:[#allocation2] sm:$0xff]  ;;  %15997 = vmatprep.subr.bf16.mxu1 %v17038_v39  ;;  %v17035_v48 = vld [vmem:[%s18341_s30 + $0xac] ss:$12 sps:$4 sm:$0xff]   ;;  %v17042_v49 = vld [vmem:[%s18341_s30 + $0x68] ss:$12 sps:$4 sm:$0xff]   ;;  %v18428_v58 = vshrl.u32 %v1086_v57, 7 }
 0x284   : > { %v17028_v41 = vld [vmem:[%s18341_s30 + $0x60] ss:$12 sps:$4 sm:$0xff]   ;;  %v17029_v42 = vld [vmem:[%s18341_s30 + $0x7c] ss:$12 sps:$4 sm:$0xff]   ;;  %15998 = vmatpush3.bf16.msra.mxu1 %v17038_v39  ;;  %v17040_v43 = vld [vmem:[%s18341_s30 + $0x38] ss:$12 sps:$4 sm:$0xff]  }
 0x285   : > { %1232 = vmatpush1.bf16.msra.mxu0 %v17019_v30  ;;  %v1047_v37 = vld [vmem:[#allocation2 + $0x8] sm:$0xff]  ;;  %15999 = vmatprep.subr.bf16.mxu1 %v17039_v40  ;;  %v17032_v45 = vld [vmem:[%s18341_s30 + $0x94] ss:$12 sps:$4 sm:$0xff]   ;;  %v17041_v46 = vld [vmem:[%s18341_s30 + $0x50] ss:$12 sps:$4 sm:$0xff]   ;;  %21935 = vst [vmem:[#allocation39_spill] sm:$0xff] %v18428_v58 }
 0x286   : > { %1233 = vmatprep.subr.bf16.mxu0 %v17020_v31  ;;  %v1050_v38 = vpack.c.bf16 %v1047_v37, %v1046_v34  ;;  %v17031_v44 = vld [vmem:[%s18341_s30 + $0x78] ss:$12 sps:$4 sm:$0xff]   ;;  %v17034_v47 = vld [vmem:[%s18341_s30 + $0x90] ss:$12 sps:$4 sm:$0xff]   ;;  %v17037_v50 = vld [vmem:[%s18341_s30 + $0xa8] ss:$12 sps:$4 sm:$0xff]  }
 0x287   : > { %v17043_v51 = vld [vmem:[%s18341_s30 + $0x80] ss:$12 sps:$4 sm:$0xff]   ;;  %v17044_v52 = vld [vmem:[%s18341_s30 + $0x98] ss:$12 sps:$4 sm:$0xff]   ;;  %v17045_v55 = vld [vmem:[%s18341_s30 + $0xb0] ss:$12 sps:$4 sm:$0xff]  }
 0x288   : > { %16013 = vmatprep.mubr.bf16.mxu1 %v1050_v38  ;;  %16000 = vmatpush3.bf16.msra.mxu1 %v17039_v40  ;;  %v1048_v53 = vld [vmem:[#allocation2 + $0x10] sm:$0xff]  ;;  %v1049_v54 = vld [vmem:[#allocation2 + $0x18] sm:$0xff]  ;;  %v18431_v59 = vsub.s32 1, %v18428_v58  ;;  %v1084_v61 = vld [vmem:[%s18349_s5] sm:$0x7]  ;;  %v18437_v62 = vsub.s32 0, %v18428_v58 }
 0x289   : > { %1234 = vmatpush1.bf16.msra.mxu0 %v17022_v32  ;;  %16001 = vmatprep.subr.bf16.mxu1 %v17040_v43  ;;  %v1051_v56 = vpack.c.bf16 %v1049_v54, %v1048_v53  ;;  %s17879_s2 = smov 32   ;;  %s17880_s11 = smov 96   ;;  %vm17882_vm0 = vmmov 0   ;;  %v18510_v17 = vsub.s32 2, %v18428_v58  ;;  %v17883_v27 = vmov 1983009808  }
 0x28a   : > { %1235 = vmatprep.subr.bf16.mxu0 %v17023_v33  ;;  %21936 = vst [vmem:[#allocation40_spill] sm:$0xff] %v18431_v59  ;;  %21937 = vst [vmem:[#allocation41_spill] sm:$0xff] %v18437_v62  ;;  %v1093_v63 = vrot.slane %v1084_v61, %v18431_v59  ;;  %v1089_v2 = vrot.slane %v1084_v61, %v18437_v62  ;;  %s17881_s30 = smov 64   ;;  %v1374_v29 = vunpack.c.l.s4 %v17883_v27  ;;  %v17884_v33 = vmov 1934713408   ;;  %s22054_s9 = sld [smem:[#allocation89_spill]] }
 0x28b   : > { %21938 = vst [vmem:[#allocation42_spill] sm:$0xff] %v18510_v17  ;;  %v1097_v20 = vrot.slane %v1084_v61, %v18510_v17  ;;  %v1406_v34 = vunpack.c.l.s4 %v17884_v33  ;;  %vm3995_vm1 = vcmask 261120   ;;  %vm6940_vm2 = vcmask 9216   ;;  %s22057_s22 = scalar_lea.vmem [#allocation15], %s18338_s25 }
 0x28c   : > { %16002 = vmatpush3.bf16.msra.mxu1 %v17040_v43  ;;  %v1375_v32 = vunpack.c.0.s8 %v1374_v29  ;;  %vm7713_vm3 = vcmask 1040384   ;;  %vm7709_vm4 = vcmask 15360   ;;  %vm11379_vm5 = vcmask 523264  }
 0x28d   : > { %1236 = vmatpush1.bf16.msra.mxu0 %v17025_v35  ;;  %16003 = vmatprep.subr.bf16.mxu1 %v17041_v46  ;;  %v1407_v40 = vunpack.c.0.s8 %v1406_v34  ;;  %vm11384_vm6 = vcmask 785408  }
 0x28e   : > { %1237 = vmatprep.subr.bf16.mxu0 %v17026_v36  ;;  %v18544_v37 = vsub.s32 %v1375_v32, %v18428_v58 }
 0x290   : > { %16004 = vmatpush3.bf16.msra.mxu1 %v17041_v46  ;;  %s22055_s20 = scalar_lea.vmem %s22054_s9, %s18373_s10 }
 0x291   : > { %1238 = vmatpush1.bf16.msra.mxu0 %v17028_v41  ;;  %16005 = vmatprep.subr.bf16.mxu1 %v17042_v49 }
 0x292   : > { %1239 = vmatprep.subr.bf16.mxu0 %v17029_v42 }
 0x294   : > { %16006 = vmatpush3.bf16.msra.mxu1 %v17042_v49 }
 0x295   : > { %1240 = vmatpush1.bf16.msra.mxu0 %v17031_v44  ;;  %16007 = vmatprep.subr.bf16.mxu1 %v17043_v51 }
 0x296   : > { %1241 = vmatprep.subr.bf16.mxu0 %v17032_v45 }
 0x298   : > { %16008 = vmatpush3.bf16.msra.mxu1 %v17043_v51 }
 0x299   : > { %1242 = vmatpush1.bf16.msra.mxu0 %v17034_v47  ;;  %16009 = vmatprep.subr.bf16.mxu1 %v17044_v52  ;;  %v18561_v47 = vsub.s32 %v1407_v40, %v18428_v58 }
 0x29a   : > { %1243 = vmatprep.subr.bf16.mxu0 %v17035_v48 }
 0x29c   : > { %16010 = vmatpush3.bf16.msra.mxu1 %v17044_v52 }
 0x29d   : > { %1244 = vmatpush1.bf16.msra.mxu0 %v17037_v50  ;;  %16011 = vmatprep.subr.bf16.mxu1 %v17045_v55 }
 0x29e   : > { %16017 = vmatprep.subr.bf16.mxu0 %v21794_v60 }
 0x2a0   : > { %1262 = vmatmul.mubr.bf16.vlgmr.msra.gmra.mrb[0].mxu0 %v1050_v38  ;;  %16012 = vmatpush3.bf16.msra.mxu1 %v17045_v55 }
 0x2a1   : > { %1271 = vmatprep.mubr.bf16.mxu0 %v21792_v28  ;;  %16029 = vmatprep.subr.bf16.mxu1 %v21794_v60 }
 0x2a3   : > { %16014 = vmatmul.mubr.bf16.vlgmr.msra.gmra.mrb[0].mxu1 %v1051_v56 }
 0x2a4   : > { %16031 = vmatprep.mubr.msk.bf16.mxu1 %vm17882_vm0, %v21794_v60 }
 0x2a8   : > { %1272 = vmatmul.mubr.bf16.gmra.mrb[4].mxu0 %v1051_v56 }
 0x2a9   : > { %16019 = vmatprep.mubr.msk.bf16.mxu0 %vm17882_vm0, %v21794_v60 }
 0x373   : > { %v1263_v0 = vpop.f32.mrb[0].mxu0 }
 0x374   : > { %v1265_v1 = vpop.f32.mrb[1].mxu0  ;;  %v18447_v6 = vadd.f32 %v1263_v0, %v1089_v2 }
 0x375   : > { %v18441_v3 = vadd.f32 %v1265_v1, %v1093_v63  ;;  %v1267_v4 = vpop.f32.mrb[2].mxu0 }
 0x376   : > { %v1269_v5 = vpop.f32.mrb[3].mxu0  ;;  %v18463_v12 = vadd.f32 %v1267_v4, %v1089_v2  ;;  %v16015_v18 = vpop.f32.mrb[0].mxu1 }
 0x377   : > { %2247 = vrot.lane.b32.xlu1 %v18441_v3, %s17879_s2  ;;  %2223 = vrot.lane.b32.xlu0 %v18441_v3, %s17880_s11  ;;  %v18457_v11 = vadd.f32 %v1269_v5, %v1093_v63  ;;  %v1316_v19 = vpop.f32.mrb[1].mxu1  ;;  %v18529_v26 = vadd.f32 %v16015_v18, %v1097_v20 }
 0x378   : > { %v18513_v21 = vadd.f32 %v1316_v19, %v1097_v20  ;;  %v16016_v22 = vpop.f32.mrb[2].mxu1 }
 0x379   : > { %v18519_v23 = vadd.f32 %v16016_v22, %v1097_v20  ;;  %v1319_v24 = vpop.f32.mrb[3].mxu1  ;;  %21942 = vst [vmem:[#allocation46_spill] sm:$0xff] %v18529_v26 }
 0x37a   : > { %21939 = vst [vmem:[#allocation43_spill] sm:$0xff] %v18513_v21  ;;  %v18523_v25 = vadd.f32 %v1319_v24, %v1097_v20 }
 0x37b   : > { %2235 = vrot.lane.b32.xlu0 %v18441_v3, %s17881_s30  ;;  %1335 = vrot.lane.b32.xlu1 %v18447_v6, %s17880_s11  ;;  %v1273_v7 = vpop.f32.mrb[4].mxu0  ;;  %21940 = vst [vmem:[#allocation44_spill] sm:$0xff] %v18519_v23 }
 0x37c   : > { %v1275_v8 = vpop.f32.mrb[5].mxu0  ;;  %v18475_v14 = vadd.f32 %v1273_v7, %v1089_v2  ;;  %21941 = vst [vmem:[#allocation45_spill] sm:$0xff] %v18523_v25 }
 0x37d   : > { %v1277_v9 = vpop.f32.mrb[6].mxu0  ;;  %v18473_v13 = vadd.f32 %v1275_v8, %v1093_v63 }
 0x37e   : > { %v1279_v10 = vpop.f32.mrb[7].mxu0  ;;  %v18495_v16 = vadd.f32 %v1277_v9, %v1089_v2 }
 0x37f   : > { %1347 = vrot.lane.b32.xlu0 %v18447_v6, %s17881_s30  ;;  %1359 = vrot.lane.b32.xlu1 %v18447_v6, %s17879_s2  ;;  %v18493_v15 = vadd.f32 %v1279_v10, %v1093_v63 }
 0x383   : > { %2225 = vrot.lane.b32.xlu0 %v18457_v11, %s17880_s11  ;;  %2237 = vrot.lane.b32.xlu1 %v18457_v11, %s17881_s30 }
 0x387   : > { %2249 = vrot.lane.b32.xlu0 %v18457_v11, %s17879_s2  ;;  %1337 = vrot.lane.b32.xlu1 %v18463_v12, %s17880_s11 }
 0x38b   : > { %1349 = vrot.lane.b32.xlu0 %v18463_v12, %s17881_s30  ;;  %1361 = vrot.lane.b32.xlu1 %v18463_v12, %s17879_s2 }
 0x38f   : > { %2227 = vrot.lane.b32.xlu0 %v18473_v13, %s17880_s11  ;;  %2239 = vrot.lane.b32.xlu1 %v18473_v13, %s17881_s30 }
 0x393   : > { %2251 = vrot.lane.b32.xlu0 %v18473_v13, %s17879_s2  ;;  %1339 = vrot.lane.b32.xlu1 %v18475_v14, %s17880_s11 }
 0x397   : > { %1351 = vrot.lane.b32.xlu0 %v18475_v14, %s17881_s30  ;;  %1363 = vrot.lane.b32.xlu1 %v18475_v14, %s17879_s2 }
 0x39b   : > { %2229 = vrot.lane.b32.xlu0 %v18493_v15, %s17880_s11  ;;  %2241 = vrot.lane.b32.xlu1 %v18493_v15, %s17881_s30 }
 0x39f   : > { %2253 = vrot.lane.b32.xlu0 %v18493_v15, %s17879_s2  ;;  %1341 = vrot.lane.b32.xlu1 %v18495_v16, %s17880_s11 }
 0x3a3   : > { %1353 = vrot.lane.b32.xlu0 %v18495_v16, %s17881_s30  ;;  %1365 = vrot.lane.b32.xlu1 %v18495_v16, %s17879_s2 }
 0x3a7   : > { %3111 = vrot.lane.b32.xlu1 %v18513_v21, %s17880_s11  ;;  %3123 = vrot.lane.b32.xlu0 %v18513_v21, %s17881_s30 }
 0x3ab   : > { %3135 = vrot.lane.b32.xlu1 %v18513_v21, %s17879_s2  ;;  %3113 = vrot.lane.b32.xlu0 %v18523_v25, %s17880_s11 }
 0x3af   : > { %3125 = vrot.lane.b32.xlu1 %v18523_v25, %s17881_s30 }
 0x3b3   : > { %3137 = vrot.lane.b32.xlu1 %v18523_v25, %s17879_s2 }
 0x3b7   : > { %3115 = vrot.lane.b32.xlu1 %v18529_v26, %s17880_s11 }
 0x3e9   : > { %v18535_v30 = vpop.permute.xlu1 %2247  ;;  %v18537_v31 = vpop.permute.xlu0 %2223 }
 0x3ea   : > { %v2275_v38 = vcombine.low %v18537_v31, %v18535_v30 }
 0x3ec   : > { %v2283_v44 = vrot.slane %v2275_v38, %v18544_v37 }
 0x3ed   : > { %v18539_v35 = vpop.permute.xlu0 %2235  ;;  %v18541_v36 = vpop.permute.xlu1 %1335 }
 0x3ee   : > { %v2259_v39 = vcombine.low %v18441_v3, %v18539_v35 }
 0x3f0   : > { %v2267_v41 = vrot.slane %v2259_v39, %v18544_v37 }
 0x3f1   : > { %v18551_v42 = vpop.permute.xlu0 %1347  ;;  %v18553_v43 = vpop.permute.xlu1 %1359 }
 0x3f2   : > { %v1371_v45 = vcombine.low %v18447_v6, %v18551_v42  ;;  %v1387_v46 = vcombine.low %v18541_v36, %v18553_v43  ;;  %v2291_v48 = vcombine.low %v2267_v41, %v2283_v44  ;;  %v2292_v0 = vcombine.high %v2267_v41, %v2283_v44 }
 0x3f4   : > { %v1379_v49 = vrot.slane %v1371_v45, %v18544_v37  ;;  %v1395_v50 = vrot.slane %v1387_v46, %v18544_v37  ;;  %v2299_v51 = vrot.slane %v2291_v48, %v18561_v47  ;;  %v2306_v9 = vrot.slane %v2292_v0, %v18561_v47 }
 0x3f6   : > { %v1403_v52 = vcombine.low %v1379_v49, %v1395_v50  ;;  %v2522_v53 = vcombine.high %v2299_v51, %v21794_v60  ;;  %v2521_v57 = vrot.slane %v2299_v51, %v18544_v37  ;;  %v1404_v18 = vcombine.high %v1379_v49, %v1395_v50 }
 0x3f7   : > { %v2555_v24 = vcombine.high %v2306_v9, %v21794_v60  ;;  %v2554_v44 = vrot.slane %v2306_v9, %v18544_v37  ;;  %v2260_v50 = vcombine.high %v18441_v3, %v18539_v35  ;;  %v1372_v35 = vcombine.high %v18447_v6, %v18551_v42 }
 0x3f8   : > { %v1411_v54 = vrot.slane %v1403_v52, %v18561_v47  ;;  %v2529_v55 = vrot.slane %v2522_v53, %v18544_v37  ;;  %v1418_v29 = vrot.slane %v1404_v18, %v18561_v47  ;;  %v2276_v53 = vcombine.high %v18537_v31, %v18535_v30 }
 0x3f9   : > { %v2562_v38 = vrot.slane %v2555_v24, %v18544_v37 }
 0x3fa   : > { %v1634_v56 = vcombine.high %v1411_v54, %v21794_v60  ;;  %v2530_v61 = vcombine.low %v2521_v57, %v2529_v55  ;;  %v2531_v63 = vcombine.high %v2521_v57, %v2529_v55  ;;  %v1633_v5 = vrot.slane %v1411_v54, %v18544_v37 }
 0x3fb   : > { %v1667_v39 = vcombine.high %v1418_v29, %v21794_v60  ;;  %v2563_v46 = vcombine.low %v2554_v44, %v2562_v38  ;;  %v1666_v51 = vrot.slane %v1418_v29, %v18544_v37  ;;  %v2274_v57 = vrot.slane %v2260_v50, %v18544_v37 }
 0x3fc   : > { %v1641_v1 = vrot.slane %v1634_v56, %v18544_v37  ;;  %v2538_v2 = vrot.slane %v2530_v61, %v18561_v47  ;;  %v2545_v4 = vrot.slane %v2531_v63, %v18561_v47  ;;  %v2290_v3 = vrot.slane %v2276_v53, %v18544_v37 }
 0x3fd   : > { %v1674_v48 = vrot.slane %v1667_v39, %v18544_v37  ;;  %v2571_v49 = vrot.slane %v2563_v46, %v18561_v47  ;;  %v1388_v61 = vcombine.high %v18541_v36, %v18553_v43  ;;  %v2564_v36 = vcombine.high %v2554_v44, %v2562_v38  ;;  %v18643_v39 = vpop.permute.xlu1 %2237 }
 0x3fe   : > { %v3043_v7 = vpack.c.bf16 %v2538_v2, %v2538_v2  ;;  %v3045_v8 = vpack.c.bf16 %v2545_v4, %v2545_v4  ;;  %v1642_v10 = vcombine.low %v1633_v5, %v1641_v1  ;;  %v1643_v19 = vcombine.high %v1633_v5, %v1641_v1 }
 0x3ff   : > { %v2546_v33 = vcombine.high %v2538_v2, %v21794_v60  ;;  %v3047_v52 = vpack.c.bf16 %v2571_v49, %v2571_v49  ;;  %v1675_v55 = vcombine.low %v1666_v51, %v1674_v48  ;;  %v2307_v31 = vcombine.low %v2274_v57, %v2290_v3 }
 0x400   : > { %v4000_v20 = vsel %vm3995_vm1, %v3043_v7, 0  ;;  %v4092_v22 = vsel %vm3995_vm1, %v3045_v8, 0  ;;  %v1650_v27 = vrot.slane %v1642_v10, %v18561_v47  ;;  %v1657_v32 = vrot.slane %v1643_v19, %v18561_v47 }
 0x401   : > { %16018 = vmatpush3.bf16.xpose.msra.mxu0 %v4000_v20  ;;  %16030 = vmatpush3.bf16.xpose.msra.mxu1 %v4092_v22  ;;  %v3044_v41 = vpack.c.bf16 %v2546_v33, %v2546_v33  ;;  %v4184_v56 = vsel %vm3995_vm1, %v3047_v52, 0  ;;  %v1683_v30 = vrot.slane %v1675_v55, %v18561_v47  ;;  %v18617_v1 = vrot.slane %v1372_v35, %v18544_v37  ;;  %v18636_v22 = vpop.permute.xlu0 %2225 }
 0x402   : > { %16023 = vmatprep.subr.bf16.mxu0 %v21794_v60  ;;  %16041 = vmatprep.subr.bf16.mxu1 %v21794_v60  ;;  %v2155_v34 = vpack.c.bf16 %v1650_v27, %v1650_v27  ;;  %v2157_v40 = vpack.c.bf16 %v1657_v32, %v1657_v32  ;;  %v1658_v54 = vcombine.high %v1650_v27, %v21794_v60 }
 0x403   : > { %v4046_v45 = vsel %vm3995_vm1, %v3044_v41, 0  ;;  %v2159_v0 = vpack.c.bf16 %v1683_v30, %v1683_v30  ;;  %v18620_v2 = vrot.slane %v1388_v61, %v18544_v37  ;;  %v2547_v6 = vcombine.high %v2545_v4, %v21794_v60 }
 0x404   : > { %v2156_v63 = vpack.c.bf16 %v1658_v54, %v1658_v54  ;;  %v2315_v42 = vrot.slane %v2307_v31, %v18561_v47  ;;  %v2578_v5 = vrot.slane %v2564_v36, %v18561_v47  ;;  %v1676_v9 = vcombine.high %v1666_v51, %v1674_v48  ;;  %v18663_v54 = vpop.permute.xlu1 %1337 }
 0x405   : > { %v3046_v43 = vpack.c.bf16 %v2547_v6, %v2547_v6  ;;  %v1419_v7 = vcombine.low %v18617_v1, %v18620_v2  ;;  %v1659_v18 = vcombine.high %v1657_v32, %v21794_v60  ;;  %v2308_v24 = vcombine.high %v2274_v57, %v2290_v3 }
 0x406   : > { %v3049_v10 = vpack.c.bf16 %v2578_v5, %v2578_v5  ;;  %v2588_v4 = vcombine.high %v2315_v42, %v21794_v60  ;;  %v1690_v27 = vrot.slane %v1676_v9, %v18561_v47  ;;  %v2579_v29 = vcombine.high %v2571_v49, %v21794_v60 }
 0x407   : > { %v4138_v8 = vsel %vm3995_vm1, %v3046_v43, 0  ;;  %v1427_v20 = vrot.slane %v1419_v7, %v18561_v47  ;;  %v2158_v33 = vpack.c.bf16 %v1659_v18, %v1659_v18  ;;  %v2322_v41 = vrot.slane %v2308_v24, %v18561_v47 }
 0x408   : > { %16020 = vmatmul.mubr.msk.bf16.vlgmr.msra.gmra.mrb[8].mxu0 %vm3995_vm1, %v2155_v34  ;;  %16032 = vmatmul.mubr.msk.bf16.vlgmr.msra.gmra.mrb[4].mxu1 %vm3995_vm1, %v2157_v40  ;;  %v4276_v19 = vsel %vm3995_vm1, %v3049_v10, 0  ;;  %v2595_v34 = vrot.slane %v2588_v4, %v18544_v37  ;;  %v3048_v32 = vpack.c.bf16 %v2579_v29, %v2579_v29  ;;  %v2587_v40 = vrot.slane %v2315_v42, %v18544_v37 }
 0x409   : > { %16025 = vmatprep.mubr.msk.bf16.mxu0 %vm17882_vm0, %v21794_v60  ;;  %16024 = vmatpush3.bf16.xpose.msra.mxu0 %v4046_v45  ;;  %v1700_v38 = vcombine.high %v1427_v20, %v21794_v60  ;;  %v2161_v44 = vpack.c.bf16 %v1690_v27, %v1690_v27  ;;  %v18650_v45 = vpop.permute.xlu0 %2249  ;;  %v1691_v50 = vcombine.high %v1683_v30, %v21794_v60 }
 0x40a   : > { %16043 = vmatprep.mubr.msk.bf16.mxu1 %vm17882_vm0, %v21794_v60  ;;  %16035 = vmatprep.subr.bf16.mxu0 %v21794_v60  ;;  %v4230_v46 = vsel %vm3995_vm1, %v3048_v32, 0  ;;  %v2596_v48 = vcombine.low %v2587_v40, %v2595_v34  ;;  %v2621_v51 = vcombine.high %v2322_v41, %v21794_v60  ;;  %v2339_v52 = vcombine.low %v18636_v22, %v18650_v45 }
 0x40b   : > { %16042 = vmatpush3.bf16.xpose.msra.mxu1 %v4184_v56  ;;  %v1707_v49 = vrot.slane %v1700_v38, %v18544_v37  ;;  %v1699_v53 = vrot.slane %v1427_v20, %v18544_v37  ;;  %v2580_v56 = vcombine.high %v2578_v5, %v21794_v60  ;;  %v2597_v57 = vcombine.high %v2587_v40, %v2595_v34 }
 0x40c   : > { %16053 = vmatprep.subr.bf16.mxu1 %v21794_v60  ;;  %v2604_v55 = vrot.slane %v2596_v48, %v18561_v47  ;;  %v1420_v3 = vcombine.high %v18617_v1, %v18620_v2  ;;  %v2323_v35 = vcombine.low %v18457_v11, %v18643_v39  ;;  %v2160_v30 = vpack.c.bf16 %v1691_v50, %v1691_v50 }
 0x40d   : > { %v1708_v61 = vcombine.low %v1699_v53, %v1707_v49  ;;  %v3050_v31 = vpack.c.bf16 %v2580_v56, %v2580_v56  ;;  %v2611_v42 = vrot.slane %v2597_v57, %v18561_v47  ;;  %v2628_v1 = vrot.slane %v2621_v51, %v18544_v37  ;;  %v18684_v7 = vpop.permute.xlu0 %1349 }
 0x40e   : > { %v1434_v2 = vrot.slane %v1420_v3, %v18561_v47  ;;  %v18681_v43 = vrot.slane %v2323_v35, %v18544_v37  ;;  %v2612_v5 = vcombine.high %v2604_v55, %v21794_v60  ;;  %v1692_v10 = vcombine.high %v1690_v27, %v21794_v60 }
 0x40f   : > { %v4322_v36 = vsel %vm3995_vm1, %v3050_v31, 0  ;;  %v1716_v9 = vrot.slane %v1708_v61, %v18561_v47  ;;  %v2620_v4 = vrot.slane %v2322_v41, %v18544_v37  ;;  %v1435_v24 = vcombine.low %v18463_v12, %v18684_v7 }
 0x410   : > { %16026 = vmatmul.mubr.msk.bf16.vlgmr.msra.gmra.mrb[12].mxu0 %vm3995_vm1, %v2156_v63  ;;  %v3051_v63 = vpack.c.bf16 %v2604_v55, %v2604_v55  ;;  %v1709_v34 = vcombine.high %v1699_v53, %v1707_v49  ;;  %v1733_v32 = vcombine.high %v1434_v2, %v21794_v60  ;;  %v2162_v38 = vpack.c.bf16 %v1692_v10, %v1692_v10 }
 0x411   : > { %16037 = vmatprep.mubr.msk.bf16.mxu0 %vm17882_vm0, %v21794_v60  ;;  %16036 = vmatpush3.bf16.xpose.msra.mxu0 %v4138_v8  ;;  %v18686_v8 = vpop.permute.xlu1 %1361  ;;  %v2629_v20 = vcombine.low %v2620_v4, %v2628_v1  ;;  %v2163_v27 = vpack.c.bf16 %v1716_v9, %v1716_v9  ;;  %v2613_v53 = vcombine.high %v2611_v42, %v21794_v60 }
 0x412   : > { %16044 = vmatmul.mubr.msk.bf16.vlgmr.msra.gmra.mrb[8].mxu1 %vm3995_vm1, %v2159_v0  ;;  %16047 = vmatprep.subr.bf16.mxu0 %v21794_v60  ;;  %v18672_v0 = vrot.slane %v2339_v52, %v18544_v37  ;;  %v4368_v6 = vsel %vm3995_vm1, %v3051_v63, 0  ;;  %v1451_v29 = vcombine.low %v18663_v54, %v18686_v8  ;;  %v1740_v51 = vrot.slane %v1733_v32, %v18544_v37 }
 0x413   : > { %16055 = vmatprep.mubr.msk.bf16.mxu1 %vm17882_vm0, %v21794_v60  ;;  %16054 = vmatpush3.bf16.xpose.msra.mxu1 %v4276_v19  ;;  %v3053_v19 = vpack.c.bf16 %v2611_v42, %v2611_v42  ;;  %v1723_v52 = vrot.slane %v1709_v34, %v18561_v47  ;;  %v1732_v55 = vrot.slane %v1434_v2, %v18544_v37 }
 0x414   : > { %16065 = vmatprep.subr.bf16.mxu1 %v21794_v60  ;;  %v2355_v18 = vcombine.low %v18681_v43, %v18672_v0  ;;  %v18711_v48 = vrot.slane %v1451_v29, %v18544_v37  ;;  %v1724_v3 = vcombine.high %v1716_v9, %v21794_v60  ;;  %v2630_v35 = vcombine.high %v2620_v4, %v2628_v1 }
 0x415   : > { %v4460_v41 = vsel %vm3995_vm1, %v3053_v19, 0  ;;  %v18713_v49 = vpop.permute.xlu1 %2239  ;;  %v1741_v63 = vcombine.low %v1732_v55, %v1740_v51  ;;  %v3054_v31 = vpack.c.bf16 %v2613_v53, %v2613_v53  ;;  %v2356_v19 = vcombine.high %v18681_v43, %v18672_v0 }
 0x416   : > { %v2363_v40 = vrot.slane %v2355_v18, %v18561_v47  ;;  %v2164_v42 = vpack.c.bf16 %v1724_v3, %v1724_v3  ;;  %v2644_v2 = vrot.slane %v2630_v35, %v18561_v47  ;;  %v1725_v29 = vcombine.high %v1723_v52, %v21794_v60 }
 0x417   : > { %v1749_v1 = vrot.slane %v1741_v63, %v18561_v47  ;;  %v4506_v10 = vsel %vm3995_vm1, %v3054_v31, 0  ;;  %v1742_v32 = vcombine.high %v1732_v55, %v1740_v51  ;;  %v2370_v0 = vrot.slane %v2356_v19, %v18561_v47 }
 0x418   : > { %16038 = vmatmul.mubr.msk.bf16.vlgmr.msra.gmra.mrb[16].mxu0 %vm3995_vm1, %v2158_v33  ;;  %v3052_v33 = vpack.c.bf16 %v2612_v5, %v2612_v5  ;;  %v2654_v56 = vcombine.high %v2363_v40, %v21794_v60  ;;  %v2653_v18 = vrot.slane %v2363_v40, %v18544_v37  ;;  %v2646_v55 = vcombine.high %v2644_v2, %v21794_v60 }
 0x419   : > { %16049 = vmatprep.mubr.msk.bf16.mxu0 %vm17882_vm0, %v21794_v60  ;;  %16048 = vmatpush3.bf16.xpose.msra.mxu0 %v4230_v46  ;;  %v18708_v46 = vrot.slane %v1435_v24, %v18544_v37  ;;  %v3057_v24 = vpack.c.bf16 %v2644_v2, %v2644_v2  ;;  %v1757_v63 = vcombine.high %v1749_v1, %v21794_v60 }
 0x41a   : > { %16056 = vmatmul.mubr.msk.bf16.vlgmr.msra.gmra.mrb[12].mxu1 %vm3995_vm1, %v2161_v44  ;;  %16059 = vmatprep.subr.bf16.mxu0 %v21794_v60  ;;  %v2637_v44 = vrot.slane %v2629_v20, %v18561_v47  ;;  %v4414_v50 = vsel %vm3995_vm1, %v3052_v33, 0  ;;  %v2661_v5 = vrot.slane %v2654_v56, %v18544_v37  ;;  %v18747_v20 = vpop.permute.xlu0 %2227  ;;  %v2340_v56 = vcombine.high %v18636_v22, %v18650_v45 }
 0x41b   : > { %16067 = vmatprep.mubr.msk.bf16.mxu1 %vm17882_vm0, %v21794_v60  ;;  %16066 = vmatpush3.bf16.xpose.msra.mxu1 %v4368_v6  ;;  %v1467_v61 = vcombine.low %v18708_v46, %v18711_v48  ;;  %v18730_v6 = vpop.permute.xlu1 %1339  ;;  %v4644_v43 = vsel %vm3995_vm1, %v3057_v24, 0  ;;  %v2324_v31 = vcombine.high %v18457_v11, %v18643_v39  ;;  %v1468_v22 = vcombine.high %v18708_v46, %v18711_v48 }
 0x41c   : > { %16077 = vmatprep.subr.bf16.mxu1 %v21794_v60  ;;  %v3055_v57 = vpack.c.bf16 %v2637_v44, %v2637_v44  ;;  %v2645_v4 = vcombine.high %v2637_v44, %v21794_v60  ;;  %v2662_v33 = vcombine.low %v2653_v18, %v2661_v5  ;;  %v18788_v2 = vrot.slane %v2340_v56, %v18544_v37 }
 0x41d   : > { %v1475_v9 = vrot.slane %v1467_v61, %v18561_v47  ;;  %v18797_v39 = vrot.slane %v2324_v31, %v18544_v37  ;;  %v1482_v46 = vrot.slane %v1468_v22, %v18561_v47  ;;  %v2686_v24 = vrot.slane %v2370_v0, %v18544_v37 }
 0x41e   : > { %v3056_v40 = vpack.c.bf16 %v2645_v4, %v2645_v4  ;;  %v2670_v44 = vrot.slane %v2662_v33, %v18561_v47 }
 0x41f   : > { %v18753_v34 = vpop.permute.xlu1 %1363  ;;  %v1765_v35 = vrot.slane %v1475_v9, %v18544_v37 }
 0x420   : > { %16050 = vmatmul.mubr.msk.bf16.vlgmr.msra.gmra.mrb[20].mxu0 %vm3995_vm1, %v2160_v30  ;;  %v2165_v30 = vpack.c.bf16 %v1723_v52, %v1723_v52  ;;  %v1756_v52 = vrot.slane %v1742_v32, %v18561_v47  ;;  %v4598_v53 = vsel %vm3995_vm1, %v3056_v40, 0  ;;  %v3059_v61 = vpack.c.bf16 %v2670_v44, %v2670_v44 }
 0x421   : > { %16060 = vmatpush3.bf16.xpose.msra.mxu0 %v4322_v36  ;;  %16061 = vmatprep.mubr.msk.bf16.mxu0 %vm17882_vm0, %v21794_v60  ;;  %v4552_v36 = vsel %vm3995_vm1, %v3055_v57, 0  ;;  %v2687_v57 = vcombine.high %v2370_v0, %v21794_v60  ;;  %v2678_v19 = vcombine.high %v2670_v44, %v21794_v60  ;;  %v1452_v40 = vcombine.high %v18663_v54, %v18686_v8 }
 0x422   : > { %16071 = vmatprep.subr.bf16.mxu0 %v21794_v60  ;;  %16068 = vmatmul.mubr.msk.bf16.vlgmr.msra.gmra.mrb[16].mxu1 %vm3995_vm1, %v2163_v27  ;;  %v1766_v27 = vcombine.high %v1475_v9, %v21794_v60  ;;  %v1758_v32 = vcombine.high %v1756_v52, %v21794_v60  ;;  %v1799_v0 = vcombine.high %v1482_v46, %v21794_v60 }
 0x423   : > { %16078 = vmatpush3.bf16.xpose.msra.mxu1 %v4460_v41  ;;  %16079 = vmatprep.mubr.msk.bf16.mxu1 %vm17882_vm0, %v21794_v60  ;;  %v2166_v41 = vpack.c.bf16 %v1725_v29, %v1725_v29  ;;  %v18775_v3 = vpop.permute.xlu1 %2241  ;;  %v2694_v11 = vrot.slane %v2687_v57, %v18544_v37  ;;  %v2371_v29 = vcombine.low %v18797_v39, %v18788_v2 }
 0x424   : > { %16089 = vmatprep.subr.bf16.mxu1 %v21794_v60  ;;  %v18765_v51 = vrot.slane %v1766_v27, %v18544_v37  ;;  %v18834_v8 = vrot.slane %v1452_v40, %v18544_v37 }
 0x425   : > { %v2695_v27 = vcombine.low %v2686_v24, %v2694_v11 }
 0x426   : > { %v1774_v45 = vcombine.low %v1765_v35, %v18765_v51 }
 0x427   : > { %v18800_v48 = vpop.permute.xlu1 %1341 }
 0x428   : > { %16062 = vmatmul.mubr.msk.bf16.vlgmr.msra.gmra.mrb[24].mxu0 %vm3995_vm1, %v2162_v38  ;;  %v2167_v38 = vpack.c.bf16 %v1749_v1, %v1749_v1  ;;  %v4736_v1 = vsel %vm3995_vm1, %v3059_v61, 0  ;;  %v1782_v4 = vrot.slane %v1774_v45, %v18561_v47 }
 0x429   : > { %16072 = vmatpush3.bf16.xpose.msra.mxu0 %v4414_v50  ;;  %16073 = vmatprep.mubr.msk.bf16.mxu0 %vm17882_vm0, %v21794_v60  ;;  %v18760_v50 = vpop.permute.xlu0 %2251 }
 0x42a   : > { %16083 = vmatprep.subr.bf16.mxu0 %v21794_v60  ;;  %16080 = vmatmul.mubr.msk.bf16.vlgmr.msra.gmra.mrb[20].mxu1 %vm3995_vm1, %v2165_v30  ;;  %v2663_v30 = vcombine.high %v2653_v18, %v2661_v5  ;;  %v2168_v5 = vpack.c.bf16 %v1757_v63, %v1757_v63  ;;  %v2171_v44 = vpack.c.bf16 %v1782_v4, %v1782_v4 }
 0x42b   : > { %16090 = vmatpush3.bf16.xpose.msra.mxu1 %v4552_v36  ;;  %16091 = vmatprep.mubr.msk.bf16.mxu1 %vm17882_vm0, %v21794_v60  ;;  %v2169_v36 = vpack.c.bf16 %v1756_v52, %v1756_v52  ;;  %v2379_v52 = vrot.slane %v2371_v29, %v18561_v47  ;;  %v1798_v63 = vrot.slane %v1482_v46, %v18544_v37 }
 0x42c   : > { %16101 = vmatprep.subr.bf16.mxu1 %v21794_v60 }
 0x42d   : > { %v18790_v9 = vpop.permute.xlu0 %1351  ;;  %v2720_v22 = vcombine.high %v2379_v52, %v21794_v60  ;;  %v2719_v40 = vrot.slane %v2379_v52, %v18544_v37 }
 0x430   : > { %16074 = vmatmul.mubr.msk.bf16.vlgmr.msra.gmra.mrb[28].mxu0 %vm3995_vm1, %v2164_v42  ;;  %v3058_v42 = vpack.c.bf16 %v2646_v55, %v2646_v55  ;;  %v18824_v55 = vpop.permute.xlu1 %1365 }
 0x431   : > { %16084 = vmatpush3.bf16.xpose.msra.mxu0 %v4506_v10  ;;  %16085 = vmatprep.mubr.msk.bf16.mxu0 %vm17882_vm0, %v21794_v60  ;;  %v2677_v10 = vrot.slane %v2663_v30, %v18561_v47 }
 0x432   : > { %16095 = vmatprep.subr.bf16.mxu0 %v21794_v60  ;;  %16092 = vmatmul.mubr.msk.bf16.vlgmr.msra.gmra.mrb[24].mxu1 %vm3995_vm1, %v2167_v38  ;;  %v4690_v18 = vsel %vm3995_vm1, %v3058_v42, 0  ;;  %v1436_v38 = vcombine.high %v18463_v12, %v18684_v7  ;;  %v2170_v12 = vpack.c.bf16 %v1758_v32, %v1758_v32  ;;  %v2703_v7 = vrot.slane %v2695_v27, %v18561_v47 }
 0x433   : > { %16102 = vmatpush3.bf16.xpose.msra.mxu1 %v4644_v43  ;;  %16103 = vmatprep.mubr.msk.bf16.mxu1 %vm17882_vm0, %v21794_v60  ;;  %v3061_v33 = vpack.c.bf16 %v2677_v10, %v2677_v10  ;;  %v18821_v43 = vpop.permute.xlu0 %2229  ;;  %v2679_v61 = vcombine.high %v2677_v10, %v21794_v60  ;;  %v2696_v42 = vcombine.high %v2686_v24, %v2694_v11 }
 0x434   : > { %16113 = vmatprep.subr.bf16.mxu1 %v21794_v60  ;;  %v18831_v54 = vrot.slane %v1436_v38, %v18544_v37  ;;  %v18851_v31 = vpop.permute.xlu1 %3111  ;;  %v3063_v45 = vpack.c.bf16 %v2703_v7, %v2703_v7  ;;  %v2711_v38 = vcombine.high %v2703_v7, %v21794_v60 }
 0x435   : > { %v4828_v56 = vsel %vm3995_vm1, %v3061_v33, 0  ;;  %21943 = vst [vmem:[#allocation47_spill] sm:$0xff] %v18851_v31  ;;  %v3062_v46 = vpack.c.bf16 %v2679_v61, %v2679_v61  ;;  %v2710_v29 = vrot.slane %v2696_v42, %v18561_v47  ;;  %v2727_v33 = vrot.slane %v2720_v22, %v18544_v37 }
 0x436   : > { %v3064_v61 = vpack.c.bf16 %v2711_v38, %v2711_v38 }
 0x437   : > { %v18847_v30 = vpop.permute.xlu0 %2253  ;;  %v4874_v27 = vsel %vm3995_vm1, %v3062_v46, 0 }
 0x438   : > { %16086 = vmatmul.mubr.msk.bf16.vlgmr.msra.gmra.mrb[32].mxu0 %vm3995_vm1, %v2166_v41  ;;  %v1775_v41 = vcombine.high %v1765_v35, %v18765_v51  ;;  %v18837_v51 = vrot.slane %v1799_v0, %v18544_v37  ;;  %v18869_v24 = vpop.permute.xlu1 %3135 }
 0x439   : > { %16096 = vmatpush3.bf16.xpose.msra.mxu0 %v4598_v53  ;;  %16097 = vmatprep.mubr.msk.bf16.mxu0 %vm17882_vm0, %v21794_v60  ;;  %v3060_v53 = vpack.c.bf16 %v2678_v19, %v2678_v19  ;;  %21944 = vst [vmem:[#allocation48_spill] sm:$0xff] %v18869_v24  ;;  %v3163_v0 = vcombine.low %v18851_v31, %v18869_v24 }
 0x43a   : > { %16107 = vmatprep.subr.bf16.mxu0 %v21794_v60  ;;  %16104 = vmatmul.mubr.msk.bf16.vlgmr.msra.gmra.mrb[28].mxu1 %vm3995_vm1, %v2169_v36  ;;  %v1789_v57 = vrot.slane %v1775_v41, %v18561_v47  ;;  %v1790_v36 = vcombine.high %v1782_v4, %v21794_v60  ;;  %v2372_v41 = vcombine.high %v18797_v39, %v18788_v2 }
 0x43b   : > { %16114 = vmatpush3.bf16.xpose.msra.mxu1 %v4736_v1  ;;  %16115 = vmatprep.mubr.msk.bf16.mxu1 %vm17882_vm0, %v21794_v60  ;;  %v4782_v35 = vsel %vm3995_vm1, %v3060_v53, 0  ;;  %v1483_v1 = vcombine.low %v18831_v54, %v18834_v8  ;;  %v18864_v32 = vpop.permute.xlu0 %1353  ;;  %v18889_v2 = vrot.slane %v3163_v0, %v18544_v37  ;;  %v1484_v0 = vcombine.high %v18831_v54, %v18834_v8 }
 0x43c   : > { %16125 = vmatprep.subr.bf16.mxu1 %v21794_v60  ;;  %v2173_v10 = vpack.c.bf16 %v1789_v57, %v1789_v57  ;;  %v2172_v19 = vpack.c.bf16 %v1790_v36, %v1790_v36  ;;  %v1791_v53 = vcombine.high %v1789_v57, %v21794_v60  ;;  %v2386_v22 = vrot.slane %v2372_v41, %v18561_v47 }
 0x43d   : > { %v1491_v4 = vrot.slane %v1483_v1, %v18561_v47  ;;  %v4966_v1 = vsel %vm3995_vm1, %v3064_v61, 0  ;;  %v2387_v41 = vcombine.low %v18473_v13, %v18713_v49  ;;  %v1498_v54 = vrot.slane %v1484_v0, %v18561_v47 }
 0x43e   : > { %v2753_v46 = vcombine.high %v2386_v22, %v21794_v60 }
 0x43f   : > { %v1832_v52 = vcombine.high %v1491_v4, %v21794_v60  ;;  %v18886_v7 = vpop.permute.xlu0 %3123  ;;  %v18934_v8 = vrot.slane %v2387_v41, %v18544_v37 }
 0x440   : > { %16098 = vmatmul.mubr.msk.bf16.vlgmr.msra.gmra.mrb[36].mxu0 %vm3995_vm1, %v2168_v5  ;;  %v1807_v5 = vcombine.low %v1798_v63, %v18837_v51  ;;  %21945 = vst [vmem:[#allocation49_spill] sm:$0xff] %v18886_v7  ;;  %v3147_v39 = vcombine.low %v18513_v21, %v18886_v7 }
 0x441   : > { %16108 = vmatpush3.bf16.xpose.msra.mxu0 %v4690_v18  ;;  %16109 = vmatprep.mubr.msk.bf16.mxu0 %vm17882_vm0, %v21794_v60  ;;  %v4920_v18 = vsel %vm3995_vm1, %v3063_v45, 0  ;;  %v2174_v45 = vpack.c.bf16 %v1791_v53, %v1791_v53  ;;  %v18901_v36 = vrot.slane %v1832_v52, %v18544_v37 }
 0x442   : > { %16119 = vmatprep.subr.bf16.mxu0 %v21794_v60  ;;  %16116 = vmatmul.mubr.msk.bf16.vlgmr.msra.gmra.mrb[32].mxu1 %vm3995_vm1, %v2171_v44  ;;  %v1815_v11 = vrot.slane %v1807_v5, %v18561_v47  ;;  %v3065_v44 = vpack.c.bf16 %v2710_v29, %v2710_v29  ;;  %v2712_v5 = vcombine.high %v2710_v29, %v21794_v60 }
 0x443   : > { %16126 = vmatpush3.bf16.xpose.msra.mxu1 %v4828_v56  ;;  %16127 = vmatprep.mubr.msk.bf16.mxu1 %vm17882_vm0, %v21794_v60  ;;  %v2728_v56 = vcombine.low %v2719_v40, %v2727_v33  ;;  %v2729_v29 = vcombine.high %v2719_v40, %v2727_v33  ;;  %v2760_v40 = vrot.slane %v2753_v46, %v18544_v37 }
 0x444   : > { %16137 = vmatprep.subr.bf16.mxu1 %v21794_v60  ;;  %v5012_v57 = vsel %vm3995_vm1, %v3065_v44, 0  ;;  %v1823_v38 = vcombine.high %v1815_v11, %v21794_v60  ;;  %v1499_v46 = vcombine.low %v18475_v14, %v18790_v9 }
 0x445   : > { %v2743_v33 = vrot.slane %v2729_v29, %v18561_v47 }
 0x448   : > { %16110 = vmatmul.mubr.msk.bf16.vlgmr.msra.gmra.mrb[40].mxu0 %vm3995_vm1, %v2170_v12  ;;  %v1808_v12 = vcombine.high %v1798_v63, %v18837_v51  ;;  %v2736_v51 = vrot.slane %v2728_v56, %v18561_v47  ;;  %v18898_v63 = vrot.slane %v3147_v39, %v18544_v37  ;;  %v3066_v56 = vpack.c.bf16 %v2712_v5, %v2712_v5 }
 0x449   : > { %16120 = vmatpush3.bf16.xpose.msra.mxu0 %v4782_v35  ;;  %16121 = vmatprep.mubr.msk.bf16.mxu0 %vm17882_vm0, %v21794_v60  ;;  %v2175_v35 = vpack.c.bf16 %v1815_v11, %v1815_v11  ;;  %v2176_v11 = vpack.c.bf16 %v1823_v38, %v1823_v38  ;;  %v2752_v39 = vrot.slane %v2386_v22, %v18544_v37 }
 0x44a   : > { %16131 = vmatprep.subr.bf16.mxu0 %v21794_v60  ;;  %16128 = vmatmul.mubr.msk.bf16.vlgmr.msra.gmra.mrb[36].mxu1 %vm3995_vm1, %v2173_v10  ;;  %v1822_v42 = vrot.slane %v1808_v12, %v18561_v47  ;;  %v2744_v61 = vcombine.high %v2736_v51, %v21794_v60 }
 0x44b   : > { %16138 = vmatpush3.bf16.xpose.msra.mxu1 %v4920_v18  ;;  %16139 = vmatprep.mubr.msk.bf16.mxu1 %vm17882_vm0, %v21794_v60  ;;  %v2403_v18 = vcombine.low %v18747_v20, %v18760_v50  ;;  %v2761_v5 = vcombine.low %v2752_v39, %v2760_v40 }
 0x44c   : > { %16149 = vmatprep.subr.bf16.mxu1 %v21794_v60  ;;  %v2177_v53 = vpack.c.bf16 %v1822_v42, %v1822_v42  ;;  %v3068_v38 = vpack.c.bf16 %v2744_v61, %v2744_v61 }
 0x44d   : > { %v18926_v12 = vrot.slane %v2403_v18, %v18544_v37  ;;  %v1865_v18 = vcombine.high %v1498_v54, %v21794_v60  ;;  %v2769_v41 = vrot.slane %v2761_v5, %v18561_v47 }
 0x44f   : > { %v3071_v61 = vpack.c.bf16 %v2769_v41, %v2769_v41 }
 0x450   : > { %16122 = vmatmul.mubr.msk.bf16.vlgmr.msra.gmra.mrb[44].mxu0 %vm3995_vm1, %v2172_v19  ;;  %v1831_v19 = vrot.slane %v1491_v4, %v18544_v37 }
 0x451   : > { %16132 = vmatpush3.bf16.xpose.msra.mxu0 %v4874_v27  ;;  %16133 = vmatprep.mubr.msk.bf16.mxu0 %vm17882_vm0, %v21794_v60  ;;  %v3067_v27 = vpack.c.bf16 %v2736_v51, %v2736_v51  ;;  %v1515_v51 = vcombine.low %v18730_v6, %v18753_v34 }
 0x452   : > { %16143 = vmatprep.subr.bf16.mxu0 %v21794_v60  ;;  %16140 = vmatmul.mubr.msk.bf16.vlgmr.msra.gmra.mrb[40].mxu1 %vm3995_vm1, %v2175_v35  ;;  %v1840_v44 = vcombine.low %v1831_v19, %v18901_v36  ;;  %v5058_v35 = vsel %vm3995_vm1, %v3066_v56, 0  ;;  %v1841_v22 = vcombine.high %v1831_v19, %v18901_v36  ;;  %v1872_v36 = vrot.slane %v1865_v18, %v18544_v37 }
 0x453   : > { %16150 = vmatpush3.bf16.xpose.msra.mxu1 %v5012_v57  ;;  %16151 = vmatprep.mubr.msk.bf16.mxu1 %vm17882_vm0, %v21794_v60  ;;  %v5104_v4 = vsel %vm3995_vm1, %v3067_v27, 0  ;;  %v2419_v57 = vcombine.low %v18934_v8, %v18926_v12  ;;  %v5150_v56 = vsel %vm3995_vm1, %v3068_v38, 0 }
 0x454   : > { %16161 = vmatprep.subr.bf16.mxu1 %v21794_v60  ;;  %v1848_v52 = vrot.slane %v1840_v44, %v18561_v47  ;;  %v18961_v44 = vrot.slane %v1499_v46, %v18544_v37  ;;  %v1855_v19 = vrot.slane %v1841_v22, %v18561_v47 }
 0x455   : > { %v2427_v29 = vrot.slane %v2419_v57, %v18561_v47 }
 0x456   : > { %v2179_v27 = vpack.c.bf16 %v1848_v52, %v1848_v52  ;;  %v1856_v57 = vcombine.high %v1848_v52, %v21794_v60  ;;  %v2181_v46 = vpack.c.bf16 %v1855_v19, %v1855_v19 }
 0x457   : > { %v2785_v38 = vrot.slane %v2427_v29, %v18544_v37 }
 0x458   : > { %16134 = vmatmul.mubr.msk.bf16.vlgmr.msra.gmra.mrb[48].mxu0 %vm3995_vm1, %v2174_v45  ;;  %v3069_v45 = vpack.c.bf16 %v2743_v33, %v2743_v33 }
 0x459   : > { %16144 = vmatpush3.bf16.xpose.msra.mxu0 %v4966_v1  ;;  %16145 = vmatprep.mubr.msk.bf16.mxu0 %vm17882_vm0, %v21794_v60  ;;  %v1824_v1 = vcombine.high %v1822_v42, %v21794_v60 }
 0x45a   : > { %16155 = vmatprep.subr.bf16.mxu0 %v21794_v60  ;;  %16152 = vmatmul.mubr.msk.bf16.vlgmr.msra.gmra.mrb[44].mxu1 %vm3995_vm1, %v2177_v53  ;;  %v5196_v42 = vsel %vm3995_vm1, %v3069_v45, 0  ;;  %v18964_v53 = vrot.slane %v1515_v51, %v18544_v37  ;;  %v2762_v45 = vcombine.high %v2752_v39, %v2760_v40  ;;  %v2180_v51 = vpack.c.bf16 %v1856_v57, %v1856_v57 }
 0x45b   : > { %16162 = vmatpush3.bf16.xpose.msra.mxu1 %v5104_v4  ;;  %16163 = vmatprep.mubr.msk.bf16.mxu1 %vm17882_vm0, %v21794_v60  ;;  %v2178_v0 = vpack.c.bf16 %v1824_v1, %v1824_v1  ;;  %v2745_v4 = vcombine.high %v2743_v33, %v21794_v60 }
 0x45c   : > { %16173 = vmatprep.subr.bf16.mxu1 %v21794_v60  ;;  %v1531_v1 = vcombine.low %v18961_v44, %v18964_v53  ;;  %v2776_v22 = vrot.slane %v2762_v45, %v18561_v47 }
 0x45d   : > { %v3070_v33 = vpack.c.bf16 %v2745_v4, %v2745_v4 }
 0x45e   : > { %v1539_v52 = vrot.slane %v1531_v1, %v18561_v47  ;;  %v2778_v1 = vcombine.high %v2776_v22, %v21794_v60 }
 0x45f   : > { %v5242_v39 = vsel %vm3995_vm1, %v3070_v33, 0 }
 0x460   : > { %16146 = vmatmul.mubr.msk.bf16.vlgmr.msra.gmra.mrb[52].mxu0 %vm3995_vm1, %v2176_v11  ;;  %v1864_v11 = vrot.slane %v1498_v54, %v18544_v37  ;;  %v5288_v54 = vsel %vm3995_vm1, %v3071_v61, 0  ;;  %v1898_v61 = vcombine.high %v1539_v52, %v21794_v60  ;;  %v1897_v33 = vrot.slane %v1539_v52, %v18544_v37 }
 0x461   : > { %16156 = vmatpush3.bf16.xpose.msra.mxu0 %v5058_v35  ;;  %16157 = vmatprep.mubr.msk.bf16.mxu0 %vm17882_vm0, %v21794_v60  ;;  %v2786_v35 = vcombine.high %v2427_v29, %v21794_v60 }
 0x462   : > { %16167 = vmatprep.subr.bf16.mxu0 %v21794_v60  ;;  %16164 = vmatmul.mubr.msk.bf16.vlgmr.msra.gmra.mrb[48].mxu1 %vm3995_vm1, %v2179_v27  ;;  %v1873_v5 = vcombine.low %v1864_v11, %v1872_v36  ;;  %v2777_v27 = vcombine.high %v2769_v41, %v21794_v60 }
 0x463   : > { %16174 = vmatpush3.bf16.xpose.msra.mxu1 %v5196_v42  ;;  %16175 = vmatprep.mubr.msk.bf16.mxu1 %vm17882_vm0, %v21794_v60  ;;  %v2793_v18 = vrot.slane %v2786_v35, %v18544_v37  ;;  %v2420_v42 = vcombine.high %v18934_v8, %v18926_v12  ;;  %v1874_v35 = vcombine.high %v1864_v11, %v1872_v36 }
 0x464   : > { %16185 = vmatprep.subr.bf16.mxu1 %v21794_v60  ;;  %v1881_v40 = vrot.slane %v1873_v5, %v18561_v47  ;;  %v3072_v41 = vpack.c.bf16 %v2777_v27, %v2777_v27  ;;  %v2404_v5 = vcombine.high %v18747_v20, %v18760_v50  ;;  %v1532_v20 = vcombine.high %v18961_v44, %v18964_v53 }
 0x465   : > { %v2794_v4 = vcombine.low %v2785_v38, %v2793_v18  ;;  %v2434_v29 = vrot.slane %v2420_v42, %v18561_v47  ;;  %v1888_v36 = vrot.slane %v1874_v35, %v18561_v47  ;;  %v3074_v42 = vpack.c.bf16 %v2778_v1, %v2778_v1 }
 0x466   : > { %v2183_v57 = vpack.c.bf16 %v1881_v40, %v1881_v40  ;;  %v5334_v11 = vsel %vm3995_vm1, %v3072_v41, 0 }
 0x467   : > { %v2802_v45 = vrot.slane %v2794_v4, %v18561_v47  ;;  %v2185_v27 = vpack.c.bf16 %v1888_v36, %v1888_v36  ;;  %v5426_v53 = vsel %vm3995_vm1, %v3074_v42, 0  ;;  %v2818_v4 = vrot.slane %v2434_v29, %v18544_v37 }
 0x468   : > { %16158 = vmatmul.mubr.msk.bf16.vlgmr.msra.gmra.mrb[56].mxu0 %vm3995_vm1, %v2178_v0  ;;  %v3073_v0 = vpack.c.bf16 %v2776_v22, %v2776_v22  ;;  %v2388_v22 = vcombine.high %v18473_v13, %v18713_v49  ;;  %v1546_v49 = vrot.slane %v1532_v20, %v18561_v47 }
 0x469   : > { %16168 = vmatpush3.bf16.xpose.msra.mxu0 %v5150_v56  ;;  %16169 = vmatprep.mubr.msk.bf16.mxu0 %vm17882_vm0, %v21794_v60  ;;  %v1857_v56 = vcombine.high %v1855_v19, %v21794_v60  ;;  %v19009_v19 = vrot.slane %v1898_v61, %v18544_v37 }
 0x46a   : > { %16179 = vmatprep.subr.bf16.mxu0 %v21794_v60  ;;  %16176 = vmatmul.mubr.msk.bf16.vlgmr.msra.gmra.mrb[52].mxu1 %vm3995_vm1, %v2181_v46  ;;  %v5380_v12 = vsel %vm3995_vm1, %v3073_v0, 0  ;;  %v2819_v46 = vcombine.high %v2434_v29, %v21794_v60  ;;  %v19030_v0 = vrot.slane %v2404_v5, %v18544_v37  ;;  %v19037_v13 = vrot.slane %v2388_v22, %v18544_v37 }
 0x46b   : > { %16186 = vmatpush3.bf16.xpose.msra.mxu1 %v5288_v54  ;;  %16187 = vmatprep.mubr.msk.bf16.mxu1 %vm17882_vm0, %v21794_v60  ;;  %v2182_v8 = vpack.c.bf16 %v1857_v56, %v1857_v56  ;;  %v3075_v54 = vpack.c.bf16 %v2802_v45, %v2802_v45  ;;  %v1906_v50 = vcombine.low %v1897_v33, %v19009_v19 }
 0x46c   : > { %16197 = vmatprep.subr.bf16.mxu1 %v21794_v60  ;;  %v2810_v56 = vcombine.high %v2802_v45, %v21794_v60  ;;  %v2435_v35 = vcombine.low %v19037_v13, %v19030_v0  ;;  %v3179_v29 = vcombine.low %v18898_v63, %v18889_v2  ;;  %v1907_v45 = vcombine.high %v1897_v33, %v19009_v19 }
 0x46d   : > { %v5472_v52 = vsel %vm3995_vm1, %v3075_v54, 0  ;;  %v1914_v44 = vrot.slane %v1906_v50, %v18561_v47  ;;  %v1930_v20 = vrot.slane %v1546_v49, %v18544_v37 }
 0x46e   : > { %v3076_v5 = vpack.c.bf16 %v2810_v56, %v2810_v56  ;;  %v1921_v33 = vrot.slane %v1907_v45, %v18561_v47  ;;  %v2436_v45 = vcombine.high %v19037_v13, %v19030_v0 }
 0x46f   : > { %v2187_v1 = vpack.c.bf16 %v1914_v44, %v1914_v44 }
 0x470   : > { %16170 = vmatmul.mubr.msk.bf16.vlgmr.msra.gmra.mrb[60].mxu0 %vm3995_vm1, %v2180_v51  ;;  %v1889_v51 = vcombine.high %v1881_v40, %v21794_v60  ;;  %v2450_v0 = vrot.slane %v2436_v45, %v18561_v47 }
 0x471   : > { %16180 = vmatpush3.bf16.xpose.msra.mxu0 %v5242_v39  ;;  %16181 = vmatprep.mubr.msk.bf16.mxu0 %vm17882_vm0, %v21794_v60  ;;  %v2795_v39 = vcombine.high %v2785_v38, %v2793_v18  ;;  %v2826_v38 = vrot.slane %v2819_v46, %v18544_v37 }
 0x472   : > { %16191 = vmatprep.subr.bf16.mxu0 %v21794_v60  ;;  %16188 = vmatmul.mubr.msk.bf16.vlgmr.msra.gmra.mrb[56].mxu1 %vm3995_vm1, %v2183_v57  ;;  %v2184_v40 = vpack.c.bf16 %v1889_v51, %v1889_v51  ;;  %v1890_v57 = vcombine.high %v1888_v36, %v21794_v60  ;;  %v2443_v36 = vrot.slane %v2435_v35, %v18561_v47  ;;  %v5518_v51 = vsel %vm3995_vm1, %v3076_v5, 0 }
 0x473   : > { %16198 = vmatpush3.bf16.xpose.msra.mxu1 %v5380_v12  ;;  %16199 = vmatprep.mubr.msk.bf16.mxu1 %vm17882_vm0, %v21794_v60  ;;  %v2809_v18 = vrot.slane %v2795_v39, %v18561_v47  ;;  %v2827_v41 = vcombine.low %v2818_v4, %v2826_v38  ;;  %v1500_v12 = vcombine.high %v18475_v14, %v18790_v9 }
 0x474   : > { %16209 = vmatprep.subr.bf16.mxu1 %v21794_v60  ;;  %v2186_v54 = vpack.c.bf16 %v1890_v57, %v1890_v57  ;;  %v3187_v9 = vrot.slane %v3179_v29, %v18561_v47  ;;  %v2852_v22 = vcombine.high %v2443_v36, %v21794_v60  ;;  %v2828_v42 = vcombine.high %v2818_v4, %v2826_v38 }
 0x475   : > { %v3077_v61 = vpack.c.bf16 %v2809_v18, %v2809_v18  ;;  %v2835_v14 = vrot.slane %v2827_v41, %v18561_v47  ;;  %v2811_v39 = vcombine.high %v2809_v18, %v21794_v60  ;;  %v2851_v29 = vrot.slane %v2443_v36, %v18544_v37 }
 0x476   : > { %v19098_v38 = vrot.slane %v3187_v9, %v18544_v37 }
 0x477   : > { %v5564_v46 = vsel %vm3995_vm1, %v3077_v61, 0  ;;  %v3079_v50 = vpack.c.bf16 %v2835_v14, %v2835_v14  ;;  %v3078_v56 = vpack.c.bf16 %v2811_v39, %v2811_v39 }
 0x478   : > { %16182 = vmatmul.mubr.msk.bf16.vlgmr.msra.gmra.mrb[64].mxu0 %vm3995_vm1, %v2182_v8  ;;  %v1516_v8 = vcombine.high %v18730_v6, %v18753_v34  ;;  %v19067_v6 = vrot.slane %v1500_v12, %v18544_v37 }
 0x479   : > { %16192 = vmatpush3.bf16.xpose.msra.mxu0 %v5334_v11  ;;  %16193 = vmatprep.mubr.msk.bf16.mxu0 %vm17882_vm0, %v21794_v60  ;;  %v1931_v11 = vcombine.high %v1546_v49, %v21794_v60  ;;  %v5656_v35 = vsel %vm3995_vm1, %v3079_v50, 0  ;;  %v2842_v49 = vrot.slane %v2828_v42, %v18561_v47  ;;  %v5610_v12 = vsel %vm3995_vm1, %v3078_v56, 0 }
 0x47a   : > { %16203 = vmatprep.subr.bf16.mxu0 %v21794_v60  ;;  %16200 = vmatmul.mubr.msk.bf16.vlgmr.msra.gmra.mrb[60].mxu1 %vm3995_vm1, %v2185_v27  ;;  %v19070_v34 = vrot.slane %v1516_v8, %v18544_v37  ;;  %v1922_v27 = vcombine.high %v1914_v44, %v21794_v60  ;;  %v2859_v44 = vrot.slane %v2852_v22, %v18544_v37 }
 0x47b   : > { %16210 = vmatpush3.bf16.xpose.msra.mxu1 %v5472_v52  ;;  %16211 = vmatprep.mubr.msk.bf16.mxu1 %vm17882_vm0, %v21794_v60  ;;  %v1938_v19 = vrot.slane %v1931_v11, %v18544_v37  ;;  %v2843_v8 = vcombine.high %v2835_v14, %v21794_v60  ;;  %v3081_v11 = vpack.c.bf16 %v2842_v49, %v2842_v49 }
 0x47c   : > { %16221 = vmatprep.subr.bf16.mxu1 %v21794_v60  ;;  %v1547_v52 = vcombine.low %v19067_v6, %v19070_v34  ;;  %v2188_v61 = vpack.c.bf16 %v1922_v27, %v1922_v27  ;;  %v2860_v5 = vcombine.low %v2851_v29, %v2859_v44  ;;  %v2885_v50 = vcombine.high %v2450_v0, %v21794_v60 }
 0x47d   : > { %v1939_v18 = vcombine.low %v1930_v20, %v1938_v19  ;;  %v5748_v13 = vsel %vm3995_vm1, %v3081_v11, 0  ;;  %v2467_v27 = vcombine.low %v18821_v43, %v18847_v30  ;;  %v2451_v56 = vcombine.low %v18493_v15, %v18775_v3 }
 0x47e   : > { %v1555_v57 = vrot.slane %v1547_v52, %v18561_v47 }
 0x47f   : > { %v1947_v41 = vrot.slane %v1939_v18, %v18561_v47  ;;  %v2861_v18 = vcombine.high %v2851_v29, %v2859_v44  ;;  %v2892_v44 = vrot.slane %v2885_v50, %v18544_v37 }
 0x480   : > { %16194 = vmatmul.mubr.msk.bf16.vlgmr.msra.gmra.mrb[68].mxu0 %vm3995_vm1, %v2184_v40  ;;  %v3410_v40 = vcombine.high %v3187_v9, %v21794_v60  ;;  %v1964_v14 = vcombine.high %v1555_v57, %v21794_v60  ;;  %v3080_v9 = vpack.c.bf16 %v2843_v8, %v2843_v8  ;;  %v1963_v42 = vrot.slane %v1555_v57, %v18544_v37 }
 0x481   : > { %16204 = vmatpush3.bf16.xpose.msra.mxu0 %v5426_v53  ;;  %16205 = vmatprep.mubr.msk.bf16.mxu0 %vm17882_vm0, %v21794_v60  ;;  %v2189_v53 = vpack.c.bf16 %v1921_v33, %v1921_v33  ;;  %v2191_v36 = vpack.c.bf16 %v1947_v41, %v1947_v41  ;;  %v2875_v8 = vrot.slane %v2861_v18, %v18561_v47 }
 0x482   : > { %16215 = vmatprep.subr.bf16.mxu0 %v21794_v60  ;;  %16212 = vmatmul.mubr.msk.bf16.vlgmr.msra.gmra.mrb[64].mxu1 %vm3995_vm1, %v2187_v1  ;;  %v19101_v4 = vrot.slane %v3410_v40, %v18544_v37  ;;  %v1923_v1 = vcombine.high %v1921_v33, %v21794_v60  ;;  %v2868_v33 = vrot.slane %v2860_v5, %v18561_v47  ;;  %v5702_v22 = vsel %vm3995_vm1, %v3080_v9, 0 }
 0x483   : > { %16222 = vmatpush3.bf16.xpose.msra.mxu1 %v5564_v46  ;;  %16223 = vmatprep.mubr.msk.bf16.mxu1 %vm17882_vm0, %v21794_v60  ;;  %v1971_v39 = vrot.slane %v1964_v14, %v18544_v37  ;;  %v1955_v40 = vcombine.high %v1947_v41, %v21794_v60  ;;  %v1563_v9 = vcombine.low %v18495_v16, %v18864_v32 }
 0x484   : > { %16233 = vmatprep.subr.bf16.mxu1 %v21794_v60  ;;  %21946 = vst [vmem:[#allocation50_spill] sm:$0xff] %v19101_v4  ;;  %v3083_v52 = vpack.c.bf16 %v2868_v33, %v2868_v33  ;;  %v2876_v11 = vcombine.high %v2868_v33, %v21794_v60 }
 0x485   : > { %v2192_v41 = vpack.c.bf16 %v1955_v40, %v1955_v40 }
 0x486   : > { %v5840_v57 = vsel %vm3995_vm1, %v3083_v52, 0  ;;  %v19177_v52 = vrot.slane %v1563_v9, %v18544_v37 }
 0x488   : > { %16206 = vmatmul.mubr.msk.bf16.vlgmr.msra.gmra.mrb[72].mxu0 %vm3995_vm1, %v2186_v54  ;;  %v1940_v54 = vcombine.high %v1930_v20, %v1938_v19  ;;  %v2844_v20 = vcombine.high %v2842_v49, %v21794_v60 }
 0x489   : > { %16216 = vmatpush3.bf16.xpose.msra.mxu0 %v5518_v51  ;;  %16217 = vmatprep.mubr.msk.bf16.mxu0 %vm17882_vm0, %v21794_v60  ;;  %v2190_v51 = vpack.c.bf16 %v1923_v1, %v1923_v1  ;;  %v2884_v1 = vrot.slane %v2450_v0, %v18544_v37  ;;  %v1973_v0 = vcombine.high %v1963_v42, %v1971_v39 }
 0x48a   : > { %16227 = vmatprep.subr.bf16.mxu0 %v21794_v60  ;;  %16224 = vmatmul.mubr.msk.bf16.vlgmr.msra.gmra.mrb[68].mxu1 %vm3995_vm1, %v2189_v53  ;;  %v1954_v19 = vrot.slane %v1940_v54, %v18561_v47  ;;  %v1548_v53 = vcombine.high %v19067_v6, %v19070_v34  ;;  %v3082_v49 = vpack.c.bf16 %v2844_v20, %v2844_v20 }
 0x48b   : > { %16234 = vmatpush3.bf16.xpose.msra.mxu1 %v5656_v35  ;;  %16235 = vmatprep.mubr.msk.bf16.mxu1 %vm17882_vm0, %v21794_v60  ;;  %v1972_v35 = vcombine.low %v1963_v42, %v1971_v39  ;;  %v19151_v34 = vrot.slane %v2451_v56, %v18544_v37  ;;  %v3085_v54 = vpack.c.bf16 %v2875_v8, %v2875_v8 }
 0x48c   : > { %16245 = vmatprep.subr.bf16.mxu1 %v21794_v60  ;;  %v1562_v6 = vrot.slane %v1548_v53, %v18561_v47  ;;  %v5794_v45 = vsel %vm3995_vm1, %v3082_v49, 0  ;;  %v1956_v14 = vcombine.high %v1954_v19, %v21794_v60  ;;  %v1987_v42 = vrot.slane %v1973_v0, %v18561_v47 }
 0x48d   : > { %v1980_v29 = vrot.slane %v1972_v35, %v18561_v47  ;;  %v2877_v53 = vcombine.high %v2875_v8, %v21794_v60 }
 0x48e   : > { %v2194_v50 = vpack.c.bf16 %v1956_v14, %v1956_v14  ;;  %v1996_v56 = vrot.slane %v1562_v6, %v18544_v37 }
 0x48f   : > { %v2195_v33 = vpack.c.bf16 %v1980_v29, %v1980_v29  ;;  %v1988_v49 = vcombine.high %v1980_v29, %v21794_v60  ;;  %v3086_v8 = vpack.c.bf16 %v2877_v53, %v2877_v53 }
 0x490   : > { %16218 = vmatmul.mubr.msk.bf16.vlgmr.msra.gmra.mrb[76].mxu0 %vm3995_vm1, %v2188_v61  ;;  %v2193_v61 = vpack.c.bf16 %v1954_v19, %v1954_v19  ;;  %v5932_v19 = vsel %vm3995_vm1, %v3085_v54, 0 }
 0x491   : > { %16228 = vmatpush3.bf16.xpose.msra.mxu0 %v5610_v12  ;;  %16229 = vmatprep.mubr.msk.bf16.mxu0 %vm17882_vm0, %v21794_v60  ;;  %v19143_v12 = vrot.slane %v2467_v27, %v18544_v37 }
 0x492   : > { %16239 = vmatprep.subr.bf16.mxu0 %v21794_v60  ;;  %16236 = vmatmul.mubr.msk.bf16.vlgmr.msra.gmra.mrb[72].mxu1 %vm3995_vm1, %v2191_v36  ;;  %v2893_v36 = vcombine.low %v2884_v1, %v2892_v44 }
 0x493   : > { %16246 = vmatpush3.bf16.xpose.msra.mxu1 %v5748_v13  ;;  %16247 = vmatprep.mubr.msk.bf16.mxu1 %vm17882_vm0, %v21794_v60  ;;  %v2483_v5 = vcombine.low %v19151_v34, %v19143_v12  ;;  %v1579_v13 = vcombine.low %v18800_v48, %v18824_v55 }
 0x494   : > { %16257 = vmatprep.subr.bf16.mxu1 %v21794_v60  ;;  %v2901_v27 = vrot.slane %v2893_v36, %v18561_v47 }
 0x495   : > { %v2491_v20 = vrot.slane %v2483_v5, %v18561_v47  ;;  %v19180_v40 = vrot.slane %v1579_v13, %v18544_v37  ;;  %v2196_v5 = vpack.c.bf16 %v1988_v49, %v1988_v49  ;;  %v2484_v13 = vcombine.high %v19151_v34, %v19143_v12 }
 0x496   : > { %v2909_v36 = vcombine.high %v2901_v27, %v21794_v60 }
 0x497   : > { %v2918_v35 = vcombine.high %v2491_v20, %v21794_v60  ;;  %v2917_v9 = vrot.slane %v2491_v20, %v18544_v37  ;;  %v2498_v20 = vrot.slane %v2484_v13, %v18561_v47 }
 0x498   : > { %16230 = vmatmul.mubr.msk.bf16.vlgmr.msra.gmra.mrb[80].mxu0 %vm3995_vm1, %v2190_v51  ;;  %v1997_v51 = vcombine.high %v1562_v6, %v21794_v60 }
 0x499   : > { %16240 = vmatpush3.bf16.xpose.msra.mxu0 %v5702_v22  ;;  %16241 = vmatprep.mubr.msk.bf16.mxu0 %vm17882_vm0, %v21794_v60  ;;  %v3084_v22 = vpack.c.bf16 %v2876_v11, %v2876_v11  ;;  %v2197_v11 = vpack.c.bf16 %v1987_v42, %v1987_v42  ;;  %v2925_v14 = vrot.slane %v2918_v35, %v18544_v37 }
 0x49a   : > { %16251 = vmatprep.subr.bf16.mxu0 %v21794_v60  ;;  %16248 = vmatmul.mubr.msk.bf16.vlgmr.msra.gmra.mrb[76].mxu1 %vm3995_vm1, %v2193_v61  ;;  %v2004_v39 = vrot.slane %v1997_v51, %v18544_v37  ;;  %v3087_v61 = vpack.c.bf16 %v2901_v27, %v2901_v27  ;;  %v1989_v51 = vcombine.high %v1987_v42, %v21794_v60 }
 0x49b   : > { %16258 = vmatpush3.bf16.xpose.msra.mxu1 %v5840_v57  ;;  %16259 = vmatprep.mubr.msk.bf16.mxu1 %vm17882_vm0, %v21794_v60  ;;  %v5886_v18 = vsel %vm3995_vm1, %v3084_v22, 0  ;;  %v2894_v57 = vcombine.high %v2884_v1, %v2892_v44  ;;  %v5978_v1 = vsel %vm3995_vm1, %v3086_v8, 0  ;;  %v3088_v27 = vpack.c.bf16 %v2909_v36, %v2909_v36 }
 0x49c   : > { %16269 = vmatprep.subr.bf16.mxu1 %v21794_v60  ;;  %v6024_v6 = vsel %vm3995_vm1, %v3087_v61, 0  ;;  %v2006_v22 = vcombine.high %v1996_v56, %v2004_v39  ;;  %v2198_v34 = vpack.c.bf16 %v1989_v51, %v1989_v51  ;;  %v2468_v35 = vcombine.high %v18821_v43, %v18847_v30 }
 0x49d   : > { %v2908_v54 = vrot.slane %v2894_v57, %v18561_v47  ;;  %v6070_v53 = vsel %vm3995_vm1, %v3088_v27, 0  ;;  %v2951_v61 = vcombine.high %v2498_v20, %v21794_v60  ;;  %v1596_v43 = vcombine.high %v19177_v52, %v19180_v40 }
 0x49e   : > { %v2950_v36 = vrot.slane %v2498_v20, %v18544_v37 }
 0x49f   : > { %v3089_v0 = vpack.c.bf16 %v2908_v54, %v2908_v54 }
 0x4a0   : > { %16242 = vmatmul.mubr.msk.bf16.vlgmr.msra.gmra.mrb[84].mxu0 %vm3995_vm1, %v2192_v41  ;;  %v1595_v41 = vcombine.low %v19177_v52, %v19180_v40 }
 0x4a1   : > { %16252 = vmatpush3.bf16.xpose.msra.mxu0 %v5794_v45  ;;  %16253 = vmatprep.mubr.msk.bf16.mxu0 %vm17882_vm0, %v21794_v60  ;;  %v2005_v45 = vcombine.low %v1996_v56, %v2004_v39  ;;  %v6116_v12 = vsel %vm3995_vm1, %v3089_v0, 0  ;;  %v2020_v39 = vrot.slane %v2006_v22, %v18561_v47  ;;  %v2910_v56 = vcombine.high %v2908_v54, %v21794_v60 }
 0x4a2   : > { %16263 = vmatprep.subr.bf16.mxu0 %v21794_v60  ;;  %16260 = vmatmul.mubr.msk.bf16.vlgmr.msra.gmra.mrb[80].mxu1 %vm3995_vm1, %v2195_v33  ;;  %v1603_v29 = vrot.slane %v1595_v41, %v18561_v47  ;;  %v2926_v33 = vcombine.low %v2917_v9, %v2925_v14  ;;  %v1580_v22 = vcombine.high %v18800_v48, %v18824_v55 }
 0x4a3   : > { %16270 = vmatpush3.bf16.xpose.msra.mxu1 %v5932_v19  ;;  %16271 = vmatprep.mubr.msk.bf16.mxu1 %vm17882_vm0, %v21794_v60  ;;  %v2013_v44 = vrot.slane %v2005_v45, %v18561_v47  ;;  %v2927_v45 = vcombine.high %v2917_v9, %v2925_v14  ;;  %v2201_v8 = vpack.c.bf16 %v2020_v39, %v2020_v39 }
 0x4a4   : > { %16281 = vmatprep.subr.bf16.mxu1 %v21794_v60  ;;  %v2030_v19 = vcombine.high %v1603_v29, %v21794_v60  ;;  %v2029_v49 = vrot.slane %v1603_v29, %v18544_v37  ;;  %v2958_v14 = vrot.slane %v2951_v61, %v18544_v37  ;;  %v2022_v0 = vcombine.high %v2020_v39, %v21794_v60 }
 0x4a5   : > { %v2021_v41 = vcombine.high %v2013_v44, %v21794_v60 }
 0x4a6   : > { %v2037_v42 = vrot.slane %v2030_v19, %v18544_v37  ;;  %v2959_v51 = vcombine.low %v2950_v36, %v2958_v14 }
 0x4a7   : > { %v2200_v29 = vpack.c.bf16 %v2021_v41, %v2021_v41 }
 0x4a8   : > { %16254 = vmatmul.mubr.msk.bf16.vlgmr.msra.gmra.mrb[88].mxu0 %vm3995_vm1, %v2194_v50  ;;  %v2199_v50 = vpack.c.bf16 %v2013_v44, %v2013_v44  ;;  %v2038_v30 = vcombine.low %v2029_v49, %v2037_v42  ;;  %v2941_v44 = vrot.slane %v2927_v45, %v18561_v47  ;;  %v2039_v19 = vcombine.high %v2029_v49, %v2037_v42 }
 0x4a9   : > { %16264 = vmatpush3.bf16.xpose.msra.mxu0 %v5886_v18  ;;  %16265 = vmatprep.mubr.msk.bf16.mxu0 %vm17882_vm0, %v21794_v60  ;;  %v2934_v18 = vrot.slane %v2926_v33, %v18561_v47  ;;  %v1564_v33 = vcombine.high %v18495_v16, %v18864_v32  ;;  %v2967_v39 = vrot.slane %v2959_v51, %v18561_v47 }
 0x4aa   : > { %16275 = vmatprep.subr.bf16.mxu0 %v21794_v60  ;;  %16272 = vmatmul.mubr.msk.bf16.vlgmr.msra.gmra.mrb[84].mxu1 %vm3995_vm1, %v2197_v11  ;;  %v2452_v11 = vcombine.high %v18493_v15, %v18775_v3  ;;  %v1610_v3 = vrot.slane %v1596_v43, %v18561_v47  ;;  %v2046_v52 = vrot.slane %v2038_v30, %v18561_v47 }
 0x4ab   : > { %16282 = vmatpush3.bf16.xpose.msra.mxu1 %v6024_v6  ;;  %16283 = vmatprep.mubr.msk.bf16.mxu1 %vm17882_vm0, %v21794_v60  ;;  %v3091_v57 = vpack.c.bf16 %v2934_v18, %v2934_v18  ;;  %v3090_v6 = vpack.c.bf16 %v2910_v56, %v2910_v56  ;;  %v3093_v13 = vpack.c.bf16 %v2941_v44, %v2941_v44 }
 0x4ac   : > { %16293 = vmatprep.subr.bf16.mxu1 %v21794_v60  ;;  %v19250_v15 = vrot.slane %v2452_v11, %v18544_v37  ;;  %v2203_v27 = vpack.c.bf16 %v2046_v52, %v2046_v52  ;;  %v19280_v16 = vrot.slane %v1580_v22, %v18544_v37  ;;  %v2053_v55 = vrot.slane %v2039_v19, %v18561_v47 }
 0x4ad   : > { %v6208_v54 = vsel %vm3995_vm1, %v3091_v57, 0  ;;  %v6162_v40 = vsel %vm3995_vm1, %v3090_v6, 0  ;;  %v2943_v42 = vcombine.high %v2941_v44, %v21794_v60  ;;  %v3095_v61 = vpack.c.bf16 %v2967_v39, %v2967_v39 }
 0x4ae   : > { %v2054_v49 = vcombine.high %v2046_v52, %v21794_v60  ;;  %v2960_v57 = vcombine.high %v2950_v36, %v2958_v14  ;;  %v2205_v11 = vpack.c.bf16 %v2053_v55, %v2053_v55 }
 0x4af   : > { %v3094_v43 = vpack.c.bf16 %v2943_v42, %v2943_v42 }
 0x4b0   : > { %16266 = vmatmul.mubr.msk.bf16.vlgmr.msra.gmra.mrb[92].mxu0 %vm3995_vm1, %v2196_v5  ;;  %v19243_v5 = vrot.slane %v2468_v35, %v18544_v37  ;;  %v2062_v35 = vrot.slane %v1610_v3, %v18544_v37  ;;  %v2204_v6 = vpack.c.bf16 %v2054_v49, %v2054_v49 }
 0x4b1   : > { %16276 = vmatpush3.bf16.xpose.msra.mxu0 %v5978_v1  ;;  %16277 = vmatprep.mubr.msk.bf16.mxu0 %vm17882_vm0, %v21794_v60  ;;  %v2942_v1 = vcombine.high %v2934_v18, %v21794_v60  ;;  %v2202_v18 = vpack.c.bf16 %v2022_v0, %v2022_v0 }
 0x4b2   : > { %16287 = vmatprep.subr.bf16.mxu0 %v21794_v60  ;;  %16284 = vmatmul.mubr.msk.bf16.vlgmr.msra.gmra.mrb[88].mxu1 %vm3995_vm1, %v2199_v50  ;;  %v2499_v9 = vcombine.low %v19250_v15, %v19243_v5  ;;  %v2063_v50 = vcombine.high %v1610_v3, %v21794_v60  ;;  %v2500_v22 = vcombine.high %v19250_v15, %v19243_v5 }
 0x4b3   : > { %16294 = vmatpush3.bf16.xpose.msra.mxu1 %v6116_v12  ;;  %16295 = vmatprep.mubr.msk.bf16.mxu1 %vm17882_vm0, %v21794_v60  ;;  %v3092_v20 = vpack.c.bf16 %v2942_v1, %v2942_v1 }
 0x4b4   : > { %16305 = vmatprep.subr.bf16.mxu1 %v21794_v60  ;;  %v2507_v12 = vrot.slane %v2499_v9, %v18561_v47  ;;  %v19285_v48 = vrot.slane %v2063_v50, %v18544_v37  ;;  %v6346_v9 = vsel %vm3995_vm1, %v3094_v43, 0  ;;  %v2514_v5 = vrot.slane %v2500_v22, %v18561_v47 }
 0x4b5   : > { %v6254_v32 = vsel %vm3995_vm1, %v3092_v20, 0 }
 0x4b6   : > { %v2984_v56 = vcombine.high %v2507_v12, %v21794_v60  ;;  %v2071_v45 = vcombine.low %v2062_v35, %v19285_v48  ;;  %v2983_v0 = vrot.slane %v2507_v12, %v18544_v37  ;;  %v2072_v12 = vcombine.high %v2062_v35, %v19285_v48 }
 0x4b7   : > { %v3017_v49 = vcombine.high %v2514_v5, %v21794_v60 }
 0x4b8   : > { %16278 = vmatmul.mubr.msk.bf16.vlgmr.msra.gmra.mrb[96].mxu0 %vm3995_vm1, %v2198_v34  ;;  %v6300_v34 = vsel %vm3995_vm1, %v3093_v13, 0  ;;  %v2079_v36 = vrot.slane %v2071_v45, %v18561_v47  ;;  %v2975_v13 = vcombine.high %v2967_v39, %v21794_v60 }
 0x4b9   : > { %16288 = vmatpush3.bf16.xpose.msra.mxu0 %v6070_v53  ;;  %16289 = vmatprep.mubr.msk.bf16.mxu0 %vm17882_vm0, %v21794_v60  ;;  %v19277_v53 = vrot.slane %v1564_v33, %v18544_v37 }
 0x4ba   : > { %16299 = vmatprep.subr.bf16.mxu0 %v21794_v60  ;;  %16296 = vmatmul.mubr.msk.bf16.vlgmr.msra.gmra.mrb[92].mxu1 %vm3995_vm1, %v2201_v8  ;;  %v6392_v8 = vsel %vm3995_vm1, %v3095_v61, 0  ;;  %v3096_v39 = vpack.c.bf16 %v2975_v13, %v2975_v13 }
 0x4bb   : > { %16306 = vmatpush3.bf16.xpose.msra.mxu1 %v6208_v54  ;;  %16307 = vmatprep.mubr.msk.bf16.mxu1 %vm17882_vm0, %v21794_v60  ;;  %v1611_v41 = vcombine.low %v19277_v53, %v19280_v16  ;;  %v2974_v54 = vrot.slane %v2960_v57, %v18561_v47 }
 0x4bc   : > { %16317 = vmatprep.subr.bf16.mxu1 %v21794_v60  ;;  %v6438_v35 = vsel %vm3995_vm1, %v3096_v39, 0 }
 0x4bd   : > { %v1619_v3 = vrot.slane %v1611_v41, %v18561_v47  ;;  %v3097_v50 = vpack.c.bf16 %v2974_v54, %v2974_v54  ;;  %v2976_v61 = vcombine.high %v2974_v54, %v21794_v60  ;;  %v1612_v54 = vcombine.high %v19277_v53, %v19280_v16 }
 0x4be   : > { %v3024_v53 = vrot.slane %v3017_v49, %v18544_v37 }
 0x4bf   : > { %v2095_v57 = vrot.slane %v1619_v3, %v18544_v37  ;;  %v1626_v16 = vrot.slane %v1612_v54, %v18561_v47 }
 0x4c0   : > { %16290 = vmatmul.mubr.msk.bf16.vlgmr.msra.gmra.mrb[100].mxu0 %vm3995_vm1, %v2200_v29  ;;  %v19307_v29 = vrot.slane %v2984_v56, %v18544_v37  ;;  %v2086_v56 = vrot.slane %v2072_v12, %v18561_v47 }
 0x4c1   : > { %16300 = vmatpush3.bf16.xpose.msra.mxu0 %v6162_v40  ;;  %16301 = vmatprep.mubr.msk.bf16.mxu0 %vm17882_vm0, %v21794_v60  ;;  %v2129_v39 = vcombine.high %v1626_v16, %v21794_v60 }
 0x4c2   : > { %16311 = vmatprep.subr.bf16.mxu0 %v21794_v60  ;;  %16308 = vmatmul.mubr.msk.bf16.vlgmr.msra.gmra.mrb[96].mxu1 %vm3995_vm1, %v2203_v27  ;;  %v2055_v27 = vcombine.high %v2053_v55, %v21794_v60  ;;  %v2992_v20 = vcombine.low %v2983_v0, %v19307_v29  ;;  %v6484_v55 = vsel %vm3995_vm1, %v3097_v50, 0  ;;  %v2993_v43 = vcombine.high %v2983_v0, %v19307_v29 }
 0x4c3   : > { %16318 = vmatpush3.bf16.xpose.msra.mxu1 %v6300_v34  ;;  %16319 = vmatprep.mubr.msk.bf16.mxu1 %vm17882_vm0, %v21794_v60  ;;  %v2096_v34 = vcombine.high %v1619_v3, %v21794_v60 }
 0x4c4   : > { %16329 = vmatprep.subr.bf16.mxu1 %v21794_v60  ;;  %v3000_v42 = vrot.slane %v2992_v20, %v18561_v47  ;;  %v3007_v0 = vrot.slane %v2993_v43, %v18561_v47  ;;  %v2128_v43 = vrot.slane %v1626_v16, %v18544_v37 }
 0x4c5   : > { %v19340_v48 = vrot.slane %v2096_v34, %v18544_v37  ;;  %v2088_v34 = vcombine.high %v2086_v56, %v21794_v60 }
 0x4c6   : > { %v3099_v45 = vpack.c.bf16 %v3000_v42, %v3000_v42  ;;  %v3008_v50 = vcombine.high %v3000_v42, %v21794_v60  ;;  %v3101_v12 = vpack.c.bf16 %v3007_v0, %v3007_v0 }
 0x4c7   : > { %v2104_v3 = vcombine.low %v2095_v57, %v19340_v48  ;;  %v2210_v42 = vpack.c.bf16 %v2088_v34, %v2088_v34 }
 0x4c8   : > { %16302 = vmatmul.mubr.msk.bf16.vlgmr.msra.gmra.mrb[104].mxu0 %vm3995_vm1, %v2202_v18  ;;  %v2207_v18 = vpack.c.bf16 %v2079_v36, %v2079_v36  ;;  %v6576_v29 = vsel %vm3995_vm1, %v3099_v45, 0 }
 0x4c9   : > { %16312 = vmatpush3.bf16.xpose.msra.mxu0 %v6254_v32  ;;  %16313 = vmatprep.mubr.msk.bf16.mxu0 %vm17882_vm0, %v21794_v60  ;;  %v2206_v32 = vpack.c.bf16 %v2055_v27, %v2055_v27  ;;  %v2112_v22 = vrot.slane %v2104_v3, %v18561_v47  ;;  %v3016_v27 = vrot.slane %v2514_v5, %v18544_v37 }
 0x4ca   : > { %16323 = vmatprep.subr.bf16.mxu0 %v21794_v60  ;;  %16320 = vmatmul.mubr.msk.bf16.vlgmr.msra.gmra.mrb[100].mxu1 %vm3995_vm1, %v2205_v11  ;;  %v2087_v11 = vcombine.high %v2079_v36, %v21794_v60  ;;  %v3100_v5 = vpack.c.bf16 %v3008_v50, %v3008_v50 }
 0x4cb   : > { %16330 = vmatpush3.bf16.xpose.msra.mxu1 %v6392_v8  ;;  %16331 = vmatprep.mubr.msk.bf16.mxu1 %vm17882_vm0, %v21794_v60  ;;  %v2120_v3 = vcombine.high %v2112_v22, %v21794_v60 }
 0x4cc   : > { %16341 = vmatprep.subr.bf16.mxu1 %v21794_v60  ;;  %v2208_v13 = vpack.c.bf16 %v2087_v11, %v2087_v11  ;;  %v6622_v49 = vsel %vm3995_vm1, %v3100_v5, 0  ;;  %v3009_v11 = vcombine.high %v3007_v0, %v21794_v60 }
 0x4ce   : > { %v3102_v0 = vpack.c.bf16 %v3009_v11, %v3009_v11 }
 0x4d0   : > { %16314 = vmatmul.mubr.msk.bf16.vlgmr.msra.gmra.mrb[108].mxu0 %vm3995_vm1, %v2204_v6 }
 0x4d1   : > { %16324 = vmatpush3.bf16.xpose.msra.mxu0 %v6346_v9  ;;  %16325 = vmatprep.mubr.msk.bf16.mxu0 %vm17882_vm0, %v21794_v60 }
 0x4d2   : > { %16335 = vmatprep.subr.bf16.mxu0 %v21794_v60  ;;  %16332 = vmatmul.mubr.msk.bf16.vlgmr.msra.gmra.mrb[104].mxu1 %vm3995_vm1, %v2207_v18  ;;  %v3025_v18 = vcombine.low %v3016_v27, %v3024_v53 }
 0x4d3   : > { %16342 = vmatpush3.bf16.xpose.msra.mxu1 %v6484_v55  ;;  %16343 = vmatprep.mubr.msk.bf16.mxu1 %vm17882_vm0, %v21794_v60  ;;  %v2211_v55 = vpack.c.bf16 %v2112_v22, %v2112_v22 }
 0x4d4   : > { %16353 = vmatprep.subr.bf16.mxu1 %v21794_v60 }
 0x4d8   : > { %16326 = vmatmul.mubr.msk.bf16.vlgmr.msra.gmra.mrb[112].mxu0 %vm3995_vm1, %v2206_v32  ;;  %v6668_v32 = vsel %vm3995_vm1, %v3101_v12, 0 }
 0x4d9   : > { %16336 = vmatpush3.bf16.xpose.msra.mxu0 %v6438_v35  ;;  %16337 = vmatprep.mubr.msk.bf16.mxu0 %vm17882_vm0, %v21794_v60  ;;  %v3033_v35 = vrot.slane %v3025_v18, %v18561_v47 }
 0x4da   : > { %16347 = vmatprep.subr.bf16.mxu0 %v21794_v60 }
 0x4db   : > { %v19301_v30 = vpop.f32.mrb[8].mxu0  ;;  %v19309_v44 = vpop.f32.mrb[4].mxu1  ;;  %v3041_v50 = vcombine.high %v3033_v35, %v21794_v60 }
 0x4dc   : > { %v16021_v14 = vpop.f32.mrb[9].mxu0  ;;  %v16033_v52 = vpop.f32.mrb[5].mxu1  ;;  %v6941_v40 = vsel %vm6940_vm2, %v19301_v30, -inf  ;;  %v6947_v15 = vsel %vm6940_vm2, %v19309_v44, -inf }
 0x4dd   : > { %v4039_v1 = vpop.f32.mrb[10].mxu0  ;;  %v4131_v51 = vpop.f32.mrb[6].mxu1  ;;  %6942 = vmax.xlane.f32.xlu0 %v6941_v40  ;;  %v2209_v52 = vpack.c.bf16 %v2086_v56, %v2086_v56  ;;  %v3098_v40 = vpack.c.bf16 %v2976_v61, %v2976_v61  ;;  %v19388_v61 = vrot.slane %v2129_v39, %v18544_v37  ;;  %v3418_v39 = vcombine.low %v19098_v38, %v19101_v4 }
 0x4de   : > { %v16022_v33 = vpop.f32.mrb[11].mxu0  ;;  %v16034_v19 = vpop.f32.mrb[7].mxu1 }
 0x4df   : > { %16344 = vmatmul.mubr.msk.bf16.vlgmr.msra.gmra.mrb[108].mxu1 %vm3995_vm1, %v2209_v52  ;;  %v6530_v19 = vsel %vm3995_vm1, %v3098_v40, 0  ;;  %v3026_v52 = vcombine.high %v3016_v27, %v3024_v53 }
 0x4e0   : > { %16354 = vmatpush3.bf16.xpose.msra.mxu1 %v6576_v29  ;;  %16355 = vmatprep.mubr.msk.bf16.mxu1 %vm17882_vm0, %v21794_v60 }
 0x4e1   : > { %6948 = vmax.xlane.f32.xlu0 %v6947_v15  ;;  %16338 = vmatmul.mubr.msk.bf16.vlgmr.msra.gmra.mrb[116].mxu0 %vm3995_vm1, %v2208_v13  ;;  %v2105_v15 = vcombine.high %v2095_v57, %v19340_v48  ;;  %v3040_v22 = vrot.slane %v3026_v52, %v18561_v47 }
 0x4e2   : > { %16365 = vmatprep.subr.bf16.mxu1 %v21794_v60  ;;  %16348 = vmatpush3.bf16.xpose.msra.mxu0 %v6530_v19  ;;  %v6714_v19 = vsel %vm3995_vm1, %v3102_v0, 0 }
 0x4e3   : > { %v19351_v41 = vpop.f32.mrb[12].mxu0  ;;  %16349 = vmatprep.mubr.msk.bf16.mxu0 %vm17882_vm0, %v21794_v60  ;;  %16359 = vmatprep.subr.bf16.mxu0 %v21794_v60  ;;  %v2119_v48 = vrot.slane %v2105_v15, %v18561_v47 }
 0x4e4   : > { %v16027_v8 = vpop.f32.mrb[13].mxu0  ;;  %v6944_v6 = vsel %vm6940_vm2, %v19351_v41, -inf }
 0x4e5   : > { %6945 = vmax.xlane.f32.xlu1 %v6944_v6  ;;  %v4085_v14 = vpop.f32.mrb[14].mxu0  ;;  %v19361_v1 = vpop.f32.mrb[8].mxu1  ;;  %v3103_v6 = vpack.c.bf16 %v3033_v35, %v3033_v35  ;;  %v2213_v29 = vpack.c.bf16 %v2119_v48, %v2119_v48  ;;  %v2121_v18 = vcombine.high %v2119_v48, %v21794_v60 }
 0x4e6   : > { %v16028_v36 = vpop.f32.mrb[15].mxu0  ;;  %v16045_v9 = vpop.f32.mrb[9].mxu1  ;;  %v6953_v20 = vsel %vm6940_vm2, %v19361_v1, -inf }
 0x4e7   : > { %v4223_v51 = vpop.f32.mrb[10].mxu1  ;;  %16356 = vmatmul.mubr.msk.bf16.vlgmr.msra.gmra.mrb[112].mxu1 %vm3995_vm1, %v2211_v55  ;;  %v2137_v9 = vcombine.low %v2128_v43, %v19388_v61  ;;  %v6760_v16 = vsel %vm3995_vm1, %v3103_v6, 0  ;;  %v2138_v55 = vcombine.high %v2128_v43, %v19388_v61 }
 0x4e8   : > { %v16046_v33 = vpop.f32.mrb[11].mxu1  ;;  %16366 = vmatpush3.bf16.xpose.msra.mxu1 %v6668_v32  ;;  %16367 = vmatprep.mubr.msk.bf16.mxu1 %vm17882_vm0, %v21794_v60 }
 0x4e9   : > { %6954 = vmax.xlane.f32.xlu1 %v6953_v20  ;;  %16350 = vmatmul.mubr.msk.bf16.vlgmr.msra.gmra.mrb[120].mxu0 %vm3995_vm1, %v2210_v42  ;;  %v2212_v33 = vpack.c.bf16 %v2120_v3, %v2120_v3  ;;  %v2145_v53 = vrot.slane %v2137_v9, %v18561_v47  ;;  %v3105_v20 = vpack.c.bf16 %v3040_v22, %v3040_v22 }
 0x4ea   : > { %16377 = vmatprep.subr.bf16.mxu1 %v21794_v60  ;;  %16360 = vmatpush3.bf16.xpose.msra.mxu0 %v6622_v49  ;;  %v3104_v42 = vpack.c.bf16 %v3041_v50, %v3041_v50  ;;  %v2214_v49 = vpack.c.bf16 %v2121_v18, %v2121_v18  ;;  %v2152_v48 = vrot.slane %v2138_v55, %v18561_v47 }
 0x4eb   : > { %v19392_v56 = vpop.f32.mrb[16].mxu0  ;;  %16361 = vmatprep.mubr.msk.bf16.mxu0 %vm17882_vm0, %v21794_v60  ;;  %16371 = vmatprep.subr.bf16.mxu0 %v21794_v60  ;;  %v2215_v5 = vpack.c.bf16 %v2145_v53, %v2145_v53  ;;  %v6852_v35 = vsel %vm3995_vm1, %v3105_v20, 0 }
 0x4ec   : > { %v16039_v57 = vpop.f32.mrb[17].mxu0  ;;  %v6950_v45 = vsel %vm6940_vm2, %v19392_v56, -inf  ;;  %v6806_v61 = vsel %vm3995_vm1, %v3104_v42, 0 }
 0x4ed   : > { %6951 = vmax.xlane.f32.xlu0 %v6950_v45  ;;  %v4177_v8 = vpop.f32.mrb[18].mxu0  ;;  %v19402_v54 = vpop.f32.mrb[12].mxu1  ;;  %v3426_v57 = vrot.slane %v3418_v39, %v18561_v47  ;;  %v3042_v45 = vcombine.high %v3040_v22, %v21794_v60 }
 0x4ee   : > { %v16040_v14 = vpop.f32.mrb[19].mxu0  ;;  %v16057_v40 = vpop.f32.mrb[13].mxu1  ;;  %v6959_v36 = vsel %vm6940_vm2, %v19402_v54, -inf }
 0x4ef   : > { %v4315_v13 = vpop.f32.mrb[14].mxu1  ;;  %6960 = vmax.xlane.f32.xlu1 %v6959_v36  ;;  %16368 = vmatmul.mubr.msk.bf16.vlgmr.msra.gmra.mrb[116].mxu1 %vm3995_vm1, %v2213_v29  ;;  %v3931_v14 = vpack.c.bf16 %v3426_v57, %v3426_v57  ;;  %v2153_v40 = vcombine.high %v2145_v53, %v21794_v60  ;;  %v3434_v53 = vcombine.high %v3426_v57, %v21794_v60 }
 0x4f0   : > { %v16058_v51 = vpop.f32.mrb[15].mxu1  ;;  %16378 = vmatpush3.bf16.xpose.msra.mxu1 %v6760_v16  ;;  %16379 = vmatprep.mubr.msk.bf16.mxu1 %vm17882_vm0, %v21794_v60  ;;  %v2217_v13 = vpack.c.bf16 %v2152_v48, %v2152_v48 }
 0x4f1   : > { %16362 = vmatmul.mubr.msk.bf16.vlgmr.msra.gmra.mrb[124].mxu0 %vm3995_vm1, %v2212_v33  ;;  %16389 = vmatprep.subr.bf16.mxu1 %v21794_v60  ;;  %v3106_v51 = vpack.c.bf16 %v3042_v45, %v3042_v45  ;;  %v7715_v16 = vsel %vm7713_vm3, %v3931_v14, 0  ;;  %v2216_v33 = vpack.c.bf16 %v2153_v40, %v2153_v40 }
 0x4f2   : > { %16372 = vmatpush3.bf16.xpose.msra.mxu0 %v6714_v19  ;;  %16373 = vmatprep.mubr.msk.bf16.mxu0 %vm17882_vm0, %v21794_v60 }
 0x4f3   : > { %v19421_v27 = vpop.f32.mrb[20].mxu0  ;;  %16383 = vmatprep.subr.bf16.mxu0 %v21794_v60  ;;  %v6898_v22 = vsel %vm3995_vm1, %v3106_v51, 0 }
 0x4f4   : > { %v16051_v12 = vpop.f32.mrb[21].mxu0  ;;  %v6956_v34 = vsel %vm6940_vm2, %v19421_v27, -inf }
 0x4f5   : > { %6957 = vmax.xlane.f32.xlu0 %v6956_v34  ;;  %v4269_v15 = vpop.f32.mrb[22].mxu0  ;;  %v19442_v11 = vpop.f32.mrb[16].mxu1  ;;  %v2154_v12 = vcombine.high %v2152_v48, %v21794_v60 }
 0x4f6   : > { %v16052_v32 = vpop.f32.mrb[23].mxu0  ;;  %v16069_v8 = vpop.f32.mrb[17].mxu1  ;;  %v6965_v6 = vsel %vm6940_vm2, %v19442_v11, -inf }
 0x4f7   : > { %16380 = vmatmul.mubr.msk.bf16.vlgmr.msra.gmra.mrb[120].mxu1 %vm3995_vm1, %v2215_v5  ;;  %v4407_v36 = vpop.f32.mrb[18].mxu1  ;;  %6966 = vmax.xlane.f32.xlu1 %v6965_v6  ;;  %v3932_v5 = vpack.c.bf16 %v3434_v53, %v3434_v53 }
 0x4f8   : > { %16390 = vmatpush3.bf16.xpose.msra.mxu1 %v6852_v35  ;;  %16391 = vmatprep.mubr.msk.bf16.mxu1 %vm17882_vm0, %v21794_v60  ;;  %v16070_v29 = vpop.f32.mrb[19].mxu1  ;;  %v2218_v35 = vpack.c.bf16 %v2154_v12, %v2154_v12 }
 0x4f9   : > { %16374 = vmatmul.mubr.msk.bf16.vlgmr.msra.gmra.mrb[128].mxu0 %vm3995_vm1, %v2214_v49  ;;  %16401 = vmatprep.subr.bf16.mxu1 %v21794_v60  ;;  %v7761_v49 = vsel %vm7713_vm3, %v3932_v5, 0 }
 0x4fa   : > { %16384 = vmatpush3.bf16.xpose.msra.mxu0 %v6806_v61  ;;  %16385 = vmatprep.mubr.msk.bf16.mxu0 %vm17882_vm0, %v21794_v60 }
 0x4fb   : > { %v19444_v43 = vpop.f32.mrb[24].mxu0  ;;  %16395 = vmatprep.subr.bf16.mxu0 %v21794_v60 }
 0x4fc   : > { %v16063_v3 = vpop.f32.mrb[25].mxu0  ;;  %v6962_v52 = vsel %vm6940_vm2, %v19444_v43, -inf }
 0x4fd   : > { %6963 = vmax.xlane.f32.xlu0 %v6962_v52  ;;  %v4361_v9 = vpop.f32.mrb[26].mxu0  ;;  %v19462_v19 = vpop.f32.mrb[20].mxu1 }
 0x4fe   : > { %v16064_v0 = vpop.f32.mrb[27].mxu0  ;;  %v16081_v50 = vpop.f32.mrb[21].mxu1  ;;  %v6971_v20 = vsel %vm6940_vm2, %v19462_v19, -inf }
 0x4ff   : > { %16392 = vmatmul.mubr.msk.bf16.vlgmr.msra.gmra.mrb[124].mxu1 %vm3995_vm1, %v2217_v13  ;;  %v4499_v34 = vpop.f32.mrb[22].mxu1  ;;  %6972 = vmax.xlane.f32.xlu1 %v6971_v20 }
 0x500   : > { %16402 = vmatpush3.bf16.msra.mxu1 %v7715_v16  ;;  %16403 = vmatprep.mubr.msk.bf16.mxu1 %vm17882_vm0, %v21794_v60  ;;  %v16082_v39 = vpop.f32.mrb[23].mxu1 }
 0x501   : > { %16386 = vmatmul.mubr.msk.bf16.vlgmr.msra.gmra.mrb[132].mxu0 %vm3995_vm1, %v2216_v33  ;;  %16413 = vmatprep.subr.bf16.mxu1 %v21794_v60 }
 0x502   : > { %16396 = vmatpush3.bf16.xpose.msra.mxu0 %v6898_v22  ;;  %16397 = vmatprep.mubr.msk.bf16.mxu0 %vm17882_vm0, %v21794_v60 }
 0x503   : > { %16407 = vmatprep.subr.bf16.mxu0 %v21794_v60  ;;  %v19470_v18 = vpop.f32.mrb[28].mxu0 }
 0x504   : > { %v16075_v15 = vpop.f32.mrb[29].mxu0  ;;  %v6968_v55 = vsel %vm6940_vm2, %v19470_v18, -inf }
 0x505   : > { %6969 = vmax.xlane.f32.xlu0 %v6968_v55  ;;  %v4453_v32 = vpop.f32.mrb[30].mxu0  ;;  %v19476_v57 = vpop.f32.mrb[24].mxu1 }
 0x506   : > { %v16076_v42 = vpop.f32.mrb[31].mxu0  ;;  %v16093_v48 = vpop.f32.mrb[25].mxu1  ;;  %v6977_v61 = vsel %vm6940_vm2, %v19476_v57, -inf }
 0x507   : > { %v4591_v45 = vpop.f32.mrb[26].mxu1  ;;  %6978 = vmax.xlane.f32.xlu1 %v6977_v61 }
 0x508   : > { %v16094_v6 = vpop.f32.mrb[27].mxu1 }
 0x509   : > { %16398 = vmatmul.mubr.msk.bf16.vlgmr.msra.gmra.mrb[136].mxu0 %vm3995_vm1, %v2218_v35 }
 0x50a   : > { %16408 = vmatpush3.bf16.msra.mxu0 %v7761_v49  ;;  %16409 = vmatprep.mubr.msk.bf16.mxu0 %vm17882_vm0, %v21794_v60 }
 0x50b   : > { %16419 = vmatprep.subr.bf16.mxu0 %v21794_v60  ;;  %v19483_v8 = vpop.f32.mrb[32].mxu0 }
 0x50c   : > { %v16087_v14 = vpop.f32.mrb[33].mxu0  ;;  %v6974_v3 = vsel %vm6940_vm2, %v19483_v8, -inf }
 0x50d   : > { %6975 = vmax.xlane.f32.xlu0 %v6974_v3  ;;  %v4545_v52 = vpop.f32.mrb[34].mxu0  ;;  %v19487_v36 = vpop.f32.mrb[28].mxu1 }
 0x50e   : > { %v16088_v40 = vpop.f32.mrb[35].mxu0  ;;  %v16105_v9 = vpop.f32.mrb[29].mxu1  ;;  %v6983_v29 = vsel %vm6940_vm2, %v19487_v36, -inf }
 0x50f   : > { %v4683_v13 = vpop.f32.mrb[30].mxu1  ;;  %6984 = vmax.xlane.f32.xlu1 %v6983_v29 }
 0x510   : > { %v16106_v51 = vpop.f32.mrb[31].mxu1 }
 0x513   : > { %v19491_v0 = vpop.f32.mrb[36].mxu0 }
 0x514   : > { %v16099_v16 = vpop.f32.mrb[37].mxu0  ;;  %v6980_v33 = vsel %vm6940_vm2, %v19491_v0, -inf }
 0x515   : > { %6981 = vmax.xlane.f32.xlu0 %v6980_v33  ;;  %v4637_v22 = vpop.f32.mrb[38].mxu0  ;;  %v19495_v50 = vpop.f32.mrb[32].mxu1 }
 0x516   : > { %v16100_v53 = vpop.f32.mrb[39].mxu0  ;;  %v16117_v20 = vpop.f32.mrb[33].mxu1  ;;  %v6989_v12 = vsel %vm6940_vm2, %v19495_v50, -inf }
 0x517   : > { %6990 = vmax.xlane.f32.xlu1 %v6989_v12  ;;  %v4775_v34 = vpop.f32.mrb[34].mxu1 }
 0x518   : > { %v16118_v15 = vpop.f32.mrb[35].mxu1 }
 0x51b   : > { %v19499_v39 = vpop.f32.mrb[40].mxu0 }
 0x51c   : > { %v16111_v55 = vpop.f32.mrb[41].mxu0  ;;  %v6986_v5 = vsel %vm6940_vm2, %v19499_v39, -inf }
 0x51d   : > { %6987 = vmax.xlane.f32.xlu0 %v6986_v5  ;;  %v4729_v32 = vpop.f32.mrb[42].mxu0  ;;  %v19503_v35 = vpop.f32.mrb[36].mxu1 }
 0x51e   : > { %v16112_v42 = vpop.f32.mrb[43].mxu0  ;;  %v16129_v49 = vpop.f32.mrb[37].mxu1  ;;  %v6995_v48 = vsel %vm6940_vm2, %v19503_v35, -inf }
 0x51f   : > { %6996 = vmax.xlane.f32.xlu1 %v6995_v48  ;;  %v4867_v61 = vpop.f32.mrb[38].mxu1 }
 0x520   : > { %v16130_v6 = vpop.f32.mrb[39].mxu1 }
 0x523   : > { %v19507_v45 = vpop.f32.mrb[44].mxu0 }
 0x524   : > { %v16123_v14 = vpop.f32.mrb[45].mxu0  ;;  %v6992_v3 = vsel %vm6940_vm2, %v19507_v45, -inf }
 0x525   : > { %6993 = vmax.xlane.f32.xlu0 %v6992_v3  ;;  %v4821_v52 = vpop.f32.mrb[46].mxu0  ;;  %v19511_v9 = vpop.f32.mrb[40].mxu1 }
 0x526   : > { %v16124_v40 = vpop.f32.mrb[47].mxu0  ;;  %v16141_v29 = vpop.f32.mrb[41].mxu1  ;;  %v7001_v13 = vsel %vm6940_vm2, %v19511_v9, -inf }
 0x527   : > { %7002 = vmax.xlane.f32.xlu1 %v7001_v13  ;;  %v4959_v51 = vpop.f32.mrb[42].mxu1 }
 0x528   : > { %v16142_v33 = vpop.f32.mrb[43].mxu1 }
 0x52b   : > { %v19515_v16 = vpop.f32.mrb[48].mxu0 }
 0x52c   : > { %v16135_v22 = vpop.f32.mrb[49].mxu0  ;;  %v6998_v53 = vsel %vm6940_vm2, %v19515_v16, -inf }
 0x52d   : > { %6999 = vmax.xlane.f32.xlu0 %v6998_v53  ;;  %v4913_v20 = vpop.f32.mrb[50].mxu0  ;;  %v19519_v34 = vpop.f32.mrb[44].mxu1 }
 0x52e   : > { %v16136_v12 = vpop.f32.mrb[51].mxu0  ;;  %v16153_v15 = vpop.f32.mrb[45].mxu1  ;;  %v7007_v55 = vsel %vm6940_vm2, %v19519_v34, -inf }
 0x52f   : > { %7008 = vmax.xlane.f32.xlu1 %v7007_v55  ;;  %v5051_v5 = vpop.f32.mrb[46].mxu1 }
 0x530   : > { %v16154_v42 = vpop.f32.mrb[47].mxu1 }
 0x533   : > { %v19523_v32 = vpop.f32.mrb[52].mxu0 }
 0x534   : > { %v16147_v49 = vpop.f32.mrb[53].mxu0  ;;  %v7004_v48 = vsel %vm6940_vm2, %v19523_v32, -inf }
 0x535   : > { %7005 = vmax.xlane.f32.xlu0 %v7004_v48  ;;  %v5005_v61 = vpop.f32.mrb[54].mxu0  ;;  %v19527_v14 = vpop.f32.mrb[48].mxu1 }
 0x536   : > { %v16148_v6 = vpop.f32.mrb[55].mxu0  ;;  %v16165_v3 = vpop.f32.mrb[49].mxu1  ;;  %v7013_v52 = vsel %vm6940_vm2, %v19527_v14, -inf }
 0x537   : > { %7014 = vmax.xlane.f32.xlu1 %v7013_v52  ;;  %v5143_v40 = vpop.f32.mrb[50].mxu1 }
 0x538   : > { %v16166_v13 = vpop.f32.mrb[51].mxu1 }
 0x53b   : > { %v19531_v29 = vpop.f32.mrb[56].mxu0 }
 0x53c   : > { %v16159_v51 = vpop.f32.mrb[57].mxu0  ;;  %v7010_v33 = vsel %vm6940_vm2, %v19531_v29, -inf }
 0x53d   : > { %7011 = vmax.xlane.f32.xlu0 %v7010_v33  ;;  %v5097_v22 = vpop.f32.mrb[58].mxu0  ;;  %v19535_v20 = vpop.f32.mrb[52].mxu1 }
 0x53e   : > { %v16160_v53 = vpop.f32.mrb[59].mxu0  ;;  %v16177_v12 = vpop.f32.mrb[53].mxu1  ;;  %v7019_v15 = vsel %vm6940_vm2, %v19535_v20, -inf }
 0x53f   : > { %v5235_v55 = vpop.f32.mrb[54].mxu1 }
 0x540   : > { %v16178_v42 = vpop.f32.mrb[55].mxu1 }
 0x541   : > { %7020 = vmax.xlane.f32.xlu0 %v7019_v15 }
 0x543   : > { %v19539_v5 = vpop.f32.mrb[60].mxu0 }
 0x544   : > { %v16171_v49 = vpop.f32.mrb[61].mxu0  ;;  %v7016_v48 = vsel %vm6940_vm2, %v19539_v5, -inf }
 0x545   : > { %v5189_v61 = vpop.f32.mrb[62].mxu0  ;;  %7017 = vmax.xlane.f32.xlu0 %v7016_v48  ;;  %v19543_v3 = vpop.f32.mrb[56].mxu1 }
 0x546   : > { %v16172_v6 = vpop.f32.mrb[63].mxu0  ;;  %v16189_v52 = vpop.f32.mrb[57].mxu1  ;;  %v7025_v40 = vsel %vm6940_vm2, %v19543_v3, -inf }
 0x547   : > { %v5327_v13 = vpop.f32.mrb[58].mxu1 }
 0x548   : > { %v16190_v33 = vpop.f32.mrb[59].mxu1 }
 0x549   : > { %7026 = vmax.xlane.f32.xlu0 %v7025_v40 }
 0x54b   : > { %v19547_v51 = vpop.f32.mrb[64].mxu0 }
 0x54c   : > { %v16183_v22 = vpop.f32.mrb[65].mxu0  ;;  %v7022_v53 = vsel %vm6940_vm2, %v19547_v51, -inf }
 0x54d   : > { %7023 = vmax.xlane.f32.xlu1 %v7022_v53  ;;  %v5281_v12 = vpop.f32.mrb[66].mxu0  ;;  %v19551_v55 = vpop.f32.mrb[60].mxu1 }
 0x54e   : > { %v16184_v15 = vpop.f32.mrb[67].mxu0  ;;  %v16201_v42 = vpop.f32.mrb[61].mxu1  ;;  %v7031_v49 = vsel %vm6940_vm2, %v19551_v55, -inf }
 0x54f   : > { %v5419_v48 = vpop.f32.mrb[62].mxu1  ;;  %7032 = vmax.xlane.f32.xlu0 %v7031_v49  ;;  %v19559_v22 = vpop.permute.xlu1 %3125 }
 0x550   : > { %v16202_v6 = vpop.f32.mrb[63].mxu1  ;;  %21947 = vst [vmem:[#allocation51_spill] sm:$0xff] %v19559_v22  ;;  %v19563_v12 = vpop.permute.xlu0 %3113 }
 0x551   : > { %21948 = vst [vmem:[#allocation52_spill] sm:$0xff] %v19563_v12 }
 0x553   : > { %v19555_v61 = vpop.f32.mrb[68].mxu0 }
 0x554   : > { %v16195_v52 = vpop.f32.mrb[69].mxu0  ;;  %v7028_v40 = vsel %vm6940_vm2, %v19555_v61, -inf }
 0x555   : > { %7029 = vmax.xlane.f32.xlu1 %v7028_v40  ;;  %v5373_v13 = vpop.f32.mrb[70].mxu0  ;;  %v19561_v53 = vpop.f32.mrb[64].mxu1 }
 0x556   : > { %v16196_v33 = vpop.f32.mrb[71].mxu0  ;;  %v16213_v15 = vpop.f32.mrb[65].mxu1  ;;  %v7037_v42 = vsel %vm6940_vm2, %v19561_v53, -inf }
 0x557   : > { %7038 = vmax.xlane.f32.xlu0 %v7037_v42  ;;  %v5511_v49 = vpop.f32.mrb[66].mxu1  ;;  %v19571_v33 = vpop.permute.xlu1 %3137 }
 0x558   : > { %v16214_v6 = vpop.f32.mrb[67].mxu1  ;;  %21949 = vst [vmem:[#allocation53_spill] sm:$0xff] %v19571_v33 }
 0x55b   : > { %v19567_v48 = vpop.f32.mrb[72].mxu0  ;;  %v19576_v10 = vpop.permute.xlu1 %3115 }
 0x55c   : > { %v16207_v52 = vpop.f32.mrb[73].mxu0  ;;  %v7034_v40 = vsel %vm6940_vm2, %v19567_v48, -inf  ;;  %21950 = vst [vmem:[#allocation54_spill] sm:$0xff] %v19576_v10 }
 0x55d   : > { %7035 = vmax.xlane.f32.xlu1 %v7034_v40  ;;  %v5465_v13 = vpop.f32.mrb[74].mxu0  ;;  %v19573_v60 = vpop.f32.mrb[68].mxu1 }
 0x55e   : > { %v16208_v28 = vpop.f32.mrb[75].mxu0  ;;  %v16225_v42 = vpop.f32.mrb[69].mxu1  ;;  %v7043_v49 = vsel %vm6940_vm2, %v19573_v60, -inf }
 0x55f   : > { %7044 = vmax.xlane.f32.xlu0 %v7043_v49  ;;  %v5603_v6 = vpop.f32.mrb[70].mxu1 }
 0x560   : > { %v16226_v40 = vpop.f32.mrb[71].mxu1 }
 0x563   : > { %v19580_v52 = vpop.f32.mrb[76].mxu0 }
 0x564   : > { %v16219_v13 = vpop.f32.mrb[77].mxu0  ;;  %v7040_v28 = vsel %vm6940_vm2, %v19580_v52, -inf }
 0x565   : > { %7041 = vmax.xlane.f32.xlu1 %v7040_v28  ;;  %v5557_v59 = vpop.f32.mrb[78].mxu0  ;;  %v19585_v58 = vpop.f32.mrb[72].mxu1 }
 0x566   : > { %21951 = vst [vmem:[#allocation55_spill] sm:$0xff] %v19585_v58  ;;  %v16237_v49 = vpop.f32.mrb[73].mxu1  ;;  %v7049_v6 = vsel %vm6940_vm2, %v19585_v58, -inf }
 0x567   : > { %7050 = vmax.xlane.f32.xlu0 %v7049_v6  ;;  %v5695_v40 = vpop.f32.mrb[74].mxu1 }
 0x56a   : > { %v6943_v46 = vpop.xlane.xlu0 %6942 }
 0x56b   : > { %v7133_v15 = vsub.f32 %v19301_v30, %v6943_v46  ;;  %v16220_v46 = vpop.f32.mrb[79].mxu0 }
 0x56c   : > { %v19589_v13 = vpop.f32.mrb[80].mxu0 }
 0x56d   : > { %v7197_v17 = vmul.f32 1.442695, %v7133_v15  ;;  %v16238_v15 = vpop.f32.mrb[75].mxu1  ;;  %v16231_v28 = vpop.f32.mrb[81].mxu0 }
 0x56e   : > { %v6949_v62 = vpop.xlane.xlu0 %6948  ;;  %v19594_v49 = vpop.f32.mrb[76].mxu1 }
 0x56f   : > { %v7135_v30 = vsub.f32 %v19309_v44, %v6949_v62  ;;  %17182 = vpow2.f32 %v7197_v17  ;;  %v7046_v62 = vsel %vm6940_vm2, %v19589_v13, -inf  ;;  %v5649_v44 = vpop.f32.mrb[82].mxu0  ;;  %21952 = vst [vmem:[#allocation56_spill] sm:$0xff] %v19594_v49  ;;  %v16249_v23 = vpop.f32.mrb[77].mxu1  ;;  %v7055_v6 = vsel %vm6940_vm2, %v19594_v49, -inf }
 0x570   : > { %7047 = vmax.xlane.f32.xlu1 %v7046_v62  ;;  %v16232_v46 = vpop.f32.mrb[83].mxu0  ;;  %7056 = vmax.xlane.f32.xlu0 %v7055_v6 }
 0x571   : > { %v7201_v10 = vmul.f32 1.442695, %v7135_v30 }
 0x572   : > { %v6946_v42 = vpop.xlane.xlu1 %6945 }
 0x573   : > { %v7134_v59 = vsub.f32 %v19351_v41, %v6946_v42  ;;  %17184 = vpow2.f32 %v7201_v10  ;;  %v5787_v41 = vpop.f32.mrb[78].mxu1  ;;  %v19600_v30 = vpop.f32.mrb[84].mxu0 }
 0x574   : > { %v16250_v42 = vpop.f32.mrb[79].mxu1  ;;  %v16243_v15 = vpop.f32.mrb[85].mxu0  ;;  %v7052_v28 = vsel %vm6940_vm2, %v19600_v30, -inf }
 0x575   : > { %v7199_v17 = vmul.f32 1.442695, %v7134_v59  ;;  %7053 = vmax.xlane.f32.xlu1 %v7052_v28  ;;  %v5741_v10 = vpop.f32.mrb[86].mxu0  ;;  %v19608_v44 = vpop.f32.mrb[80].mxu1 }
 0x576   : > { %v16244_v59 = vpop.f32.mrb[87].mxu0  ;;  %21955 = vst [vmem:[#allocation59_spill] sm:$0xff] %v19608_v44  ;;  %v16261_v46 = vpop.f32.mrb[81].mxu1 }
 0x577   : > { %17186 = vpow2.f32 %v7199_v17  ;;  %v7061_v17 = vsel %vm6940_vm2, %v19608_v44, -inf  ;;  %v5879_v6 = vpop.f32.mrb[82].mxu1 }
 0x578   : > { %7062 = vmax.xlane.f32.xlu0 %v7061_v17  ;;  %v16262_v42 = vpop.f32.mrb[83].mxu1 }
 0x579   : > { %v19598_v40 = vpop.eup %17182 }
 0x57a   : > { %21953 = vst [vmem:[#allocation57_spill] sm:$0xff] %v19598_v40  ;;  %v7325_v23 = vsel %vm6940_vm2, %v19598_v40, 0.0 }
 0x57b   : > { %7326 = vadd.xlane.f32.xlu1 %v7325_v23  ;;  %v19612_v41 = vpop.f32.mrb[88].mxu0 }
 0x57c   : > { %21956 = vst [vmem:[#allocation60_spill] sm:$0xff] %v19612_v41  ;;  %v16255_v15 = vpop.f32.mrb[89].mxu0  ;;  %v7058_v10 = vsel %vm6940_vm2, %v19612_v41, -inf }
 0x57d   : > { %v19606_v62 = vpop.eup %17184  ;;  %v5833_v12 = vpop.f32.mrb[90].mxu0 }
 0x57e   : > { %21954 = vst [vmem:[#allocation58_spill] sm:$0xff] %v19606_v62  ;;  %v7331_v28 = vsel %vm6940_vm2, %v19606_v62, 0.0  ;;  %v16256_v23 = vpop.f32.mrb[91].mxu0  ;;  %v19622_v17 = vpop.f32.mrb[84].mxu1 }
 0x57f   : > { %7059 = vmax.xlane.f32.xlu1 %v7058_v10  ;;  %7332 = vadd.xlane.f32.xlu0 %v7331_v28  ;;  %21958 = vst [vmem:[#allocation62_spill] sm:$0xff] %v19622_v17  ;;  %v16273_v6 = vpop.f32.mrb[85].mxu1  ;;  %v7067_v42 = vsel %vm6940_vm2, %v19622_v17, -inf }
 0x580   : > { %v5971_v15 = vpop.f32.mrb[86].mxu1 }
 0x581   : > { %v19618_v59 = vpop.eup %17186  ;;  %v16274_v25 = vpop.f32.mrb[87].mxu1 }
 0x582   : > { %21957 = vst [vmem:[#allocation61_spill] sm:$0xff] %v19618_v59  ;;  %v7328_v46 = vsel %vm6940_vm2, %v19618_v59, 0.0 }
 0x583   : > { %7068 = vmax.xlane.f32.xlu1 %v7067_v42  ;;  %v19626_v33 = vpop.f32.mrb[92].mxu0  ;;  %7329 = vadd.xlane.f32.xlu0 %v7328_v46 }
 0x584   : > { %v16267_v22 = vpop.f32.mrb[93].mxu0 }
 0x585   : > { %v5925_v12 = vpop.f32.mrb[94].mxu0  ;;  %v19628_v23 = vpop.f32.mrb[88].mxu1 }
 0x586   : > { %v16268_v10 = vpop.f32.mrb[95].mxu0  ;;  %v16285_v28 = vpop.f32.mrb[89].mxu1 }
 0x587   : > { %v6063_v21 = vpop.f32.mrb[90].mxu1 }
 0x588   : > { %v16286_v31 = vpop.f32.mrb[91].mxu1 }
 0x589   : > { %v6955_v31 = vpop.xlane.xlu1 %6954 }
 0x58b   : > { %v19630_v7 = vpop.f32.mrb[96].mxu0 }
 0x58c   : > { %v16279_v6 = vpop.f32.mrb[97].mxu0 }
 0x58d   : > { %v6017_v24 = vpop.f32.mrb[98].mxu0  ;;  %v19632_v17 = vpop.f32.mrb[92].mxu1 }
 0x58e   : > { %v16280_v62 = vpop.f32.mrb[99].mxu0  ;;  %21959 = vst [vmem:[#allocation63_spill] sm:$0xff] %v19632_v17  ;;  %v16297_v42 = vpop.f32.mrb[93].mxu1 }
 0x58f   : > { %v6155_v15 = vpop.f32.mrb[94].mxu1 }
 0x590   : > { %v16298_v25 = vpop.f32.mrb[95].mxu1 }
 0x593   : > { %v19634_v59 = vpop.f32.mrb[100].mxu0 }
 0x594   : > { %3139 = vrot.lane.b32.xlu1 %v18529_v26, %s17879_s2  ;;  %v16291_v22 = vpop.f32.mrb[101].mxu0 }
 0x595   : > { %v6109_v46 = vpop.f32.mrb[102].mxu0  ;;  %v19638_v21 = vpop.f32.mrb[96].mxu1  ;;  %v7137_v22 = vsub.f32 %v19361_v1, %v6955_v31 }
 0x596   : > { %v16292_v12 = vpop.f32.mrb[103].mxu0  ;;  %21960 = vst [vmem:[#allocation64_spill] sm:$0xff] %v19638_v21  ;;  %v16309_v24 = vpop.f32.mrb[97].mxu1 }
 0x597   : > { %v6247_v62 = vpop.f32.mrb[98].mxu1  ;;  %v6961_v46 = vpop.xlane.xlu1 %6960  ;;  %v7205_v24 = vmul.f32 1.442695, %v7137_v22 }
 0x598   : > { %v16310_v28 = vpop.f32.mrb[99].mxu1  ;;  %v7139_v62 = vsub.f32 %v19402_v54, %v6961_v46 }
 0x599   : > { %3127 = vrot.lane.b32.xlu0 %v18529_v26, %s17881_s30  ;;  %v6952_v28 = vpop.xlane.xlu0 %6951  ;;  %17188 = vpow2.f32 %v7205_v24 }
 0x59b   : > { %v19642_v10 = vpop.f32.mrb[104].mxu0  ;;  %v6967_v1 = vpop.xlane.xlu1 %6966 }
 0x59c   : > { %21961 = vst [vmem:[#allocation65_spill] sm:$0xff] %v19642_v10  ;;  %v16303_v6 = vpop.f32.mrb[105].mxu0  ;;  %v7141_v54 = vsub.f32 %v19442_v11, %v6967_v1 }
 0x59d   : > { %v6201_v42 = vpop.f32.mrb[106].mxu0  ;;  %v19644_v25 = vpop.f32.mrb[100].mxu1 }
 0x59e   : > { %v16304_v15 = vpop.f32.mrb[107].mxu0  ;;  %21962 = vst [vmem:[#allocation66_spill] sm:$0xff] %v19644_v25  ;;  %v16321_v12 = vpop.f32.mrb[101].mxu1  ;;  %v7136_v42 = vsub.f32 %v19392_v56, %v6952_v28  ;;  %v7213_v24 = vmul.f32 1.442695, %v7141_v54 }
 0x59f   : > { %v6339_v44 = vpop.f32.mrb[102].mxu1  ;;  %v7209_v15 = vmul.f32 1.442695, %v7139_v62  ;;  %v6958_v22 = vpop.xlane.xlu0 %6957 }
 0x5a0   : > { %v16322_v40 = vpop.f32.mrb[103].mxu1  ;;  %v7138_v56 = vsub.f32 %v19421_v27, %v6958_v22  ;;  %v6973_v62 = vpop.xlane.xlu1 %6972  ;;  %v7064_v27 = vsel %vm6940_vm2, %v19626_v33, -inf }
 0x5a1   : > { %17190 = vpow2.f32 %v7209_v15  ;;  %v7143_v11 = vsub.f32 %v19462_v19, %v6973_v62 }
 0x5a3   : > { %v19647_v49 = vpop.f32.mrb[108].mxu0 }
 0x5a4   : > { %v16315_v26 = vpop.f32.mrb[109].mxu0 }
 0x5a5   : > { %v6293_v41 = vpop.f32.mrb[110].mxu0  ;;  %v19650_v6 = vpop.f32.mrb[104].mxu1 }
 0x5a6   : > { %v16316_v58 = vpop.f32.mrb[111].mxu0  ;;  %21963 = vst [vmem:[#allocation67_spill] sm:$0xff] %v19650_v6  ;;  %v16333_v31 = vpop.f32.mrb[105].mxu1  ;;  %v7203_v41 = vmul.f32 1.442695, %v7136_v42 }
 0x5a7   : > { %v6431_v12 = vpop.f32.mrb[106].mxu1 }
 0x5a8   : > { %v16334_v4 = vpop.f32.mrb[107].mxu1  ;;  %17192 = vpow2.f32 %v7203_v41 }
 0x5a9   : > { %v19661_v4 = vpop.eup %17188  ;;  %17194 = vpow2.f32 %v7213_v24  ;;  %v7217_v24 = vmul.f32 1.442695, %v7143_v11 }
 0x5aa   : > { %v7337_v41 = vsel %vm6940_vm2, %v19661_v4, 0.0 }
 0x5ab   : > { %v19653_v44 = vpop.f32.mrb[112].mxu0  ;;  %v19668_v54 = vpop.eup %17190 }
 0x5ac   : > { %v16327_v40 = vpop.f32.mrb[113].mxu0  ;;  %21964 = vst [vmem:[#allocation68_spill] sm:$0xff] %v19668_v54 }
 0x5ad   : > { %v6385_v26 = vpop.f32.mrb[114].mxu0 }
 0x5ae   : > { %v16328_v58 = vpop.f32.mrb[115].mxu0  ;;  %v7207_v26 = vmul.f32 1.442695, %v7138_v56 }
 0x5af   : > { %v6964_v58 = vpop.xlane.xlu0 %6963 }
 0x5b0   : > { %17196 = vpow2.f32 %v7207_v26  ;;  %v7140_v56 = vsub.f32 %v19444_v43, %v6964_v58 }
 0x5b1   : > { %17198 = vpow2.f32 %v7217_v24 }
 0x5b2   : > { %v19656_v46 = vpop.f32.mrb[108].mxu1  ;;  %v7211_v11 = vmul.f32 1.442695, %v7140_v56 }
 0x5b3   : > { %v16345_v28 = vpop.f32.mrb[109].mxu1  ;;  %v6970_v26 = vpop.xlane.xlu0 %6969 }
 0x5b4   : > { %v6523_v31 = vpop.f32.mrb[110].mxu1  ;;  %v19659_v12 = vpop.f32.mrb[116].mxu0  ;;  %17200 = vpow2.f32 %v7211_v11  ;;  %v7142_v56 = vsub.f32 %v19470_v18, %v6970_v26 }
 0x5b5   : > { %v16346_v40 = vpop.f32.mrb[111].mxu1  ;;  %v16339_v42 = vpop.f32.mrb[117].mxu0 }
 0x5b6   : > { %v6477_v15 = vpop.f32.mrb[118].mxu0  ;;  %v6979_v28 = vpop.xlane.xlu1 %6978  ;;  %v7073_v40 = vsel %vm6940_vm2, %v19628_v23, -inf  ;;  %v7343_v42 = vsel %vm6940_vm2, %v19668_v54, 0.0  ;;  %v7215_v18 = vmul.f32 1.442695, %v7142_v56 }
 0x5b7   : > { %v16340_v1 = vpop.f32.mrb[119].mxu0  ;;  %v19679_v15 = vpop.eup %17192  ;;  %v7145_v58 = vsub.f32 %v19476_v57, %v6979_v28 }
 0x5b8   : > { %7065 = vmax.xlane.f32.xlu1 %v7064_v27  ;;  %7338 = vadd.xlane.f32.xlu0 %v7337_v41  ;;  %21965 = vst [vmem:[#allocation69_spill] sm:$0xff] %v19679_v15  ;;  %v19686_v54 = vpop.eup %17194 }
 0x5b9   : > { %21966 = vst [vmem:[#allocation70_spill] sm:$0xff] %v19686_v54  ;;  %v7221_v24 = vmul.f32 1.442695, %v7145_v58 }
 0x5ba   : > { %v19670_v22 = vpop.f32.mrb[112].mxu1 }
 0x5bb   : > { %v16357_v19 = vpop.f32.mrb[113].mxu1  ;;  %17202 = vpow2.f32 %v7221_v24 }
 0x5bc   : > { %v6615_v62 = vpop.f32.mrb[114].mxu1  ;;  %v19673_v31 = vpop.f32.mrb[120].mxu0  ;;  %7074 = vmax.xlane.f32.xlu1 %v7073_v40  ;;  %7344 = vadd.xlane.f32.xlu0 %v7343_v42  ;;  %v7334_v19 = vsel %vm6940_vm2, %v19679_v15, 0.0  ;;  %17204 = vpow2.f32 %v7215_v18 }
 0x5bd   : > { %v16358_v1 = vpop.f32.mrb[115].mxu1  ;;  %v16351_v27 = vpop.f32.mrb[121].mxu0  ;;  %v7070_v62 = vsel %vm6940_vm2, %v19630_v7, -inf }
 0x5be   : > { %v6569_v43 = vpop.f32.mrb[122].mxu0  ;;  %v6976_v40 = vpop.xlane.xlu0 %6975 }
 0x5bf   : > { %v16352_v41 = vpop.f32.mrb[123].mxu0  ;;  %v6985_v42 = vpop.xlane.xlu1 %6984  ;;  %v7079_v43 = vsel %vm6940_vm2, %v19632_v17, -inf  ;;  %v7076_v17 = vsel %vm6940_vm2, %v19634_v59, -inf  ;;  %v7144_v56 = vsub.f32 %v19483_v8, %v6976_v40 }
 0x5c0   : > { %7335 = vadd.xlane.f32.xlu1 %v7334_v19  ;;  %7071 = vmax.xlane.f32.xlu0 %v7070_v62  ;;  %v7349_v41 = vsel %vm6940_vm2, %v19686_v54, 0.0  ;;  %v19697_v19 = vpop.eup %17196  ;;  %v7147_v26 = vsub.f32 %v19487_v36, %v6985_v42 }
 0x5c1   : > { %21969 = vst [vmem:[#allocation73_spill] sm:$0xff] %v19697_v19  ;;  %v19704_v54 = vpop.eup %17198  ;;  %v7219_v8 = vmul.f32 1.442695, %v7144_v56 }
 0x5c2   : > { %v19688_v1 = vpop.f32.mrb[116].mxu1  ;;  %v6982_v58 = vpop.xlane.xlu0 %6981  ;;  %21970 = vst [vmem:[#allocation74_spill] sm:$0xff] %v19704_v54  ;;  %v7225_v24 = vmul.f32 1.442695, %v7147_v26 }
 0x5c3   : > { %21967 = vst [vmem:[#allocation71_spill] sm:$0xff] %v19688_v1  ;;  %v16369_v57 = vpop.f32.mrb[117].mxu1 }
 0x5c4   : > { %v6707_v28 = vpop.f32.mrb[118].mxu1  ;;  %v19691_v27 = vpop.f32.mrb[124].mxu0  ;;  %7080 = vmax.xlane.f32.xlu1 %v7079_v43  ;;  %7350 = vadd.xlane.f32.xlu0 %v7349_v41  ;;  %17206 = vpow2.f32 %v7225_v24 }
 0x5c5   : > { %21968 = vst [vmem:[#allocation72_spill] sm:$0xff] %v19691_v27  ;;  %v16370_v62 = vpop.f32.mrb[119].mxu1  ;;  %v16363_v15 = vpop.f32.mrb[125].mxu0  ;;  %v7340_v28 = vsel %vm6940_vm2, %v19697_v19, 0.0  ;;  %17208 = vpow2.f32 %v7219_v8 }
 0x5c6   : > { %v6661_v11 = vpop.f32.mrb[126].mxu0  ;;  %v6991_v43 = vpop.xlane.xlu1 %6990 }
 0x5c7   : > { %v16364_v57 = vpop.f32.mrb[127].mxu0  ;;  %v6988_v36 = vpop.xlane.xlu0 %6987  ;;  %v7085_v11 = vsel %vm6940_vm2, %v19638_v21, -inf  ;;  %v7149_v40 = vsub.f32 %v19495_v50, %v6991_v43 }
 0x5c8   : > { %7341 = vadd.xlane.f32.xlu1 %v7340_v28  ;;  %7077 = vmax.xlane.f32.xlu0 %v7076_v17  ;;  %v7355_v57 = vsel %vm6940_vm2, %v19704_v54, 0.0  ;;  %v19715_v28 = vpop.eup %17200 }
 0x5c9   : > { %v19722_v21 = vpop.eup %17202  ;;  %v7229_v56 = vmul.f32 1.442695, %v7149_v40 }
 0x5ca   : > { %v19706_v15 = vpop.f32.mrb[120].mxu1  ;;  %21972 = vst [vmem:[#allocation76_spill] sm:$0xff] %v19722_v21  ;;  %v6997_v24 = vpop.xlane.xlu1 %6996 }
 0x5cb   : > { %21971 = vst [vmem:[#allocation75_spill] sm:$0xff] %v19706_v15  ;;  %v16381_v42 = vpop.f32.mrb[121].mxu1  ;;  %v6994_v54 = vpop.xlane.xlu0 %6993  ;;  %17210 = vpow2.f32 %v7229_v56 }
 0x5cc   : > { %v6799_v41 = vpop.f32.mrb[122].mxu1  ;;  %v19709_v62 = vpop.f32.mrb[128].mxu0  ;;  %7086 = vmax.xlane.f32.xlu1 %v7085_v11  ;;  %7356 = vadd.xlane.f32.xlu0 %v7355_v57  ;;  %v7346_v42 = vsel %vm6940_vm2, %v19715_v28, 0.0 }
 0x5cd   : > { %v16382_v17 = vpop.f32.mrb[123].mxu1  ;;  %v16375_v19 = vpop.f32.mrb[129].mxu0  ;;  %v7082_v41 = vsel %vm6940_vm2, %v19642_v10, -inf }
 0x5ce   : > { %v6753_v18 = vpop.f32.mrb[130].mxu0  ;;  %v7146_v19 = vsub.f32 %v19491_v0, %v6982_v58  ;;  %v7091_v17 = vsel %vm6940_vm2, %v19644_v25, -inf  ;;  %v7151_v58 = vsub.f32 %v19503_v35, %v6997_v24  ;;  %v7088_v25 = vsel %vm6940_vm2, %v19647_v49, -inf }
 0x5cf   : > { %v16376_v26 = vpop.f32.mrb[131].mxu0  ;;  %v7361_v18 = vsel %vm6940_vm2, %v19722_v21, 0.0  ;;  %v7097_v35 = vsel %vm6940_vm2, %v19650_v6, -inf }
 0x5d0   : > { %7347 = vadd.xlane.f32.xlu1 %v7346_v42  ;;  %7083 = vmax.xlane.f32.xlu0 %v7082_v41  ;;  %v19733_v26 = vpop.eup %17204  ;;  %v7000_v42 = vpop.xlane.xlu0 %6999  ;;  %v7223_v0 = vmul.f32 1.442695, %v7146_v19  ;;  %v7233_v19 = vmul.f32 1.442695, %v7151_v58 }
 0x5d1   : > { %v19740_v10 = vpop.eup %17206 }
 0x5d2   : > { %v19724_v11 = vpop.f32.mrb[124].mxu1  ;;  %17212 = vpow2.f32 %v7223_v0  ;;  %v7367_v24 = vsel %vm6940_vm2, %v19740_v10, 0.0 }
 0x5d3   : > { %21973 = vst [vmem:[#allocation77_spill] sm:$0xff] %v19724_v11  ;;  %v16393_v50 = vpop.f32.mrb[125].mxu1  ;;  %17214 = vpow2.f32 %v7233_v19 }
 0x5d4   : > { %v6891_v43 = vpop.f32.mrb[126].mxu1  ;;  %v19727_v57 = vpop.f32.mrb[132].mxu0  ;;  %7092 = vmax.xlane.f32.xlu1 %v7091_v17  ;;  %7362 = vadd.xlane.f32.xlu0 %v7361_v18  ;;  %v7148_v17 = vsub.f32 %v19499_v39, %v6988_v36  ;;  %v7152_v36 = vsub.f32 %v19515_v16, %v7000_v42  ;;  %v7103_v16 = vsel %vm6940_vm2, %v19656_v46, -inf }
 0x5d5   : > { %v16394_v41 = vpop.f32.mrb[127].mxu1  ;;  %v16387_v8 = vpop.f32.mrb[133].mxu0  ;;  %v7352_v43 = vsel %vm6940_vm2, %v19733_v26, 0.0 }
 0x5d6   : > { %v6845_v40 = vpop.f32.mrb[134].mxu0  ;;  %v7006_v21 = vpop.xlane.xlu0 %7005 }
 0x5d7   : > { %v16388_v50 = vpop.f32.mrb[135].mxu0  ;;  %v19749_v18 = vpop.eup %17208  ;;  %v7227_v40 = vmul.f32 1.442695, %v7148_v17 }
 0x5d8   : > { %7353 = vadd.xlane.f32.xlu1 %v7352_v43  ;;  %7089 = vmax.xlane.f32.xlu0 %v7088_v25  ;;  %v7150_v25 = vsub.f32 %v19507_v45, %v6994_v54  ;;  %v7003_v39 = vpop.xlane.xlu1 %7002  ;;  %v7358_v50 = vsel %vm6940_vm2, %v19749_v18, 0.0  ;;  %v7094_v43 = vsel %vm6940_vm2, %v19653_v44, -inf  ;;  %v19757_v6 = vpop.eup %17210  ;;  %v7235_v54 = vmul.f32 1.442695, %v7152_v36 }
 0x5d9   : > { %17216 = vpow2.f32 %v7227_v40  ;;  %v7153_v45 = vsub.f32 %v19511_v9, %v7003_v39  ;;  %v7373_v42 = vsel %vm6940_vm2, %v19757_v6, 0.0  ;;  %v7154_v9 = vsub.f32 %v19523_v32, %v7006_v21 }
 0x5da   : > { %v7012_v41 = vpop.xlane.xlu0 %7011  ;;  %v7100_v40 = vsel %vm6940_vm2, %v19659_v12, -inf }
 0x5dc   : > { %v19743_v56 = vpop.f32.mrb[136].mxu0  ;;  %7098 = vmax.xlane.f32.xlu1 %v7097_v35  ;;  %7368 = vadd.xlane.f32.xlu0 %v7367_v24  ;;  %v7231_v35 = vmul.f32 1.442695, %v7150_v25  ;;  %v7009_v17 = vpop.xlane.xlu1 %7008  ;;  %v7237_v25 = vmul.f32 1.442695, %v7153_v45  ;;  %v7156_v45 = vsub.f32 %v19531_v29, %v7012_v41 }
 0x5dd   : > { %v16399_v8 = vpop.f32.mrb[137].mxu0  ;;  %v19764_v24 = vpop.eup %17212 }
 0x5de   : > { %v6937_v0 = vpop.f32.mrb[138].mxu0  ;;  %v7021_v19 = vpop.xlane.xlu0 %7020  ;;  %17218 = vpow2.f32 %v7231_v35  ;;  %v7155_v8 = vsub.f32 %v19519_v34, %v7009_v17  ;;  %v7109_v34 = vsel %vm6940_vm2, %v19670_v22, -inf }
 0x5df   : > { %v16400_v58 = vpop.f32.mrb[139].mxu0  ;;  %17220 = vpow2.f32 %v7235_v54  ;;  %v7364_v0 = vsel %vm6940_vm2, %v19764_v24, 0.0  ;;  %v19772_v39 = vpop.eup %17214 }
 0x5e0   : > { %7359 = vadd.xlane.f32.xlu1 %v7358_v50  ;;  %7095 = vmax.xlane.f32.xlu0 %v7094_v43  ;;  %v7241_v58 = vmul.f32 1.442695, %v7155_v8  ;;  %17222 = vpow2.f32 %v7237_v25  ;;  %v7239_v50 = vmul.f32 1.442695, %v7154_v9  ;;  %v7015_v43 = vpop.xlane.xlu1 %7014  ;;  %v7379_v32 = vsel %vm6940_vm2, %v19772_v39, 0.0 }
 0x5e1   : > { %v7157_v35 = vsub.f32 %v19527_v14, %v7015_v43  ;;  %v7106_v8 = vsel %vm6940_vm2, %v19673_v31, -inf }
 0x5e2   : > { %v7018_v36 = vpop.xlane.xlu0 %7017  ;;  %17224 = vpow2.f32 %v7241_v58 }
 0x5e3   : > { %v19778_v21 = vpop.eup %17216  ;;  %17226 = vpow2.f32 %v7239_v50  ;;  %v7245_v9 = vmul.f32 1.442695, %v7157_v35  ;;  %v7159_v50 = vsub.f32 %v19535_v20, %v7021_v19  ;;  %v7158_v43 = vsub.f32 %v19539_v5, %v7018_v36 }
 0x5e4   : > { %7104 = vmax.xlane.f32.xlu1 %v7103_v16  ;;  %7374 = vadd.xlane.f32.xlu0 %v7373_v42  ;;  %v7024_v17 = vpop.xlane.xlu1 %7023  ;;  %v7370_v42 = vsel %vm6940_vm2, %v19778_v21, 0.0  ;;  %v7112_v35 = vsel %vm6940_vm2, %v19691_v27, -inf }
 0x5e5   : > { %17228 = vpow2.f32 %v7245_v9  ;;  %v7249_v9 = vmul.f32 1.442695, %v7159_v50 }
 0x5e6   : > { %v7027_v54 = vpop.xlane.xlu0 %7026 }
 0x5e7   : > { %v7161_v36 = vsub.f32 %v19543_v3, %v7027_v54 }
 0x5e8   : > { %7365 = vadd.xlane.f32.xlu1 %v7364_v0  ;;  %7101 = vmax.xlane.f32.xlu0 %v7100_v40  ;;  %v19782_v16 = vpop.eup %17218  ;;  %v7243_v0 = vmul.f32 1.442695, %v7156_v45  ;;  %v7030_v14 = vpop.xlane.xlu1 %7029 }
 0x5e9   : > { %v19788_v25 = vpop.eup %17220  ;;  %v7376_v29 = vsel %vm6940_vm2, %v19782_v16, 0.0  ;;  %v7253_v27 = vmul.f32 1.442695, %v7161_v36 }
 0x5ea   : > { %v7382_v41 = vsel %vm6940_vm2, %v19788_v25, 0.0  ;;  %v19794_v40 = vpop.eup %17222  ;;  %v7033_v58 = vpop.xlane.xlu0 %7032  ;;  %17230 = vpow2.f32 %v7243_v0 }
 0x5eb   : > { %v7385_v45 = vsel %vm6940_vm2, %v19794_v40, 0.0  ;;  %17232 = vpow2.f32 %v7249_v9  ;;  %v7163_v54 = vsub.f32 %v19551_v55, %v7033_v58 }
 0x5ec   : > { %7110 = vmax.xlane.f32.xlu1 %v7109_v34  ;;  %7380 = vadd.xlane.f32.xlu0 %v7379_v32  ;;  %v7036_v34 = vpop.xlane.xlu1 %7035  ;;  %v19798_v32 = vpop.eup %17224 }
 0x5ed   : > { %v7391_v19 = vsel %vm6940_vm2, %v19798_v32, 0.0  ;;  %v7257_v36 = vmul.f32 1.442695, %v7163_v54  ;;  %v7164_v58 = vsub.f32 %v19567_v48, %v7036_v34 }
 0x5ef   : > { %v7259_v54 = vmul.f32 1.442695, %v7164_v58 }
 0x5f0   : > { %7371 = vadd.xlane.f32.xlu1 %v7370_v42  ;;  %7107 = vmax.xlane.f32.xlu0 %v7106_v8  ;;  %v19804_v42 = vpop.eup %17226  ;;  %v7039_v8 = vpop.xlane.xlu0 %7038 }
 0x5f1   : > { %21974 = vst [vmem:[#allocation78_spill] sm:$0xff] %v19804_v42  ;;  %v7388_v5 = vsel %vm6940_vm2, %v19804_v42, 0.0  ;;  %v19814_v50 = vpop.eup %17228 }
 0x5f2   : > { %v19806_v20 = vpop.xlane.xlu1 %7041 }
 0x5f4   : > { %7377 = vadd.xlane.f32.xlu1 %v7376_v29  ;;  %7383 = vadd.xlane.f32.xlu0 %v7382_v41  ;;  %v7247_v29 = vmul.f32 1.442695, %v7158_v43  ;;  %v7045_v0 = vpop.xlane.xlu0 %7044  ;;  %v7160_v41 = vsub.f32 %v19547_v51, %v7024_v17  ;;  %v7115_v43 = vsel %vm6940_vm2, %v19688_v1, -inf  ;;  %v19820_v42 = vpop.eup %17230  ;;  %v7162_v17 = vsub.f32 %v19555_v61, %v7030_v14 }
 0x5f5   : > { %v19834_v14 = vpop.eup %17232 }
 0x5f6   : > { %17234 = vpow2.f32 %v7247_v29  ;;  %v7251_v51 = vmul.f32 1.442695, %v7160_v41  ;;  %v7394_v29 = vsel %vm6940_vm2, %v19820_v42, 0.0  ;;  %v7255_v55 = vmul.f32 1.442695, %v7162_v17 }
 0x5f7   : > { %17236 = vpow2.f32 %v7253_v27  ;;  %v7121_v41 = vsel %vm6940_vm2, %v19706_v15, -inf  ;;  %v7124_v27 = vsel %vm6940_vm2, %v19727_v57, -inf }
 0x5f8   : > { %7113 = vmax.xlane.f32.xlu0 %v7112_v35  ;;  %7386 = vadd.xlane.f32.xlu1 %v7385_v45  ;;  %v7118_v45 = vsel %vm6940_vm2, %v19709_v62, -inf  ;;  %v19822_v3 = vpop.xlane.xlu0 %7050  ;;  %17238 = vpow2.f32 %v7251_v51 }
 0x5fc   : > { %7389 = vadd.xlane.f32.xlu0 %v7388_v5  ;;  %7392 = vadd.xlane.f32.xlu1 %v7391_v19  ;;  %v7397_v5 = vsel %vm6940_vm2, %v19814_v50, 0.0 }
 0x5fd   : > { %v7048_v35 = vpop.xlane.xlu1 %7047  ;;  %v19830_v19 = vpop.xlane.xlu0 %7056 }
 0x5fe   : > { %v7168_v51 = vsub.f32 %v19589_v13, %v7048_v35  ;;  %v7127_v13 = vsel %vm6940_vm2, %v19724_v11, -inf }
 0x600   : > { %7116 = vmax.xlane.f32.xlu0 %v7115_v43  ;;  %7119 = vmax.xlane.f32.xlu1 %v7118_v45  ;;  %v7165_v43 = vsub.f32 %v19561_v53, %v7039_v8  ;;  %v19840_v45 = vpop.eup %17234  ;;  %v21975_v53 = vcombine.high %v18898_v63, %v18889_v2  ;;  %v7167_v8 = vsub.f32 %v19573_v60, %v7045_v0  ;;  %v7267_v35 = vmul.f32 1.442695, %v7168_v51 }
 0x601   : > { %v7400_v17 = vsel %vm6940_vm2, %v19840_v45, 0.0  ;;  %v19855_v63 = vpop.eup %17236  ;;  %v7166_v60 = vsub.f32 %v19580_v52, %v19806_v20  ;;  %v21978_v20 = vld [vmem:[#allocation50_spill] sm:$0xff] }
 0x602   : > { %v7054_v9 = vpop.xlane.xlu1 %7053  ;;  %v3194_v48 = vrot.slane %v21975_v53, %v18561_v47  ;;  %v7261_v34 = vmul.f32 1.442695, %v7165_v43  ;;  %v19861_v0 = vpop.eup %17238  ;;  %v7409_v52 = vsel %vm6940_vm2, %v19855_v63, 0.0 }
 0x603   : > { %21977 = vst [vmem:[#allocation79_spill] sm:$0xff] %v19861_v0  ;;  %v7170_v43 = vsub.f32 %v19600_v30, %v7054_v9 }
 0x604   : > { %7395 = vadd.xlane.f32.xlu0 %v7394_v29  ;;  %7398 = vadd.xlane.f32.xlu1 %v7397_v5  ;;  %v7403_v5 = vsel %vm6940_vm2, %v19834_v14, 0.0  ;;  %v19867_v53 = vrot.slane %v3194_v48, %v18544_v37 }
 0x605   : > { %v19842_v29 = vpop.xlane.xlu0 %7062 }
 0x608   : > { %v7327_v61 = vpop.xlane.xlu1 %7326  ;;  %7122 = vmax.xlane.f32.xlu0 %v7121_v41  ;;  %7125 = vmax.xlane.f32.xlu1 %v7124_v27  ;;  %v21976_v41 = vmov 0.0  }
 0x609   : > { %17240 = vrcp.f32 %v7327_v61  ;;  %v3443_v2 = vcombine.high %v3194_v48, %v21976_v41  ;;  %v7406_v48 = vsel %vm6940_vm2, %v19861_v0, 0.0 }
 0x60a   : > { %17242 = vpow2.f32 %v7257_v36  ;;  %v7265_v36 = vmul.f32 1.442695, %v7167_v8 }
 0x60b   : > { %17244 = vpow2.f32 %v7255_v55  ;;  %v7130_v55 = vsel %vm6940_vm2, %v19743_v56, -inf  ;;  %v19876_v9 = vrot.slane %v3443_v2, %v18544_v37 }
 0x60c   : > { %v7333_v61 = vpop.xlane.xlu0 %7332  ;;  %7401 = vadd.xlane.f32.xlu0 %v7400_v17  ;;  %7404 = vadd.xlane.f32.xlu1 %v7403_v5  ;;  %17246 = vpow2.f32 %v7261_v34  ;;  %v7060_v58 = vpop.xlane.xlu1 %7059  ;;  %v21979_v34 = vcombine.high %v19098_v38, %v21978_v20  ;;  %v7263_v17 = vmul.f32 1.442695, %v7166_v60  ;;  %v21982_v38 = vld [vmem:[#allocation57_spill] sm:$0xff]  ;;  %v21984_v60 = vld [vmem:[#allocation56_spill] sm:$0xff] }
 0x60d   : > { %17248 = vpow2.f32 %v7259_v54  ;;  %v21980_v54 = vld [vmem:[#allocation55_spill] sm:$0xff] }
 0x60e   : > { %17250 = vrcp.f32 %v7333_v61  ;;  %v3433_v30 = vrot.slane %v21979_v34, %v18561_v47  ;;  %v7169_v51 = vsub.f32 %v21980_v54, %v19822_v3  ;;  %v7271_v61 = vmul.f32 1.442695, %v7170_v43 }
 0x60f   : > { %v3451_v3 = vcombine.low %v19867_v53, %v19876_v9  ;;  %v7171_v34 = vsub.f32 %v21984_v60, %v19830_v19 }
 0x610   : > { %v7330_v27 = vpop.xlane.xlu0 %7329  ;;  %7128 = vmax.xlane.f32.xlu0 %v7127_v13  ;;  %7131 = vmax.xlane.f32.xlu1 %v7130_v55  ;;  %v21981_v13 = vld [vmem:[#allocation60_spill] sm:$0xff]  ;;  %v3933_v2 = vpack.c.bf16 %v3433_v30, %v3433_v30 }
 0x611   : > { %17252 = vrcp.f32 %v7330_v27  ;;  %v7172_v55 = vsub.f32 %v21981_v13, %v7060_v58  ;;  %v21987_v13 = vld [vmem:[#allocation59_spill] sm:$0xff] }
 0x612   : > { %17254 = vpow2.f32 %v7265_v36  ;;  %v7269_v36 = vmul.f32 1.442695, %v7169_v51  ;;  %v3435_v51 = vcombine.high %v3433_v30, %v21976_v41  ;;  %v7807_v19 = vsel %vm7713_vm3, %v3933_v2, 0  ;;  %v7069_v30 = vpop.xlane.xlu1 %7068 }
 0x613   : > { %v17241_v8 = vpop.eup %17240  ;;  %17256 = vpow2.f32 %v7267_v35  ;;  %v7275_v58 = vmul.f32 1.442695, %v7172_v55  ;;  %v7173_v55 = vsub.f32 %v21987_v13, %v19842_v29  ;;  %v21989_v29 = vld [vmem:[#allocation61_spill] sm:$0xff] }
 0x614   : > { %v19882_v5 = vpop.eup %17242  ;;  %v7581_v27 = vmul.f32 %v17241_v8, %v21982_v38  ;;  %7410 = vadd.xlane.f32.xlu1 %v7409_v52  ;;  %7407 = vadd.xlane.f32.xlu0 %v7406_v48  ;;  %17258 = vpow2.f32 %v7263_v17  ;;  %v19904_v48 = vrot.slane %v3451_v3, %v18561_v47  ;;  %v3934_v60 = vpack.c.bf16 %v3435_v51, %v3435_v51 }
 0x615   : > { %v19886_v20 = vpop.eup %17244  ;;  %17260 = vpow2.f32 %v7271_v61  ;;  %v7415_v8 = vsel %vm6940_vm2, %v19882_v5, 0.0  ;;  %v7273_v61 = vmul.f32 1.442695, %v7171_v34  ;;  %v21990_v34 = vld [vmem:[#allocation58_spill] sm:$0xff] }
 0x616   : > { %21983 = vst [vmem:[#allocation50_spill] sm:$0xff] %v19886_v20  ;;  %v7645_v35 = vpack.c.bf16 %v7581_v27, %v7581_v27  ;;  %v19892_v43 = vpop.eup %17246  ;;  %v7412_v52 = vsel %vm6940_vm2, %v19886_v20, 0.0  ;;  %17262 = vpow2.f32 %v7269_v36  ;;  %v7853_v51 = vsel %vm7713_vm3, %v3934_v60, 0 }
 0x617   : > { %21985 = vst [vmem:[#allocation55_spill] sm:$0xff] %v19892_v43  ;;  %v19898_v54 = vpop.eup %17248  ;;  %17264 = vpow2.f32 %v7275_v58  ;;  %v7421_v27 = vsel %vm6940_vm2, %v19892_v43, 0.0  ;;  %v3935_v58 = vpack.c.bf16 %v19904_v48, %v19904_v48 }
 0x618   : > { %21986 = vst [vmem:[#allocation60_spill] sm:$0xff] %v19898_v54  ;;  %7416 = vadd.xlane.f32.xlu1 %v7415_v8  ;;  %7413 = vadd.xlane.f32.xlu0 %v7412_v52  ;;  %v17251_v17 = vpop.eup %17250  ;;  %v7418_v2 = vsel %vm6940_vm2, %v19898_v54, 0.0  ;;  %17266 = vpow2.f32 %v7273_v61  ;;  %v7277_v52 = vmul.f32 1.442695, %v7173_v55 }
 0x619   : > { %16404 = vmatmul.mubr.msk.bf16.vlgmr.msra.gmra.mrb[128].mxu1 %vm7709_vm4, %v7645_v35  ;;  %v7583_v35 = vmul.f32 %v17251_v17, %v21990_v34  ;;  %v7899_v55 = vsel %vm7713_vm3, %v3935_v58, 0 }
 0x61a   : > { %16414 = vmatpush3.bf16.msra.mxu1 %v7807_v19  ;;  %16415 = vmatprep.mubr.msk.bf16.mxu1 %vm17882_vm0, %v21976_v41  ;;  %v21992_v19 = vld [vmem:[#allocation62_spill] sm:$0xff]  ;;  %17268 = vpow2.f32 %v7277_v52 }
 0x61b   : > { %v17253_v38 = vpop.eup %17252  ;;  %16425 = vmatprep.subr.bf16.mxu1 %v21976_v41  ;;  %v7175_v13 = vsub.f32 %v21992_v19, %v7069_v30 }
 0x61c   : > { %v19915_v3 = vpop.eup %17254  ;;  %7422 = vadd.xlane.f32.xlu1 %v7421_v27  ;;  %7419 = vadd.xlane.f32.xlu0 %v7418_v2  ;;  %v7582_v36 = vmul.f32 %v17253_v38, %v21989_v29  ;;  %v7647_v38 = vpack.c.bf16 %v7583_v35, %v7583_v35 }
 0x61d   : > { %21988 = vst [vmem:[#allocation57_spill] sm:$0xff] %v19915_v3  ;;  %v19919_v8 = vpop.eup %17256  ;;  %v7427_v15 = vsel %vm6940_vm2, %v19915_v3, 0.0  ;;  %v7281_v61 = vmul.f32 1.442695, %v7175_v13 }
 0x61e   : > { %21991 = vst [vmem:[#allocation56_spill] sm:$0xff] %v19919_v8  ;;  %v7646_v11 = vpack.c.bf16 %v7582_v36, %v7582_v36  ;;  %v19926_v27 = vpop.eup %17258  ;;  %v7430_v17 = vsel %vm6940_vm2, %v19919_v8, 0.0 }
 0x61f   : > { %21993 = vst [vmem:[#allocation59_spill] sm:$0xff] %v19926_v27  ;;  %v19932_v2 = vpop.eup %17260  ;;  %17270 = vpow2.f32 %v7281_v61  ;;  %v22002_v61 = vld [vmem:[#allocation49_spill] sm:$0xff] }
 0x620   : > { %16410 = vmatmul.mubr.msk.bf16.vlgmr.msra.gmra.mrb[140].mxu0 %vm7709_vm4, %v7646_v11  ;;  %7428 = vadd.xlane.f32.xlu0 %v7427_v15  ;;  %21994 = vst [vmem:[#allocation61_spill] sm:$0xff] %v19932_v2  ;;  %v7424_v15 = vsel %vm6940_vm2, %v19926_v27, 0.0  ;;  %v19942_v11 = vpop.eup %17262  ;;  %v7436_v30 = vsel %vm6940_vm2, %v19932_v2, 0.0 }
 0x621   : > { %16420 = vmatpush3.bf16.msra.mxu0 %v7853_v51  ;;  %7431 = vadd.xlane.f32.xlu1 %v7430_v17  ;;  %21995 = vst [vmem:[#allocation58_spill] sm:$0xff] %v19942_v11  ;;  %v19947_v29 = vpop.eup %17264  ;;  %v7433_v36 = vsel %vm6940_vm2, %v19942_v11, 0.0  ;;  %v22000_v51 = vld [vmem:[#allocation48_spill] sm:$0xff]  ;;  %v22001_v17 = vld [vmem:[#allocation47_spill] sm:$0xff]  ;;  %v22013_v11 = vld [vmem:[#allocation69_spill] sm:$0xff] }
 0x622   : > { %16416 = vmatmul.mubr.msk.bf16.vlgmr.msra.gmra.mrb[132].mxu1 %vm7709_vm4, %v7647_v38  ;;  %16421 = vmatprep.mubr.msk.bf16.mxu0 %vm17882_vm0, %v21976_v41  ;;  %21996 = vst [vmem:[#allocation62_spill] sm:$0xff] %v19947_v29  ;;  %v19952_v60 = vpop.eup %17266  ;;  %v7442_v34 = vsel %vm6940_vm2, %v19947_v29, 0.0  ;;  %v3164_v38 = vcombine.high %v22001_v17, %v22000_v51  ;;  %v19974_v29 = vpop.permute.xlu1 %3139 }
 0x623   : > { %16426 = vmatpush3.bf16.msra.mxu1 %v7899_v55  ;;  %16427 = vmatprep.mubr.msk.bf16.mxu1 %vm17882_vm0, %v21976_v41  ;;  %21997 = vst [vmem:[#allocation80_spill] sm:$0xff] %v19952_v60  ;;  %v7439_v35 = vsel %vm6940_vm2, %v19952_v60, 0.0  ;;  %v22003_v55 = vld [vmem:[#allocation43_spill] sm:$0xff] }
 0x624   : > { %7425 = vadd.xlane.f32.xlu0 %v7424_v15  ;;  %16437 = vmatprep.subr.bf16.mxu1 %v21976_v41  ;;  %v19958_v58 = vpop.eup %17268  ;;  %v3148_v15 = vcombine.high %v22003_v55, %v22002_v61 }
 0x625   : > { %7437 = vadd.xlane.f32.xlu1 %v7436_v30  ;;  %16431 = vmatprep.subr.bf16.mxu0 %v21976_v41  ;;  %21998 = vst [vmem:[#allocation81_spill] sm:$0xff] %v19958_v58  ;;  %v7445_v52 = vsel %vm6940_vm2, %v19958_v58, 0.0  ;;  %v3178_v30 = vrot.slane %v3164_v38, %v18544_v37  ;;  %v3452_v38 = vcombine.high %v19867_v53, %v19876_v9 }
 0x627   : > { %v19983_v60 = vrot.slane %v3452_v38, %v18561_v47 }
 0x628   : > { %7434 = vadd.xlane.f32.xlu0 %v7433_v36  ;;  %v3162_v36 = vrot.slane %v3148_v15, %v18544_v37 }
 0x629   : > { %7443 = vadd.xlane.f32.xlu1 %v7442_v34  ;;  %v19962_v19 = vpop.eup %17270 }
 0x62a   : > { %21999 = vst [vmem:[#allocation82_spill] sm:$0xff] %v19962_v19  ;;  %v7451_v13 = vsel %vm6940_vm2, %v19962_v19, 0.0  ;;  %v3195_v34 = vcombine.low %v3162_v36, %v3178_v30 }
 0x62c   : > { %7440 = vadd.xlane.f32.xlu0 %v7439_v35  ;;  %v19972_v35 = vpop.permute.xlu0 %3127 }
 0x630   : > { %7446 = vadd.xlane.f32.xlu0 %v7445_v52  ;;  %v3203_v52 = vrot.slane %v3195_v34, %v18561_v47 }
 0x632   : > { %v3476_v17 = vcombine.high %v3203_v52, %v21976_v41 }
 0x634   : > { %7452 = vadd.xlane.f32.xlu0 %v7451_v13 }
 0x645   : > { %v7339_v2 = vpop.xlane.xlu0 %7338  ;;  %v7066_v19 = vpop.xlane.xlu1 %7065 }
 0x646   : > { %17272 = vrcp.f32 %v7339_v2  ;;  %v7174_v13 = vsub.f32 %v19626_v33, %v7066_v19  ;;  %v19986_v33 = vrot.slane %v3203_v52, %v18544_v37  ;;  %v19989_v2 = vrot.slane %v3476_v17, %v18544_v37  ;;  %v22004_v17 = vld [vmem:[#allocation63_spill] sm:$0xff] }
 0x648   : > { %v7279_v51 = vmul.f32 1.442695, %v7174_v13  ;;  %v3484_v52 = vcombine.low %v19986_v33, %v19989_v2 }
 0x649   : > { %v7345_v61 = vpop.xlane.xlu0 %7344  ;;  %v7075_v55 = vpop.xlane.xlu1 %7074 }
 0x64a   : > { %17274 = vpow2.f32 %v7279_v51  ;;  %v7177_v15 = vsub.f32 %v19628_v23, %v7075_v55  ;;  %v3196_v23 = vcombine.high %v3162_v36, %v3178_v30  ;;  %v3937_v55 = vpack.c.bf16 %v19983_v60, %v19983_v60 }
 0x64b   : > { %17276 = vrcp.f32 %v7345_v61 }
 0x64c   : > { %v7285_v58 = vmul.f32 1.442695, %v7177_v15  ;;  %v3210_v30 = vrot.slane %v3196_v23, %v18561_v47  ;;  %v3467_v23 = vcombine.high %v19904_v48, %v21976_v41 }
 0x64d   : > { %v7072_v8 = vpop.xlane.xlu0 %7071  ;;  %v7336_v34 = vpop.xlane.xlu1 %7335 }
 0x64e   : > { %17278 = vpow2.f32 %v7285_v58  ;;  %v7176_v19 = vsub.f32 %v19630_v7, %v7072_v8  ;;  %v3509_v48 = vcombine.high %v3210_v30, %v21976_v41  ;;  %v3936_v1 = vpack.c.bf16 %v3467_v23, %v3467_v23 }
 0x64f   : > { %17280 = vrcp.f32 %v7336_v34 }
 0x650   : > { %v17273_v53 = vpop.eup %17272  ;;  %v7283_v9 = vmul.f32 1.442695, %v7176_v19 }
 0x651   : > { %v7351_v13 = vpop.xlane.xlu0 %7350  ;;  %v7081_v51 = vpop.xlane.xlu1 %7080  ;;  %v7585_v61 = vmul.f32 %v17273_v53, %v19661_v4  ;;  %v7991_v4 = vsel %vm7713_vm3, %v3937_v55, 0  ;;  %v20006_v53 = vrot.slane %v3484_v52, %v18561_v47  ;;  %v22008_v55 = vld [vmem:[#allocation68_spill] sm:$0xff] }
 0x652   : > { %17282 = vpow2.f32 %v7283_v9  ;;  %v7179_v38 = vsub.f32 %v22004_v17, %v7081_v51  ;;  %v22007_v51 = vld [vmem:[#allocation45_spill] sm:$0xff] }
 0x653   : > { %17284 = vrcp.f32 %v7351_v13  ;;  %v7649_v58 = vpack.c.bf16 %v7585_v61, %v7585_v61  ;;  %v22006_v13 = vld [vmem:[#allocation51_spill] sm:$0xff] }
 0x654   : > { %v19998_v7 = vpop.eup %17274  ;;  %v7289_v8 = vmul.f32 1.442695, %v7179_v38  ;;  %v3211_v61 = vcombine.low %v22007_v51, %v22006_v13  ;;  %v22010_v38 = vld [vmem:[#allocation53_spill] sm:$0xff] }
 0x655   : > { %22005 = vst [vmem:[#allocation48_spill] sm:$0xff] %v19998_v7  ;;  %v17277_v15 = vpop.eup %17276  ;;  %v7078_v36 = vpop.xlane.xlu0 %7077  ;;  %16428 = vmatmul.mubr.msk.bf16.vlgmr.msra.gmra.mrb[136].mxu1 %vm7709_vm4, %v7649_v58  ;;  %v7448_v19 = vsel %vm6940_vm2, %v19998_v7, 0.0  ;;  %v3939_v7 = vpack.c.bf16 %v20006_v53, %v20006_v53 }
 0x656   : > { %v7342_v34 = vpop.xlane.xlu1 %7341  ;;  %17286 = vpow2.f32 %v7289_v8  ;;  %v7178_v9 = vsub.f32 %v19634_v59, %v7078_v36  ;;  %16438 = vmatpush3.bf16.msra.mxu1 %v7991_v4  ;;  %7449 = vadd.xlane.f32.xlu1 %v7448_v19  ;;  %v7587_v52 = vmul.f32 %v17277_v15, %v22008_v55  ;;  %v22011_v59 = vld [vmem:[#allocation52_spill] sm:$0xff]  ;;  %v3485_v15 = vcombine.high %v19986_v33, %v19989_v2 }
 0x657   : > { %17288 = vrcp.f32 %v7342_v34  ;;  %16439 = vmatprep.mubr.msk.bf16.mxu1 %vm17882_vm0, %v21976_v41  ;;  %16449 = vmatprep.subr.bf16.mxu1 %v21976_v41  ;;  %v3227_v58 = vcombine.low %v22011_v59, %v22010_v38  ;;  %v22012_v55 = vld [vmem:[#allocation64_spill] sm:$0xff]  ;;  %v20031_v54 = vrot.slane %v3211_v61, %v18544_v37  ;;  %v20039_v33 = vrot.slane %v3210_v30, %v18544_v37 }
 0x658   : > { %v20017_v17 = vpop.eup %17278  ;;  %v7287_v8 = vmul.f32 1.442695, %v7178_v9  ;;  %v7651_v3 = vpack.c.bf16 %v7587_v52, %v7587_v52  ;;  %v20048_v52 = vrot.slane %v3485_v15, %v18561_v47  ;;  %v7945_v30 = vsel %vm7713_vm3, %v3936_v1, 0 }
 0x659   : > { %22009 = vst [vmem:[#allocation47_spill] sm:$0xff] %v20017_v17  ;;  %v17281_v36 = vpop.eup %17280  ;;  %v7357_v4 = vpop.xlane.xlu0 %7356  ;;  %v7457_v34 = vsel %vm6940_vm2, %v20017_v17, 0.0  ;;  %v20036_v17 = vrot.slane %v3227_v58, %v18544_v37 }
 0x65a   : > { %v7087_v19 = vpop.xlane.xlu1 %7086  ;;  %17290 = vpow2.f32 %v7287_v8  ;;  %7458 = vadd.xlane.f32.xlu0 %v7457_v34  ;;  %v7584_v9 = vmul.f32 %v17281_v36, %v22013_v11  ;;  %v8083_v11 = vsel %vm7713_vm3, %v3939_v7, 0  ;;  %v22015_v7 = vld [vmem:[#allocation70_spill] sm:$0xff]  ;;  %v22017_v34 = vld [vmem:[#allocation73_spill] sm:$0xff] }
 0x65b   : > { %v7181_v27 = vsub.f32 %v22012_v55, %v7087_v19  ;;  %17292 = vrcp.f32 %v7357_v4  ;;  %v3243_v1 = vcombine.low %v20031_v54, %v20036_v17  ;;  %v3941_v4 = vpack.c.bf16 %v20048_v52, %v20048_v52 }
 0x65c   : > { %v20033_v20 = vpop.eup %17282  ;;  %v7648_v0 = vpack.c.bf16 %v7584_v9, %v7584_v9 }
 0x65d   : > { %22014 = vst [vmem:[#allocation49_spill] sm:$0xff] %v20033_v20  ;;  %v7293_v43 = vmul.f32 1.442695, %v7181_v27  ;;  %v17285_v2 = vpop.eup %17284  ;;  %v20041_v8 = vpop.xlane.xlu0 %7083  ;;  %16440 = vmatmul.mubr.msk.bf16.vlgmr.msra.gmra.mrb[140].mxu1 %vm7709_vm4, %v7651_v3  ;;  %v7454_v61 = vsel %vm6940_vm2, %v20033_v20, 0.0  ;;  %v20051_v27 = vrot.slane %v3509_v48, %v18544_v37  ;;  %v3468_v3 = vcombine.high %v19983_v60, %v21976_v41 }
 0x65e   : > { %v7348_v23 = vpop.xlane.xlu1 %7347  ;;  %16422 = vmatmul.mubr.msk.bf16.vlgmr.msra.gmra.mrb[144].mxu0 %vm7709_vm4, %v7648_v0  ;;  %16450 = vmatpush3.bf16.msra.mxu1 %v8083_v11  ;;  %v7589_v58 = vmul.f32 %v17285_v2, %v22015_v7  ;;  %v8175_v7 = vsel %vm7713_vm3, %v3941_v4, 0 }
 0x65f   : > { %17294 = vpow2.f32 %v7293_v43  ;;  %16432 = vmatpush3.bf16.msra.mxu0 %v7945_v30  ;;  %7455 = vadd.xlane.f32.xlu1 %v7454_v61  ;;  %v3517_v19 = vcombine.low %v20039_v33, %v20051_v27  ;;  %v3938_v55 = vpack.c.bf16 %v3468_v3, %v3468_v3  ;;  %v3251_v61 = vrot.slane %v3243_v1, %v18561_v47 }
 0x660   : > { %17296 = vrcp.f32 %v7348_v23  ;;  %v20058_v36 = vpop.eup %17286  ;;  %16433 = vmatprep.mubr.msk.bf16.mxu0 %vm17882_vm0, %v21976_v41  ;;  %16443 = vmatprep.subr.bf16.mxu0 %v21976_v41  ;;  %v7653_v9 = vpack.c.bf16 %v7589_v58, %v7589_v58  ;;  %v3500_v1 = vcombine.high %v20006_v53, %v21976_v41 }
 0x661   : > { %22016 = vst [vmem:[#allocation43_spill] sm:$0xff] %v20058_v36  ;;  %v17289_v43 = vpop.eup %17288  ;;  %v7363_v0 = vpop.xlane.xlu0 %7362  ;;  %v7463_v60 = vsel %vm6940_vm2, %v20058_v36, 0.0  ;;  %16451 = vmatprep.mubr.msk.bf16.mxu1 %vm17882_vm0, %v21976_v41  ;;  %16461 = vmatprep.subr.bf16.mxu1 %v21976_v41  ;;  %v20087_v3 = vrot.slane %v3517_v19, %v18561_v47  ;;  %v8037_v58 = vsel %vm7713_vm3, %v3938_v55, 0 }
 0x662   : > { %v20065_v48 = vpop.xlane.xlu1 %7092  ;;  %v7586_v15 = vmul.f32 %v17289_v43, %v22017_v34  ;;  %7464 = vadd.xlane.f32.xlu0 %v7463_v60  ;;  %17298 = vrcp.f32 %v7363_v0  ;;  %v22019_v0 = vld [vmem:[#allocation74_spill] sm:$0xff]  ;;  %v3542_v34 = vcombine.high %v3251_v61, %v21976_v41 }
 0x664   : > { %v20077_v2 = vpop.eup %17290  ;;  %v7650_v11 = vpack.c.bf16 %v7586_v15, %v7586_v15 }
 0x665   : > { %22018 = vst [vmem:[#allocation63_spill] sm:$0xff] %v20077_v2  ;;  %v17293_v23 = vpop.eup %17292  ;;  %v20080_v30 = vpop.xlane.xlu0 %7089  ;;  %16452 = vmatmul.mubr.msk.bf16.vlgmr.msra.gmra.mrb[144].mxu1 %vm7709_vm4, %v7653_v9  ;;  %v7460_v43 = vsel %vm6940_vm2, %v20077_v2, 0.0  ;;  %v3518_v9 = vcombine.high %v20039_v33, %v20051_v27  ;;  %v20120_v33 = vrot.slane %v3251_v61, %v18544_v37 }
 0x666   : > { %v7354_v36 = vpop.xlane.xlu1 %7353  ;;  %16434 = vmatmul.mubr.msk.bf16.vlgmr.msra.gmra.mrb[148].mxu0 %vm7709_vm4, %v7650_v11  ;;  %16462 = vmatpush3.bf16.msra.mxu1 %v8175_v7  ;;  %v7591_v60 = vmul.f32 %v17293_v23, %v22019_v0  ;;  %v3940_v23 = vpack.c.bf16 %v3500_v1, %v3500_v1 }
 0x667   : > { %16444 = vmatpush3.bf16.msra.mxu0 %v8037_v58  ;;  %17300 = vrcp.f32 %v7354_v36  ;;  %7461 = vadd.xlane.f32.xlu1 %v7460_v43  ;;  %v3943_v36 = vpack.c.bf16 %v20087_v3, %v20087_v3  ;;  %v20117_v20 = vrot.slane %v3518_v9, %v18561_v47 }
 0x668   : > { %16445 = vmatprep.mubr.msk.bf16.mxu0 %vm17882_vm0, %v21976_v41  ;;  %16455 = vmatprep.subr.bf16.mxu0 %v21976_v41  ;;  %v7655_v7 = vpack.c.bf16 %v7591_v60, %v7591_v60  ;;  %v8129_v1 = vsel %vm7713_vm3, %v3940_v23, 0  ;;  %v3501_v60 = vcombine.high %v20048_v52, %v21976_v41 }
 0x669   : > { %v20094_v4 = vpop.eup %17294  ;;  %v7369_v15 = vpop.xlane.xlu0 %7368  ;;  %16463 = vmatprep.mubr.msk.bf16.mxu1 %vm17882_vm0, %v21976_v41  ;;  %16473 = vmatprep.subr.bf16.mxu1 %v21976_v41  ;;  %v3945_v52 = vpack.c.bf16 %v20117_v20, %v20117_v20 }
 0x66a   : > { %22020 = vst [vmem:[#allocation51_spill] sm:$0xff] %v20094_v4  ;;  %v17297_v19 = vpop.eup %17296  ;;  %v20100_v55 = vpop.xlane.xlu1 %7098  ;;  %v7469_v53 = vsel %vm6940_vm2, %v20094_v4, 0.0  ;;  %17302 = vrcp.f32 %v7369_v15  ;;  %v8267_v4 = vsel %vm7713_vm3, %v3943_v36, 0 }
 0x66b   : > { %v7588_v11 = vmul.f32 %v17297_v19, %v19715_v28  ;;  %7470 = vadd.xlane.f32.xlu0 %v7469_v53  ;;  %v20123_v28 = vrot.slane %v3542_v34, %v18544_v37  ;;  %v22021_v19 = vld [vmem:[#allocation76_spill] sm:$0xff]  ;;  %v3244_v34 = vcombine.high %v20031_v54, %v20036_v17 }
 0x66c   : > { %v17299_v58 = vpop.eup %17298 }
 0x66d   : > { %v7652_v43 = vpack.c.bf16 %v7588_v11, %v7588_v11  ;;  %v20112_v0 = vpop.xlane.xlu0 %7095  ;;  %16464 = vmatmul.mubr.msk.bf16.vlgmr.msra.gmra.mrb[148].mxu1 %vm7709_vm4, %v7655_v7  ;;  %v7593_v15 = vmul.f32 %v17299_v58, %v22021_v19  ;;  %v3942_v11 = vpack.c.bf16 %v3501_v60, %v3501_v60  ;;  %v3258_v7 = vrot.slane %v3244_v34, %v18561_v47 }
 0x66e   : > { %v7360_v2 = vpop.xlane.xlu1 %7359  ;;  %v7184_v27 = vsub.f32 %v19653_v44, %v20112_v0  ;;  %16474 = vmatpush3.bf16.msra.mxu1 %v8267_v4  ;;  %16475 = vmatprep.mubr.msk.bf16.mxu1 %vm17882_vm0, %v21976_v41  ;;  %v8359_v58 = vsel %vm7713_vm3, %v3945_v52, 0  ;;  %v3533_v60 = vcombine.high %v20087_v3, %v21976_v41  ;;  %v3228_v34 = vcombine.high %v22011_v59, %v22010_v38  ;;  %v22023_v59 = vld [vmem:[#allocation65_spill] sm:$0xff] }
 0x66f   : > { %16446 = vmatmul.mubr.msk.bf16.vlgmr.msra.gmra.mrb[152].mxu0 %vm7709_vm4, %v7652_v43  ;;  %17304 = vrcp.f32 %v7360_v2  ;;  %16485 = vmatprep.subr.bf16.mxu1 %v21976_v41  ;;  %v3550_v2 = vcombine.low %v20120_v33, %v20123_v28  ;;  %v7657_v23 = vpack.c.bf16 %v7593_v15, %v7593_v15  ;;  %v3575_v3 = vcombine.high %v3258_v7, %v21976_v41 }
 0x670   : > { %16456 = vmatpush3.bf16.msra.mxu0 %v8129_v1  ;;  %16457 = vmatprep.mubr.msk.bf16.mxu0 %vm17882_vm0, %v21976_v41 }
 0x671   : > { %16467 = vmatprep.subr.bf16.mxu0 %v21976_v41  ;;  %v17301_v61 = vpop.eup %17300  ;;  %v7375_v4 = vpop.xlane.xlu0 %7374  ;;  %v20155_v19 = vrot.slane %v3550_v2, %v18561_v47 }
 0x672   : > { %v20139_v53 = vpop.xlane.xlu1 %7104  ;;  %v7590_v36 = vmul.f32 %v17301_v61, %v19733_v26  ;;  %17306 = vrcp.f32 %v7375_v4  ;;  %v8221_v26 = vsel %vm7713_vm3, %v3942_v11, 0  ;;  %v3212_v61 = vcombine.high %v22007_v51, %v22006_v13  ;;  %v22022_v4 = vld [vmem:[#allocation44_spill] sm:$0xff] }
 0x673   : > { %v7187_v9 = vsub.f32 %v19656_v46, %v20139_v53  ;;  %v3947_v13 = vpack.c.bf16 %v20155_v19, %v20155_v19  ;;  %v3551_v51 = vcombine.high %v20120_v33, %v20123_v28 }
 0x674   : > { %v7654_v54 = vpack.c.bf16 %v7590_v36, %v7590_v36  ;;  %v17303_v17 = vpop.eup %17302  ;;  %v3944_v36 = vpack.c.bf16 %v3533_v60, %v3533_v60  ;;  %v20201_v60 = vrot.slane %v3575_v3, %v18544_v37 }
 0x675   : > { %v20150_v43 = vpop.xlane.xlu0 %7101  ;;  %16476 = vmatmul.mubr.msk.bf16.vlgmr.msra.gmra.mrb[152].mxu1 %vm7709_vm4, %v7657_v23  ;;  %v7595_v15 = vmul.f32 %v17303_v17, %v19740_v10  ;;  %v20185_v23 = vrot.slane %v3212_v61, %v18544_v37  ;;  %v20195_v28 = vrot.slane %v3551_v51, %v18561_v47  ;;  %v3534_v61 = vcombine.high %v20117_v20, %v21976_v41 }
 0x676   : > { %v7366_v1 = vpop.xlane.xlu1 %7365  ;;  %16486 = vmatpush3.bf16.msra.mxu1 %v8359_v58  ;;  %16487 = vmatprep.mubr.msk.bf16.mxu1 %vm17882_vm0, %v21976_v41 }
 0x677   : > { %16458 = vmatmul.mubr.msk.bf16.vlgmr.msra.gmra.mrb[156].mxu0 %vm7709_vm4, %v7654_v54  ;;  %17308 = vrcp.f32 %v7366_v1  ;;  %16497 = vmatprep.subr.bf16.mxu1 %v21976_v41  ;;  %v7659_v11 = vpack.c.bf16 %v7595_v15, %v7595_v15  ;;  %v20188_v54 = vrot.slane %v3228_v34, %v18544_v37  ;;  %v8313_v15 = vsel %vm7713_vm3, %v3944_v36, 0 }
 0x678   : > { %16468 = vmatpush3.bf16.msra.mxu0 %v8221_v26  ;;  %16469 = vmatprep.mubr.msk.bf16.mxu0 %vm17882_vm0, %v21976_v41  ;;  %v20198_v26 = vrot.slane %v3258_v7, %v18544_v37  ;;  %v3946_v51 = vpack.c.bf16 %v3534_v61, %v3534_v61 }
 0x679   : > { %3129 = vrot.lane.b32.xlu1 %v22022_v4, %s17881_s30  ;;  %16479 = vmatprep.subr.bf16.mxu0 %v21976_v41  ;;  %v17305_v52 = vpop.eup %17304  ;;  %v7381_v10 = vpop.xlane.xlu0 %7380  ;;  %v3259_v7 = vcombine.low %v20185_v23, %v20188_v54 }
 0x67a   : > { %v20172_v2 = vpop.xlane.xlu1 %7110  ;;  %v7592_v38 = vmul.f32 %v17305_v52, %v19749_v18  ;;  %17310 = vrcp.f32 %v7381_v10  ;;  %v8451_v18 = vsel %vm7713_vm3, %v3947_v13, 0  ;;  %v3583_v20 = vcombine.low %v20198_v26, %v20201_v60 }
 0x67b   : > { %v3267_v36 = vrot.slane %v3259_v7, %v18561_v47  ;;  %v8405_v61 = vsel %vm7713_vm3, %v3946_v51, 0  ;;  %v7182_v51 = vsub.f32 %v19647_v49, %v20080_v30 }
 0x67c   : > { %v7656_v17 = vpack.c.bf16 %v7592_v38, %v7592_v38  ;;  %v17307_v58 = vpop.eup %17306 }
 0x67d   : > { %v20190_v1 = vpop.xlane.xlu0 %7107  ;;  %16488 = vmatmul.mubr.msk.bf16.vlgmr.msra.gmra.mrb[156].mxu1 %vm7709_vm4, %v7659_v11  ;;  %v7597_v34 = vmul.f32 %v17307_v58, %v19757_v6  ;;  %v3949_v6 = vpack.c.bf16 %v20195_v28, %v20195_v28 }
 0x67e   : > { %v7372_v33 = vpop.xlane.xlu1 %7371  ;;  %16498 = vmatpush3.bf16.msra.mxu1 %v8451_v18  ;;  %16499 = vmatprep.mubr.msk.bf16.mxu1 %vm17882_vm0, %v21976_v41 }
 0x67f   : > { %16470 = vmatmul.mubr.msk.bf16.vlgmr.msra.gmra.mrb[160].mxu0 %vm7709_vm4, %v7656_v17  ;;  %17312 = vrcp.f32 %v7372_v33  ;;  %16509 = vmatprep.subr.bf16.mxu1 %v21976_v41  ;;  %v7661_v38 = vpack.c.bf16 %v7597_v34, %v7597_v34  ;;  %v8543_v18 = vsel %vm7713_vm3, %v3949_v6, 0  ;;  %v3566_v34 = vcombine.high %v20155_v19, %v21976_v41 }
 0x680   : > { %16480 = vmatpush3.bf16.msra.mxu0 %v8313_v15  ;;  %16481 = vmatprep.mubr.msk.bf16.mxu0 %vm17882_vm0, %v21976_v41  ;;  %v20229_v15 = vrot.slane %v3583_v20, %v18561_v47  ;;  %v3584_v19 = vcombine.high %v20198_v26, %v20201_v60 }
 0x681   : > { %3117 = vrot.lane.b32.xlu0 %v22022_v4, %s17880_s11  ;;  %16491 = vmatprep.subr.bf16.mxu0 %v21976_v41  ;;  %v17309_v52 = vpop.eup %17308  ;;  %v7384_v3 = vpop.xlane.xlu0 %7383 }
 0x682   : > { %v7378_v10 = vpop.xlane.xlu1 %7377  ;;  %v7594_v13 = vmul.f32 %v17309_v52, %v19764_v24  ;;  %v7180_v24 = vsub.f32 %v22023_v59, %v20041_v8  ;;  %v3608_v52 = vcombine.high %v3267_v36, %v21976_v41  ;;  %v22024_v59 = vld [vmem:[#allocation66_spill] sm:$0xff]  ;;  %v20269_v30 = vrot.slane %v3584_v19, %v18561_v47 }
 0x683   : > { %17314 = vrcp.f32 %v7378_v10  ;;  %v7183_v10 = vsub.f32 %v22024_v59, %v20065_v48  ;;  %v20255_v48 = vrot.slane %v3267_v36, %v18544_v37 }
 0x684   : > { %v7658_v11 = vpack.c.bf16 %v7594_v13, %v7594_v13  ;;  %v17311_v17 = vpop.eup %17310  ;;  %v7291_v13 = vmul.f32 1.442695, %v7180_v24  ;;  %v20260_v59 = vrot.slane %v3608_v52, %v18544_v37  ;;  %v3567_v24 = vcombine.high %v20195_v28, %v21976_v41 }
 0x685   : > { %v20224_v58 = vpop.xlane.xlu0 %7113  ;;  %16500 = vmatmul.mubr.msk.bf16.vlgmr.msra.gmra.mrb[160].mxu1 %vm7709_vm4, %v7661_v38  ;;  %v7599_v7 = vmul.f32 %v17311_v17, %v19772_v39  ;;  %v3951_v39 = vpack.c.bf16 %v20229_v15, %v20229_v15  ;;  %v7297_v26 = vmul.f32 1.442695, %v7183_v10 }
 0x686   : > { %v7387_v33 = vpop.xlane.xlu1 %7386  ;;  %16510 = vmatpush3.bf16.msra.mxu1 %v8543_v18  ;;  %16511 = vmatprep.mubr.msk.bf16.mxu1 %vm17882_vm0, %v21976_v41  ;;  %v22025_v18 = vld [vmem:[#allocation67_spill] sm:$0xff]  ;;  %v3616_v10 = vcombine.low %v20255_v48, %v20260_v59 }
 0x687   : > { %16482 = vmatmul.mubr.msk.bf16.vlgmr.msra.gmra.mrb[164].mxu0 %vm7709_vm4, %v7658_v11  ;;  %17316 = vrcp.f32 %v7387_v33  ;;  %16521 = vmatprep.subr.bf16.mxu1 %v21976_v41  ;;  %v3948_v11 = vpack.c.bf16 %v3566_v34, %v3566_v34  ;;  %v7663_v17 = vpack.c.bf16 %v7599_v7, %v7599_v7  ;;  %v7185_v33 = vsub.f32 %v22025_v18, %v20100_v55 }
 0x688   : > { %16492 = vmatpush3.bf16.msra.mxu0 %v8405_v61  ;;  %16493 = vmatprep.mubr.msk.bf16.mxu0 %vm17882_vm0, %v21976_v41  ;;  %17318 = vrcp.f32 %v7384_v3  ;;  %v8635_v49 = vsel %vm7713_vm3, %v3951_v39, 0  ;;  %v7295_v55 = vmul.f32 1.442695, %v7182_v51  ;;  %v3260_v34 = vcombine.high %v20185_v23, %v20188_v54 }
 0x689   : > { %16503 = vmatprep.subr.bf16.mxu0 %v21976_v41  ;;  %v17313_v8 = vpop.eup %17312  ;;  %v7390_v6 = vpop.xlane.xlu0 %7389  ;;  %v8497_v36 = vsel %vm7713_vm3, %v3948_v11, 0  ;;  %v7301_v52 = vmul.f32 1.442695, %v7185_v33  ;;  %v7186_v23 = vsub.f32 %v19659_v12, %v20150_v43  ;;  %v3950_v39 = vpack.c.bf16 %v3567_v24, %v3567_v24  ;;  %v22028_v24 = vld [vmem:[#allocation72_spill] sm:$0xff] }
 0x68a   : > { %v7393_v20 = vpop.xlane.xlu1 %7392  ;;  %v7596_v38 = vmul.f32 %v17313_v8, %v19778_v21  ;;  %v3274_v19 = vrot.slane %v3260_v34, %v18561_v47  ;;  %v7188_v51 = vsub.f32 %v19673_v31, %v20190_v1  ;;  %v3599_v1 = vcombine.high %v20229_v15, %v21976_v41 }
 0x68b   : > { %17320 = vrcp.f32 %v7393_v20  ;;  %v8589_v31 = vsel %vm7713_vm3, %v3950_v39, 0  ;;  %v3617_v33 = vcombine.high %v20255_v48, %v20260_v59  ;;  %v22026_v48 = vld [vmem:[#allocation46_spill] sm:$0xff]  ;;  %v7190_v34 = vsub.f32 %v22028_v24, %v20224_v58 }
 0x68c   : > { %v7660_v61 = vpack.c.bf16 %v7596_v38, %v7596_v38  ;;  %17322 = vpow2.f32 %v7291_v13  ;;  %v7303_v38 = vmul.f32 1.442695, %v7186_v23  ;;  %v22027_v59 = vld [vmem:[#allocation54_spill] sm:$0xff] }
 0x68d   : > { %v20262_v60 = vpop.xlane.xlu0 %7116  ;;  %16512 = vmatmul.mubr.msk.bf16.vlgmr.msra.gmra.mrb[164].mxu1 %vm7709_vm4, %v7663_v17  ;;  %v17315_v3 = vpop.eup %17314  ;;  %17324 = vpow2.f32 %v7297_v26 }
 0x68e   : > { %v20266_v21 = vpop.xlane.xlu1 %7119  ;;  %16522 = vmatpush3.bf16.msra.mxu1 %v8635_v49  ;;  %v7598_v8 = vmul.f32 %v17315_v3, %v19782_v16  ;;  %16523 = vmatprep.mubr.msk.bf16.mxu1 %vm17882_vm0, %v21976_v41  ;;  %v3953_v16 = vpack.c.bf16 %v20269_v30, %v20269_v30  ;;  %17326 = vpow2.f32 %v7295_v55  ;;  %v7307_v3 = vmul.f32 1.442695, %v7188_v51 }
 0x68f   : > { %16494 = vmatmul.mubr.msk.bf16.vlgmr.msra.gmra.mrb[168].mxu0 %vm7709_vm4, %v7660_v61  ;;  %16533 = vmatprep.subr.bf16.mxu1 %v21976_v41  ;;  %17328 = vrcp.f32 %v7390_v6  ;;  %v3641_v61 = vcombine.high %v3274_v19, %v21976_v41  ;;  %v7192_v39 = vsub.f32 %v19709_v62, %v20266_v21 }
 0x690   : > { %16504 = vmatpush3.bf16.msra.mxu0 %v8497_v36  ;;  %16505 = vmatprep.mubr.msk.bf16.mxu0 %vm17882_vm0, %v21976_v41  ;;  %17330 = vpow2.f32 %v7301_v52  ;;  %v7662_v12 = vpack.c.bf16 %v7598_v8, %v7598_v8  ;;  %v8727_v17 = vsel %vm7713_vm3, %v3953_v16, 0  ;;  %v3291_v36 = vcombine.low %v22027_v59, %v19974_v29 }
 0x691   : > { %v17317_v7 = vpop.eup %17316  ;;  %16515 = vmatprep.subr.bf16.mxu0 %v21976_v41  ;;  %v7396_v28 = vpop.xlane.xlu0 %7395  ;;  %v3952_v52 = vpack.c.bf16 %v3599_v1, %v3599_v1  ;;  %v20329_v8 = vrot.slane %v3617_v33, %v18561_v47  ;;  %v20339_v58 = vrot.slane %v3641_v61, %v18544_v37 }
 0x692   : > { %v7601_v54 = vmul.f32 %v17317_v7, %v19794_v40  ;;  %v7399_v20 = vpop.xlane.xlu1 %7398  ;;  %v20295_v40 = vrot.slane %v3616_v10, %v18561_v47  ;;  %v17319_v43 = vpop.eup %17318  ;;  %v20332_v10 = vrot.slane %v3274_v19, %v18544_v37 }
 0x693   : > { %17332 = vrcp.f32 %v7399_v20  ;;  %v7600_v55 = vmul.f32 %v17319_v43, %v19788_v25  ;;  %v7311_v43 = vmul.f32 1.442695, %v7190_v34  ;;  %v8681_v62 = vsel %vm7713_vm3, %v3952_v52, 0 }
 0x694   : > { %v7665_v13 = vpack.c.bf16 %v7601_v54, %v7601_v54  ;;  %v3955_v15 = vpack.c.bf16 %v20295_v40, %v20295_v40  ;;  %17334 = vpow2.f32 %v7303_v38  ;;  %v3957_v61 = vpack.c.bf16 %v20329_v8, %v20329_v8 }
 0x695   : > { %v20297_v11 = vpop.xlane.xlu0 %7122  ;;  %v17321_v6 = vpop.eup %17320  ;;  %17336 = vrcp.f32 %v7396_v28 }
 0x696   : > { %16524 = vmatmul.mubr.msk.bf16.vlgmr.msra.gmra.mrb[168].mxu1 %vm7709_vm4, %v7665_v13  ;;  %v20301_v18 = vpop.xlane.xlu1 %7125  ;;  %v7603_v26 = vmul.f32 %v17321_v6, %v19798_v32  ;;  %v20313_v49 = vpop.eup %17322  ;;  %v3275_v32 = vcombine.low %v22026_v48, %v19972_v35  ;;  %17338 = vpow2.f32 %v7307_v3  ;;  %v7664_v13 = vpack.c.bf16 %v7600_v55, %v7600_v55 }
 0x697   : > { %16506 = vmatmul.mubr.msk.bf16.vlgmr.msra.gmra.mrb[172].mxu0 %vm7709_vm4, %v7662_v12  ;;  %16534 = vmatpush3.bf16.msra.mxu1 %v8727_v17  ;;  %v20334_v23 = vpop.eup %17324  ;;  %v7466_v54 = vsel %vm6940_vm2, %v20313_v49, 0.0  ;;  %v8819_v19 = vsel %vm7713_vm3, %v3955_v15, 0  ;;  %v20350_v12 = vrot.slane %v3291_v36, %v18544_v37  ;;  %v7315_v55 = vmul.f32 1.442695, %v7192_v39 }
 0x698   : > { %16516 = vmatpush3.bf16.msra.mxu0 %v8589_v31  ;;  %16517 = vmatprep.mubr.msk.bf16.mxu0 %vm17882_vm0, %v21976_v41  ;;  %v7667_v20 = vpack.c.bf16 %v7603_v26, %v7603_v26  ;;  %v20341_v16 = vpop.eup %17326  ;;  %v20347_v28 = vrot.slane %v3275_v32, %v18544_v37  ;;  %v7475_v21 = vsel %vm6940_vm2, %v20334_v23, 0.0  ;;  %v3600_v31 = vcombine.high %v20269_v30, %v21976_v41  ;;  %v22029_v26 = vld [vmem:[#allocation78_spill] sm:$0xff] }
 0x699   : > { %16527 = vmatprep.subr.bf16.mxu0 %v21976_v41  ;;  %16535 = vmatprep.mubr.msk.bf16.mxu1 %vm17882_vm0, %v21976_v41  ;;  %v7402_v7 = vpop.xlane.xlu0 %7401  ;;  %v17329_v51 = vpop.eup %17328  ;;  %v7472_v33 = vsel %vm6940_vm2, %v20341_v16, 0.0  ;;  %v3649_v30 = vcombine.low %v20332_v10, %v20339_v58  ;;  %v7194_v36 = vsub.f32 %v19727_v57, %v20301_v18  ;;  %v8911_v18 = vsel %vm7713_vm3, %v3957_v61, 0 }
 0x69a   : > { %v7405_v25 = vpop.xlane.xlu1 %7404  ;;  %16545 = vmatprep.subr.bf16.mxu1 %v21976_v41  ;;  %v20355_v6 = vpop.eup %17330  ;;  %v7602_v3 = vmul.f32 %v17329_v51, %v22029_v26  ;;  %v3307_v32 = vcombine.low %v20347_v28, %v20350_v12  ;;  %v3650_v61 = vcombine.high %v20332_v10, %v20339_v58 }
 0x69b   : > { %17340 = vrcp.f32 %v7405_v25  ;;  %v3954_v25 = vpack.c.bf16 %v3600_v31, %v3600_v31 }
 0x69c   : > { %17342 = vpow2.f32 %v7311_v43  ;;  %v7666_v57 = vpack.c.bf16 %v7602_v3, %v7602_v3 }
 0x69d   : > { %7467 = vadd.xlane.f32.xlu1 %v7466_v54  ;;  %v20352_v38 = vpop.xlane.xlu0 %7128  ;;  %v17333_v1 = vpop.eup %17332  ;;  %17344 = vrcp.f32 %v7402_v7  ;;  %v8773_v7 = vsel %vm7713_vm3, %v3954_v25, 0 }
 0x69e   : > { %16536 = vmatmul.mubr.msk.bf16.vlgmr.msra.gmra.mrb[172].mxu1 %vm7709_vm4, %v7667_v20  ;;  %v7132_v17 = vpop.xlane.xlu1 %7131  ;;  %v7605_v15 = vmul.f32 %v17333_v1, %v19814_v50  ;;  %v7481_v50 = vsel %vm6940_vm2, %v20355_v6, 0.0  ;;  %v20383_v52 = vpop.eup %17334  ;;  %17346 = vpow2.f32 %v7315_v55  ;;  %v20387_v20 = vrot.slane %v3649_v30, %v18561_v47 }
 0x69f   : > { %16518 = vmatmul.mubr.msk.bf16.vlgmr.msra.gmra.mrb[176].mxu0 %vm7709_vm4, %v7664_v13  ;;  %16546 = vmatpush3.bf16.msra.mxu1 %v8819_v19  ;;  %v17337_v39 = vpop.eup %17336  ;;  %v3315_v13 = vrot.slane %v3307_v32, %v18561_v47  ;;  %v7319_v19 = vmul.f32 1.442695, %v7194_v36  ;;  %v7196_v51 = vsub.f32 %v19743_v56, %v7132_v17  ;;  %v20422_v36 = vrot.slane %v3650_v61, %v18561_v47 }
 0x6a0   : > { %16528 = vmatpush3.bf16.msra.mxu0 %v8681_v62  ;;  %7476 = vadd.xlane.f32.xlu0 %v7475_v21  ;;  %v7669_v54 = vpack.c.bf16 %v7605_v15, %v7605_v15  ;;  %v20392_v43 = vpop.eup %17338  ;;  %v7484_v62 = vsel %vm6940_vm2, %v20383_v52, 0.0  ;;  %v3632_v21 = vcombine.high %v20295_v40, %v21976_v41  ;;  %v7604_v17 = vmul.f32 %v17337_v39, %v19820_v42 }
 0x6a1   : > { %7473 = vadd.xlane.f32.xlu1 %v7472_v33  ;;  %16529 = vmatprep.mubr.msk.bf16.mxu0 %vm17882_vm0, %v21976_v41  ;;  %v7408_v24 = vpop.xlane.xlu0 %7407  ;;  %v3674_v26 = vcombine.high %v3315_v13, %v21976_v41  ;;  %v7323_v40 = vmul.f32 1.442695, %v7196_v51  ;;  %v3959_v42 = vpack.c.bf16 %v20387_v20, %v20387_v20  ;;  %v3673_v39 = vrot.slane %v3315_v13, %v18544_v37 }
 0x6a2   : > { %v7411_v34 = vpop.xlane.xlu1 %7410  ;;  %16539 = vmatprep.subr.bf16.mxu0 %v21976_v41  ;;  %16547 = vmatprep.mubr.msk.bf16.mxu1 %vm17882_vm0, %v21976_v41  ;;  %v3956_v3 = vpack.c.bf16 %v3632_v21, %v3632_v21  ;;  %v7668_v58 = vpack.c.bf16 %v7604_v17, %v7604_v17 }
 0x6a3   : > { %16557 = vmatprep.subr.bf16.mxu1 %v21976_v41  ;;  %17348 = vrcp.f32 %v7411_v34  ;;  %v9003_v32 = vsel %vm7713_vm3, %v3959_v42, 0  ;;  %v20425_v34 = vrot.slane %v3674_v26, %v18544_v37 }
 0x6a4   : > { %7482 = vadd.xlane.f32.xlu0 %v7481_v50  ;;  %17350 = vpow2.f32 %v7319_v19 }
 0x6a5   : > { %v17341_v31 = vpop.eup %17340  ;;  %v7414_v1 = vpop.xlane.xlu0 %7413 }
 0x6a6   : > { %16548 = vmatmul.mubr.msk.bf16.vlgmr.msra.gmra.mrb[176].mxu1 %vm7709_vm4, %v7669_v54  ;;  %v7417_v56 = vpop.xlane.xlu1 %7416  ;;  %v7607_v33 = vmul.f32 %v17341_v31, %v19834_v14  ;;  %v7490_v14 = vsel %vm6940_vm2, %v20392_v43, 0.0  ;;  %v20415_v55 = vpop.eup %17342  ;;  %v3633_v54 = vcombine.high %v20329_v8, %v21976_v41  ;;  %v3961_v8 = vpack.c.bf16 %v20422_v36, %v20422_v36 }
 0x6a7   : > { %16530 = vmatmul.mubr.msk.bf16.vlgmr.msra.gmra.mrb[180].mxu0 %vm7709_vm4, %v7666_v57  ;;  %16558 = vmatpush3.bf16.msra.mxu1 %v8911_v18  ;;  %17352 = vrcp.f32 %v7417_v56  ;;  %v17345_v15 = vpop.eup %17344  ;;  %v7496_v25 = vsel %vm6940_vm2, %v20415_v55, 0.0 }
 0x6a8   : > { %16540 = vmatpush3.bf16.msra.mxu0 %v8773_v7  ;;  %7485 = vadd.xlane.f32.xlu0 %v7484_v62  ;;  %17354 = vrcp.f32 %v7408_v24  ;;  %v7671_v10 = vpack.c.bf16 %v7607_v33, %v7607_v33  ;;  %v20427_v50 = vpop.eup %17346  ;;  %v8865_v24 = vsel %vm7713_vm3, %v3956_v3, 0  ;;  %v7606_v19 = vmul.f32 %v17345_v15, %v19840_v45 }
 0x6a9   : > { %16541 = vmatprep.mubr.msk.bf16.mxu0 %vm17882_vm0, %v21976_v41  ;;  %16551 = vmatprep.subr.bf16.mxu0 %v21976_v41  ;;  %17356 = vpow2.f32 %v7323_v40  ;;  %v20417_v30 = vpop.xlane.xlu0 %7419  ;;  %v3308_v7 = vcombine.high %v20347_v28, %v20350_v12  ;;  %v3682_v45 = vcombine.low %v3673_v39, %v20425_v34  ;;  %v3958_v13 = vpack.c.bf16 %v3633_v54, %v3633_v54 }
 0x6aa   : > { %16559 = vmatprep.mubr.msk.bf16.mxu1 %vm17882_vm0, %v21976_v41  ;;  %16569 = vmatprep.subr.bf16.mxu1 %v21976_v41  ;;  %v7423_v18 = vpop.xlane.xlu1 %7422  ;;  %v7670_v31 = vpack.c.bf16 %v7606_v19, %v7606_v19  ;;  %v9095_v33 = vsel %vm7713_vm3, %v3961_v8, 0  ;;  %v3665_v40 = vcombine.high %v20387_v20, %v21976_v41  ;;  %v3276_v3 = vcombine.high %v22026_v48, %v19972_v35 }
 0x6ab   : > { %17358 = vrcp.f32 %v7423_v18  ;;  %v3322_v17 = vrot.slane %v3308_v7, %v18561_v47  ;;  %v20459_v61 = vrot.slane %v3682_v45, %v18561_v47  ;;  %v8957_v26 = vsel %vm7713_vm3, %v3958_v13, 0  ;;  %v22031_v7 = vld [vmem:[#allocation55_spill] sm:$0xff] }
 0x6ac   : > { %7491 = vadd.xlane.f32.xlu0 %v7490_v14  ;;  %17360 = vrcp.f32 %v7414_v1  ;;  %v3960_v48 = vpack.c.bf16 %v3665_v40, %v3665_v40 }
 0x6ad   : > { %v17349_v57 = vpop.eup %17348  ;;  %v7429_v28 = vpop.xlane.xlu0 %7428  ;;  %v3707_v20 = vcombine.high %v3322_v17, %v21976_v41  ;;  %v3698_v0 = vcombine.high %v20459_v61, %v21976_v41 }
 0x6ae   : > { %16560 = vmatmul.mubr.msk.bf16.vlgmr.msra.gmra.mrb[180].mxu1 %vm7709_vm4, %v7671_v10  ;;  %v7609_v51 = vmul.f32 %v17349_v57, %v19855_v63  ;;  %v7502_v63 = vsel %vm6940_vm2, %v20427_v50, 0.0  ;;  %v20453_v62 = vpop.eup %17350  ;;  %v3292_v10 = vcombine.high %v22027_v59, %v19974_v29  ;;  %v3683_v29 = vcombine.high %v3673_v39, %v20425_v34 }
 0x6af   : > { %16542 = vmatmul.mubr.msk.bf16.vlgmr.msra.gmra.mrb[184].mxu0 %vm7709_vm4, %v7668_v58  ;;  %16570 = vmatpush3.bf16.msra.mxu1 %v9003_v32  ;;  %v7508_v1 = vsel %vm6940_vm2, %v20453_v62, 0.0  ;;  %v22030_v58 = vld [vmem:[#allocation79_spill] sm:$0xff]  ;;  %17362 = vrcp.f32 %v7429_v28  ;;  %v9049_v19 = vsel %vm7713_vm3, %v3960_v48, 0  ;;  %v22032_v28 = vld [vmem:[#allocation50_spill] sm:$0xff]  ;;  %v22036_v48 = vsub.f32 %v19670_v22, %v20172_v2 }
 0x6b0   : > { %16552 = vmatpush3.bf16.msra.mxu0 %v8865_v24  ;;  %7497 = vadd.xlane.f32.xlu0 %v7496_v25  ;;  %v7673_v12 = vpack.c.bf16 %v7609_v51, %v7609_v51  ;;  %17364 = vrcp.f32 %v20417_v30  ;;  %v20489_v25 = vrot.slane %v3276_v3, %v18544_v37  ;;  %v20492_v54 = vrot.slane %v3292_v10, %v18544_v37 }
 0x6b1   : > { %16553 = vmatprep.mubr.msk.bf16.mxu0 %vm17882_vm0, %v21976_v41  ;;  %16563 = vmatprep.subr.bf16.mxu0 %v21976_v41  ;;  %v17353_v21 = vpop.eup %17352  ;;  %v7426_v32 = vpop.xlane.xlu0 %7425  ;;  %v20497_v39 = vrot.slane %v3683_v29, %v18561_v47  ;;  %v3714_v30 = vrot.slane %v3707_v20, %v18544_v37  ;;  %v3666_v51 = vcombine.high %v20422_v36, %v21976_v41 }
 0x6b2   : > { %3141 = vrot.lane.b32.xlu1 %v22022_v4, %s17879_s2  ;;  %16571 = vmatprep.mubr.msk.bf16.mxu1 %vm17882_vm0, %v21976_v41  ;;  %v17355_v56 = vpop.eup %17354  ;;  %v7611_v14 = vmul.f32 %v17353_v21, %v19882_v5  ;;  %v3963_v5 = vpack.c.bf16 %v20459_v61, %v20459_v61  ;;  %v3323_v13 = vcombine.low %v20489_v25, %v20492_v54  ;;  %v7432_v20 = vpop.xlane.xlu1 %7431  ;;  %v22035_v61 = vld [vmem:[#allocation71_spill] sm:$0xff] }
 0x6b3   : > { %16581 = vmatprep.subr.bf16.mxu1 %v21976_v41  ;;  %v20467_v42 = vpop.eup %17356  ;;  %v7608_v15 = vmul.f32 %v17355_v56, %v22030_v58  ;;  %v3965_v36 = vpack.c.bf16 %v20497_v39, %v20497_v39  ;;  %v7299_v56 = vmul.f32 1.442695, %v7184_v27  ;;  %v22033_v27 = vld [vmem:[#allocation57_spill] sm:$0xff]  ;;  %v3699_v2 = vcombine.high %v20497_v39, %v21976_v41 }
 0x6b4   : > { %7503 = vadd.xlane.f32.xlu0 %v7502_v63  ;;  %v7514_v35 = vsel %vm6940_vm2, %v20467_v42, 0.0  ;;  %v7675_v59 = vpack.c.bf16 %v7611_v14, %v7611_v14  ;;  %v9187_v34 = vsel %vm7713_vm3, %v3963_v5, 0  ;;  %v3706_v63 = vrot.slane %v3322_v17, %v18544_v37  ;;  %v22040_v39 = vld [vmem:[#allocation77_spill] sm:$0xff] }
 0x6b5   : > { %v17359_v24 = vpop.eup %17358  ;;  %v7672_v57 = vpack.c.bf16 %v7608_v15, %v7608_v15  ;;  %v7435_v45 = vpop.xlane.xlu0 %7434  ;;  %v7305_v14 = vmul.f32 1.442695, %v7187_v9  ;;  %v9279_v3 = vsel %vm7713_vm3, %v3965_v36, 0  ;;  %v22034_v9 = vld [vmem:[#allocation60_spill] sm:$0xff]  ;;  %v22039_v36 = vld [vmem:[#allocation59_spill] sm:$0xff] }
 0x6b6   : > { %16572 = vmatmul.mubr.msk.bf16.vlgmr.msra.gmra.mrb[184].mxu1 %vm7709_vm4, %v7673_v12  ;;  %v17361_v18 = vpop.eup %17360  ;;  %v7613_v8 = vmul.f32 %v17359_v24, %v22031_v7  ;;  %v3715_v21 = vcombine.low %v3706_v63, %v3714_v30  ;;  %17366 = vrcp.f32 %v7435_v45  ;;  %v3716_v29 = vcombine.high %v3706_v63, %v3714_v30  ;;  %v22037_v7 = vld [vmem:[#allocation75_spill] sm:$0xff]  ;;  %v22038_v45 = vld [vmem:[#allocation58_spill] sm:$0xff] }
 0x6b7   : > { %16554 = vmatmul.mubr.msk.bf16.vlgmr.msra.gmra.mrb[188].mxu0 %vm7709_vm4, %v7670_v31  ;;  %16582 = vmatpush3.bf16.msra.mxu1 %v9095_v33  ;;  %v7610_v12 = vmul.f32 %v17361_v18, %v22032_v28  ;;  %v3962_v31 = vpack.c.bf16 %v3666_v51, %v3666_v51  ;;  %17368 = vrcp.f32 %v7426_v32  ;;  %v7191_v32 = vsub.f32 %v22035_v61, %v20262_v60  ;;  %v22042_v61 = vld [vmem:[#allocation56_spill] sm:$0xff] }
 0x6b8   : > { %16564 = vmatpush3.bf16.msra.mxu0 %v8957_v26  ;;  %7509 = vadd.xlane.f32.xlu0 %v7508_v1  ;;  %v7677_v17 = vpack.c.bf16 %v7613_v8, %v7613_v8  ;;  %v3331_v26 = vrot.slane %v3323_v13, %v18561_v47  ;;  %v20527_v10 = vrot.slane %v3715_v21, %v18561_v47  ;;  %17370 = vpow2.f32 %v7299_v56 }
 0x6b9   : > { %16565 = vmatprep.mubr.msk.bf16.mxu0 %vm17882_vm0, %v21976_v41  ;;  %16575 = vmatprep.subr.bf16.mxu0 %v21976_v41  ;;  %v17363_v33 = vpop.eup %17362  ;;  %v7674_v1 = vpack.c.bf16 %v7610_v12, %v7610_v12  ;;  %v9141_v44 = vsel %vm7713_vm3, %v3962_v31, 0  ;;  %v7441_v46 = vpop.xlane.xlu0 %7440  ;;  %17372 = vpow2.f32 %v7305_v14  ;;  %v20552_v51 = vrot.slane %v3716_v29, %v18561_v47 }
 0x6ba   : > { %16583 = vmatprep.mubr.msk.bf16.mxu1 %vm17882_vm0, %v21976_v41  ;;  %16593 = vmatprep.subr.bf16.mxu1 %v21976_v41  ;;  %v17365_v40 = vpop.eup %17364  ;;  %v7615_v58 = vmul.f32 %v17363_v33, %v22033_v27  ;;  %v3740_v53 = vcombine.high %v3331_v26, %v21976_v41  ;;  %v3967_v5 = vpack.c.bf16 %v20527_v10, %v20527_v10  ;;  %17374 = vrcp.f32 %v7441_v46  ;;  %v7438_v31 = vpop.xlane.xlu1 %7437 }
 0x6bb   : > { %v7612_v15 = vmul.f32 %v17365_v40, %v22034_v9  ;;  %17376 = vrcp.f32 %v7432_v20  ;;  %v7193_v8 = vsub.f32 %v22037_v7, %v20297_v11  ;;  %v3739_v28 = vrot.slane %v3331_v26, %v18544_v37  ;;  %v22041_v9 = vld [vmem:[#allocation80_spill] sm:$0xff] }
 0x6bc   : > { %7515 = vadd.xlane.f32.xlu0 %v7514_v35  ;;  %v3964_v35 = vpack.c.bf16 %v3698_v0, %v3698_v0  ;;  %v7679_v24 = vpack.c.bf16 %v7615_v58, %v7615_v58  ;;  %v9371_v60 = vsel %vm7713_vm3, %v3967_v5, 0  ;;  %v20555_v30 = vrot.slane %v3740_v53, %v18544_v37 }
 0x6bd   : > { %v7676_v18 = vpack.c.bf16 %v7612_v15, %v7612_v15  ;;  %v7447_v13 = vpop.xlane.xlu0 %7446  ;;  %v3324_v12 = vcombine.high %v20489_v25, %v20492_v54  ;;  %v7195_v56 = vsub.f32 %v22040_v39, %v20352_v38  ;;  %v3966_v54 = vpack.c.bf16 %v3699_v2, %v3699_v2 }
 0x6be   : > { %16584 = vmatmul.mubr.msk.bf16.vlgmr.msra.gmra.mrb[188].mxu1 %vm7709_vm4, %v7675_v59  ;;  %v7309_v59 = vmul.f32 1.442695, %v22036_v48  ;;  %v9233_v22 = vsel %vm7713_vm3, %v3964_v35, 0  ;;  %v3748_v25 = vcombine.low %v3739_v28, %v20555_v30  ;;  %v7317_v26 = vmul.f32 1.442695, %v7193_v8  ;;  %v7444_v5 = vpop.xlane.xlu1 %7443 }
 0x6bf   : > { %16566 = vmatmul.mubr.msk.bf16.vlgmr.msra.gmra.mrb[192].mxu0 %vm7709_vm4, %v7672_v57  ;;  %16594 = vmatpush3.bf16.msra.mxu1 %v9187_v34  ;;  %v7321_v0 = vmul.f32 1.442695, %v7195_v56  ;;  %v9325_v46 = vsel %vm7713_vm3, %v3966_v54, 0  ;;  %v3731_v53 = vcombine.high %v20527_v10, %v21976_v41 }
 0x6c0   : > { %16576 = vmatpush3.bf16.msra.mxu0 %v9049_v19  ;;  %16577 = vmatprep.mubr.msk.bf16.mxu0 %vm17882_vm0, %v21976_v41  ;;  %v17367_v57 = vpop.eup %17366  ;;  %v7313_v19 = vmul.f32 1.442695, %v7191_v32  ;;  %17378 = vpow2.f32 %v7309_v59  ;;  %v20589_v58 = vrot.slane %v3748_v25, %v18561_v47  ;;  %v3749_v59 = vcombine.high %v3739_v28, %v20555_v30 }
 0x6c1   : > { %16587 = vmatprep.subr.bf16.mxu0 %v21976_v41  ;;  %16595 = vmatprep.mubr.msk.bf16.mxu1 %vm17882_vm0, %v21976_v41  ;;  %v17369_v34 = vpop.eup %17368  ;;  %v7617_v63 = vmul.f32 %v17367_v57, %v22038_v45  ;;  %v7453_v20 = vpop.xlane.xlu0 %7452  ;;  %v3732_v45 = vcombine.high %v20552_v51, %v21976_v41 }
 0x6c2   : > { %16605 = vmatprep.subr.bf16.mxu1 %v21976_v41  ;;  %v7614_v21 = vmul.f32 %v17369_v34, %v22039_v36  ;;  %v20573_v11 = vpop.eup %17370  ;;  %17380 = vpow2.f32 %v7313_v19  ;;  %v3971_v48 = vpack.c.bf16 %v20589_v58, %v20589_v58  ;;  %v20618_v7 = vrot.slane %v3749_v59, %v18561_v47 }
 0x6c3   : > { %17382 = vrcp.f32 %v7447_v13  ;;  %v20581_v33 = vpop.eup %17372  ;;  %v7478_v14 = vsel %vm6940_vm2, %v20573_v11, 0.0  ;;  %v3970_v56 = vpack.c.bf16 %v3732_v45, %v3732_v45 }
 0x6c4   : > { %17384 = vrcp.f32 %v7438_v31  ;;  %v17375_v40 = vpop.eup %17374  ;;  %v7487_v29 = vsel %vm6940_vm2, %v20581_v33, 0.0  ;;  %v9555_v2 = vsel %vm7713_vm3, %v3971_v48, 0 }
 0x6c5   : > { %v17377_v38 = vpop.eup %17376  ;;  %17386 = vpow2.f32 %v7317_v26  ;;  %v7619_v15 = vmul.f32 %v17375_v40, %v22041_v9  ;;  %v22046_v9 = vld [vmem:[#allocation62_spill] sm:$0xff] }
 0x6c6   : > { %16596 = vmatmul.mubr.msk.bf16.vlgmr.msra.gmra.mrb[192].mxu1 %vm7709_vm4, %v7677_v17  ;;  %v3969_v17 = vpack.c.bf16 %v20552_v51, %v20552_v51  ;;  %v7616_v32 = vmul.f32 %v17377_v38, %v22042_v61  ;;  %17388 = vpow2.f32 %v7321_v0  ;;  %v3973_v51 = vpack.c.bf16 %v20618_v7, %v20618_v7 }
 0x6c7   : > { %16578 = vmatmul.mubr.msk.bf16.vlgmr.msra.gmra.mrb[196].mxu0 %vm7709_vm4, %v7674_v1  ;;  %16606 = vmatpush3.bf16.msra.mxu1 %v9279_v3  ;;  %v7681_v1 = vpack.c.bf16 %v7617_v63, %v7617_v63  ;;  %v7678_v3 = vpack.c.bf16 %v7614_v21, %v7614_v21  ;;  %17390 = vrcp.f32 %v7453_v20  ;;  %v22043_v63 = vld [vmem:[#allocation81_spill] sm:$0xff]  ;;  %v3764_v0 = vcombine.high %v20589_v58, %v21976_v41 }
 0x6c8   : > { %16588 = vmatpush3.bf16.msra.mxu0 %v9141_v44  ;;  %16589 = vmatprep.mubr.msk.bf16.mxu0 %vm17882_vm0, %v21976_v41  ;;  %v3338_v44 = vrot.slane %v3324_v12, %v18561_v47  ;;  %v9463_v27 = vsel %vm7713_vm3, %v3969_v17, 0  ;;  %17392 = vrcp.f32 %v7444_v5  ;;  %v22044_v12 = vld [vmem:[#allocation61_spill] sm:$0xff] }
 0x6c9   : > { %16599 = vmatprep.subr.bf16.mxu0 %v21976_v41  ;;  %16607 = vmatprep.mubr.msk.bf16.mxu1 %vm17882_vm0, %v21976_v41  ;;  %v3972_v61 = vpack.c.bf16 %v3764_v0, %v3764_v0 }
 0x6ca   : > { %16617 = vmatprep.subr.bf16.mxu1 %v21976_v41  ;;  %v20604_v10 = vpop.eup %17378  ;;  %v3773_v35 = vcombine.high %v3338_v44, %v21976_v41  ;;  %v3772_v28 = vrot.slane %v3338_v44, %v18544_v37  ;;  %v9509_v44 = vsel %vm7713_vm3, %v3970_v56, 0 }
 0x6cb   : > { %v7493_v19 = vsel %vm6940_vm2, %v20604_v10, 0.0 }
 0x6cc   : > { %v20611_v57 = vpop.eup %17380  ;;  %v20621_v30 = vrot.slane %v3773_v35, %v18544_v37 }
 0x6cd   : > { %v17383_v34 = vpop.eup %17382  ;;  %v7499_v21 = vsel %vm6940_vm2, %v20611_v57, 0.0 }
 0x6ce   : > { %16608 = vmatmul.mubr.msk.bf16.vlgmr.msra.gmra.mrb[196].mxu1 %vm7709_vm4, %v7679_v24  ;;  %v3968_v24 = vpack.c.bf16 %v3731_v53, %v3731_v53  ;;  %v7621_v13 = vmul.f32 %v17383_v34, %v22043_v63  ;;  %v3781_v39 = vcombine.low %v3772_v28, %v20621_v30  ;;  %v3782_v5 = vcombine.high %v3772_v28, %v20621_v30 }
 0x6cf   : > { %16590 = vmatmul.mubr.msk.bf16.vlgmr.msra.gmra.mrb[200].mxu0 %vm7709_vm4, %v7676_v18  ;;  %16618 = vmatpush3.bf16.msra.mxu1 %v9371_v60  ;;  %v7683_v18 = vpack.c.bf16 %v7619_v15, %v7619_v15  ;;  %v7680_v60 = vpack.c.bf16 %v7616_v32, %v7616_v32 }
 0x6d0   : > { %16600 = vmatpush3.bf16.msra.mxu0 %v9233_v22  ;;  %16601 = vmatprep.mubr.msk.bf16.mxu0 %vm17882_vm0, %v21976_v41  ;;  %v17385_v22 = vpop.eup %17384  ;;  %v9417_v8 = vsel %vm7713_vm3, %v3968_v24, 0  ;;  %v7685_v54 = vpack.c.bf16 %v7621_v13, %v7621_v13  ;;  %v3789_v38 = vrot.slane %v3781_v39, %v18561_v47  ;;  %v3796_v30 = vrot.slane %v3782_v5, %v18561_v47  ;;  %v22048_v13 = vld [vmem:[#allocation47_spill] sm:$0xff] }
 0x6d1   : > { %16611 = vmatprep.subr.bf16.mxu0 %v21976_v41  ;;  %16619 = vmatprep.mubr.msk.bf16.mxu1 %vm17882_vm0, %v21976_v41  ;;  %v7618_v36 = vmul.f32 %v17385_v22, %v22044_v12  ;;  %v20637_v31 = vpop.eup %17386 }
 0x6d2   : > { %16629 = vmatprep.subr.bf16.mxu1 %v21976_v41  ;;  %v20643_v17 = vpop.eup %17388  ;;  %v3975_v58 = vpack.c.bf16 %v3789_v38, %v3789_v38 }
 0x6d3   : > { %v17391_v26 = vpop.eup %17390  ;;  %v7682_v40 = vpack.c.bf16 %v7618_v36, %v7618_v36  ;;  %v7511_v20 = vsel %vm6940_vm2, %v20643_v17, 0.0  ;;  %v3977_v36 = vpack.c.bf16 %v3796_v30, %v3796_v30 }
 0x6d4   : > { %v9739_v24 = vsel %vm7713_vm3, %v3975_v58, 0 }
 0x6d6   : > { %7479 = vadd.xlane.f32.xlu1 %v7478_v14  ;;  %16620 = vmatmul.mubr.msk.bf16.vlgmr.msra.gmra.mrb[200].mxu1 %vm7709_vm4, %v7681_v1  ;;  %v7505_v1 = vsel %vm6940_vm2, %v20637_v31, 0.0  ;;  %v17393_v14 = vpop.eup %17392 }
 0x6d7   : > { %16602 = vmatmul.mubr.msk.bf16.vlgmr.msra.gmra.mrb[204].mxu0 %vm7709_vm4, %v7678_v3  ;;  %16630 = vmatpush3.bf16.msra.mxu1 %v9463_v27  ;;  %v9647_v3 = vsel %vm7713_vm3, %v3973_v51, 0  ;;  %v22045_v27 = vld [vmem:[#allocation82_spill] sm:$0xff]  ;;  %v7620_v15 = vmul.f32 %v17393_v14, %v22046_v9 }
 0x6d8   : > { %16612 = vmatpush3.bf16.msra.mxu0 %v9325_v46  ;;  %16613 = vmatprep.mubr.msk.bf16.mxu0 %vm17882_vm0, %v21976_v41  ;;  %v7623_v46 = vmul.f32 %v17391_v26, %v22045_v27  ;;  %v9831_v27 = vsel %vm7713_vm3, %v3977_v36, 0 }
 0x6d9   : > { %16623 = vmatprep.subr.bf16.mxu0 %v21976_v41  ;;  %16631 = vmatprep.mubr.msk.bf16.mxu1 %vm17882_vm0, %v21976_v41  ;;  %v7684_v48 = vpack.c.bf16 %v7620_v15, %v7620_v15 }
 0x6da   : > { %7488 = vadd.xlane.f32.xlu1 %v7487_v29  ;;  %16641 = vmatprep.subr.bf16.mxu1 %v21976_v41  ;;  %v7687_v32 = vpack.c.bf16 %v7623_v46, %v7623_v46  ;;  %v22049_v46 = vld [vmem:[#allocation49_spill] sm:$0xff] }
 0x6de   : > { %7494 = vadd.xlane.f32.xlu1 %v7493_v19  ;;  %16632 = vmatmul.mubr.msk.bf16.vlgmr.msra.gmra.mrb[204].mxu1 %vm7709_vm4, %v7683_v18  ;;  %v9601_v19 = vsel %vm7713_vm3, %v3972_v61, 0 }
 0x6df   : > { %16614 = vmatmul.mubr.msk.bf16.vlgmr.msra.gmra.mrb[208].mxu0 %vm7709_vm4, %v7680_v60  ;;  %16642 = vmatpush3.bf16.msra.mxu1 %v9555_v2  ;;  %v3765_v60 = vcombine.high %v20618_v7, %v21976_v41 }
 0x6e0   : > { %16624 = vmatpush3.bf16.msra.mxu0 %v9417_v8  ;;  %16625 = vmatprep.mubr.msk.bf16.mxu0 %vm17882_vm0, %v21976_v41  ;;  %v22047_v8 = vld [vmem:[#allocation48_spill] sm:$0xff] }
 0x6e1   : > { %16635 = vmatprep.subr.bf16.mxu0 %v21976_v41  ;;  %16643 = vmatprep.mubr.msk.bf16.mxu1 %vm17882_vm0, %v21976_v41  ;;  %v3974_v7 = vpack.c.bf16 %v3765_v60, %v3765_v60 }
 0x6e2   : > { %7500 = vadd.xlane.f32.xlu1 %v7499_v21  ;;  %16653 = vmatprep.subr.bf16.mxu1 %v21976_v41 }
 0x6e3   : > { %v7450_v25 = vpop.xlane.xlu1 %7449 }
 0x6e4   : > { %17394 = vrcp.f32 %v7450_v25 }
 0x6e6   : > { %7506 = vadd.xlane.f32.xlu1 %v7505_v1  ;;  %16644 = vmatmul.mubr.msk.bf16.vlgmr.msra.gmra.mrb[208].mxu1 %vm7709_vm4, %v7685_v54 }
 0x6e7   : > { %16626 = vmatmul.mubr.msk.bf16.vlgmr.msra.gmra.mrb[212].mxu0 %vm7709_vm4, %v7682_v40  ;;  %16654 = vmatpush3.bf16.msra.mxu1 %v9647_v3  ;;  %v7459_v53 = vpop.xlane.xlu0 %7458  ;;  %v9693_v40 = vsel %vm7713_vm3, %v3974_v7, 0  ;;  %v3797_v3 = vcombine.high %v3789_v38, %v21976_v41 }
 0x6e8   : > { %16636 = vmatpush3.bf16.msra.mxu0 %v9509_v44  ;;  %16637 = vmatprep.mubr.msk.bf16.mxu0 %vm17882_vm0, %v21976_v41  ;;  %17396 = vrcp.f32 %v7459_v53 }
 0x6e9   : > { %16647 = vmatprep.subr.bf16.mxu0 %v21976_v41  ;;  %16655 = vmatprep.mubr.msk.bf16.mxu1 %vm17882_vm0, %v21976_v41  ;;  %v3976_v15 = vpack.c.bf16 %v3797_v3, %v3797_v3 }
 0x6ea   : > { %7512 = vadd.xlane.f32.xlu1 %v7511_v20  ;;  %16665 = vmatprep.subr.bf16.mxu1 %v21976_v41  ;;  %v22050_v20 = vld [vmem:[#allocation43_spill] sm:$0xff] }
 0x6eb   : > { %v9785_v5 = vsel %vm7713_vm3, %v3976_v15, 0 }
 0x6ec   : > { %v20665_v29 = vpop.f32.mrb[128].mxu1  ;;  %v7456_v35 = vpop.xlane.xlu1 %7455 }
 0x6ed   : > { %17398 = vrcp.f32 %v7456_v35  ;;  %v16405_v59 = vpop.f32.mrb[129].mxu1 }
 0x6ee   : > { %16656 = vmatmul.mubr.msk.bf16.vlgmr.msra.gmra.mrb[212].mxu1 %vm7709_vm4, %v7687_v32  ;;  %v17395_v18 = vpop.eup %17394  ;;  %v7754_v34 = vpop.f32.mrb[130].mxu1 }
 0x6ef   : > { %16638 = vmatmul.mubr.msk.bf16.vlgmr.msra.gmra.mrb[216].mxu0 %vm7709_vm4, %v7684_v48  ;;  %16666 = vmatpush3.bf16.msra.mxu1 %v9739_v24  ;;  %v16406_v22 = vpop.f32.mrb[131].mxu1  ;;  %v7465_v2 = vpop.xlane.xlu0 %7464  ;;  %v7622_v45 = vmul.f32 %v17395_v18, %v22047_v8  ;;  %v22051_v48 = vld [vmem:[#allocation63_spill] sm:$0xff] }
 0x6f0   : > { %16648 = vmatpush3.bf16.msra.mxu0 %v9601_v19  ;;  %16649 = vmatprep.mubr.msk.bf16.mxu0 %vm17882_vm0, %v21976_v41  ;;  %17400 = vrcp.f32 %v7465_v2 }
 0x6f1   : > { %16659 = vmatprep.subr.bf16.mxu0 %v21976_v41  ;;  %16667 = vmatprep.mubr.msk.bf16.mxu1 %vm17882_vm0, %v21976_v41  ;;  %v7686_v39 = vpack.c.bf16 %v7622_v45, %v7622_v45 }
 0x6f2   : > { %16677 = vmatprep.subr.bf16.mxu1 %v21976_v41  ;;  %v17397_v63 = vpop.eup %17396 }
 0x6f3   : > { %v7625_v28 = vmul.f32 %v17397_v63, %v22048_v13  ;;  %v20682_v12 = vpop.f32.mrb[140].mxu0 }
 0x6f4   : > { %v7462_v21 = vpop.xlane.xlu1 %7461  ;;  %v16411_v51 = vpop.f32.mrb[141].mxu0 }
 0x6f5   : > { %v20684_v56 = vpop.f32.mrb[132].mxu1  ;;  %17402 = vrcp.f32 %v7462_v21  ;;  %v7800_v25 = vpop.f32.mrb[142].mxu0  ;;  %v7689_v54 = vpack.c.bf16 %v7625_v28, %v7625_v28 }
 0x6f6   : > { %v10655_v26 = vcombine.low %v20665_v29, %v20684_v56  ;;  %v16417_v1 = vpop.f32.mrb[133].mxu1  ;;  %v16412_v14 = vpop.f32.mrb[143].mxu0  ;;  %v3798_v29 = vcombine.high %v3796_v30, %v21976_v41 }
 0x6f7   : > { %16650 = vmatmul.mubr.msk.bf16.vlgmr.msra.gmra.mrb[220].mxu0 %vm7709_vm4, %v7686_v39  ;;  %v17399_v44 = vpop.eup %17398  ;;  %v7846_v0 = vpop.f32.mrb[134].mxu1  ;;  %16668 = vmatmul.mubr.msk.bf16.vlgmr.msra.gmra.mrb[216].mxu1 %vm7709_vm4, %v7689_v54 }
 0x6f8   : > { %16660 = vmatpush3.bf16.msra.mxu0 %v9693_v40  ;;  %v7624_v53 = vmul.f32 %v17399_v44, %v22049_v46  ;;  %v16418_v9 = vpop.f32.mrb[135].mxu1  ;;  %16678 = vmatpush3.bf16.msra.mxu1 %v9831_v27  ;;  %v3978_v24 = vpack.c.bf16 %v3798_v29, %v3798_v29  ;;  %v20716_v19 = vpop.permute.xlu1 %3129  ;;  %v20731_v3 = vrot.slane %v10655_v26, %v18544_v37 }
 0x6f9   : > { %16661 = vmatprep.mubr.msk.bf16.mxu0 %vm17882_vm0, %v21976_v41  ;;  %16671 = vmatprep.subr.bf16.mxu0 %v21976_v41  ;;  %v7471_v30 = vpop.xlane.xlu0 %7470  ;;  %v3339_v7 = vcombine.low %v22022_v4, %v20716_v19 }
 0x6fa   : > { %16679 = vmatprep.mubr.msk.bf16.mxu1 %vm17882_vm0, %v21976_v41  ;;  %v17401_v38 = vpop.eup %17400  ;;  %16689 = vmatprep.subr.bf16.mxu1 %v21976_v41  ;;  %v7688_v61 = vpack.c.bf16 %v7624_v53, %v7624_v53  ;;  %v9877_v34 = vsel %vm7713_vm3, %v3978_v24, 0 }
 0x6fb   : > { %v7627_v58 = vmul.f32 %v17401_v38, %v22050_v20  ;;  %v3347_v44 = vrot.slane %v3339_v7, %v18544_v37 }
 0x6fd   : > { %v7691_v32 = vpack.c.bf16 %v7627_v58, %v7627_v58  ;;  %v20722_v13 = vpop.permute.xlu0 %3117 }
 0x6ff   : > { %16662 = vmatmul.mubr.msk.bf16.vlgmr.msra.gmra.mrb[224].mxu0 %vm7709_vm4, %v7688_v61  ;;  %v17403_v35 = vpop.eup %17402  ;;  %16680 = vmatmul.mubr.msk.bf16.vlgmr.msra.gmra.mrb[220].mxu1 %vm7709_vm4, %v7691_v32 }
 0x700   : > { %16672 = vmatpush3.bf16.msra.mxu0 %v9785_v5  ;;  %v7626_v59 = vmul.f32 %v17403_v35, %v22051_v48  ;;  %16673 = vmatprep.mubr.msk.bf16.mxu0 %vm17882_vm0, %v21976_v41 }
 0x701   : > { %16683 = vmatprep.subr.bf16.mxu0 %v21976_v41  ;;  %16691 = vmatprep.mubr.msk.bf16.mxu1 %vm17882_vm0, %v21976_v41 }
 0x702   : > { %v7690_v18 = vpack.c.bf16 %v7626_v59, %v7626_v59 }
 0x707   : > { %16674 = vmatmul.mubr.msk.bf16.vlgmr.msra.gmra.mrb[228].mxu0 %vm7709_vm4, %v7690_v18 }
 0x708   : > { %16684 = vmatpush3.bf16.msra.mxu0 %v9877_v34  ;;  %16685 = vmatprep.mubr.msk.bf16.mxu0 %vm17882_vm0, %v21976_v41 }
 0x709   : > { %16695 = vmatprep.subr.bf16.mxu0 %v21976_v41 }
 0x728   : > { %v20718_v60 = vpop.f32.mrb[136].mxu1 }
 0x729   : > { %v16429_v2 = vpop.f32.mrb[137].mxu1 }
 0x72a   : > { %v7468_v22 = vpop.xlane.xlu1 %7467  ;;  %v7938_v8 = vpop.f32.mrb[138].mxu1 }
 0x72b   : > { %17404 = vrcp.f32 %v7468_v22  ;;  %v16430_v45 = vpop.f32.mrb[139].mxu1 }
 0x72c   : > { %17406 = vrcp.f32 %v7471_v30 }
 0x72d   : > { %v7477_v32 = vpop.xlane.xlu0 %7476 }
 0x72e   : > { %v7474_v63 = vpop.xlane.xlu1 %7473 }
 0x72f   : > { %17408 = vrcp.f32 %v7474_v63 }
 0x730   : > { %v8027_v28 = vpop.f32.mrb[140].mxu1  ;;  %17410 = vrcp.f32 %v7477_v32 }
 0x731   : > { %v7889_v36 = vpop.f32.mrb[144].mxu0  ;;  %v10680_v21 = vcombine.low %v20718_v60, %v8027_v28  ;;  %v16441_v54 = vpop.f32.mrb[141].mxu1 }
 0x732   : > { %v20725_v51 = vpop.permute.xlu1 %3141  ;;  %v10663_v39 = vcombine.low %v20682_v12, %v7889_v36  ;;  %v16423_v25 = vpop.f32.mrb[145].mxu0  ;;  %v22052_v54 = vld [vmem:[#allocation51_spill] sm:$0xff] }
 0x733   : > { %v3355_v56 = vcombine.low %v20722_v13, %v20725_v51  ;;  %v7892_v1 = vpop.f32.mrb[146].mxu0  ;;  %v8030_v40 = vpop.f32.mrb[142].mxu1 }
 0x734   : > { %v20735_v0 = vrot.slane %v10663_v39, %v18544_v37  ;;  %v16424_v46 = vpop.f32.mrb[147].mxu0  ;;  %v16442_v12 = vpop.f32.mrb[143].mxu1 }
 0x735   : > { %v17405_v14 = vpop.eup %17404  ;;  %v3363_v27 = vrot.slane %v3355_v56, %v18544_v37  ;;  %v7483_v36 = vpop.xlane.xlu0 %7482 }
 0x736   : > { %v7628_v53 = vmul.f32 %v17405_v14, %v20313_v49  ;;  %v10671_v9 = vcombine.low %v20731_v3, %v20735_v0  ;;  %v17407_v8 = vpop.eup %17406  ;;  %17412 = vrcp.f32 %v7483_v36 }
 0x737   : > { %v3371_v38 = vcombine.low %v3347_v44, %v3363_v27  ;;  %v3372_v15 = vcombine.high %v3347_v44, %v3363_v27  ;;  %v7629_v1 = vmul.f32 %v17407_v8, %v22052_v54  ;;  %v10687_v27 = vrot.slane %v10680_v21, %v18544_v37 }
 0x738   : > { %v7692_v20 = vpack.c.bf16 %v7628_v53, %v7628_v53  ;;  %v20743_v61 = vpop.f32.mrb[144].mxu1 }
 0x739   : > { %v3379_v26 = vrot.slane %v3371_v38, %v18561_v47  ;;  %v3386_v58 = vrot.slane %v3372_v15, %v18561_v47  ;;  %v7981_v5 = vpop.f32.mrb[148].mxu0  ;;  %v16453_v35 = vpop.f32.mrb[145].mxu1 }
 0x73a   : > { %16686 = vmatmul.mubr.msk.bf16.vlgmr.msra.gmra.mrb[232].mxu0 %vm7709_vm4, %v7692_v20  ;;  %v16435_v49 = vpop.f32.mrb[149].mxu0  ;;  %v8122_v59 = vpop.f32.mrb[146].mxu1  ;;  %v7693_v35 = vpack.c.bf16 %v7629_v1, %v7629_v1 }
 0x73b   : > { %v3806_v29 = vcombine.high %v3379_v26, %v21976_v41  ;;  %16697 = vmatprep.mubr.msk.bf16.mxu0 %vm17882_vm0, %v21976_v41  ;;  %v7984_v48 = vpop.f32.mrb[150].mxu0  ;;  %v3805_v24 = vrot.slane %v3379_v26, %v18544_v37  ;;  %v3839_v18 = vcombine.high %v3386_v58, %v21976_v41  ;;  %v16454_v60 = vpop.f32.mrb[147].mxu1  ;;  %v20763_v40 = vrot.slane %v3386_v58, %v18544_v37 }
 0x73c   : > { %v16436_v34 = vpop.f32.mrb[151].mxu0  ;;  %v17409_v25 = vpop.eup %17408 }
 0x73d   : > { %v3813_v22 = vrot.slane %v3806_v29, %v18544_v37  ;;  %v20757_v28 = vrot.slane %v3839_v18, %v18544_v37  ;;  %v7630_v29 = vmul.f32 %v17409_v25, %v20341_v16  ;;  %v17411_v48 = vpop.eup %17410  ;;  %v10678_v18 = vrot.slane %v10671_v9, %v18561_v47 }
 0x73e   : > { %v7631_v8 = vmul.f32 %v17411_v48, %v20334_v23 }
 0x73f   : > { %v3814_v2 = vcombine.low %v3805_v24, %v3813_v22  ;;  %v3815_v30 = vcombine.high %v3805_v24, %v3813_v22  ;;  %v3848_v1 = vcombine.high %v20763_v40, %v20757_v28 }
 0x740   : > { %v20752_v45 = vpop.f32.mrb[148].mxu1 }
 0x741   : > { %v3822_v63 = vrot.slane %v3814_v2, %v18561_v47  ;;  %v3829_v7 = vrot.slane %v3815_v30, %v18561_v47  ;;  %v10705_v56 = vcombine.low %v20743_v61, %v20752_v45  ;;  %v16465_v44 = vpop.f32.mrb[149].mxu1  ;;  %v7694_v30 = vpack.c.bf16 %v7630_v29, %v7630_v29 }
 0x742   : > { %v8073_v39 = vpop.f32.mrb[152].mxu0  ;;  %v8214_v12 = vpop.f32.mrb[150].mxu1 }
 0x743   : > { %v10688_v14 = vcombine.low %v7981_v5, %v8073_v39  ;;  %v16447_v3 = vpop.f32.mrb[153].mxu0  ;;  %v3979_v0 = vpack.c.bf16 %v3822_v63, %v3822_v63  ;;  %v3830_v53 = vcombine.high %v3822_v63, %v21976_v41  ;;  %v3831_v38 = vcombine.high %v3829_v7, %v21976_v41  ;;  %v16466_v26 = vpop.f32.mrb[151].mxu1 }
 0x744   : > { %v8076_v46 = vpop.f32.mrb[154].mxu0  ;;  %v3981_v58 = vpack.c.bf16 %v3829_v7, %v3829_v7  ;;  %v3847_v5 = vcombine.low %v20763_v40, %v20757_v28 }
 0x745   : > { %v10695_v15 = vrot.slane %v10688_v14, %v18544_v37  ;;  %v16448_v20 = vpop.f32.mrb[155].mxu0  ;;  %v9923_v32 = vsel %vm7713_vm3, %v3979_v0, 0  ;;  %v3980_v21 = vpack.c.bf16 %v3830_v53, %v3830_v53  ;;  %v3982_v24 = vpack.c.bf16 %v3831_v38, %v3831_v38  ;;  %v17413_v46 = vpop.eup %17412 }
 0x746   : > { %16690 = vmatpush3.bf16.msra.mxu1 %v9923_v32  ;;  %v10015_v16 = vsel %vm7713_vm3, %v3981_v58, 0  ;;  %v20782_v22 = vrot.slane %v3847_v5, %v18561_v47  ;;  %v20811_v38 = vrot.slane %v3848_v1, %v18561_v47  ;;  %v7633_v58 = vmul.f32 %v17413_v46, %v20355_v6 }
 0x747   : > { %v10696_v49 = vcombine.low %v10687_v27, %v10695_v15  ;;  %16701 = vmatprep.subr.bf16.mxu1 %v21976_v41  ;;  %v9969_v59 = vsel %vm7713_vm3, %v3980_v21, 0  ;;  %v10061_v54 = vsel %vm7713_vm3, %v3982_v24, 0  ;;  %v7695_v27 = vpack.c.bf16 %v7631_v8, %v7631_v8 }
 0x748   : > { %16696 = vmatpush3.bf16.msra.mxu0 %v9969_v59  ;;  %v20778_v60 = vpop.f32.mrb[152].mxu1  ;;  %v3983_v0 = vpack.c.bf16 %v20782_v22, %v20782_v22  ;;  %v3356_v15 = vcombine.high %v20722_v13, %v20725_v51  ;;  %v10712_v51 = vrot.slane %v10705_v56, %v18544_v37  ;;  %v3985_v6 = vpack.c.bf16 %v20811_v38, %v20811_v38 }
 0x749   : > { %v10703_v34 = vrot.slane %v10696_v49, %v18561_v47  ;;  %16692 = vmatmul.mubr.msk.bf16.vlgmr.msra.gmra.mrb[224].mxu1 %vm7709_vm4, %v7693_v35  ;;  %16707 = vmatprep.subr.bf16.mxu0 %v21976_v41  ;;  %v16477_v36 = vpop.f32.mrb[153].mxu1  ;;  %v3340_v49 = vcombine.high %v22022_v4, %v20716_v19 }
 0x74a   : > { %v8165_v2 = vpop.f32.mrb[156].mxu0  ;;  %16702 = vmatpush3.bf16.msra.mxu1 %v10015_v16  ;;  %16703 = vmatprep.mubr.msk.bf16.mxu1 %vm17882_vm0, %v21976_v41  ;;  %v8306_v25 = vpop.f32.mrb[154].mxu1  ;;  %v10107_v12 = vsel %vm7713_vm3, %v3983_v0, 0  ;;  %v3370_v24 = vrot.slane %v3356_v15, %v18544_v37  ;;  %v10199_v4 = vsel %vm7713_vm3, %v3985_v6, 0 }
 0x74b   : > { %v11055_v9 = vcombine.low %v10678_v18, %v10703_v34  ;;  %v15163_v63 = vcombine.high %v10678_v18, %v10703_v34  ;;  %v16459_v7 = vpop.f32.mrb[157].mxu0  ;;  %16713 = vmatprep.subr.bf16.mxu1 %v21976_v41  ;;  %16698 = vmatmul.mubr.msk.bf16.vlgmr.msra.gmra.mrb[236].mxu0 %vm7709_vm4, %v7694_v30  ;;  %v16478_v44 = vpop.f32.mrb[155].mxu1  ;;  %v7697_v34 = vpack.c.bf16 %v7633_v58, %v7633_v58 }
 0x74c   : > { %v8168_v39 = vpop.f32.mrb[158].mxu0  ;;  %16708 = vmatpush3.bf16.msra.mxu0 %v10061_v54  ;;  %16709 = vmatprep.mubr.msk.bf16.mxu0 %vm17882_vm0, %v21976_v41  ;;  %v7486_v7 = vpop.xlane.xlu0 %7485 }
 0x74d   : > { %v20794_v23 = vrot.slane %v11055_v9, %v18544_v37  ;;  %v20797_v14 = vrot.slane %v15163_v63, %v18544_v37  ;;  %v16460_v3 = vpop.f32.mrb[159].mxu0  ;;  %16719 = vmatprep.subr.bf16.mxu0 %v21976_v41 }
 0x74f   : > { %v11087_v28 = vcombine.low %v20794_v23, %v20797_v14  ;;  %v11088_v40 = vcombine.high %v20794_v23, %v20797_v14 }
 0x750   : > { %v8395_v53 = vpop.f32.mrb[156].mxu1 }
 0x751   : > { %16704 = vmatmul.mubr.msk.bf16.vlgmr.msra.gmra.mrb[228].mxu1 %vm7709_vm4, %v7695_v27  ;;  %v10730_v26 = vcombine.low %v20778_v60, %v8395_v53  ;;  %v16489_v32 = vpop.f32.mrb[157].mxu1  ;;  %v3354_v60 = vrot.slane %v3340_v49, %v18544_v37  ;;  %v7492_v49 = vpop.xlane.xlu0 %7491 }
 0x752   : > { %16714 = vmatpush3.bf16.msra.mxu1 %v10107_v12  ;;  %v8257_v20 = vpop.f32.mrb[160].mxu0  ;;  %16715 = vmatprep.mubr.msk.bf16.mxu1 %vm17882_vm0, %v21976_v41  ;;  %v8398_v21 = vpop.f32.mrb[158].mxu1 }
 0x753   : > { %v10713_v5 = vcombine.low %v8165_v2, %v8257_v20  ;;  %v16471_v29 = vpop.f32.mrb[161].mxu0  ;;  %16725 = vmatprep.subr.bf16.mxu1 %v21976_v41  ;;  %v16490_v13 = vpop.f32.mrb[159].mxu1  ;;  %v3387_v61 = vcombine.low %v3354_v60, %v3370_v24  ;;  %v10737_v12 = vrot.slane %v10730_v26, %v18544_v37 }
 0x754   : > { %v8260_v35 = vpop.f32.mrb[162].mxu0  ;;  %v3388_v29 = vcombine.high %v3354_v60, %v3370_v24 }
 0x755   : > { %v10720_v48 = vrot.slane %v10713_v5, %v18544_v37  ;;  %v16472_v59 = vpop.f32.mrb[163].mxu0  ;;  %v3395_v63 = vrot.slane %v3387_v61, %v18561_v47  ;;  %v7498_v23 = vpop.xlane.xlu0 %7497 }
 0x756   : > { %v3863_v59 = vcombine.high %v20782_v22, %v21976_v41  ;;  %v20861_v61 = vrot.slane %v3388_v29, %v18561_v47  ;;  %v3864_v29 = vcombine.high %v20811_v38, %v21976_v41 }
 0x757   : > { %v10721_v18 = vcombine.low %v10712_v51, %v10720_v48  ;;  %v3872_v39 = vcombine.high %v3395_v63, %v21976_v41  ;;  %v20850_v21 = vrot.slane %v3395_v63, %v18544_v37 }
 0x758   : > { %v20833_v19 = vpop.f32.mrb[160].mxu1 }
 0x759   : > { %16716 = vmatmul.mubr.msk.bf16.vlgmr.msra.gmra.mrb[232].mxu1 %vm7709_vm4, %v7697_v34  ;;  %v16501_v56 = vpop.f32.mrb[161].mxu1  ;;  %v20847_v32 = vrot.slane %v3872_v39, %v18544_v37  ;;  %v10728_v35 = vrot.slane %v10721_v18, %v18561_v47 }
 0x75a   : > { %16726 = vmatpush3.bf16.msra.mxu1 %v10199_v4  ;;  %v8349_v45 = vpop.f32.mrb[164].mxu0  ;;  %16727 = vmatprep.mubr.msk.bf16.mxu1 %vm17882_vm0, %v21976_v41  ;;  %v8490_v2 = vpop.f32.mrb[162].mxu1 }
 0x75b   : > { %v16483_v16 = vpop.f32.mrb[165].mxu0  ;;  %16737 = vmatprep.subr.bf16.mxu1 %v21976_v41  ;;  %v16502_v8 = vpop.f32.mrb[163].mxu1  ;;  %v3880_v6 = vcombine.low %v20850_v21, %v20847_v32 }
 0x75c   : > { %v8352_v30 = vpop.f32.mrb[166].mxu0  ;;  %v3984_v8 = vpack.c.bf16 %v3863_v59, %v3863_v59 }
 0x75d   : > { %v16484_v9 = vpop.f32.mrb[167].mxu0 }
 0x75e   : > { %v20866_v9 = vrot.slane %v3880_v6, %v18561_v47 }
 0x760   : > { %v20839_v36 = vpop.f32.mrb[164].mxu1 }
 0x761   : > { %v10755_v54 = vcombine.low %v20833_v19, %v20839_v36  ;;  %v16513_v1 = vpop.f32.mrb[165].mxu1  ;;  %v3986_v36 = vpack.c.bf16 %v3864_v29, %v3864_v29 }
 0x762   : > { %v8441_v25 = vpop.f32.mrb[168].mxu0  ;;  %v8582_v46 = vpop.f32.mrb[166].mxu1  ;;  %v3881_v1 = vcombine.high %v20850_v21, %v20847_v32 }
 0x763   : > { %v10738_v3 = vcombine.low %v8349_v45, %v8441_v25  ;;  %v16495_v44 = vpop.f32.mrb[169].mxu0  ;;  %v7480_v0 = vpop.xlane.xlu1 %7479  ;;  %v3905_v25 = vcombine.high %v20861_v61, %v21976_v41  ;;  %v20917_v59 = vrot.slane %v10755_v54, %v18544_v37 }
 0x764   : > { %17414 = vrcp.f32 %v7480_v0  ;;  %v8444_v27 = vpop.f32.mrb[170].mxu0  ;;  %v16514_v20 = vpop.f32.mrb[167].mxu1  ;;  %v3895_v54 = vrot.slane %v3881_v1, %v18561_v47 }
 0x765   : > { %v10745_v53 = vrot.slane %v10738_v3, %v18544_v37  ;;  %v16496_v15 = vpop.f32.mrb[171].mxu0  ;;  %17416 = vrcp.f32 %v7486_v7  ;;  %v20877_v3 = vrot.slane %v11087_v28, %v18561_v47 }
 0x766   : > { %v3989_v1 = vpack.c.bf16 %v3895_v54, %v3895_v54 }
 0x767   : > { %v10746_v58 = vcombine.low %v10737_v12, %v10745_v53  ;;  %v7489_v5 = vpop.xlane.xlu1 %7488  ;;  %v20888_v12 = vrot.slane %v11088_v40, %v18561_v47 }
 0x768   : > { %17418 = vrcp.f32 %v7489_v5  ;;  %v3987_v5 = vpack.c.bf16 %v20866_v9, %v20866_v9 }
 0x769   : > { %v10753_v26 = vrot.slane %v10746_v58, %v18561_v47  ;;  %v20854_v13 = vpop.f32.mrb[168].mxu1  ;;  %v10153_v58 = vsel %vm7713_vm3, %v3984_v8, 0 }
 0x76a   : > { %v8533_v51 = vpop.f32.mrb[172].mxu0  ;;  %v16525_v48 = vpop.f32.mrb[169].mxu1  ;;  %v10291_v19 = vsel %vm7713_vm3, %v3987_v5, 0 }
 0x76b   : > { %v11071_v24 = vcombine.low %v10728_v35, %v10753_v26  ;;  %v15164_v34 = vcombine.high %v10728_v35, %v10753_v26  ;;  %v16507_v60 = vpop.f32.mrb[173].mxu0  ;;  %v7495_v4 = vpop.xlane.xlu1 %7494 }
 0x76c   : > { %17420 = vrcp.f32 %v7495_v4  ;;  %v8536_v18 = vpop.f32.mrb[174].mxu0  ;;  %v8674_v45 = vpop.f32.mrb[170].mxu1 }
 0x76d   : > { %v11078_v56 = vrot.slane %v11071_v24, %v18544_v37  ;;  %v11086_v16 = vrot.slane %v15164_v34, %v18544_v37  ;;  %v16508_v2 = vpop.f32.mrb[175].mxu0  ;;  %v16526_v30 = vpop.f32.mrb[171].mxu1  ;;  %17422 = vrcp.f32 %v7492_v49  ;;  %v20924_v18 = vrot.slane %v3905_v25, %v18544_v37 }
 0x76e   : > { %v17415_v22 = vpop.eup %17414  ;;  %v20935_v45 = vrot.slane %v20861_v61, %v18544_v37  ;;  %v3896_v61 = vcombine.high %v20866_v9, %v21976_v41  ;;  %v10383_v9 = vsel %vm7713_vm3, %v3989_v1, 0 }
 0x76f   : > { %v11103_v63 = vcombine.low %v11078_v56, %v11086_v16  ;;  %v11104_v7 = vcombine.high %v11078_v56, %v11086_v16  ;;  %v7632_v39 = vmul.f32 %v17415_v22, %v20573_v11  ;;  %v17417_v44 = vpop.eup %17416  ;;  %v7501_v0 = vpop.xlane.xlu1 %7500 }
 0x770   : > { %17424 = vrcp.f32 %v7501_v0  ;;  %v3988_v5 = vpack.c.bf16 %v3896_v61, %v3896_v61 }
 0x771   : > { %v20879_v27 = vpop.f32.mrb[172].mxu1  ;;  %v7696_v46 = vpack.c.bf16 %v7632_v39, %v7632_v39  ;;  %v20882_v11 = vrot.slane %v11103_v63, %v18561_v47  ;;  %v20891_v53 = vrot.slane %v11104_v7, %v18561_v47  ;;  %17426 = vrcp.f32 %v7498_v23 }
 0x772   : > { %v17419_v15 = vpop.eup %17418  ;;  %v8625_v28 = vpop.f32.mrb[176].mxu0  ;;  %v10780_v20 = vcombine.low %v20854_v13, %v20879_v27  ;;  %v10245_v39 = vsel %vm7713_vm3, %v3986_v36, 0  ;;  %v3897_v36 = vcombine.high %v3895_v54, %v21976_v41 }
 0x773   : > { %v16537_v32 = vpop.f32.mrb[173].mxu1  ;;  %v7635_v14 = vmul.f32 %v17419_v15, %v20581_v33  ;;  %v10763_v40 = vcombine.low %v8533_v51, %v8625_v28  ;;  %v16519_v21 = vpop.f32.mrb[177].mxu0  ;;  %16710 = vmatmul.mubr.msk.bf16.vlgmr.msra.gmra.mrb[240].mxu0 %vm7709_vm4, %v7696_v46  ;;  %v11120_v49 = vcombine.high %v20877_v3, %v20882_v11  ;;  %v11121_v35 = vcombine.low %v20888_v12, %v20891_v53 }
 0x774   : > { %16720 = vmatpush3.bf16.msra.mxu0 %v10153_v58  ;;  %v8628_v26 = vpop.f32.mrb[178].mxu0  ;;  %v8766_v48 = vpop.f32.mrb[174].mxu1  ;;  %16721 = vmatprep.mubr.msk.bf16.mxu0 %vm17882_vm0, %v21976_v41  ;;  %v11119_v33 = vcombine.low %v20877_v3, %v20882_v11  ;;  %v11122_v38 = vcombine.high %v20888_v12, %v20891_v53  ;;  %v7634_v51 = vmul.f32 %v17417_v44, %v20383_v52  ;;  %v15171_v11 = vld [vmem:[%s22055_s20] ss:$0 sm:$0xff] }
 0x775   : > { %v20920_v6 = vrot.slane %v10763_v40, %v18544_v37  ;;  %v16520_v24 = vpop.f32.mrb[179].mxu0  ;;  %v16538_v34 = vpop.f32.mrb[175].mxu1  ;;  %v7699_v60 = vpack.c.bf16 %v7635_v14, %v7635_v14  ;;  %16731 = vmatprep.subr.bf16.mxu0 %v21976_v41 }
 0x776   : > { %v17421_v4 = vpop.eup %17420  ;;  %v7507_v16 = vpop.xlane.xlu1 %7506  ;;  %v7698_v30 = vpack.c.bf16 %v7634_v51, %v7634_v51  ;;  %v3914_v24 = vcombine.high %v20935_v45, %v20924_v18 }
 0x777   : > { %v10771_v52 = vcombine.low %v20917_v59, %v20920_v6  ;;  %16728 = vmatmul.mubr.msk.bf16.vlgmr.msra.gmra.mrb[236].mxu1 %vm7709_vm4, %v7699_v60  ;;  %v7637_v56 = vmul.f32 %v17421_v4, %v20604_v10  ;;  %v17423_v22 = vpop.eup %17422  ;;  %v3913_v10 = vcombine.low %v20935_v45, %v20924_v18  ;;  %17428 = vrcp.f32 %v7507_v16  ;;  %v7504_v15 = vpop.xlane.xlu0 %7503 }
 0x778   : > { %16738 = vmatpush3.bf16.msra.mxu1 %v10291_v19  ;;  %16739 = vmatprep.mubr.msk.bf16.mxu1 %vm17882_vm0, %v21976_v41  ;;  %v7636_v46 = vmul.f32 %v17423_v22, %v20392_v43  ;;  %17430 = vrcp.f32 %v7504_v15  ;;  %v10787_v45 = vrot.slane %v10780_v20, %v18544_v37 }
 0x779   : > { %v20938_v2 = vpop.f32.mrb[176].mxu1  ;;  %16749 = vmatprep.subr.bf16.mxu1 %v21976_v41  ;;  %v7701_v32 = vpack.c.bf16 %v7637_v56, %v7637_v56  ;;  %v3921_v29 = vrot.slane %v3913_v10, %v18561_v47  ;;  %v10778_v13 = vrot.slane %v10771_v52, %v18561_v47 }
 0x77a   : > { %v8717_v8 = vpop.f32.mrb[180].mxu0  ;;  %v16549_v63 = vpop.f32.mrb[177].mxu1  ;;  %v7700_v40 = vpack.c.bf16 %v7636_v46, %v7636_v46 }
 0x77b   : > { %v16531_v7 = vpop.f32.mrb[181].mxu0  ;;  %16722 = vmatmul.mubr.msk.bf16.vlgmr.msra.gmra.mrb[244].mxu0 %vm7709_vm4, %v7698_v30  ;;  %v8858_v25 = vpop.f32.mrb[178].mxu1  ;;  %v3991_v19 = vpack.c.bf16 %v3921_v29, %v3921_v29  ;;  %v3929_v46 = vcombine.high %v3921_v29, %v21976_v41 }
 0x77c   : > { %16732 = vmatpush3.bf16.msra.mxu0 %v10245_v39  ;;  %v8720_v44 = vpop.f32.mrb[182].mxu0  ;;  %v16550_v0 = vpop.f32.mrb[179].mxu1  ;;  %16733 = vmatprep.mubr.msk.bf16.mxu0 %vm17882_vm0, %v21976_v41  ;;  %v3990_v25 = vpack.c.bf16 %v3897_v36, %v3897_v36 }
 0x77d   : > { %v16532_v28 = vpop.f32.mrb[183].mxu0  ;;  %16743 = vmatprep.subr.bf16.mxu0 %v21976_v41  ;;  %v17425_v58 = vpop.eup %17424  ;;  %v10475_v39 = vsel %vm7713_vm3, %v3991_v19, 0 }
 0x77e   : > { %v7639_v43 = vmul.f32 %v17425_v58, %v20611_v57  ;;  %v7513_v23 = vpop.xlane.xlu1 %7512  ;;  %v17427_v21 = vpop.eup %17426  ;;  %v10337_v57 = vsel %vm7713_vm3, %v3988_v5, 0  ;;  %v10429_v59 = vsel %vm7713_vm3, %v3990_v25, 0 }
 0x77f   : > { %16740 = vmatmul.mubr.msk.bf16.vlgmr.msra.gmra.mrb[240].mxu1 %vm7709_vm4, %v7701_v32  ;;  %17432 = vrcp.f32 %v7513_v23  ;;  %v7638_v30 = vmul.f32 %v17427_v21, %v20415_v55  ;;  %v7510_v18 = vpop.xlane.xlu0 %7509  ;;  %v3928_v55 = vrot.slane %v3914_v24, %v18561_v47  ;;  %v3992_v24 = vpack.c.bf16 %v3929_v46, %v3929_v46 }
 0x780   : > { %16750 = vmatpush3.bf16.msra.mxu1 %v10383_v9  ;;  %16751 = vmatprep.mubr.msk.bf16.mxu1 %vm17882_vm0, %v21976_v41  ;;  %v7703_v63 = vpack.c.bf16 %v7639_v43, %v7639_v43  ;;  %17434 = vrcp.f32 %v7510_v18 }
 0x781   : > { %v20957_v14 = vpop.f32.mrb[180].mxu1  ;;  %16761 = vmatprep.subr.bf16.mxu1 %v21976_v41  ;;  %v17429_v54 = vpop.eup %17428  ;;  %v7702_v61 = vpack.c.bf16 %v7638_v30, %v7638_v30  ;;  %v3993_v6 = vpack.c.bf16 %v3928_v55, %v3928_v55  ;;  %v10521_v18 = vsel %vm7713_vm3, %v3992_v24, 0 }
 0x782   : > { %v8809_v26 = vpop.f32.mrb[184].mxu0  ;;  %v10805_v48 = vcombine.low %v20938_v2, %v20957_v14  ;;  %v16561_v51 = vpop.f32.mrb[181].mxu1  ;;  %v7641_v27 = vmul.f32 %v17429_v54, %v20637_v31 }
 0x783   : > { %v10788_v34 = vcombine.low %v8717_v8, %v8809_v26  ;;  %v16543_v60 = vpop.f32.mrb[185].mxu0  ;;  %16734 = vmatmul.mubr.msk.bf16.vlgmr.msra.gmra.mrb[248].mxu0 %vm7709_vm4, %v7700_v40  ;;  %v8950_v4 = vpop.f32.mrb[182].mxu1 }
 0x784   : > { %16744 = vmatpush3.bf16.msra.mxu0 %v10337_v57  ;;  %v8812_v56 = vpop.f32.mrb[186].mxu0  ;;  %v16562_v16 = vpop.f32.mrb[183].mxu1  ;;  %16745 = vmatprep.mubr.msk.bf16.mxu0 %vm17882_vm0, %v21976_v41  ;;  %v7705_v40 = vpack.c.bf16 %v7641_v27, %v7641_v27  ;;  %v10812_v54 = vrot.slane %v10805_v48, %v18544_v37 }
 0x785   : > { %v10795_v22 = vrot.slane %v10788_v34, %v18544_v37  ;;  %v16544_v8 = vpop.f32.mrb[187].mxu0  ;;  %16755 = vmatprep.subr.bf16.mxu0 %v21976_v41  ;;  %v17431_v10 = vpop.eup %17430 }
 0x786   : > { %v7640_v9 = vmul.f32 %v17431_v10, %v20427_v50  ;;  %v7516_v5 = vpop.xlane.xlu0 %7515  ;;  %v10567_v50 = vsel %vm7713_vm3, %v3993_v6, 0 }
 0x787   : > { %v10796_v7 = vcombine.low %v10787_v45, %v10795_v22  ;;  %16752 = vmatmul.mubr.msk.bf16.vlgmr.msra.gmra.mrb[244].mxu1 %vm7709_vm4, %v7703_v63  ;;  %17436 = vrcp.f32 %v7516_v5  ;;  %v3930_v22 = vcombine.high %v3928_v55, %v21976_v41 }
 0x788   : > { %16762 = vmatpush3.bf16.msra.mxu1 %v10475_v39  ;;  %16763 = vmatprep.mubr.msk.bf16.mxu1 %vm17882_vm0, %v21976_v41  ;;  %v7704_v34 = vpack.c.bf16 %v7640_v9, %v7640_v9 }
 0x789   : > { %v10803_v20 = vrot.slane %v10796_v7, %v18561_v47  ;;  %v20987_v1 = vpop.f32.mrb[184].mxu1  ;;  %16773 = vmatprep.subr.bf16.mxu1 %v21976_v41  ;;  %v17433_v21 = vpop.eup %17432 }
 0x78a   : > { %v8901_v44 = vpop.f32.mrb[188].mxu0  ;;  %v16573_v0 = vpop.f32.mrb[185].mxu1  ;;  %v7643_v60 = vmul.f32 %v17433_v21, %v20643_v17 }
 0x78b   : > { %v11123_v15 = vcombine.low %v10778_v13, %v10803_v20  ;;  %v15165_v28 = vcombine.high %v10778_v13, %v10803_v20  ;;  %v16555_v32 = vpop.f32.mrb[189].mxu0  ;;  %16746 = vmatmul.mubr.msk.bf16.vlgmr.msra.gmra.mrb[252].mxu0 %vm7709_vm4, %v7702_v61  ;;  %v9042_v31 = vpop.f32.mrb[186].mxu1  ;;  %v3994_v13 = vpack.c.bf16 %v3930_v22, %v3930_v22 }
 0x78c   : > { %16756 = vmatpush3.bf16.msra.mxu0 %v10429_v59  ;;  %v8904_v52 = vpop.f32.mrb[190].mxu0  ;;  %v16574_v58 = vpop.f32.mrb[187].mxu1  ;;  %16757 = vmatprep.mubr.msk.bf16.mxu0 %vm17882_vm0, %v21976_v41  ;;  %v7707_v25 = vpack.c.bf16 %v7643_v60, %v7643_v60 }
 0x78d   : > { %v20997_v29 = vrot.slane %v11123_v15, %v18544_v37  ;;  %v21000_v43 = vrot.slane %v15165_v28, %v18544_v37  ;;  %v16556_v23 = vpop.f32.mrb[191].mxu0  ;;  %16767 = vmatprep.subr.bf16.mxu0 %v21976_v41  ;;  %v17435_v4 = vpop.eup %17434  ;;  %v10613_v2 = vsel %vm7713_vm3, %v3994_v13, 0 }
 0x78e   : > { %v7642_v17 = vmul.f32 %v17435_v4, %v20453_v62  ;;  %v22053_v23 = vmov 0  }
 0x78f   : > { %v11155_v26 = vcombine.low %v20997_v29, %v21000_v43  ;;  %v11156_v51 = vcombine.high %v20997_v29, %v21000_v43  ;;  %16764 = vmatmul.mubr.msk.bf16.vlgmr.msra.gmra.mrb[248].mxu1 %vm7709_vm4, %v7705_v40 }
 0x790   : > { %16774 = vmatpush3.bf16.msra.mxu1 %v10567_v50  ;;  %16775 = vmatprep.mubr.msk.bf16.mxu1 %vm17882_vm0, %v21976_v41  ;;  %v7706_v27 = vpack.c.bf16 %v7642_v17, %v7642_v17 }
 0x791   : > { %v9131_v57 = vpop.f32.mrb[188].mxu1 }
 0x792   : > { %v8993_v19 = vpop.f32.mrb[192].mxu0  ;;  %v10830_v36 = vcombine.low %v20987_v1, %v9131_v57  ;;  %v16585_v56 = vpop.f32.mrb[189].mxu1 }
 0x793   : > { %v10813_v16 = vcombine.low %v8901_v44, %v8993_v19  ;;  %v16567_v30 = vpop.f32.mrb[193].mxu0  ;;  %16758 = vmatmul.mubr.msk.bf16.vlgmr.msra.gmra.mrb[0].mxu0 %vm7709_vm4, %v7704_v34  ;;  %v9134_v45 = vpop.f32.mrb[190].mxu1 }
 0x794   : > { %16768 = vmatpush3.bf16.msra.mxu0 %v10521_v18  ;;  %v8996_v8 = vpop.f32.mrb[194].mxu0  ;;  %v16586_v63 = vpop.f32.mrb[191].mxu1  ;;  %16769 = vmatprep.mubr.msk.bf16.mxu0 %vm17882_vm0, %v21976_v41 }
 0x795   : > { %v10820_v7 = vrot.slane %v10813_v16, %v18544_v37  ;;  %v16568_v39 = vpop.f32.mrb[195].mxu0  ;;  %16779 = vmatprep.subr.bf16.mxu0 %v21976_v41  ;;  %v17437_v1 = vpop.eup %17436 }
 0x796   : > { %v7644_v0 = vmul.f32 %v17437_v1, %v20467_v42  ;;  %v11170_v39 = vrot.slane %v11156_v51, %v18561_v47 }
 0x797   : > { %v10821_v55 = vcombine.low %v10812_v54, %v10820_v7  ;;  %16776 = vmatmul.mubr.msk.bf16.vlgmr.msra.gmra.mrb[252].mxu1 %vm7709_vm4, %v7707_v25  ;;  %v21046_v54 = vrot.slane %v11155_v26, %v18561_v47 }
 0x798   : > { %v7708_v15 = vpack.c.bf16 %v7644_v0, %v7644_v0 }
 0x799   : > { %v21026_v20 = vpop.f32.mrb[192].mxu1  ;;  %v10828_v50 = vrot.slane %v10821_v55, %v18561_v47 }
 0x79a   : > { %v9085_v62 = vpop.f32.mrb[196].mxu0  ;;  %v16597_v61 = vpop.f32.mrb[193].mxu1 }
 0x79b   : > { %v16579_v10 = vpop.f32.mrb[197].mxu0  ;;  %16770 = vmatmul.mubr.msk.bf16.vlgmr.msra.gmra.mrb[4].mxu0 %vm7709_vm4, %v7706_v27  ;;  %v9226_v14 = vpop.f32.mrb[194].mxu1 }
 0x79c   : > { %16780 = vmatpush3.bf16.msra.mxu0 %v10613_v2  ;;  %v9088_v48 = vpop.f32.mrb[198].mxu0  ;;  %v16598_v44 = vpop.f32.mrb[195].mxu1  ;;  %16781 = vmatprep.mubr.msk.bf16.mxu0 %vm17882_vm0, %v21976_v41  ;;  %v10837_v41 = vrot.slane %v10830_v36, %v18544_v37 }
 0x79d   : > { %v16580_v46 = vpop.f32.mrb[199].mxu0 }
 0x7a1   : > { %v9315_v28 = vpop.f32.mrb[196].mxu1 }
 0x7a2   : > { %v9177_v32 = vpop.f32.mrb[200].mxu0  ;;  %v10855_v59 = vcombine.low %v21026_v20, %v9315_v28  ;;  %v16609_v31 = vpop.f32.mrb[197].mxu1 }
 0x7a3   : > { %v10838_v6 = vcombine.low %v9085_v62, %v9177_v32  ;;  %v16591_v52 = vpop.f32.mrb[201].mxu0  ;;  %16782 = vmatmul.mubr.msk.bf16.vlgmr.msra.gmra.mrb[8].mxu0 %vm7709_vm4, %v7708_v15  ;;  %v9318_v58 = vpop.f32.mrb[198].mxu1 }
 0x7a4   : > { %v9180_v9 = vpop.f32.mrb[202].mxu0  ;;  %v16610_v5 = vpop.f32.mrb[199].mxu1  ;;  %12468 = vmatprep.mubr.bf16.mxu0 %v22053_v23  ;;  %v10862_v29 = vrot.slane %v10855_v59, %v18544_v37 }
 0x7a5   : > { %v10845_v42 = vrot.slane %v10838_v6, %v18544_v37  ;;  %v16592_v40 = vpop.f32.mrb[203].mxu0 }
 0x7a7   : > { %v10846_v21 = vcombine.low %v10837_v41, %v10845_v42 }
 0x7a9   : > { %v10853_v24 = vrot.slane %v10846_v21, %v18561_v47  ;;  %v9407_v34 = vpop.f32.mrb[200].mxu1 }
 0x7aa   : > { %v9269_v60 = vpop.f32.mrb[204].mxu0  ;;  %v16621_v57 = vpop.f32.mrb[201].mxu1 }
 0x7ab   : > { %v11139_v4 = vcombine.low %v10828_v50, %v10853_v24  ;;  %v15166_v19 = vcombine.high %v10828_v50, %v10853_v24  ;;  %v16603_v56 = vpop.f32.mrb[205].mxu0  ;;  %v9410_v16 = vpop.f32.mrb[202].mxu1 }
 0x7ac   : > { %v9272_v30 = vpop.f32.mrb[206].mxu0  ;;  %v16622_v18 = vpop.f32.mrb[203].mxu1 }
 0x7ad   : > { %v11146_v45 = vrot.slane %v11139_v4, %v18544_v37  ;;  %v11154_v36 = vrot.slane %v15166_v19, %v18544_v37  ;;  %v16604_v22 = vpop.f32.mrb[207].mxu0 }
 0x7af   : > { %v11171_v8 = vcombine.low %v11146_v45, %v11154_v36  ;;  %v11172_v63 = vcombine.high %v11146_v45, %v11154_v36 }
 0x7b1   : > { %v9499_v17 = vpop.f32.mrb[204].mxu1  ;;  %v21049_v7 = vrot.slane %v11171_v8, %v18561_v47  ;;  %v11186_v25 = vrot.slane %v11172_v63, %v18561_v47 }
 0x7b2   : > { %v9361_v55 = vpop.f32.mrb[208].mxu0  ;;  %v10880_v13 = vcombine.low %v9407_v34, %v9499_v17  ;;  %v16633_v27 = vpop.f32.mrb[205].mxu1 }
 0x7b3   : > { %v10863_v20 = vcombine.low %v9269_v60, %v9361_v55  ;;  %v16615_v1 = vpop.f32.mrb[209].mxu0  ;;  %v9502_v62 = vpop.f32.mrb[206].mxu1  ;;  %v11188_v26 = vcombine.high %v21046_v54, %v21049_v7  ;;  %v11189_v61 = vcombine.low %v11170_v39, %v11186_v25  ;;  %v11187_v10 = vcombine.low %v21046_v54, %v21049_v7 }
 0x7b4   : > { %v9364_v2 = vpop.f32.mrb[210].mxu0  ;;  %v16634_v14 = vpop.f32.mrb[207].mxu1  ;;  %v11190_v48 = vcombine.high %v11170_v39, %v11186_v25  ;;  %v10887_v21 = vrot.slane %v10880_v13, %v18544_v37 }
 0x7b5   : > { %v10870_v43 = vrot.slane %v10863_v20, %v18544_v37  ;;  %v16616_v51 = vpop.f32.mrb[211].mxu0  ;;  %v16984_v44 = vpack.i.bf16 %v11188_v26, %v11120_v49  ;;  %v16989_v0 = vpack.i.bf16 %v11189_v61, %v11121_v35 }
 0x7b6   : > { %v21071_v46 = vpack.i.bf16 %v11190_v48, %v11122_v38 }
 0x7b7   : > { %v10871_v15 = vcombine.low %v10862_v29, %v10870_v43  ;;  %16985 = vrot.lane.b32.xlu1 %v16984_v44, %s17879_s2 }
 0x7b9   : > { %v9591_v28 = vpop.f32.mrb[208].mxu1  ;;  %v10878_v60 = vrot.slane %v10871_v15, %v18561_v47 }
 0x7ba   : > { %v9453_v32 = vpop.f32.mrb[212].mxu0  ;;  %v16645_v59 = vpop.f32.mrb[209].mxu1 }
 0x7bb   : > { %16990 = vrot.lane.b32.xlu1 %v16989_v0, %s17881_s30  ;;  %v16627_v31 = vpop.f32.mrb[213].mxu0  ;;  %v9594_v6 = vpop.f32.mrb[210].mxu1 }
 0x7bc   : > { %v9456_v49 = vpop.f32.mrb[214].mxu0  ;;  %v16646_v52 = vpop.f32.mrb[211].mxu1  ;;  %v17046_v6 = vld [vmem:[%s18351_s16] sm:$0xff]  }
 0x7bd   : > { %v16628_v58 = vpop.f32.mrb[215].mxu0  ;;  %v17047_v49 = vld [vmem:[%s18351_s16 + $0x8] sm:$0xff]   ;;  %16785 = vmatprep.subr.bf16.mxu1 %v17046_v6 }
 0x7be   : > { %16786 = vmatpush3.bf16.msra.mxu1 %v17046_v6 }
 0x7bf   : > { %16787 = vmatprep.subr.bf16.mxu1 %v17047_v49 }
 0x7c1   : > { %v9683_v9 = vpop.f32.mrb[212].mxu1 }
 0x7c2   : > { %v9545_v35 = vpop.f32.mrb[216].mxu0  ;;  %v10905_v5 = vcombine.low %v9591_v28, %v9683_v9  ;;  %v16657_v41 = vpop.f32.mrb[213].mxu1  ;;  %16788 = vmatpush3.bf16.msra.mxu1 %v17047_v49 }
 0x7c3   : > { %v10888_v12 = vcombine.low %v9453_v32, %v9545_v35  ;;  %v16639_v53 = vpop.f32.mrb[217].mxu0  ;;  %v9686_v38 = vpop.f32.mrb[214].mxu1 }
 0x7c4   : > { %v9548_v42 = vpop.f32.mrb[218].mxu0  ;;  %v16658_v40 = vpop.f32.mrb[215].mxu1  ;;  %v10912_v61 = vrot.slane %v10905_v5, %v18544_v37  ;;  %v17048_v5 = vld [vmem:[%s18351_s16 + $0x10] sm:$0xff]  }
 0x7c5   : > { %v10895_v50 = vrot.slane %v10888_v12, %v18544_v37  ;;  %v16640_v24 = vpop.f32.mrb[219].mxu0  ;;  %16789 = vmatprep.subr.bf16.mxu1 %v17048_v5  ;;  %v17049_v42 = vld [vmem:[%s18351_s16 + $0x18] sm:$0xff]  }
 0x7c6   : > { %16790 = vmatpush3.bf16.msra.mxu1 %v17048_v5 }
 0x7c7   : > { %v10896_v34 = vcombine.low %v10887_v21, %v10895_v50  ;;  %16791 = vmatprep.subr.bf16.mxu1 %v17049_v42 }
 0x7c9   : > { %v10903_v57 = vrot.slane %v10896_v34, %v18561_v47  ;;  %v17050_v34 = vld [vmem:[%s18351_s16 + $0x20] sm:$0xff]  }
 0x7ca   : > { %v9637_v4 = vpop.f32.mrb[220].mxu0  ;;  %v9775_v30 = vpop.f32.mrb[216].mxu1  ;;  %16792 = vmatpush3.bf16.msra.mxu1 %v17049_v42 }
 0x7cb   : > { %v11191_v19 = vcombine.low %v10878_v60, %v10903_v57  ;;  %v15167_v56 = vcombine.high %v10878_v60, %v10903_v57  ;;  %v16651_v16 = vpop.f32.mrb[221].mxu0  ;;  %v16669_v45 = vpop.f32.mrb[217].mxu1  ;;  %16793 = vmatprep.subr.bf16.mxu1 %v17050_v34 }
 0x7cc   : > { %v9640_v18 = vpop.f32.mrb[222].mxu0  ;;  %v9778_v63 = vpop.f32.mrb[218].mxu1 }
 0x7cd   : > { %v11198_v36 = vrot.slane %v11191_v19, %v18544_v37  ;;  %v11206_v22 = vrot.slane %v15167_v56, %v18544_v37  ;;  %v16652_v8 = vpop.f32.mrb[223].mxu0  ;;  %v16670_v17 = vpop.f32.mrb[219].mxu1 }
 0x7ce   : > { %v17051_v17 = vld [vmem:[%s18351_s16 + $0x28] sm:$0xff]   ;;  %16794 = vmatpush3.bf16.msra.mxu1 %v17050_v34 }
 0x7cf   : > { %v11223_v39 = vcombine.low %v11198_v36, %v11206_v22  ;;  %v11224_v25 = vcombine.high %v11198_v36, %v11206_v22  ;;  %16795 = vmatprep.subr.bf16.mxu1 %v17051_v17 }
 0x7d1   : > { %v21095_v57 = vrot.slane %v11224_v25, %v18561_v47  ;;  %v21101_v19 = vrot.slane %v11223_v39, %v18561_v47 }
 0x7d2   : > { %v9729_v55 = vpop.f32.mrb[224].mxu0  ;;  %v9867_v20 = vpop.f32.mrb[220].mxu1  ;;  %16796 = vmatpush3.bf16.msra.mxu1 %v17051_v17 }
 0x7d3   : > { %v10913_v13 = vcombine.low %v9637_v4, %v9729_v55  ;;  %v16663_v27 = vpop.f32.mrb[225].mxu0  ;;  %v10930_v62 = vcombine.low %v9775_v30, %v9867_v20  ;;  %v16681_v26 = vpop.f32.mrb[221].mxu1 }
 0x7d4   : > { %v9732_v1 = vpop.f32.mrb[226].mxu0  ;;  %v9870_v48 = vpop.f32.mrb[222].mxu1 }
 0x7d5   : > { %v10920_v2 = vrot.slane %v10913_v13, %v18544_v37  ;;  %v16664_v14 = vpop.f32.mrb[227].mxu0  ;;  %v16682_v29 = vpop.f32.mrb[223].mxu1  ;;  %v10937_v52 = vrot.slane %v10930_v62, %v18544_v37 }
 0x7d7   : > { %v10921_v43 = vcombine.low %v10912_v61, %v10920_v2 }
 0x7d9   : > { %v10928_v41 = vrot.slane %v10921_v43, %v18561_v47 }
 0x7da   : > { %v9821_v51 = vpop.f32.mrb[228].mxu0 }
 0x7db   : > { %v16675_v44 = vpop.f32.mrb[229].mxu0 }
 0x7dc   : > { %v9824_v0 = vpop.f32.mrb[230].mxu0 }
 0x7dd   : > { %v16676_v15 = vpop.f32.mrb[231].mxu0 }
 0x80d   : > { %v9913_v28 = vpop.f32.mrb[232].mxu0 }
 0x80e   : > { %v10938_v32 = vcombine.low %v9821_v51, %v9913_v28  ;;  %v16687_v59 = vpop.f32.mrb[233].mxu0 }
 0x80f   : > { %v9916_v31 = vpop.f32.mrb[234].mxu0 }
 0x810   : > { %v10945_v58 = vrot.slane %v10938_v32, %v18544_v37  ;;  %v16688_v9 = vpop.f32.mrb[235].mxu0 }
 0x812   : > { %v10946_v35 = vcombine.low %v10937_v52, %v10945_v58 }
 0x814   : > { %v10953_v12 = vrot.slane %v10946_v35, %v18561_v47 }
 0x816   : > { %v11207_v53 = vcombine.low %v10928_v41, %v10953_v12  ;;  %v15168_v38 = vcombine.high %v10928_v41, %v10953_v12 }
 0x818   : > { %v11214_v40 = vrot.slane %v11207_v53, %v18544_v37  ;;  %v11222_v21 = vrot.slane %v15168_v38, %v18544_v37 }
 0x81a   : > { %v11239_v50 = vcombine.low %v11214_v40, %v11222_v21  ;;  %v11240_v24 = vcombine.high %v11214_v40, %v11222_v21 }
 0x81c   : > { %v9959_v60 = vpop.f32.mrb[224].mxu1  ;;  %v21098_v4 = vrot.slane %v11240_v24, %v18561_v47  ;;  %v21104_v56 = vrot.slane %v11239_v50, %v18561_v47 }
 0x81d   : > { %v16693_v16 = vpop.f32.mrb[225].mxu1 }
 0x81e   : > { %v9962_v30 = vpop.f32.mrb[226].mxu1  ;;  %v11257_v18 = vcombine.low %v21095_v57, %v21098_v4  ;;  %v11256_v45 = vcombine.high %v21101_v19, %v21104_v56  ;;  %v11258_v36 = vcombine.high %v21095_v57, %v21098_v4  ;;  %v11255_v22 = vcombine.low %v21101_v19, %v21104_v56  ;;  %v10005_v8 = vpop.f32.mrb[236].mxu0 }
 0x81f   : > { %v16694_v63 = vpop.f32.mrb[227].mxu1  ;;  %v16699_v39 = vpop.f32.mrb[237].mxu0 }
 0x820   : > { %v10008_v25 = vpop.f32.mrb[238].mxu0 }
 0x821   : > { %v16700_v55 = vpop.f32.mrb[239].mxu0 }
 0x824   : > { %v10051_v13 = vpop.f32.mrb[228].mxu1 }
 0x825   : > { %v10955_v27 = vcombine.low %v9959_v60, %v10051_v13  ;;  %v16705_v20 = vpop.f32.mrb[229].mxu1 }
 0x826   : > { %v10054_v1 = vpop.f32.mrb[230].mxu1 }
 0x827   : > { %v16706_v62 = vpop.f32.mrb[231].mxu1  ;;  %v10962_v44 = vrot.slane %v10955_v27, %v18544_v37 }
 0x82c   : > { %v10143_v26 = vpop.f32.mrb[232].mxu1 }
 0x82d   : > { %v16717_v61 = vpop.f32.mrb[233].mxu1 }
 0x82e   : > { %v10146_v2 = vpop.f32.mrb[234].mxu1 }
 0x82f   : > { %v16718_v14 = vpop.f32.mrb[235].mxu1 }
 0x846   : > { %v10097_v48 = vpop.f32.mrb[240].mxu0 }
 0x847   : > { %v10963_v29 = vcombine.low %v10005_v8, %v10097_v48  ;;  %v16711_v43 = vpop.f32.mrb[241].mxu0 }
 0x848   : > { %v10100_v51 = vpop.f32.mrb[242].mxu0 }
 0x849   : > { %v10970_v0 = vrot.slane %v10963_v29, %v18544_v37  ;;  %v16712_v15 = vpop.f32.mrb[243].mxu0 }
 0x84a   : > { %v10235_v28 = vpop.f32.mrb[236].mxu1 }
 0x84b   : > { %v10971_v32 = vcombine.low %v10962_v44, %v10970_v0  ;;  %v10980_v59 = vcombine.low %v10143_v26, %v10235_v28  ;;  %v16729_v31 = vpop.f32.mrb[237].mxu1 }
 0x84c   : > { %v10238_v6 = vpop.f32.mrb[238].mxu1 }
 0x84d   : > { %v16730_v49 = vpop.f32.mrb[239].mxu1  ;;  %v10987_v50 = vrot.slane %v10980_v59, %v18544_v37  ;;  %v10978_v17 = vrot.slane %v10971_v32, %v18561_v47 }
 0x84e   : > { %v10189_v52 = vpop.f32.mrb[244].mxu0 }
 0x84f   : > { %v16723_v58 = vpop.f32.mrb[245].mxu0 }
 0x850   : > { %v10192_v9 = vpop.f32.mrb[246].mxu0 }
 0x851   : > { %v16724_v35 = vpop.f32.mrb[247].mxu0 }
 0x852   : > { %v10327_v5 = vpop.f32.mrb[240].mxu1 }
 0x853   : > { %v16741_v41 = vpop.f32.mrb[241].mxu1 }
 0x854   : > { %v10330_v12 = vpop.f32.mrb[242].mxu1 }
 0x855   : > { %v16742_v53 = vpop.f32.mrb[243].mxu1 }
 0x856   : > { %v10281_v38 = vpop.f32.mrb[248].mxu0 }
 0x857   : > { %v10988_v42 = vcombine.low %v10189_v52, %v10281_v38  ;;  %v16735_v40 = vpop.f32.mrb[249].mxu0 }
 0x858   : > { %v10284_v21 = vpop.f32.mrb[250].mxu0 }
 0x859   : > { %v10995_v24 = vrot.slane %v10988_v42, %v18544_v37  ;;  %v16736_v34 = vpop.f32.mrb[251].mxu0 }
 0x85a   : > { %v10419_v60 = vpop.f32.mrb[244].mxu1 }
 0x85b   : > { %v10996_v16 = vcombine.low %v10987_v50, %v10995_v24  ;;  %v11005_v30 = vcombine.low %v10327_v5, %v10419_v60  ;;  %v16753_v8 = vpop.f32.mrb[245].mxu1 }
 0x85c   : > { %v10422_v63 = vpop.f32.mrb[246].mxu1 }
 0x85d   : > { %v11003_v39 = vrot.slane %v10996_v16, %v18561_v47  ;;  %v16754_v25 = vpop.f32.mrb[247].mxu1  ;;  %v11012_v32 = vrot.slane %v11005_v30, %v18544_v37 }
 0x85e   : > { %v10373_v55 = vpop.f32.mrb[252].mxu0  ;;  %v17052_v25 = vld [vmem:[%s18351_s16 + $0x30] sm:$0xff]  }
 0x85f   : > { %v11259_v13 = vcombine.low %v10978_v17, %v11003_v39  ;;  %v15169_v27 = vcombine.high %v10978_v17, %v11003_v39  ;;  %v16747_v20 = vpop.f32.mrb[253].mxu0  ;;  %16797 = vmatprep.subr.bf16.mxu1 %v17052_v25 }
 0x860   : > { %v10376_v1 = vpop.f32.mrb[254].mxu0  ;;  %16798 = vmatpush3.bf16.msra.mxu1 %v17052_v25  ;;  %v17457_v25 = vld [vmem:[#allocation2 + $0x18] sm:$0xff] }
 0x861   : > { %v11266_v62 = vrot.slane %v11259_v13, %v18544_v37  ;;  %v11274_v26 = vrot.slane %v15169_v27, %v18544_v37  ;;  %v16748_v61 = vpop.f32.mrb[255].mxu0 }
 0x862   : > { %v10511_v2 = vpop.f32.mrb[248].mxu1 }
 0x863   : > { %v11291_v14 = vcombine.low %v11266_v62, %v11274_v26  ;;  %v11292_v48 = vcombine.high %v11266_v62, %v11274_v26  ;;  %v16765_v29 = vpop.f32.mrb[249].mxu1  ;;  %v17053_v26 = vld [vmem:[%s18351_s16 + $0x38] sm:$0xff]  }
 0x864   : > { %v10514_v43 = vpop.f32.mrb[250].mxu1  ;;  %16799 = vmatprep.subr.bf16.mxu1 %v17053_v26 }
 0x865   : > { %v16766_v51 = vpop.f32.mrb[251].mxu1  ;;  %v11306_v27 = vrot.slane %v11292_v48, %v18561_v47  ;;  %v11299_v1 = vrot.slane %v11291_v14, %v18561_v47  ;;  %16800 = vmatpush3.bf16.msra.mxu1 %v17053_v26  ;;  %v11593_v26 = vld [vmem:[%s18359_s26 + $0x48] sm:$0xff] }
 0x866   : > { %v10465_v44 = vpop.f32.mrb[0].mxu0 }
 0x867   : > { %v11013_v0 = vcombine.low %v10373_v55, %v10465_v44  ;;  %v16759_v15 = vpop.f32.mrb[1].mxu0 }
 0x868   : > { %v10468_v28 = vpop.f32.mrb[2].mxu0 }
 0x869   : > { %v11020_v59 = vrot.slane %v11013_v0, %v18544_v37  ;;  %v16760_v31 = vpop.f32.mrb[3].mxu0 }
 0x86a   : > { %v10603_v6 = vpop.f32.mrb[252].mxu1 }
 0x86b   : > { %v11021_v49 = vcombine.low %v11012_v32, %v11020_v59  ;;  %v11030_v52 = vcombine.low %v10511_v2, %v10603_v6  ;;  %v16777_v58 = vpop.f32.mrb[253].mxu1 }
 0x86c   : > { %v10606_v9 = vpop.f32.mrb[254].mxu1 }
 0x86d   : > { %v16778_v35 = vpop.f32.mrb[255].mxu1  ;;  %v11037_v50 = vrot.slane %v11030_v52, %v18544_v37  ;;  %v11028_v16 = vrot.slane %v11021_v49, %v18561_v47 }
 0x86e   : > { %v10557_v5 = vpop.f32.mrb[4].mxu0 }
 0x86f   : > { %v16771_v41 = vpop.f32.mrb[5].mxu0 }
 0x870   : > { %v10560_v12 = vpop.f32.mrb[6].mxu0 }
 0x871   : > { %v16772_v53 = vpop.f32.mrb[7].mxu0 }
 0x876   : > { %v10649_v38 = vpop.f32.mrb[8].mxu0 }
 0x877   : > { %v11038_v42 = vcombine.low %v10557_v5, %v10649_v38  ;;  %v16783_v40 = vpop.f32.mrb[9].mxu0 }
 0x878   : > { %v10652_v21 = vpop.f32.mrb[10].mxu0 }
 0x879   : > { %v11045_v24 = vrot.slane %v11038_v42, %v18544_v37  ;;  %v16784_v34 = vpop.f32.mrb[11].mxu0 }
 0x87a   : > { %v17454_v34 = vld [vmem:[#allocation2] sm:$0xff] }
 0x87b   : > { %v11046_v60 = vcombine.low %v11037_v50, %v11045_v24 }
 0x87d   : > { %v11053_v30 = vrot.slane %v11046_v60, %v18561_v47 }
 0x87f   : > { %v11275_v8 = vcombine.low %v11028_v16, %v11053_v30  ;;  %v15170_v63 = vcombine.high %v11028_v16, %v11053_v30  ;;  %v17455_v30 = vld [vmem:[#allocation2 + $0x8] sm:$0xff] }
 0x881   : > { %v11282_v17 = vrot.slane %v11275_v8, %v18544_v37  ;;  %v11290_v39 = vrot.slane %v15170_v63, %v18544_v37  ;;  %v17456_v63 = vld [vmem:[#allocation2 + $0x10] sm:$0xff] }
 0x883   : > { %v11307_v55 = vcombine.low %v11282_v17, %v11290_v39  ;;  %v11308_v13 = vcombine.high %v11282_v17, %v11290_v39 }
 0x885   : > { %v11322_v20 = vrot.slane %v11308_v13, %v18561_v47  ;;  %v11315_v62 = vrot.slane %v11307_v55, %v18561_v47  ;;  %v16986_v47 = vpop.permute.xlu1 %16985  ;;  %v11584_v13 = vld [vmem:[%s18359_s26] sm:$0xff] }
 0x886   : > { %v16987_v0 = vunpack.i.l.bf16 %v16986_v47 }
 0x887   : > { %v11325_v61 = vcombine.low %v11306_v27, %v11322_v20  ;;  %v11324_v2 = vcombine.high %v11299_v1, %v11315_v62  ;;  %v11326_v29 = vcombine.high %v11306_v27, %v11322_v20  ;;  %v11323_v43 = vcombine.low %v11299_v1, %v11315_v62  ;;  %v11592_v27 = vld [vmem:[%s18359_s26 + $0x40] sm:$0xff]  ;;  %v11585_v20 = vld [vmem:[%s18359_s26 + $0x8] sm:$0xff] }
 0x888   : > { %v11375_v49 = vsel %vm3995_vm1, %v11119_v33, %v16987_v0  ;;  %v15182_v1 = vcombine.low %v11584_v13, %v11592_v27  ;;  %v15183_v62 = vcombine.high %v11584_v13, %v11592_v27  ;;  %v11688_v27 = vld [vmem:[%s18359_s26 + $0x340] sm:$0xff] }
 0x889   : > { %v17004_v51 = vpack.i.bf16 %v11325_v61, %v11257_v18  ;;  %v16994_v48 = vpack.i.bf16 %v11324_v2, %v11256_v45  ;;  %v17009_v14 = vpack.i.bf16 %v11326_v29, %v11258_v36  ;;  %v16991_v44 = vpop.permute.xlu1 %16990  ;;  %v16988_v18 = vunpack.i.h.bf16 %v16986_v47  ;;  %v11600_v61 = vld [vmem:[%s18359_s26 + $0x80] sm:$0xff] }
 0x88a   : > { %v16993_v59 = vunpack.i.h.bf16 %v16991_v44  ;;  %v16992_v57 = vunpack.i.l.bf16 %v16991_v44  ;;  %v11608_v2 = vld [vmem:[%s18359_s26 + $0xc0] sm:$0xff]  ;;  %v15184_v29 = vcombine.low %v11585_v20, %v11593_v26  ;;  %12436 = vmatprep.subr.bf16.mxu0 %v15183_v62 }
 0x88b   : > { %17005 = vrot.lane.b32.xlu1 %v17004_v51, %s17881_s30  ;;  %16995 = vrot.lane.b32.xlu0 %v16994_v48, %s17879_s2  ;;  %v11376_v6 = vsel %vm3995_vm1, %v11187_v10, %v16988_v18  ;;  %v15199_v51 = vcombine.high %v11600_v61, %v11608_v2  ;;  %v11601_v48 = vld [vmem:[%s18359_s26 + $0x88] sm:$0xff]  ;;  %v15198_v44 = vcombine.low %v11600_v61, %v11608_v2  ;;  %v11696_v2 = vld [vmem:[%s18359_s26 + $0x380] sm:$0xff] }
 0x88c   : > { %v11381_v5 = vsel %vm11379_vm5, %v11376_v6, %v16993_v59  ;;  %12437 = vmatpush1.bf16.msra.mxu0 %v15182_v1  ;;  %v11689_v1 = vld [vmem:[%s18359_s26 + $0x348] sm:$0xff] }
 0x88d   : > { %12438 = vmatprep.subr.bf16.mxu0 %v15199_v51 }
 0x88f   : > { %17010 = vrot.lane.b32.xlu1 %v17009_v14, %s17880_s11  ;;  %17000 = vrot.lane.b32.xlu0 %v21071_v46, %s17880_s11  ;;  %v11609_v14 = vld [vmem:[%s18359_s26 + $0xc8] sm:$0xff] }
 0x890   : > { %v15201_v47 = vcombine.high %v11601_v48, %v11609_v14  ;;  %v15200_v18 = vcombine.low %v11601_v48, %v11609_v14  ;;  %12439 = vmatpush1.bf16.msra.mxu0 %v15198_v44  ;;  %v11704_v48 = vld [vmem:[%s18359_s26 + $0x3c0] sm:$0xff]  ;;  %v21228_v44 = vld [vmem:[%s18359_s26 + $0x58] sm:$0xff] }
 0x8fd   : > { %v16996_v15 = vpop.permute.xlu0 %16995  ;;  %v17006_v28 = vpop.permute.xlu1 %17005 }
 0x8fe   : > { %v16998_v45 = vunpack.i.h.bf16 %v16996_v15  ;;  %v16997_v32 = vunpack.i.l.bf16 %v16996_v15  ;;  %v17008_v4 = vunpack.i.h.bf16 %v17006_v28  ;;  %v17007_v36 = vunpack.i.l.bf16 %v17006_v28 }
 0x900   : > { %v11377_v31 = vsel %vm3995_vm1, %v11255_v22, %v16997_v32  ;;  %v11378_v46 = vsel %vm3995_vm1, %v11323_v43, %v16998_v45  ;;  %v11380_v22 = vsel %vm11379_vm5, %v11375_v49, %v16992_v57  ;;  %v15185_v43 = vcombine.high %v11585_v20, %v11593_v26  ;;  %v11681_v20 = vld [vmem:[%s18359_s26 + $0x308] sm:$0xff] }
 0x901   : > { %v17001_v52 = vpop.permute.xlu0 %17000  ;;  %v17011_v58 = vpop.permute.xlu1 %17010  ;;  %v11383_v41 = vsel %vm11379_vm5, %v11378_v46, %v17008_v4  ;;  %v11382_v12 = vsel %vm11379_vm5, %v11377_v31, %v17007_v36  ;;  %v15281_v51 = vcombine.high %v11681_v20, %v11689_v1 }
 0x902   : > { %v17003_v9 = vunpack.i.h.bf16 %v17001_v52  ;;  %v17002_v35 = vunpack.i.l.bf16 %v17001_v52  ;;  %v17013_v19 = vunpack.i.h.bf16 %v17011_v58  ;;  %v17012_v56 = vunpack.i.l.bf16 %v17011_v58  ;;  %12489 = vmatprep.subr.bf16.mxu1 %v15185_v43  ;;  %v21219_v43 = vld [vmem:[%s18359_s26 + $0x50] sm:$0xff] }
 0x904   : > { %v11387_v54 = vsel %vm11384_vm6, %v11382_v12, %v17012_v56  ;;  %v11388_v7 = vsel %vm11384_vm6, %v11383_v41, %v17013_v19  ;;  %v11385_v10 = vsel %vm11384_vm6, %v11380_v22, %v17002_v35  ;;  %v11386_v53 = vsel %vm11384_vm6, %v11381_v5, %v17003_v9  ;;  %v11616_v35 = vld [vmem:[%s18359_s26 + $0x100] sm:$0xff]  ;;  %v11617_v56 = vld [vmem:[%s18359_s26 + $0x108] sm:$0xff] }
 0x905   : > { %v11390_v38 = vpack.c.bf16 %v11388_v7, %v11387_v54  ;;  %v11389_v3 = vpack.c.bf16 %v11386_v53, %v11385_v10  ;;  %v11624_v19 = vld [vmem:[%s18359_s26 + $0x140] sm:$0xff]  ;;  %v11625_v41 = vld [vmem:[%s18359_s26 + $0x148] sm:$0xff] }
 0x906   : > { %v15214_v22 = vcombine.low %v11616_v35, %v11624_v19  ;;  %v15215_v5 = vcombine.high %v11616_v35, %v11624_v19  ;;  %v15216_v12 = vcombine.low %v11617_v56, %v11625_v41  ;;  %v15217_v54 = vcombine.high %v11617_v56, %v11625_v41  ;;  %v11632_v7 = vld [vmem:[%s18359_s26 + $0x180] sm:$0xff]  ;;  %v11633_v53 = vld [vmem:[%s18359_s26 + $0x188] sm:$0xff] }
 0x907   : > { %16801 = vmatprep.mubr.bf16.mxu1 %v11389_v3  ;;  %v11640_v10 = vld [vmem:[%s18359_s26 + $0x1c0] sm:$0xff] }
 0x908   : > { %16802 = vmatmul.mubr.bf16.vlgmr.msra.gmra.mrb[0].mxu1 %v11390_v38  ;;  %12440 = vmatprep.subr.bf16.mxu0 %v15215_v5  ;;  %v15230_v38 = vcombine.low %v11632_v7, %v11640_v10  ;;  %v15231_v3 = vcombine.high %v11632_v7, %v11640_v10 }
 0x909   : > { %12521 = vmatprep.mubr.bf16.mxu1 %v22053_v23  ;;  %12490 = vmatpush1.bf16.msra.mxu1 %v15184_v29  ;;  %v21216_v29 = vld [vmem:[%s18359_s26 + $0x10] sm:$0xff] }
 0x90a   : > { %12491 = vmatprep.subr.bf16.mxu1 %v15201_v47  ;;  %12441 = vmatpush1.bf16.msra.mxu0 %v15214_v22  ;;  %v15186_v14 = vcombine.low %v21216_v29, %v21219_v43  ;;  %v21225_v47 = vld [vmem:[%s18359_s26 + $0x18] sm:$0xff] }
 0x90b   : > { %12442 = vmatprep.subr.bf16.mxu0 %v15231_v3 }
 0x90d   : > { %12492 = vmatpush1.bf16.msra.mxu1 %v15200_v18  ;;  %v11697_v18 = vld [vmem:[%s18359_s26 + $0x388] sm:$0xff] }
 0x90e   : > { %12493 = vmatprep.subr.bf16.mxu1 %v15217_v54  ;;  %12443 = vmatpush1.bf16.msra.mxu0 %v15230_v38  ;;  %v15180_v38 = vld [vmem:[%s900_s13] ss:$0 sm:$0xff] }
 0x911   : > { %12494 = vmatpush1.bf16.msra.mxu1 %v15216_v12 }
 0x9db   : > { %v16803_v33 = vpop.f32.mrb[0].mxu1 }
 0x9dc   : > { %v11496_v42 = vpop.f32.mrb[1].mxu1  ;;  %v11505_v24 = vadd.f32 %v16803_v33, %v15171_v11 }
 0x9dd   : > { %v11497_v40 = vadd.f32 %v15171_v11, %v11496_v42  ;;  %v16804_v21 = vpop.f32.mrb[2].mxu1 }
 0x9de   : > { %v11499_v50 = vpop.f32.mrb[3].mxu1  ;;  %v11513_v17 = vadd.f32 %v17456_v63, %v11505_v24  ;;  %v11508_v39 = vadd.f32 %v16804_v21, %v15171_v11  ;;  %v11656_v21 = vld [vmem:[%s18359_s26 + $0x240] sm:$0xff] }
 0x9df   : > { %v11511_v60 = vadd.f32 %v17454_v34, %v11497_v40  ;;  %v11500_v16 = vadd.f32 %v15171_v11, %v11499_v50  ;;  %v11641_v11 = vld [vmem:[%s18359_s26 + $0x1c8] sm:$0xff]  ;;  %v11648_v40 = vld [vmem:[%s18359_s26 + $0x200] sm:$0xff] }
 0x9e0   : > { %v11514_v55 = vadd.f32 %v17457_v25, %v11508_v39  ;;  %v15232_v33 = vcombine.low %v11633_v53, %v11641_v11  ;;  %v15233_v42 = vcombine.high %v11633_v53, %v11641_v11  ;;  %v11649_v50 = vld [vmem:[%s18359_s26 + $0x208] sm:$0xff]  ;;  %v15246_v24 = vcombine.low %v11648_v40, %v11656_v21 }
 0x9e1   : > { %v11512_v8 = vadd.f32 %v17455_v30, %v11500_v16  ;;  %11517 = vadd.xlane.f32.xlu0 %v11511_v60  ;;  %v15247_v34 = vcombine.high %v11648_v40, %v11656_v21  ;;  %v11664_v16 = vld [vmem:[%s18359_s26 + $0x280] sm:$0xff]  ;;  %v11665_v39 = vld [vmem:[%s18359_s26 + $0x288] sm:$0xff]  ;;  %v15181_v21 = vld [vmem:[%s22057_s22] ss:$0 sm:$0xff] }
 0x9e2   : > { %12495 = vmatprep.subr.bf16.mxu1 %v15233_v42  ;;  %v11672_v30 = vld [vmem:[%s18359_s26 + $0x2c0] sm:$0xff]  ;;  %v11673_v25 = vld [vmem:[%s18359_s26 + $0x2c8] sm:$0xff] }
 0x9e3   : > { %11519 = vadd.xlane.f32.xlu1 %v11512_v8  ;;  %12496 = vmatpush1.bf16.msra.mxu1 %v15232_v33  ;;  %v15265_v13 = vcombine.high %v11665_v39, %v11673_v25  ;;  %v15262_v62 = vcombine.low %v11664_v16, %v11672_v30  ;;  %v15264_v26 = vcombine.low %v11665_v39, %v11673_v25 }
 0x9e4   : > { %12444 = vmatprep.subr.bf16.mxu0 %v15247_v34  ;;  %v11610_v34 = vld [vmem:[%s18359_s26 + $0xd0] sm:$0xff] }
 0x9e5   : > { %11521 = vadd.xlane.f32.xlu0 %v11513_v17  ;;  %12445 = vmatpush1.bf16.msra.mxu0 %v15246_v24  ;;  %v11602_v24 = vld [vmem:[%s18359_s26 + $0x90] sm:$0xff] }
 0x9e6   : > { %v15203_v39 = vcombine.high %v11602_v24, %v11610_v34 }
 0x9e9   : > { %11523 = vadd.xlane.f32.xlu0 %v11514_v55 }
 0xa6e   : > { %v11518_v0 = vpop.xlane.xlu0 %11517 }
 0xa6f   : > { %v11526_v15 = vmul.f32 0.0078125, %v11518_v0  ;;  %v11705_v0 = vld [vmem:[%s18359_s26 + $0x3c8] sm:$0xff] }
 0xa70   : > { %v11520_v28 = vpop.xlane.xlu1 %11519 }
 0xa71   : > { %v21178_v45 = vsub.f32 %v11511_v60, %v11526_v15  ;;  %v11527_v32 = vmul.f32 0.0078125, %v11520_v28  ;;  %v11657_v60 = vld [vmem:[%s18359_s26 + $0x248] sm:$0xff]  ;;  %v15188_v15 = vcombine.low %v21225_v47, %v21228_v44 }
 0xa72   : > { %v11522_v59 = vpop.xlane.xlu0 %11521  ;;  %v15249_v63 = vcombine.high %v11649_v50, %v11657_v60 }
 0xa73   : > { %v21180_v57 = vsub.f32 %v11512_v8, %v11527_v32  ;;  %v11528_v4 = vmul.f32 0.0078125, %v11522_v59  ;;  %v11534_v36 = vmul.f32 %v21178_v45, %v21178_v45  ;;  %v15248_v8 = vcombine.low %v11649_v50, %v11657_v60  ;;  %v11603_v60 = vld [vmem:[%s18359_s26 + $0x98] sm:$0xff] }
 0xa74   : > { %12497 = vmatprep.subr.bf16.mxu1 %v15249_v63  ;;  %v15280_v32 = vcombine.low %v11681_v20, %v11689_v1  ;;  %v15295_v59 = vcombine.high %v11696_v2, %v11704_v48  ;;  %v11627_v20 = vld [vmem:[%s18359_s26 + $0x158] sm:$0xff] }
 0xa75   : > { %v21184_v31 = vsub.f32 %v11513_v17, %v11528_v4  ;;  %11538 = vadd.xlane.f32.xlu1 %v11534_v36  ;;  %v11535_v46 = vmul.f32 %v21180_v57, %v21180_v57  ;;  %v15263_v17 = vcombine.high %v11664_v16, %v11672_v30  ;;  %12498 = vmatpush1.bf16.msra.mxu1 %v15248_v8  ;;  %v11611_v16 = vld [vmem:[%s18359_s26 + $0xd8] sm:$0xff] }
 0xa76   : > { %v11524_v6 = vpop.xlane.xlu0 %11523  ;;  %12499 = vmatprep.subr.bf16.mxu1 %v15265_v13  ;;  %v15297_v4 = vcombine.high %v11697_v18, %v11705_v0  ;;  %v15294_v36 = vcombine.low %v11696_v2, %v11704_v48  ;;  %v15205_v25 = vcombine.high %v11603_v60, %v11611_v16  ;;  %v11626_v13 = vld [vmem:[%s18359_s26 + $0x150] sm:$0xff]  ;;  %v11643_v48 = vld [vmem:[%s18359_s26 + $0x1d8] sm:$0xff] }
 0xa77   : > { %v11529_v49 = vmul.f32 0.0078125, %v11524_v6  ;;  %11540 = vadd.xlane.f32.xlu0 %v11535_v46  ;;  %v11536_v52 = vmul.f32 %v21184_v31, %v21184_v31  ;;  %12446 = vmatprep.subr.bf16.mxu0 %v15263_v17  ;;  %v15296_v46 = vcombine.low %v11697_v18, %v11705_v0  ;;  %v15187_v6 = vcombine.high %v21216_v29, %v21219_v43  ;;  %v11642_v29 = vld [vmem:[%s18359_s26 + $0x1d0] sm:$0xff]  ;;  %v11635_v43 = vld [vmem:[%s18359_s26 + $0x198] sm:$0xff] }
 0xa78   : > { %12447 = vmatpush1.bf16.msra.mxu0 %v15262_v62 }
 0xa79   : > { %v21190_v58 = vsub.f32 %v11514_v55, %v11529_v49  ;;  %11542 = vadd.xlane.f32.xlu1 %v11536_v52  ;;  %v11680_v55 = vld [vmem:[%s18359_s26 + $0x300] sm:$0xff]  ;;  %12500 = vmatpush1.bf16.msra.mxu1 %v15264_v26  ;;  %v15189_v49 = vcombine.high %v21225_v47, %v21228_v44 }
 0xa7a   : > { %v15279_v61 = vcombine.high %v11680_v55, %v11688_v27  ;;  %v15278_v28 = vcombine.low %v11680_v55, %v11688_v27  ;;  %12501 = vmatprep.subr.bf16.mxu1 %v15281_v51  ;;  %v11618_v55 = vld [vmem:[%s18359_s26 + $0x110] sm:$0xff]  ;;  %v11619_v27 = vld [vmem:[%s18359_s26 + $0x118] sm:$0xff] }
 0xa7b   : > { %v11537_v9 = vmul.f32 %v21190_v58, %v21190_v58  ;;  %v15221_v2 = vcombine.high %v11619_v27, %v11627_v20  ;;  %v11634_v51 = vld [vmem:[%s18359_s26 + $0x190] sm:$0xff]  ;;  %v15218_v47 = vcombine.low %v11618_v55, %v11626_v13  ;;  %v15220_v44 = vcombine.low %v11619_v27, %v11627_v20  ;;  %v11604_v27 = vld [vmem:[%s18359_s26 + $0xa0] sm:$0xff] }
 0xa7c   : > { %12448 = vmatprep.subr.bf16.mxu0 %v15279_v61  ;;  %v15219_v61 = vcombine.high %v11618_v55, %v11626_v13  ;;  %v15235_v0 = vcombine.high %v11634_v51, %v11642_v29  ;;  %v11612_v20 = vld [vmem:[%s18359_s26 + $0xe0] sm:$0xff] }
 0xa7d   : > { %11544 = vadd.xlane.f32.xlu0 %v11537_v9  ;;  %12449 = vmatpush1.bf16.msra.mxu0 %v15278_v28  ;;  %v11650_v28 = vld [vmem:[%s18359_s26 + $0x210] sm:$0xff] }
 0xa7e   : > { %12502 = vmatpush1.bf16.msra.mxu1 %v15280_v32  ;;  %12450 = vmatprep.subr.bf16.mxu0 %v15295_v59  ;;  %v11658_v32 = vld [vmem:[%s18359_s26 + $0x250] sm:$0xff]  ;;  %v11651_v59 = vld [vmem:[%s18359_s26 + $0x218] sm:$0xff] }
 0xa7f   : > { %12503 = vmatprep.subr.bf16.mxu1 %v15297_v4  ;;  %v11659_v4 = vld [vmem:[%s18359_s26 + $0x258] sm:$0xff] }
 0xa81   : > { %12451 = vmatpush1.bf16.msra.mxu0 %v15294_v36  ;;  %v15234_v36 = vcombine.low %v11634_v51, %v11642_v29  ;;  %v11620_v51 = vld [vmem:[%s18359_s26 + $0x120] sm:$0xff] }
 0xa82   : > { %12504 = vmatpush1.bf16.msra.mxu1 %v15296_v46  ;;  %12542 = vmatprep.subr.bf16.mxu0 %v15187_v6  ;;  %v15236_v46 = vcombine.low %v11635_v43, %v11643_v48  ;;  %v15251_v6 = vcombine.high %v11650_v28, %v11658_v32  ;;  %v11628_v29 = vld [vmem:[%s18359_s26 + $0x160] sm:$0xff] }
 0xa83   : > { %12595 = vmatprep.subr.bf16.mxu1 %v15189_v49  ;;  %v15253_v49 = vcombine.high %v11651_v59, %v11659_v4 }
 0xb02   : > { %v11539_v52 = vpop.xlane.xlu1 %11538 }
 0xb03   : > { %v11546_v9 = vmul.f32 0.0078125, %v11539_v52  ;;  %v11666_v52 = vld [vmem:[%s18359_s26 + $0x290] sm:$0xff] }
 0xb04   : > { %v11541_v35 = vpop.xlane.xlu0 %11540 }
 0xb05   : > { %v11550_v19 = vadd.f32 1e-05, %v11546_v9  ;;  %v11547_v56 = vmul.f32 0.0078125, %v11541_v35  ;;  %v11674_v9 = vld [vmem:[%s18359_s26 + $0x2d0] sm:$0xff]  ;;  %v11667_v35 = vld [vmem:[%s18359_s26 + $0x298] sm:$0xff] }
 0xb06   : > { %v11543_v22 = vpop.xlane.xlu1 %11542 }
 0xb07   : > { %17438 = vrsqrt.f32 %v11550_v19  ;;  %v11551_v5 = vadd.f32 1e-05, %v11547_v56  ;;  %v11548_v41 = vmul.f32 0.0078125, %v11543_v22  ;;  %v11675_v19 = vld [vmem:[%s18359_s26 + $0x2d8] sm:$0xff]  ;;  %v15250_v56 = vcombine.low %v11650_v28, %v11658_v32  ;;  %v11636_v28 = vld [vmem:[%s18359_s26 + $0x1a0] sm:$0xff] }
 0xb08   : > { %v15252_v22 = vcombine.low %v11651_v59, %v11659_v4  ;;  %v11644_v32 = vld [vmem:[%s18359_s26 + $0x1e0] sm:$0xff]  ;;  %v11637_v59 = vld [vmem:[%s18359_s26 + $0x1a8] sm:$0xff] }
 0xb09   : > { %17440 = vrsqrt.f32 %v11551_v5  ;;  %v11552_v12 = vadd.f32 1e-05, %v11548_v41  ;;  %v15267_v5 = vcombine.high %v11666_v52, %v11674_v9  ;;  %v15269_v41 = vcombine.high %v11667_v35, %v11675_v19  ;;  %v11645_v4 = vld [vmem:[%s18359_s26 + $0x1e8] sm:$0xff] }
 0xb0a   : > { %v11545_v54 = vpop.xlane.xlu0 %11544 }
 0xb0b   : > { %17442 = vrsqrt.f32 %v11552_v12  ;;  %v11549_v7 = vmul.f32 0.0078125, %v11545_v54  ;;  %v11682_v12 = vld [vmem:[%s18359_s26 + $0x310] sm:$0xff] }
 0xb0c   : > { %v11690_v54 = vld [vmem:[%s18359_s26 + $0x350] sm:$0xff] }
 0xb0d   : > { %v11553_v10 = vadd.f32 1e-05, %v11549_v7  ;;  %v11683_v7 = vld [vmem:[%s18359_s26 + $0x318] sm:$0xff] }
 0xb0f   : > { %17444 = vrsqrt.f32 %v11553_v10  ;;  %v11691_v10 = vld [vmem:[%s18359_s26 + $0x358] sm:$0xff] }
 0xb11   : > { %v17439_v53 = vpop.eup %17438 }
 0xb12   : > { %v11558_v3 = vmul.f32 %v17439_v53, %v21178_v45  ;;  %v15266_v53 = vcombine.low %v11666_v52, %v11674_v9  ;;  %v11652_v52 = vld [vmem:[%s18359_s26 + $0x220] sm:$0xff] }
 0xb13   : > { %v17441_v11 = vpop.eup %17440  ;;  %v11660_v9 = vld [vmem:[%s18359_s26 + $0x260] sm:$0xff] }
 0xb14   : > { %v11568_v33 = vmul.f32 %v15180_v38, %v11558_v3  ;;  %v11559_v42 = vmul.f32 %v17441_v11, %v21180_v57  ;;  %v15283_v3 = vcombine.high %v11682_v12, %v11690_v54  ;;  %v15285_v11 = vcombine.high %v11683_v7, %v11691_v10 }
 0xb15   : > { %v17443_v40 = vpop.eup %17442 }
 0xb16   : > { %v11569_v50 = vmul.f32 %v15180_v38, %v11559_v42  ;;  %v21251_v30 = vadd.f32 %v15181_v21, %v11568_v33  ;;  %v11560_v45 = vmul.f32 %v17443_v40, %v21184_v31  ;;  %v15202_v31 = vcombine.low %v11602_v24, %v11610_v34  ;;  %v11698_v33 = vld [vmem:[%s18359_s26 + $0x390] sm:$0xff]  ;;  %v11699_v40 = vld [vmem:[%s18359_s26 + $0x398] sm:$0xff] }
 0xb17   : > { %v11706_v42 = vld [vmem:[%s18359_s26 + $0x3d0] sm:$0xff]  ;;  %v15284_v24 = vcombine.low %v11683_v7, %v11691_v10  ;;  %v11669_v7 = vld [vmem:[%s18359_s26 + $0x2a8] sm:$0xff] }
 0xb18   : > { %v21253_v8 = vadd.f32 %v15181_v21, %v11569_v50  ;;  %v11570_v1 = vmul.f32 %v15180_v38, %v11560_v45  ;;  %v15282_v50 = vcombine.low %v11682_v12, %v11690_v54  ;;  %v15299_v34 = vcombine.high %v11698_v33, %v11706_v42  ;;  %v11596_v45 = vld [vmem:[%s18359_s26 + $0x60] sm:$0xff]  ;;  %v11677_v10 = vld [vmem:[%s18359_s26 + $0x2e8] sm:$0xff] }
 0xb19   : > { %v17445_v63 = vpop.eup %17444  ;;  %v11668_v12 = vld [vmem:[%s18359_s26 + $0x2a0] sm:$0xff] }
 0xb1a   : > { %v21258_v57 = vpack.c.bf16 %v21253_v8, %v21251_v30  ;;  %v11561_v17 = vmul.f32 %v17445_v63, %v21190_v58  ;;  %v15204_v58 = vcombine.low %v11603_v60, %v11611_v16  ;;  %v11588_v16 = vld [vmem:[%s18359_s26 + $0x20] sm:$0xff]  ;;  %v11589_v63 = vld [vmem:[%s18359_s26 + $0x28] sm:$0xff] }
 0xb1b   : > { %v15191_v55 = vcombine.high %v11588_v16, %v11596_v45  ;;  %v11676_v54 = vld [vmem:[%s18359_s26 + $0x2e0] sm:$0xff] }
 0xb1c   : > { %v11571_v62 = vmul.f32 %v15180_v38, %v11561_v17  ;;  %12469 = vmatmul.mubr.bf16.vlgmr.msra.gmra.mrb[12].mxu0 %v21258_v57  ;;  %12522 = vmatmul.mubr.bf16.vlgmr.msra.gmra.mrb[4].mxu1 %v21258_v57  ;;  %v15268_v38 = vcombine.low %v11667_v35, %v11675_v19  ;;  %v11597_v17 = vld [vmem:[%s18359_s26 + $0x68] sm:$0xff] }
 0xb1d   : > { %12543 = vmatpush1.bf16.msra.mxu0 %v15186_v14  ;;  %12596 = vmatpush1.bf16.msra.mxu1 %v15188_v15  ;;  %v21281_v14 = vadd.f32 %v15181_v21, %v11570_v1  ;;  %v15237_v15 = vcombine.high %v11635_v43, %v11643_v48  ;;  %v15193_v13 = vcombine.high %v11589_v63, %v11597_v17  ;;  %v11605_v1 = vld [vmem:[%s18359_s26 + $0xa8] sm:$0xff] }
 0xb1e   : > { %v21273_v26 = vadd.f32 %v15181_v21, %v11571_v62  ;;  %12544 = vmatprep.subr.bf16.mxu0 %v15203_v39  ;;  %12597 = vmatprep.subr.bf16.mxu1 %v15205_v25  ;;  %v11707_v21 = vld [vmem:[%s18359_s26 + $0x3d8] sm:$0xff]  ;;  %v15298_v39 = vcombine.low %v11698_v33, %v11706_v42  ;;  %v11613_v62 = vld [vmem:[%s18359_s26 + $0xe8] sm:$0xff]  ;;  %v11684_v33 = vld [vmem:[%s18359_s26 + $0x320] sm:$0xff] }
 0xb1f   : > { %12478 = vmatprep.mubr.bf16.mxu0 %v22053_v23  ;;  %12531 = vmatprep.mubr.bf16.mxu1 %v22053_v23  ;;  %v15301_v60 = vcombine.high %v11699_v40, %v11707_v21  ;;  %v15300_v25 = vcombine.low %v11699_v40, %v11707_v21  ;;  %v11621_v43 = vld [vmem:[%s18359_s26 + $0x128] sm:$0xff]  ;;  %v11692_v42 = vld [vmem:[%s18359_s26 + $0x360] sm:$0xff] }
 0xb20   : > { %v21285_v18 = vpack.c.bf16 %v21273_v26, %v21281_v14  ;;  %v11629_v48 = vld [vmem:[%s18359_s26 + $0x168] sm:$0xff] }
 0xb21   : > { %12545 = vmatpush1.bf16.msra.mxu0 %v15202_v31  ;;  %12598 = vmatpush1.bf16.msra.mxu1 %v15204_v58  ;;  %v15190_v31 = vcombine.low %v11588_v16, %v11596_v45  ;;  %v15192_v58 = vcombine.low %v11589_v63, %v11597_v17  ;;  %v11653_v35 = vld [vmem:[%s18359_s26 + $0x228] sm:$0xff]  ;;  %v11700_v16 = vld [vmem:[%s18359_s26 + $0x3a0] sm:$0xff] }
 0xb22   : > { %12546 = vmatprep.subr.bf16.mxu0 %v15219_v61  ;;  %12599 = vmatprep.subr.bf16.mxu1 %v15221_v2  ;;  %v15207_v61 = vcombine.high %v11604_v27, %v11612_v20  ;;  %v15209_v2 = vcombine.high %v11605_v1, %v11613_v62  ;;  %v11661_v19 = vld [vmem:[%s18359_s26 + $0x268] sm:$0xff]  ;;  %v11708_v45 = vld [vmem:[%s18359_s26 + $0x3e0] sm:$0xff] }
 0xb23   : > { %v11685_v40 = vld [vmem:[%s18359_s26 + $0x328] sm:$0xff] }
 0xb24   : > { %12479 = vmatmul.mubr.bf16.gmra.mrb[16].mxu0 %v21285_v18  ;;  %12532 = vmatmul.mubr.bf16.gmra.mrb[8].mxu1 %v21285_v18  ;;  %v11693_v21 = vld [vmem:[%s18359_s26 + $0x368] sm:$0xff] }
 0xb25   : > { %12547 = vmatpush1.bf16.msra.mxu0 %v15218_v47  ;;  %12600 = vmatpush1.bf16.msra.mxu1 %v15220_v44  ;;  %v15206_v47 = vcombine.low %v11604_v27, %v11612_v20  ;;  %v15208_v44 = vcombine.low %v11605_v1, %v11613_v62  ;;  %v11701_v63 = vld [vmem:[%s18359_s26 + $0x3a8] sm:$0xff]  ;;  %v11590_v27 = vld [vmem:[%s18359_s26 + $0x30] sm:$0xff]  ;;  %v11591_v1 = vld [vmem:[%s18359_s26 + $0x38] sm:$0xff] }
 0xb26   : > { %12548 = vmatprep.subr.bf16.mxu0 %v15235_v0  ;;  %12601 = vmatprep.subr.bf16.mxu1 %v15237_v15  ;;  %v15223_v0 = vcombine.high %v11620_v51, %v11628_v29  ;;  %v15225_v15 = vcombine.high %v11621_v43, %v11629_v48  ;;  %v11709_v17 = vld [vmem:[%s18359_s26 + $0x3e8] sm:$0xff]  ;;  %v11598_v20 = vld [vmem:[%s18359_s26 + $0x70] sm:$0xff]  ;;  %v11599_v62 = vld [vmem:[%s18359_s26 + $0x78] sm:$0xff] }
 0xb27   : > { %12574 = vmatprep.mubr.bf16.mxu0 %v22053_v23  ;;  %12627 = vmatprep.mubr.bf16.mxu1 %v22053_v23 }
 0xb29   : > { %12549 = vmatpush1.bf16.msra.mxu0 %v15234_v36  ;;  %12602 = vmatpush1.bf16.msra.mxu1 %v15236_v46  ;;  %v15222_v36 = vcombine.low %v11620_v51, %v11628_v29  ;;  %v15224_v46 = vcombine.low %v11621_v43, %v11629_v48  ;;  %v11606_v51 = vld [vmem:[%s18359_s26 + $0xb0] sm:$0xff]  ;;  %v11607_v43 = vld [vmem:[%s18359_s26 + $0xb8] sm:$0xff] }
 0xb2a   : > { %12550 = vmatprep.subr.bf16.mxu0 %v15251_v6  ;;  %12603 = vmatprep.subr.bf16.mxu1 %v15253_v49  ;;  %v15239_v6 = vcombine.high %v11636_v28, %v11644_v32  ;;  %v15241_v49 = vcombine.high %v11637_v59, %v11645_v4  ;;  %v11614_v29 = vld [vmem:[%s18359_s26 + $0xf0] sm:$0xff]  ;;  %v11615_v48 = vld [vmem:[%s18359_s26 + $0xf8] sm:$0xff] }
 0xb2d   : > { %12551 = vmatpush1.bf16.msra.mxu0 %v15250_v56  ;;  %12604 = vmatpush1.bf16.msra.mxu1 %v15252_v22  ;;  %v15238_v56 = vcombine.low %v11636_v28, %v11644_v32  ;;  %v15240_v22 = vcombine.low %v11637_v59, %v11645_v4  ;;  %v11622_v28 = vld [vmem:[%s18359_s26 + $0x130] sm:$0xff]  ;;  %v11623_v59 = vld [vmem:[%s18359_s26 + $0x138] sm:$0xff] }
 0xb2e   : > { %12552 = vmatprep.subr.bf16.mxu0 %v15267_v5  ;;  %12605 = vmatprep.subr.bf16.mxu1 %v15269_v41  ;;  %v15255_v5 = vcombine.high %v11652_v52, %v11660_v9  ;;  %v15257_v41 = vcombine.high %v11653_v35, %v11661_v19  ;;  %v11630_v32 = vld [vmem:[%s18359_s26 + $0x170] sm:$0xff]  ;;  %v11631_v4 = vld [vmem:[%s18359_s26 + $0x178] sm:$0xff] }
 0xb31   : > { %12553 = vmatpush1.bf16.msra.mxu0 %v15266_v53  ;;  %12606 = vmatpush1.bf16.msra.mxu1 %v15268_v38  ;;  %v15254_v53 = vcombine.low %v11652_v52, %v11660_v9  ;;  %v15256_v38 = vcombine.low %v11653_v35, %v11661_v19  ;;  %v11638_v52 = vld [vmem:[%s18359_s26 + $0x1b0] sm:$0xff]  ;;  %v11639_v35 = vld [vmem:[%s18359_s26 + $0x1b8] sm:$0xff] }
 0xb32   : > { %12554 = vmatprep.subr.bf16.mxu0 %v15283_v3  ;;  %12607 = vmatprep.subr.bf16.mxu1 %v15285_v11  ;;  %v15271_v3 = vcombine.high %v11668_v12, %v11676_v54  ;;  %v15273_v11 = vcombine.high %v11669_v7, %v11677_v10  ;;  %v11646_v9 = vld [vmem:[%s18359_s26 + $0x1f0] sm:$0xff]  ;;  %v11647_v19 = vld [vmem:[%s18359_s26 + $0x1f8] sm:$0xff] }
 0xb35   : > { %12555 = vmatpush1.bf16.msra.mxu0 %v15282_v50  ;;  %12608 = vmatpush1.bf16.msra.mxu1 %v15284_v24  ;;  %v15270_v50 = vcombine.low %v11668_v12, %v11676_v54  ;;  %v15272_v24 = vcombine.low %v11669_v7, %v11677_v10  ;;  %v11654_v12 = vld [vmem:[%s18359_s26 + $0x230] sm:$0xff]  ;;  %v11655_v7 = vld [vmem:[%s18359_s26 + $0x238] sm:$0xff] }
 0xb36   : > { %12556 = vmatprep.subr.bf16.mxu0 %v15299_v34  ;;  %12609 = vmatprep.subr.bf16.mxu1 %v15301_v60  ;;  %v15287_v34 = vcombine.high %v11684_v33, %v11692_v42  ;;  %v15289_v60 = vcombine.high %v11685_v40, %v11693_v21  ;;  %v11662_v54 = vld [vmem:[%s18359_s26 + $0x270] sm:$0xff]  ;;  %v11663_v10 = vld [vmem:[%s18359_s26 + $0x278] sm:$0xff] }
 0xb39   : > { %12557 = vmatpush1.bf16.msra.mxu0 %v15298_v39  ;;  %12610 = vmatpush1.bf16.msra.mxu1 %v15300_v25  ;;  %v15286_v39 = vcombine.low %v11684_v33, %v11692_v42  ;;  %v15288_v25 = vcombine.low %v11685_v40, %v11693_v21  ;;  %v11670_v33 = vld [vmem:[%s18359_s26 + $0x2b0] sm:$0xff]  ;;  %v11671_v40 = vld [vmem:[%s18359_s26 + $0x2b8] sm:$0xff] }
 0xb3a   : > { %12648 = vmatprep.subr.bf16.mxu0 %v15191_v55  ;;  %12701 = vmatprep.subr.bf16.mxu1 %v15193_v13  ;;  %v15303_v55 = vcombine.high %v11700_v16, %v11708_v45  ;;  %v15305_v13 = vcombine.high %v11701_v63, %v11709_v17  ;;  %v11678_v42 = vld [vmem:[%s18359_s26 + $0x2f0] sm:$0xff]  ;;  %v11679_v21 = vld [vmem:[%s18359_s26 + $0x2f8] sm:$0xff] }
 0xb3c   : > { %12575 = vmatmul.mubr.bf16.vlgmr.msra.gmra.mrb[20].mxu0 %v21258_v57  ;;  %12628 = vmatmul.mubr.bf16.vlgmr.msra.gmra.mrb[12].mxu1 %v21258_v57 }
 0xb3d   : > { %12649 = vmatpush1.bf16.msra.mxu0 %v15190_v31  ;;  %12702 = vmatpush1.bf16.msra.mxu1 %v15192_v58  ;;  %v15302_v31 = vcombine.low %v11700_v16, %v11708_v45  ;;  %v15304_v58 = vcombine.low %v11701_v63, %v11709_v17  ;;  %v11686_v16 = vld [vmem:[%s18359_s26 + $0x330] sm:$0xff]  ;;  %v11687_v63 = vld [vmem:[%s18359_s26 + $0x338] sm:$0xff] }
 0xb3e   : > { %12650 = vmatprep.subr.bf16.mxu0 %v15207_v61  ;;  %12703 = vmatprep.subr.bf16.mxu1 %v15209_v2  ;;  %v15195_v61 = vcombine.high %v11590_v27, %v11598_v20  ;;  %v15197_v2 = vcombine.high %v11591_v1, %v11599_v62  ;;  %v11694_v45 = vld [vmem:[%s18359_s26 + $0x370] sm:$0xff]  ;;  %v11695_v17 = vld [vmem:[%s18359_s26 + $0x378] sm:$0xff] }
 0xb3f   : > { %12584 = vmatprep.mubr.bf16.mxu0 %v22053_v23  ;;  %12637 = vmatprep.mubr.bf16.mxu1 %v22053_v23 }
 0xb41   : > { %12651 = vmatpush1.bf16.msra.mxu0 %v15206_v47  ;;  %12704 = vmatpush1.bf16.msra.mxu1 %v15208_v44  ;;  %v15194_v47 = vcombine.low %v11590_v27, %v11598_v20  ;;  %v15196_v44 = vcombine.low %v11591_v1, %v11599_v62  ;;  %v11702_v27 = vld [vmem:[%s18359_s26 + $0x3b0] sm:$0xff]  ;;  %v11703_v1 = vld [vmem:[%s18359_s26 + $0x3b8] sm:$0xff] }
 0xb42   : > { %12652 = vmatprep.subr.bf16.mxu0 %v15223_v0  ;;  %12705 = vmatprep.subr.bf16.mxu1 %v15225_v15  ;;  %v15211_v0 = vcombine.high %v11606_v51, %v11614_v29  ;;  %v15213_v15 = vcombine.high %v11607_v43, %v11615_v48  ;;  %v11710_v20 = vld [vmem:[%s18359_s26 + $0x3f0] sm:$0xff]  ;;  %v11711_v62 = vld [vmem:[%s18359_s26 + $0x3f8] sm:$0xff] }
 0xb44   : > { %12585 = vmatmul.mubr.bf16.gmra.mrb[24].mxu0 %v21285_v18  ;;  %12638 = vmatmul.mubr.bf16.gmra.mrb[16].mxu1 %v21285_v18 }
 0xb45   : > { %12653 = vmatpush1.bf16.msra.mxu0 %v15222_v36  ;;  %12706 = vmatpush1.bf16.msra.mxu1 %v15224_v46  ;;  %v15210_v36 = vcombine.low %v11606_v51, %v11614_v29  ;;  %v15212_v46 = vcombine.low %v11607_v43, %v11615_v48  ;;  %v15306_v51 = vcombine.low %v11702_v27, %v11710_v20  ;;  %v17054_v43 = vld [vmem:[%s18365_s19 + $0x40] sm:$0xff]  }
 0xb46   : > { %12654 = vmatprep.subr.bf16.mxu0 %v15239_v6  ;;  %12707 = vmatprep.subr.bf16.mxu1 %v15241_v49  ;;  %v15227_v6 = vcombine.high %v11622_v28, %v11630_v32  ;;  %v15229_v49 = vcombine.high %v11623_v59, %v11631_v4  ;;  %v15308_v29 = vcombine.low %v11703_v1, %v11711_v62  ;;  %v17055_v48 = vld [vmem:[%s18365_s19 + $0xc0] sm:$0xff]  }
 0xb47   : > { %12680 = vmatprep.mubr.bf16.mxu0 %v22053_v23  ;;  %12733 = vmatprep.mubr.bf16.mxu1 %v22053_v23 }
 0xb49   : > { %12655 = vmatpush1.bf16.msra.mxu0 %v15238_v56  ;;  %12708 = vmatpush1.bf16.msra.mxu1 %v15240_v22  ;;  %v15226_v56 = vcombine.low %v11622_v28, %v11630_v32  ;;  %v15228_v22 = vcombine.low %v11623_v59, %v11631_v4  ;;  %v17060_v28 = vld [vmem:[%s18365_s19 + $0x8] sm:$0xff]   ;;  %v17062_v59 = vld [vmem:[%s18365_s19 + $0x50] sm:$0xff]  }
 0xb4a   : > { %12656 = vmatprep.subr.bf16.mxu0 %v15255_v5  ;;  %12709 = vmatprep.subr.bf16.mxu1 %v15257_v41  ;;  %v15243_v5 = vcombine.high %v11638_v52, %v11646_v9  ;;  %v15245_v41 = vcombine.high %v11639_v35, %v11647_v19  ;;  %v17061_v32 = vld [vmem:[%s18365_s19 + $0x88] sm:$0xff]   ;;  %v17063_v4 = vld [vmem:[%s18365_s19 + $0xd0] sm:$0xff]  }
 0xb4d   : > { %12657 = vmatpush1.bf16.msra.mxu0 %v15254_v53  ;;  %12710 = vmatpush1.bf16.msra.mxu1 %v15256_v38  ;;  %v15242_v53 = vcombine.low %v11638_v52, %v11646_v9  ;;  %v15244_v38 = vcombine.low %v11639_v35, %v11647_v19  ;;  %v17070_v52 = vld [vmem:[%s18365_s19 + $0x60] sm:$0xff]  }
 0xb4e   : > { %12658 = vmatprep.subr.bf16.mxu0 %v15271_v3  ;;  %12711 = vmatprep.subr.bf16.mxu1 %v15273_v11  ;;  %v15259_v3 = vcombine.high %v11654_v12, %v11662_v54  ;;  %v15261_v11 = vcombine.high %v11655_v7, %v11663_v10  ;;  %v17071_v9 = vld [vmem:[%s18365_s19 + $0xe0] sm:$0xff]  }
 0xb4f   : > { %v17072_v35 = vld [vmem:[%s18365_s19 + $0x20] sm:$0xff]  }
 0xb50   : > { %v17073_v19 = vld [vmem:[%s18365_s19 + $0xa0] sm:$0xff]  }
 0xb51   : > { %12659 = vmatpush1.bf16.msra.mxu0 %v15270_v50  ;;  %12712 = vmatpush1.bf16.msra.mxu1 %v15272_v24  ;;  %v15258_v50 = vcombine.low %v11654_v12, %v11662_v54  ;;  %v15260_v24 = vcombine.low %v11655_v7, %v11663_v10  ;;  %v17079_v12 = vld [vmem:[%s18365_s19 + $0xf0] sm:$0xff]   ;;  %v17082_v10 = vld [vmem:[%s18365_s19 + $0x78] sm:$0xff]  }
 0xb52   : > { %12660 = vmatprep.subr.bf16.mxu0 %v15287_v34  ;;  %12713 = vmatprep.subr.bf16.mxu1 %v15289_v60  ;;  %v15275_v34 = vcombine.high %v11670_v33, %v11678_v42  ;;  %v15277_v60 = vcombine.high %v11671_v40, %v11679_v21  ;;  %v17080_v54 = vld [vmem:[%s18365_s19 + $0x30] sm:$0xff]  }
 0xb53   : > { %v17081_v7 = vld [vmem:[%s18365_s19 + $0xb0] sm:$0xff]  }
 0xb55   : > { %12661 = vmatpush1.bf16.msra.mxu0 %v15286_v39  ;;  %12714 = vmatpush1.bf16.msra.mxu1 %v15288_v25  ;;  %v15274_v39 = vcombine.low %v11670_v33, %v11678_v42  ;;  %v15276_v25 = vcombine.low %v11671_v40, %v11679_v21  ;;  %v17087_v33 = vld [vmem:[%s18365_s19 + $0x1c0] sm:$0xff]   ;;  %v21428_v42 = vld [vmem:[%s18391_s0] sm:$0xff] }
 0xb56   : > { %12662 = vmatprep.subr.bf16.mxu0 %v15303_v55  ;;  %12715 = vmatprep.subr.bf16.mxu1 %v15305_v13  ;;  %v15291_v55 = vcombine.high %v11686_v16, %v11694_v45  ;;  %v15293_v13 = vcombine.high %v11687_v63, %v11695_v17  ;;  %v22058_v40 = vld [vmem:[#allocation39_spill] sm:$0xff] }
 0xb57   : > { %v11730_v21 = vsub.s32 3, %v22058_v40 }
 0xb59   : > { %12663 = vmatpush1.bf16.msra.mxu0 %v15302_v31  ;;  %12716 = vmatpush1.bf16.msra.mxu1 %v15304_v58  ;;  %v15290_v31 = vcombine.low %v11686_v16, %v11694_v45  ;;  %v15292_v58 = vcombine.low %v11687_v63, %v11695_v17  ;;  %v22061_v16 = vld [vmem:[#allocation40_spill] sm:$0xff]  ;;  %v11731_v63 = vrot.slane %v21428_v42, %v11730_v21 }
 0xb5a   : > { %12754 = vmatprep.subr.bf16.mxu0 %v15195_v61  ;;  %12807 = vmatprep.subr.bf16.mxu1 %v15197_v2  ;;  %v15307_v61 = vcombine.high %v11702_v27, %v11710_v20  ;;  %v15309_v2 = vcombine.high %v11703_v1, %v11711_v62  ;;  %v11723_v45 = vrot.slane %v21428_v42, %v22061_v16 }
 0xb5c   : > { %12681 = vmatmul.mubr.bf16.vlgmr.msra.gmra.mrb[28].mxu0 %v21258_v57  ;;  %12734 = vmatmul.mubr.bf16.vlgmr.msra.gmra.mrb[20].mxu1 %v21258_v57 }
 0xb5d   : > { %12755 = vmatpush1.bf16.msra.mxu0 %v15194_v47  ;;  %12808 = vmatpush1.bf16.msra.mxu1 %v15196_v44  ;;  %v17056_v47 = vld [vmem:[%s18365_s19] sm:$0xff]  }
 0xb5e   : > { %12756 = vmatprep.subr.bf16.mxu0 %v15211_v0  ;;  %12809 = vmatprep.subr.bf16.mxu1 %v15213_v15  ;;  %v17057_v44 = vld [vmem:[%s18365_s19 + $0x80] sm:$0xff]   ;;  %v17058_v0 = vld [vmem:[%s18365_s19 + $0x48] sm:$0xff]  }
 0xb5f   : > { %12690 = vmatprep.mubr.bf16.mxu0 %v22053_v23  ;;  %12743 = vmatprep.mubr.bf16.mxu1 %v22053_v23  ;;  %v17059_v15 = vld [vmem:[%s18365_s19 + $0xc8] sm:$0xff]  }
 0xb61   : > { %12757 = vmatpush1.bf16.msra.mxu0 %v15210_v36  ;;  %12810 = vmatpush1.bf16.msra.mxu1 %v15212_v46  ;;  %v17065_v36 = vld [vmem:[%s18365_s19 + $0x90] sm:$0xff]   ;;  %v17067_v46 = vld [vmem:[%s18365_s19 + $0xd8] sm:$0xff]  }
 0xb62   : > { %12758 = vmatprep.subr.bf16.mxu0 %v15227_v6  ;;  %12811 = vmatprep.subr.bf16.mxu1 %v15229_v49  ;;  %v17068_v6 = vld [vmem:[%s18365_s19 + $0x18] sm:$0xff]  }
 0xb63   : > { %v17069_v49 = vld [vmem:[%s18365_s19 + $0x98] sm:$0xff]  }
 0xb64   : > { %12691 = vmatmul.mubr.bf16.gmra.mrb[32].mxu0 %v21285_v18  ;;  %12744 = vmatmul.mubr.bf16.gmra.mrb[24].mxu1 %v21285_v18 }
 0xb65   : > { %12759 = vmatpush1.bf16.msra.mxu0 %v15226_v56  ;;  %12812 = vmatpush1.bf16.msra.mxu1 %v15228_v22  ;;  %v17075_v56 = vld [vmem:[%s18365_s19 + $0xe8] sm:$0xff]  }
 0xb66   : > { %12760 = vmatprep.subr.bf16.mxu0 %v15243_v5  ;;  %12813 = vmatprep.subr.bf16.mxu1 %v15245_v41  ;;  %v17076_v22 = vld [vmem:[%s18365_s19 + $0x28] sm:$0xff]   ;;  %v17078_v41 = vld [vmem:[%s18365_s19 + $0x70] sm:$0xff]  }
 0xb67   : > { %12786 = vmatprep.mubr.bf16.mxu0 %v22053_v23  ;;  %12839 = vmatprep.mubr.bf16.mxu1 %v22053_v23  ;;  %v17077_v5 = vld [vmem:[%s18365_s19 + $0xa8] sm:$0xff]  }
 0xb69   : > { %12761 = vmatpush1.bf16.msra.mxu0 %v15242_v53  ;;  %12814 = vmatpush1.bf16.msra.mxu1 %v15244_v38  ;;  %v17083_v53 = vld [vmem:[%s18365_s19 + $0xf8] sm:$0xff]  }
 0xb6a   : > { %12762 = vmatprep.subr.bf16.mxu0 %v15259_v3  ;;  %12815 = vmatprep.subr.bf16.mxu1 %v15261_v11  ;;  %v17084_v38 = vld [vmem:[%s18365_s19 + $0x38] sm:$0xff]   ;;  %v17086_v11 = vld [vmem:[%s18365_s19 + $0x140] sm:$0xff]  }
 0xb6b   : > { %v17085_v3 = vld [vmem:[%s18365_s19 + $0xb8] sm:$0xff]  }
 0xb6d   : > { %12763 = vmatpush1.bf16.msra.mxu0 %v15258_v50  ;;  %12816 = vmatpush1.bf16.msra.mxu1 %v15260_v24  ;;  %v22059_v50 = vld [vmem:[#allocation41_spill] sm:$0xff] }
 0xb6e   : > { %12764 = vmatprep.subr.bf16.mxu0 %v15275_v34  ;;  %12817 = vmatprep.subr.bf16.mxu1 %v15277_v60  ;;  %v11719_v24 = vrot.slane %v21428_v42, %v22059_v50  ;;  %v22060_v34 = vld [vmem:[#allocation42_spill] sm:$0xff] }
 0xb6f   : > { %v11727_v60 = vrot.slane %v21428_v42, %v22060_v34 }
 0xb71   : > { %12765 = vmatpush1.bf16.msra.mxu0 %v15274_v39  ;;  %12818 = vmatpush1.bf16.msra.mxu1 %v15276_v25 }
 0xb72   : > { %12766 = vmatprep.subr.bf16.mxu0 %v15291_v55  ;;  %12819 = vmatprep.subr.bf16.mxu1 %v15293_v13 }
 0xb75   : > { %12767 = vmatpush1.bf16.msra.mxu0 %v15290_v31  ;;  %12820 = vmatpush1.bf16.msra.mxu1 %v15292_v58 }
 0xb76   : > { %12768 = vmatprep.subr.bf16.mxu0 %v15307_v61  ;;  %12821 = vmatprep.subr.bf16.mxu1 %v15309_v2 }
 0xb79   : > { %12769 = vmatpush1.bf16.msra.mxu0 %v15306_v51  ;;  %12822 = vmatpush1.bf16.msra.mxu1 %v15308_v29 }
 0xb7a   : > { %15744 = vmatprep.subr.bf16.mxu0 %v17054_v43  ;;  %15772 = vmatprep.subr.bf16.mxu1 %v17055_v48 }
 0xb7c   : > { %12787 = vmatmul.mubr.bf16.vlgmr.msra.gmra.mrb[36].mxu0 %v21258_v57  ;;  %12840 = vmatmul.mubr.bf16.vlgmr.msra.gmra.mrb[28].mxu1 %v21258_v57  ;;  %v17064_v57 = vld [vmem:[%s18365_s19 + $0x10] sm:$0xff]  }
 0xb7d   : > { %12796 = vmatprep.mubr.bf16.mxu0 %v22053_v23  ;;  %12849 = vmatprep.mubr.bf16.mxu1 %v22053_v23  ;;  %v17066_v23 = vld [vmem:[%s18365_s19 + $0x58] sm:$0xff]  }
 0xb7e   : > { %15745 = vmatpush3.bf16.msra.mxu0 %v17056_v47  ;;  %15773 = vmatpush3.bf16.msra.mxu1 %v17057_v44 }
 0xb7f   : > { %15746 = vmatprep.subr.bf16.mxu0 %v17058_v0  ;;  %15774 = vmatprep.subr.bf16.mxu1 %v17059_v15 }
 0xb82   : > { %15747 = vmatpush3.bf16.msra.mxu0 %v17060_v28  ;;  %15775 = vmatpush3.bf16.msra.mxu1 %v17061_v32 }
 0xb83   : > { %15748 = vmatprep.subr.bf16.mxu0 %v17062_v59  ;;  %15776 = vmatprep.subr.bf16.mxu1 %v17063_v4 }
 0xb84   : > { %12797 = vmatmul.mubr.bf16.gmra.mrb[40].mxu0 %v21285_v18  ;;  %12850 = vmatmul.mubr.bf16.gmra.mrb[32].mxu1 %v21285_v18  ;;  %v17074_v18 = vld [vmem:[%s18365_s19 + $0x68] sm:$0xff]  }
 0xb86   : > { %15749 = vmatpush3.bf16.msra.mxu0 %v17064_v57  ;;  %15777 = vmatpush3.bf16.msra.mxu1 %v17065_v36 }
 0xb87   : > { %15750 = vmatprep.subr.bf16.mxu0 %v17066_v23  ;;  %15778 = vmatprep.subr.bf16.mxu1 %v17067_v46 }
 0xb8a   : > { %15751 = vmatpush3.bf16.msra.mxu0 %v17068_v6  ;;  %15779 = vmatpush3.bf16.msra.mxu1 %v17069_v49  ;;  %v17088_v49 = vld [vmem:[%s18365_s19 + $0x100] sm:$0xff]  }
 0xb8b   : > { %15752 = vmatprep.subr.bf16.mxu0 %v17070_v52  ;;  %15780 = vmatprep.subr.bf16.mxu1 %v17071_v9  ;;  %v17089_v52 = vld [vmem:[%s18365_s19 + $0x180] sm:$0xff]  }
 0xb8e   : > { %15753 = vmatpush3.bf16.msra.mxu0 %v17072_v35  ;;  %15781 = vmatpush3.bf16.msra.mxu1 %v17073_v19 }
 0xb8f   : > { %15754 = vmatprep.subr.bf16.mxu0 %v17074_v18  ;;  %15782 = vmatprep.subr.bf16.mxu1 %v17075_v56  ;;  %v17090_v56 = vld [vmem:[%s18365_s19 + $0x148] sm:$0xff]  }
 0xb92   : > { %15755 = vmatpush3.bf16.msra.mxu0 %v17076_v22  ;;  %15783 = vmatpush3.bf16.msra.mxu1 %v17077_v5  ;;  %v17091_v22 = vld [vmem:[%s18365_s19 + $0x1c8] sm:$0xff]  }
 0xb93   : > { %15756 = vmatprep.subr.bf16.mxu0 %v17078_v41  ;;  %15784 = vmatprep.subr.bf16.mxu1 %v17079_v12 }
 0xb96   : > { %15757 = vmatpush3.bf16.msra.mxu0 %v17080_v54  ;;  %15785 = vmatpush3.bf16.msra.mxu1 %v17081_v7 }
 0xb97   : > { %15758 = vmatprep.subr.bf16.mxu0 %v17082_v10  ;;  %15786 = vmatprep.subr.bf16.mxu1 %v17083_v53 }
 0xb9a   : > { %15759 = vmatpush3.bf16.msra.mxu0 %v17084_v38  ;;  %15787 = vmatpush3.bf16.msra.mxu1 %v17085_v3 }
 0xb9b   : > { %15800 = vmatprep.subr.bf16.mxu0 %v17086_v11  ;;  %15828 = vmatprep.subr.bf16.mxu1 %v17087_v33  ;;  %v17092_v33 = vld [vmem:[%s18365_s19 + $0x108] sm:$0xff]  }
 0xbef   : > { %v12470_v17 = vpop.f32.mrb[12].mxu0  ;;  %v12523_v39 = vpop.f32.mrb[4].mxu1 }
 0xbf0   : > { %v12471_v25 = vadd.f32 %v12470_v17, %v11719_v24  ;;  %v12524_v55 = vadd.f32 %v12523_v39, %v11727_v60  ;;  %v12472_v13 = vpop.f32.mrb[13].mxu0  ;;  %v12525_v27 = vpop.f32.mrb[5].mxu1  ;;  %v17093_v17 = vld [vmem:[%s18365_s19 + $0x188] sm:$0xff]  }
 0xbf1   : > { %v12473_v20 = vadd.f32 %v12472_v13, %v11723_v45  ;;  %v12526_v1 = vadd.f32 %v12525_v27, %v11731_v63  ;;  %v12474_v62 = vpop.f32.mrb[14].mxu0  ;;  %v12527_v31 = vpop.f32.mrb[6].mxu1 }
 0xbf2   : > { %v12475_v58 = vadd.f32 %v12474_v62, %v11719_v24  ;;  %v12528_v61 = vadd.f32 %v12527_v31, %v11727_v60  ;;  %v12476_v2 = vpop.f32.mrb[15].mxu0  ;;  %v12529_v51 = vpop.f32.mrb[7].mxu1  ;;  %v12860_v48 = vmax.f32 %v12471_v25, 0.0  ;;  %v12862_v47 = vmax.f32 %v12524_v55, 0.0 }
 0xbf3   : > { %v12477_v29 = vadd.f32 %v12476_v2, %v11723_v45  ;;  %v12530_v43 = vadd.f32 %v12529_v51, %v11731_v63  ;;  %v12861_v15 = vmax.f32 %v12473_v20, 0.0  ;;  %v12863_v28 = vmax.f32 %v12526_v1, 0.0  ;;  %v17097_v2 = vld [vmem:[%s18365_s19 + $0x190] sm:$0xff]   ;;  %v17098_v51 = vld [vmem:[%s18365_s19 + $0x158] sm:$0xff]  }
 0xbf4   : > { %v12876_v44 = vmax.f32 %v12475_v58, 0.0  ;;  %v12878_v0 = vmax.f32 %v12528_v61, 0.0  ;;  %v17096_v61 = vld [vmem:[%s18365_s19 + $0x110] sm:$0xff]  }
 0xbf5   : > { %v12877_v32 = vmax.f32 %v12477_v29, 0.0  ;;  %v12879_v59 = vmax.f32 %v12530_v43, 0.0  ;;  %v17099_v29 = vld [vmem:[%s18365_s19 + $0x1d8] sm:$0xff]  }
 0xbf6   : > { %v12924_v4 = vpack.c.bf16 %v12876_v44, %v12860_v48  ;;  %v12926_v57 = vpack.c.bf16 %v12878_v0, %v12862_v47  ;;  %v17100_v43 = vld [vmem:[%s18365_s19 + $0x118] sm:$0xff]   ;;  %v17102_v47 = vld [vmem:[%s18365_s19 + $0x160] sm:$0xff]  }
 0xbf7   : > { %v12925_v36 = vpack.c.bf16 %v12877_v32, %v12861_v15  ;;  %v12927_v23 = vpack.c.bf16 %v12879_v59, %v12863_v28  ;;  %v12480_v46 = vpop.f32.mrb[16].mxu0  ;;  %v12533_v6 = vpop.f32.mrb[8].mxu1  ;;  %v17101_v48 = vld [vmem:[%s18365_s19 + $0x198] sm:$0xff]   ;;  %v17103_v44 = vld [vmem:[%s18365_s19 + $0x1e0] sm:$0xff]   ;;  %v17106_v28 = vld [vmem:[%s18365_s19 + $0x168] sm:$0xff]   ;;  %v11734_v59 = vsub.s32 4, %v22058_v40 }
 0xbf8   : > { %v12481_v9 = vadd.f32 %v12480_v46, %v11719_v24  ;;  %v12534_v35 = vadd.f32 %v12533_v6, %v11727_v60  ;;  %v12482_v19 = vpop.f32.mrb[17].mxu0  ;;  %v12535_v18 = vpop.f32.mrb[9].mxu1  ;;  %v17104_v0 = vld [vmem:[%s18365_s19 + $0x120] sm:$0xff]   ;;  %v17107_v32 = vld [vmem:[%s18365_s19 + $0x1e8] sm:$0xff]  }
 0xbf9   : > { %v12483_v5 = vadd.f32 %v12482_v19, %v11723_v45  ;;  %v12536_v41 = vadd.f32 %v12535_v18, %v11731_v63  ;;  %v12484_v12 = vpop.f32.mrb[18].mxu0  ;;  %v12537_v54 = vpop.f32.mrb[10].mxu1  ;;  %14019 = vmatprep.mubr.bf16.mxu0 %v12925_v36  ;;  %14068 = vmatprep.mubr.bf16.mxu1 %v12927_v23  ;;  %v17105_v15 = vld [vmem:[%s18365_s19 + $0x1a0] sm:$0xff]   ;;  %v11746_v36 = vsub.s32 7, %v22058_v40  ;;  %v17108_v23 = vld [vmem:[%s18365_s19 + $0x128] sm:$0xff]   ;;  %v21469_v6 = vrot.slane %v21428_v42, %v11734_v59 }
 0xbfa   : > { %v12485_v7 = vadd.f32 %v12484_v12, %v11719_v24  ;;  %v12538_v10 = vadd.f32 %v12537_v54, %v11727_v60  ;;  %v12486_v53 = vpop.f32.mrb[19].mxu0  ;;  %v12539_v38 = vpop.f32.mrb[11].mxu1  ;;  %14020 = vmatmul.mubr.bf16.vlgmr.msra.gmra.mrb[44].mxu0 %v12924_v4  ;;  %14069 = vmatmul.mubr.bf16.vlgmr.msra.gmra.mrb[36].mxu1 %v12926_v57  ;;  %v12892_v39 = vmax.f32 %v12481_v9, 0.0  ;;  %v12894_v25 = vmax.f32 %v12534_v35, 0.0  ;;  %v17094_v24 = vld [vmem:[%s18365_s19 + $0x150] sm:$0xff]   ;;  %v17109_v46 = vld [vmem:[%s18365_s19 + $0x1a8] sm:$0xff]  }
 0xbfb   : > { %v12487_v3 = vadd.f32 %v12486_v53, %v11723_v45  ;;  %v12540_v11 = vadd.f32 %v12539_v38, %v11731_v63  ;;  %15801 = vmatpush3.bf16.msra.mxu0 %v17088_v49  ;;  %15829 = vmatpush3.bf16.msra.mxu1 %v17089_v52  ;;  %v17095_v60 = vld [vmem:[%s18365_s19 + $0x1d0] sm:$0xff]   ;;  %v12893_v27 = vmax.f32 %v12483_v5, 0.0  ;;  %v12895_v20 = vmax.f32 %v12536_v41, 0.0  ;;  %v17115_v53 = vld [vmem:[%s18365_s19 + $0x1f8] sm:$0xff]  }
 0xbfc   : > { %v12908_v55 = vmax.f32 %v12485_v7, 0.0  ;;  %v12910_v13 = vmax.f32 %v12538_v10, 0.0  ;;  %15802 = vmatprep.subr.bf16.mxu0 %v17090_v56  ;;  %15830 = vmatprep.subr.bf16.mxu1 %v17091_v22  ;;  %v11742_v4 = vsub.s32 6, %v22058_v40  ;;  %v11738_v57 = vsub.s32 5, %v22058_v40  ;;  %v17110_v52 = vld [vmem:[%s18365_s19 + $0x170] sm:$0xff]   ;;  %v17114_v10 = vld [vmem:[%s18365_s19 + $0x178] sm:$0xff]  }
 0xbfd   : > { %v12909_v45 = vmax.f32 %v12487_v3, 0.0  ;;  %v12911_v63 = vmax.f32 %v12540_v11, 0.0  ;;  %v17111_v9 = vld [vmem:[%s18365_s19 + $0x1f0] sm:$0xff]   ;;  %v21486_v19 = vrot.slane %v21428_v42, %v11746_v36 }
 0xbfe   : > { %v12940_v1 = vpack.c.bf16 %v12908_v55, %v12892_v39  ;;  %v12942_v62 = vpack.c.bf16 %v12910_v13, %v12894_v25  ;;  %v21474_v49 = vrot.slane %v21428_v42, %v11742_v4  ;;  %v21481_v35 = vrot.slane %v21428_v42, %v11738_v57  ;;  %v17112_v22 = vld [vmem:[%s18365_s19 + $0x130] sm:$0xff]  }
 0xbff   : > { %v12941_v31 = vpack.c.bf16 %v12909_v45, %v12893_v27  ;;  %v12943_v58 = vpack.c.bf16 %v12911_v63, %v12895_v20  ;;  %15803 = vmatpush3.bf16.msra.mxu0 %v17092_v33  ;;  %15831 = vmatpush3.bf16.msra.mxu1 %v17093_v17  ;;  %v17113_v5 = vld [vmem:[%s18365_s19 + $0x1b0] sm:$0xff]  }
 0xc00   : > { %15804 = vmatprep.subr.bf16.mxu0 %v17094_v24  ;;  %15832 = vmatprep.subr.bf16.mxu1 %v17095_v60  ;;  %v17116_v24 = vld [vmem:[%s18365_s19 + $0x138] sm:$0xff]  }
 0xc01   : > { %14027 = vmatprep.mubr.bf16.mxu0 %v12941_v31  ;;  %14076 = vmatprep.mubr.bf16.mxu1 %v12943_v58  ;;  %v17117_v60 = vld [vmem:[%s18365_s19 + $0x1b8] sm:$0xff]  }
 0xc02   : > { %14028 = vmatmul.mubr.bf16.gmra.mrb[48].mxu0 %v12940_v1  ;;  %14077 = vmatmul.mubr.bf16.gmra.mrb[40].mxu1 %v12942_v62  ;;  %v17118_v1 = vld [vmem:[%s18365_s19 + $0x240] sm:$0xff]  }
 0xc03   : > { %15805 = vmatpush3.bf16.msra.mxu0 %v17096_v61  ;;  %15833 = vmatpush3.bf16.msra.mxu1 %v17097_v2  ;;  %v17119_v62 = vld [vmem:[%s18365_s19 + $0x2c0] sm:$0xff]  }
 0xc04   : > { %15806 = vmatprep.subr.bf16.mxu0 %v17098_v51  ;;  %15834 = vmatprep.subr.bf16.mxu1 %v17099_v29 }
 0xc07   : > { %15807 = vmatpush3.bf16.msra.mxu0 %v17100_v43  ;;  %15835 = vmatpush3.bf16.msra.mxu1 %v17101_v48 }
 0xc08   : > { %15808 = vmatprep.subr.bf16.mxu0 %v17102_v47  ;;  %15836 = vmatprep.subr.bf16.mxu1 %v17103_v44 }
 0xc0b   : > { %15809 = vmatpush3.bf16.msra.mxu0 %v17104_v0  ;;  %15837 = vmatpush3.bf16.msra.mxu1 %v17105_v15  ;;  %v17120_v0 = vld [vmem:[%s18365_s19 + $0x200] sm:$0xff]  }
 0xc0c   : > { %15810 = vmatprep.subr.bf16.mxu0 %v17106_v28  ;;  %15838 = vmatprep.subr.bf16.mxu1 %v17107_v32  ;;  %v17121_v15 = vld [vmem:[%s18365_s19 + $0x280] sm:$0xff]  }
 0xc0f   : > { %v12576_v18 = vpop.f32.mrb[20].mxu0  ;;  %v12629_v56 = vpop.f32.mrb[12].mxu1  ;;  %15811 = vmatpush3.bf16.msra.mxu0 %v17108_v23  ;;  %15839 = vmatpush3.bf16.msra.mxu1 %v17109_v46 }
 0xc10   : > { %v12577_v41 = vadd.f32 %v12576_v18, %v21469_v6  ;;  %v12630_v12 = vadd.f32 %v12629_v56, %v21474_v49  ;;  %v12578_v54 = vpop.f32.mrb[21].mxu0  ;;  %v12631_v7 = vpop.f32.mrb[13].mxu1  ;;  %15812 = vmatprep.subr.bf16.mxu0 %v17110_v52  ;;  %15840 = vmatprep.subr.bf16.mxu1 %v17111_v9  ;;  %v17122_v52 = vld [vmem:[%s18365_s19 + $0x248] sm:$0xff]  }
 0xc11   : > { %v12579_v42 = vadd.f32 %v12578_v54, %v21481_v35  ;;  %v12632_v38 = vadd.f32 %v12631_v7, %v21486_v19  ;;  %v12580_v3 = vpop.f32.mrb[22].mxu0  ;;  %v12633_v11 = vpop.f32.mrb[14].mxu1  ;;  %v17123_v9 = vld [vmem:[%s18365_s19 + $0x2c8] sm:$0xff]  }
 0xc12   : > { %v12581_v33 = vadd.f32 %v12580_v3, %v21469_v6  ;;  %v12634_v17 = vadd.f32 %v12633_v11, %v21474_v49  ;;  %v12582_v39 = vpop.f32.mrb[23].mxu0  ;;  %v12635_v25 = vpop.f32.mrb[15].mxu1  ;;  %v12864_v27 = vmax.f32 %v12577_v41, 0.0  ;;  %v12866_v20 = vmax.f32 %v12630_v12, 0.0 }
 0xc13   : > { %v12583_v55 = vadd.f32 %v12582_v39, %v21481_v35  ;;  %v12636_v13 = vadd.f32 %v12635_v25, %v21486_v19  ;;  %15813 = vmatpush3.bf16.msra.mxu0 %v17112_v22  ;;  %15841 = vmatpush3.bf16.msra.mxu1 %v17113_v5  ;;  %v12865_v31 = vmax.f32 %v12579_v42, 0.0  ;;  %v12867_v58 = vmax.f32 %v12632_v38, 0.0  ;;  %v17124_v42 = vld [vmem:[%s18365_s19 + $0x208] sm:$0xff]  }
 0xc14   : > { %v12880_v45 = vmax.f32 %v12581_v33, 0.0  ;;  %v12882_v63 = vmax.f32 %v12634_v17, 0.0  ;;  %15814 = vmatprep.subr.bf16.mxu0 %v17114_v10  ;;  %15842 = vmatprep.subr.bf16.mxu1 %v17115_v53  ;;  %v17125_v38 = vld [vmem:[%s18365_s19 + $0x288] sm:$0xff]   ;;  %v17127_v17 = vld [vmem:[%s18365_s19 + $0x2d0] sm:$0xff]  }
 0xc15   : > { %v12881_v61 = vmax.f32 %v12583_v55, 0.0  ;;  %v12883_v2 = vmax.f32 %v12636_v13, 0.0 }
 0xc16   : > { %v12928_v51 = vpack.c.bf16 %v12880_v45, %v12864_v27  ;;  %v12930_v29 = vpack.c.bf16 %v12882_v63, %v12866_v20  ;;  %v17128_v27 = vld [vmem:[%s18365_s19 + $0x210] sm:$0xff]   ;;  %v17130_v45 = vld [vmem:[%s18365_s19 + $0x258] sm:$0xff]  }
 0xc17   : > { %v12929_v43 = vpack.c.bf16 %v12881_v61, %v12865_v31  ;;  %v12931_v48 = vpack.c.bf16 %v12883_v2, %v12867_v58  ;;  %v12586_v47 = vpop.f32.mrb[24].mxu0  ;;  %v12639_v44 = vpop.f32.mrb[16].mxu1  ;;  %15815 = vmatpush3.bf16.msra.mxu0 %v17116_v24  ;;  %15843 = vmatpush3.bf16.msra.mxu1 %v17117_v60  ;;  %v17129_v20 = vld [vmem:[%s18365_s19 + $0x290] sm:$0xff]   ;;  %v17131_v63 = vld [vmem:[%s18365_s19 + $0x2d8] sm:$0xff]   ;;  %v17134_v31 = vld [vmem:[%s18365_s19 + $0x260] sm:$0xff]  }
 0xc18   : > { %v12587_v28 = vadd.f32 %v12586_v47, %v21469_v6  ;;  %v12640_v32 = vadd.f32 %v12639_v44, %v21474_v49  ;;  %v12588_v23 = vpop.f32.mrb[25].mxu0  ;;  %v12641_v46 = vpop.f32.mrb[17].mxu1  ;;  %15856 = vmatprep.subr.bf16.mxu0 %v17118_v1  ;;  %15884 = vmatprep.subr.bf16.mxu1 %v17119_v62  ;;  %v17132_v1 = vld [vmem:[%s18365_s19 + $0x218] sm:$0xff]   ;;  %v17135_v58 = vld [vmem:[%s18365_s19 + $0x2e0] sm:$0xff]   ;;  %v17141_v47 = vld [vmem:[%s18365_s19 + $0x2a8] sm:$0xff]  }
 0xc19   : > { %v12589_v18 = vadd.f32 %v12588_v23, %v21481_v35  ;;  %v12642_v56 = vadd.f32 %v12641_v46, %v21486_v19  ;;  %v12590_v22 = vpop.f32.mrb[26].mxu0  ;;  %v12643_v5 = vpop.f32.mrb[18].mxu1  ;;  %14117 = vmatprep.mubr.bf16.mxu0 %v12929_v43  ;;  %14166 = vmatprep.mubr.bf16.mxu1 %v12931_v48  ;;  %v17133_v62 = vld [vmem:[%s18365_s19 + $0x298] sm:$0xff]   ;;  %v17136_v61 = vld [vmem:[%s18365_s19 + $0x220] sm:$0xff]   ;;  %v17140_v48 = vld [vmem:[%s18365_s19 + $0x228] sm:$0xff]  }
 0xc1a   : > { %v12591_v41 = vadd.f32 %v12590_v22, %v21469_v6  ;;  %v12644_v12 = vadd.f32 %v12643_v5, %v21474_v49  ;;  %v12592_v54 = vpop.f32.mrb[27].mxu0  ;;  %v12645_v7 = vpop.f32.mrb[19].mxu1  ;;  %14118 = vmatmul.mubr.bf16.vlgmr.msra.gmra.mrb[52].mxu0 %v12928_v51  ;;  %14167 = vmatmul.mubr.bf16.vlgmr.msra.gmra.mrb[44].mxu1 %v12930_v29  ;;  %v12896_v3 = vmax.f32 %v12587_v28, 0.0  ;;  %v12898_v11 = vmax.f32 %v12640_v32, 0.0  ;;  %v17126_v49 = vld [vmem:[%s18365_s19 + $0x250] sm:$0xff]   ;;  %v17137_v2 = vld [vmem:[%s18365_s19 + $0x2a0] sm:$0xff]  }
 0xc1b   : > { %v12593_v10 = vadd.f32 %v12592_v54, %v21481_v35  ;;  %v12646_v53 = vadd.f32 %v12645_v7, %v21486_v19  ;;  %15857 = vmatpush3.bf16.msra.mxu0 %v17120_v0  ;;  %15885 = vmatpush3.bf16.msra.mxu1 %v17121_v15  ;;  %v12897_v39 = vmax.f32 %v12589_v18, 0.0  ;;  %v12899_v35 = vmax.f32 %v12642_v56, 0.0  ;;  %v17138_v51 = vld [vmem:[%s18365_s19 + $0x268] sm:$0xff]   ;;  %v21533_v43 = vld [vmem:[%s18391_s0 + $0x8] sm:$0xff]  ;;  %v17142_v15 = vld [vmem:[%s18365_s19 + $0x270] sm:$0xff]  }
 0xc1c   : > { %v12912_v33 = vmax.f32 %v12591_v41, 0.0  ;;  %v12914_v6 = vmax.f32 %v12644_v12, 0.0  ;;  %15858 = vmatprep.subr.bf16.mxu0 %v17122_v52  ;;  %15886 = vmatprep.subr.bf16.mxu1 %v17123_v9  ;;  %v17139_v29 = vld [vmem:[%s18365_s19 + $0x2e8] sm:$0xff]   ;;  %v21539_v44 = vrot.slane %v21533_v43, %v22059_v50  ;;  %v21543_v0 = vrot.slane %v21533_v43, %v22060_v34  ;;  %v17143_v28 = vld [vmem:[%s18365_s19 + $0x2f0] sm:$0xff]   ;;  %v17147_v5 = vld [vmem:[%s18365_s19 + $0x2f8] sm:$0xff]  }
 0xc1d   : > { %v12913_v25 = vmax.f32 %v12593_v10, 0.0  ;;  %v12915_v19 = vmax.f32 %v12646_v53, 0.0  ;;  %v21549_v32 = vrot.slane %v21533_v43, %v22061_v16  ;;  %v21554_v23 = vrot.slane %v21533_v43, %v11730_v21  ;;  %v17144_v52 = vld [vmem:[%s18365_s19 + $0x230] sm:$0xff]   ;;  %v17146_v16 = vld [vmem:[%s18365_s19 + $0x278] sm:$0xff]  }
 0xc1e   : > { %v12944_v55 = vpack.c.bf16 %v12912_v33, %v12896_v3  ;;  %v12946_v13 = vpack.c.bf16 %v12914_v6, %v12898_v11  ;;  %v17145_v34 = vld [vmem:[%s18365_s19 + $0x2b0] sm:$0xff]   ;;  %v17148_v11 = vld [vmem:[%s18365_s19 + $0x238] sm:$0xff]  }
 0xc1f   : > { %v12945_v24 = vpack.c.bf16 %v12913_v25, %v12897_v39  ;;  %v12947_v60 = vpack.c.bf16 %v12915_v19, %v12899_v35  ;;  %15859 = vmatpush3.bf16.msra.mxu0 %v17124_v42  ;;  %15887 = vmatpush3.bf16.msra.mxu1 %v17125_v38  ;;  %v17149_v33 = vld [vmem:[%s18365_s19 + $0x2b8] sm:$0xff]   ;;  %v17150_v35 = vld [vmem:[%s18365_s19 + $0x340] sm:$0xff]  }
 0xc20   : > { %15860 = vmatprep.subr.bf16.mxu0 %v17126_v49  ;;  %15888 = vmatprep.subr.bf16.mxu1 %v17127_v17  ;;  %v17151_v25 = vld [vmem:[%s18365_s19 + $0x3c0] sm:$0xff]  }
 0xc21   : > { %14125 = vmatprep.mubr.bf16.mxu0 %v12945_v24  ;;  %14174 = vmatprep.mubr.bf16.mxu1 %v12947_v60 }
 0xc22   : > { %14126 = vmatmul.mubr.bf16.gmra.mrb[56].mxu0 %v12944_v55  ;;  %14175 = vmatmul.mubr.bf16.gmra.mrb[48].mxu1 %v12946_v13 }
 0xc23   : > { %15861 = vmatpush3.bf16.msra.mxu0 %v17128_v27  ;;  %15889 = vmatpush3.bf16.msra.mxu1 %v17129_v20 }
 0xc24   : > { %15862 = vmatprep.subr.bf16.mxu0 %v17130_v45  ;;  %15890 = vmatprep.subr.bf16.mxu1 %v17131_v63 }
 0xc27   : > { %15863 = vmatpush3.bf16.msra.mxu0 %v17132_v1  ;;  %15891 = vmatpush3.bf16.msra.mxu1 %v17133_v62  ;;  %v17152_v62 = vld [vmem:[%s18365_s19 + $0x300] sm:$0xff]  }
 0xc28   : > { %15864 = vmatprep.subr.bf16.mxu0 %v17134_v31  ;;  %15892 = vmatprep.subr.bf16.mxu1 %v17135_v58  ;;  %v17153_v31 = vld [vmem:[%s18365_s19 + $0x380] sm:$0xff]  }
 0xc2b   : > { %15865 = vmatpush3.bf16.msra.mxu0 %v17136_v61  ;;  %15893 = vmatpush3.bf16.msra.mxu1 %v17137_v2 }
 0xc2c   : > { %15866 = vmatprep.subr.bf16.mxu0 %v17138_v51  ;;  %15894 = vmatprep.subr.bf16.mxu1 %v17139_v29  ;;  %v17154_v29 = vld [vmem:[%s18365_s19 + $0x348] sm:$0xff]  }
 0xc2f   : > { %v12682_v46 = vpop.f32.mrb[28].mxu0  ;;  %v12735_v50 = vpop.f32.mrb[20].mxu1  ;;  %15867 = vmatpush3.bf16.msra.mxu0 %v17140_v48  ;;  %15895 = vmatpush3.bf16.msra.mxu1 %v17141_v47  ;;  %v17155_v48 = vld [vmem:[%s18365_s19 + $0x3c8] sm:$0xff]  }
 0xc30   : > { %v12683_v9 = vadd.f32 %v12682_v46, %v21539_v44  ;;  %v12736_v18 = vadd.f32 %v12735_v50, %v21543_v0  ;;  %v12684_v56 = vpop.f32.mrb[29].mxu0  ;;  %v12737_v22 = vpop.f32.mrb[21].mxu1  ;;  %15868 = vmatprep.subr.bf16.mxu0 %v17142_v15  ;;  %15896 = vmatprep.subr.bf16.mxu1 %v17143_v28 }
 0xc31   : > { %v12685_v21 = vadd.f32 %v12684_v56, %v21549_v32  ;;  %v12738_v41 = vadd.f32 %v12737_v22, %v21554_v23  ;;  %v12686_v12 = vpop.f32.mrb[30].mxu0  ;;  %v12739_v54 = vpop.f32.mrb[22].mxu1  ;;  %v17156_v22 = vld [vmem:[%s18365_s19 + $0x308] sm:$0xff]  }
 0xc32   : > { %v12687_v7 = vadd.f32 %v12686_v12, %v21539_v44  ;;  %v12740_v10 = vadd.f32 %v12739_v54, %v21543_v0  ;;  %v12688_v53 = vpop.f32.mrb[31].mxu0  ;;  %v12741_v42 = vpop.f32.mrb[23].mxu1  ;;  %v12868_v6 = vmax.f32 %v12683_v9, 0.0  ;;  %v12870_v49 = vmax.f32 %v12736_v18, 0.0  ;;  %v17159_v12 = vld [vmem:[%s18365_s19 + $0x3d0] sm:$0xff]  }
 0xc33   : > { %v12689_v38 = vadd.f32 %v12688_v53, %v21549_v32  ;;  %v12742_v3 = vadd.f32 %v12741_v42, %v21554_v23  ;;  %15869 = vmatpush3.bf16.msra.mxu0 %v17144_v52  ;;  %15897 = vmatpush3.bf16.msra.mxu1 %v17145_v34  ;;  %v12869_v19 = vmax.f32 %v12685_v21, 0.0  ;;  %v12871_v55 = vmax.f32 %v12738_v41, 0.0 }
 0xc34   : > { %v12884_v17 = vmax.f32 %v12687_v7, 0.0  ;;  %v12886_v39 = vmax.f32 %v12740_v10, 0.0  ;;  %15870 = vmatprep.subr.bf16.mxu0 %v17146_v16  ;;  %15898 = vmatprep.subr.bf16.mxu1 %v17147_v5  ;;  %v17157_v16 = vld [vmem:[%s18365_s19 + $0x388] sm:$0xff]  }
 0xc35   : > { %v12885_v13 = vmax.f32 %v12689_v38, 0.0  ;;  %v12887_v24 = vmax.f32 %v12742_v3, 0.0  ;;  %v17160_v3 = vld [vmem:[%s18365_s19 + $0x310] sm:$0xff]  }
 0xc36   : > { %v12932_v60 = vpack.c.bf16 %v12884_v17, %v12868_v6  ;;  %v12934_v27 = vpack.c.bf16 %v12886_v39, %v12870_v49  ;;  %v17163_v6 = vld [vmem:[%s18365_s19 + $0x3d8] sm:$0xff]   ;;  %v17166_v39 = vld [vmem:[%s18365_s19 + $0x360] sm:$0xff]  }
 0xc37   : > { %v12933_v20 = vpack.c.bf16 %v12885_v13, %v12869_v19  ;;  %v12935_v45 = vpack.c.bf16 %v12887_v24, %v12871_v55  ;;  %v12692_v63 = vpop.f32.mrb[32].mxu0  ;;  %v12745_v1 = vpop.f32.mrb[24].mxu1  ;;  %15871 = vmatpush3.bf16.msra.mxu0 %v17148_v11  ;;  %15899 = vmatpush3.bf16.msra.mxu1 %v17149_v33  ;;  %v17161_v11 = vld [vmem:[%s18365_s19 + $0x390] sm:$0xff]   ;;  %v17162_v33 = vld [vmem:[%s18365_s19 + $0x358] sm:$0xff]   ;;  %v17169_v19 = vld [vmem:[%s18365_s19 + $0x3a0] sm:$0xff]  }
 0xc38   : > { %v12693_v58 = vadd.f32 %v12692_v63, %v21539_v44  ;;  %v12746_v61 = vadd.f32 %v12745_v1, %v21543_v0  ;;  %v12694_v2 = vpop.f32.mrb[33].mxu0  ;;  %v12747_v51 = vpop.f32.mrb[25].mxu1  ;;  %15912 = vmatprep.subr.bf16.mxu0 %v17150_v35  ;;  %15940 = vmatprep.subr.bf16.mxu1 %v17151_v25  ;;  %v17164_v49 = vld [vmem:[%s18365_s19 + $0x318] sm:$0xff]   ;;  %v17167_v35 = vld [vmem:[%s18365_s19 + $0x3e0] sm:$0xff]   ;;  %v17170_v55 = vld [vmem:[%s18365_s19 + $0x368] sm:$0xff]   ;;  %v21613_v1 = vrot.slane %v21533_v43, %v11738_v57 }
 0xc39   : > { %v12695_v47 = vadd.f32 %v12694_v2, %v21549_v32  ;;  %v12748_v15 = vadd.f32 %v12747_v51, %v21554_v23  ;;  %v12696_v28 = vpop.f32.mrb[34].mxu0  ;;  %v12749_v46 = vpop.f32.mrb[26].mxu1  ;;  %14215 = vmatprep.mubr.bf16.mxu0 %v12933_v20  ;;  %14264 = vmatprep.mubr.bf16.mxu1 %v12935_v45  ;;  %v17165_v17 = vld [vmem:[%s18365_s19 + $0x398] sm:$0xff]   ;;  %v17168_v25 = vld [vmem:[%s18365_s19 + $0x320] sm:$0xff]   ;;  %v17171_v13 = vld [vmem:[%s18365_s19 + $0x3e8] sm:$0xff]   ;;  %v11775_v20 = vrot.slane %v21533_v43, %v11742_v4 }
 0xc3a   : > { %v12697_v50 = vadd.f32 %v12696_v28, %v21539_v44  ;;  %v12750_v52 = vadd.f32 %v12749_v46, %v21543_v0  ;;  %v12698_v34 = vpop.f32.mrb[35].mxu0  ;;  %v12751_v9 = vpop.f32.mrb[27].mxu1  ;;  %14216 = vmatmul.mubr.bf16.vlgmr.msra.gmra.mrb[60].mxu0 %v12932_v60  ;;  %14265 = vmatmul.mubr.bf16.vlgmr.msra.gmra.mrb[52].mxu1 %v12934_v27  ;;  %v12900_v5 = vmax.f32 %v12693_v58, 0.0  ;;  %v12902_v21 = vmax.f32 %v12746_v61, 0.0  ;;  %v17158_v0 = vld [vmem:[%s18365_s19 + $0x350] sm:$0xff]   ;;  %v17172_v24 = vld [vmem:[%s18365_s19 + $0x328] sm:$0xff]  }
 0xc3b   : > { %v12699_v18 = vadd.f32 %v12698_v34, %v21549_v32  ;;  %v12752_v56 = vadd.f32 %v12751_v9, %v21554_v23  ;;  %15913 = vmatpush3.bf16.msra.mxu0 %v17152_v62  ;;  %15941 = vmatpush3.bf16.msra.mxu1 %v17153_v31  ;;  %v12901_v54 = vmax.f32 %v12695_v47, 0.0  ;;  %v12903_v32 = vmax.f32 %v12748_v15, 0.0  ;;  %v17173_v60 = vld [vmem:[%s18365_s19 + $0x3a8] sm:$0xff]   ;;  %v17174_v45 = vld [vmem:[%s18365_s19 + $0x370] sm:$0xff]   ;;  %v17178_v57 = vld [vmem:[%s18365_s19 + $0x378] sm:$0xff]  }
 0xc3c   : > { %v12916_v41 = vmax.f32 %v12697_v50, 0.0  ;;  %v12918_v44 = vmax.f32 %v12750_v52, 0.0  ;;  %15914 = vmatprep.subr.bf16.mxu0 %v17154_v29  ;;  %15942 = vmatprep.subr.bf16.mxu1 %v17155_v48  ;;  %v11767_v27 = vrot.slane %v21533_v43, %v11734_v59  ;;  %v17175_v63 = vld [vmem:[%s18365_s19 + $0x3f0] sm:$0xff]   ;;  %v21618_v62 = vrot.slane %v21533_v43, %v11746_v36  ;;  %v17179_v48 = vld [vmem:[%s18365_s19 + $0x3f8] sm:$0xff]  }
 0xc3d   : > { %v12917_v7 = vmax.f32 %v12699_v18, 0.0  ;;  %v12919_v23 = vmax.f32 %v12752_v56, 0.0  ;;  %v17176_v58 = vld [vmem:[%s18365_s19 + $0x330] sm:$0xff]   ;;  %v17180_v9 = vld [vmem:[%s18365_s19 + $0x338] sm:$0xff]  }
 0xc3e   : > { %v12948_v10 = vpack.c.bf16 %v12916_v41, %v12900_v5  ;;  %v12950_v53 = vpack.c.bf16 %v12918_v44, %v12902_v21  ;;  %v17177_v4 = vld [vmem:[%s18365_s19 + $0x3b0] sm:$0xff]   ;;  %v17181_v18 = vld [vmem:[%s18365_s19 + $0x3b8] sm:$0xff]  }
 0xc3f   : > { %v12949_v42 = vpack.c.bf16 %v12917_v7, %v12901_v54  ;;  %v12951_v38 = vpack.c.bf16 %v12919_v23, %v12903_v32  ;;  %15915 = vmatpush3.bf16.msra.mxu0 %v17156_v22  ;;  %15943 = vmatpush3.bf16.msra.mxu1 %v17157_v16 }
 0xc40   : > { %15916 = vmatprep.subr.bf16.mxu0 %v17158_v0  ;;  %15944 = vmatprep.subr.bf16.mxu1 %v17159_v12 }
 0xc41   : > { %14223 = vmatprep.mubr.bf16.mxu0 %v12949_v42  ;;  %14272 = vmatprep.mubr.bf16.mxu1 %v12951_v38 }
 0xc42   : > { %14224 = vmatmul.mubr.bf16.gmra.mrb[64].mxu0 %v12948_v10  ;;  %14273 = vmatmul.mubr.bf16.gmra.mrb[56].mxu1 %v12950_v53 }
 0xc43   : > { %15917 = vmatpush3.bf16.msra.mxu0 %v17160_v3  ;;  %15945 = vmatpush3.bf16.msra.mxu1 %v17161_v11 }
 0xc44   : > { %15918 = vmatprep.subr.bf16.mxu0 %v17162_v33  ;;  %15946 = vmatprep.subr.bf16.mxu1 %v17163_v6 }
 0xc47   : > { %15919 = vmatpush3.bf16.msra.mxu0 %v17164_v49  ;;  %15947 = vmatpush3.bf16.msra.mxu1 %v17165_v17 }
 0xc48   : > { %15920 = vmatprep.subr.bf16.mxu0 %v17166_v39  ;;  %15948 = vmatprep.subr.bf16.mxu1 %v17167_v35 }
 0xc4b   : > { %15921 = vmatpush3.bf16.msra.mxu0 %v17168_v25  ;;  %15949 = vmatpush3.bf16.msra.mxu1 %v17169_v19 }
 0xc4c   : > { %15922 = vmatprep.subr.bf16.mxu0 %v17170_v55  ;;  %15950 = vmatprep.subr.bf16.mxu1 %v17171_v13 }
 0xc4f   : > { %v12788_v31 = vpop.f32.mrb[36].mxu0  ;;  %v12841_v59 = vpop.f32.mrb[28].mxu1  ;;  %15923 = vmatpush3.bf16.msra.mxu0 %v17172_v24  ;;  %15951 = vmatpush3.bf16.msra.mxu1 %v17173_v60 }
 0xc50   : > { %v12789_v61 = vadd.f32 %v12788_v31, %v11767_v27  ;;  %v12842_v2 = vadd.f32 %v12841_v59, %v11775_v20  ;;  %v12790_v51 = vpop.f32.mrb[37].mxu0  ;;  %v12843_v29 = vpop.f32.mrb[29].mxu1  ;;  %15924 = vmatprep.subr.bf16.mxu0 %v17174_v45  ;;  %15952 = vmatprep.subr.bf16.mxu1 %v17175_v63 }
 0xc51   : > { %v12791_v40 = vadd.f32 %v12790_v51, %v21613_v1  ;;  %v12844_v36 = vadd.f32 %v12843_v29, %v21618_v62  ;;  %v12792_v43 = vpop.f32.mrb[38].mxu0  ;;  %v12845_v47 = vpop.f32.mrb[30].mxu1 }
 0xc52   : > { %v12793_v15 = vadd.f32 %v12792_v43, %v11767_v27  ;;  %v12846_v28 = vadd.f32 %v12845_v47, %v11775_v20  ;;  %v12794_v46 = vpop.f32.mrb[39].mxu0  ;;  %v12847_v50 = vpop.f32.mrb[31].mxu1  ;;  %v12872_v56 = vmax.f32 %v12789_v61, 0.0  ;;  %v12874_v22 = vmax.f32 %v12842_v2, 0.0 }
 0xc53   : > { %v12795_v52 = vadd.f32 %v12794_v46, %v21613_v1  ;;  %v12848_v34 = vadd.f32 %v12847_v50, %v21618_v62  ;;  %15925 = vmatpush3.bf16.msra.mxu0 %v17176_v58  ;;  %15953 = vmatpush3.bf16.msra.mxu1 %v17177_v4  ;;  %v12873_v21 = vmax.f32 %v12791_v40, 0.0  ;;  %v12875_v41 = vmax.f32 %v12844_v36, 0.0 }
 0xc54   : > { %v12888_v16 = vmax.f32 %v12793_v15, 0.0  ;;  %v12890_v5 = vmax.f32 %v12846_v28, 0.0  ;;  %15926 = vmatprep.subr.bf16.mxu0 %v17178_v57  ;;  %15954 = vmatprep.subr.bf16.mxu1 %v17179_v48 }
 0xc55   : > { %v12889_v44 = vmax.f32 %v12795_v52, 0.0  ;;  %v12891_v0 = vmax.f32 %v12848_v34, 0.0 }
 0xc56   : > { %v12936_v12 = vpack.c.bf16 %v12888_v16, %v12872_v56  ;;  %v12938_v54 = vpack.c.bf16 %v12890_v5, %v12874_v22 }
 0xc57   : > { %v12937_v32 = vpack.c.bf16 %v12889_v44, %v12873_v21  ;;  %v12939_v7 = vpack.c.bf16 %v12891_v0, %v12875_v41  ;;  %v12798_v23 = vpop.f32.mrb[40].mxu0  ;;  %v12851_v10 = vpop.f32.mrb[32].mxu1  ;;  %15927 = vmatpush3.bf16.msra.mxu0 %v17180_v9  ;;  %15955 = vmatpush3.bf16.msra.mxu1 %v17181_v18 }
 0xc58   : > { %v12799_v53 = vadd.f32 %v12798_v23, %v11767_v27  ;;  %v12852_v42 = vadd.f32 %v12851_v10, %v11775_v20  ;;  %v12800_v38 = vpop.f32.mrb[41].mxu0  ;;  %v12853_v3 = vpop.f32.mrb[33].mxu1 }
 0xc59   : > { %v12801_v11 = vadd.f32 %v12800_v38, %v21613_v1  ;;  %v12854_v33 = vadd.f32 %v12853_v3, %v21618_v62  ;;  %v12802_v6 = vpop.f32.mrb[42].mxu0  ;;  %v12855_v49 = vpop.f32.mrb[34].mxu1  ;;  %14313 = vmatprep.mubr.bf16.mxu0 %v12937_v32  ;;  %14362 = vmatprep.mubr.bf16.mxu1 %v12939_v7 }
 0xc5a   : > { %v12803_v17 = vadd.f32 %v12802_v6, %v11767_v27  ;;  %v12856_v39 = vadd.f32 %v12855_v49, %v11775_v20  ;;  %v12804_v35 = vpop.f32.mrb[43].mxu0  ;;  %v12857_v25 = vpop.f32.mrb[35].mxu1  ;;  %14314 = vmatmul.mubr.bf16.vlgmr.msra.gmra.mrb[68].mxu0 %v12936_v12  ;;  %14363 = vmatmul.mubr.bf16.vlgmr.msra.gmra.mrb[60].mxu1 %v12938_v54  ;;  %v12904_v13 = vmax.f32 %v12799_v53, 0.0  ;;  %v12906_v24 = vmax.f32 %v12852_v42, 0.0 }
 0xc5b   : > { %v12805_v19 = vadd.f32 %v12804_v35, %v21613_v1  ;;  %v12858_v55 = vadd.f32 %v12857_v25, %v21618_v62  ;;  %v12905_v63 = vmax.f32 %v12801_v11, 0.0  ;;  %v12907_v31 = vmax.f32 %v12854_v33, 0.0  ;;  %v15310_v62 = vld [vmem:[%s907_s8] ss:$0 sm:$0xff] }
 0xc5c   : > { %v12920_v60 = vmax.f32 %v12803_v17, 0.0  ;;  %v12922_v45 = vmax.f32 %v12856_v39, 0.0 }
 0xc5d   : > { %v12921_v59 = vmax.f32 %v12805_v19, 0.0  ;;  %v12923_v58 = vmax.f32 %v12858_v55, 0.0 }
 0xc5e   : > { %v12952_v4 = vpack.c.bf16 %v12920_v60, %v12904_v13  ;;  %v12954_v27 = vpack.c.bf16 %v12922_v45, %v12906_v24 }
 0xc5f   : > { %v12953_v20 = vpack.c.bf16 %v12921_v59, %v12905_v63  ;;  %v12955_v61 = vpack.c.bf16 %v12923_v58, %v12907_v31 }
 0xc61   : > { %14321 = vmatprep.mubr.bf16.mxu0 %v12953_v20  ;;  %14370 = vmatprep.mubr.bf16.mxu1 %v12955_v61 }
 0xc62   : > { %14322 = vmatmul.mubr.bf16.gmra.mrb[72].mxu0 %v12952_v4  ;;  %14371 = vmatmul.mubr.bf16.gmra.mrb[64].mxu1 %v12954_v27 }
 0xccd   : > { %v15760_v1 = vpop.f32.mrb[44].mxu0  ;;  %v15788_v2 = vpop.f32.mrb[36].mxu1 }
 0xcce   : > { %v15761_v51 = vpop.f32.mrb[45].mxu0  ;;  %v15789_v29 = vpop.f32.mrb[37].mxu1 }
 0xccf   : > { %v15762_v57 = vadd.f32 %v15761_v51, %v15760_v1  ;;  %v15790_v48 = vadd.f32 %v15789_v29, %v15788_v2  ;;  %v15763_v40 = vpop.f32.mrb[46].mxu0  ;;  %v15791_v36 = vpop.f32.mrb[38].mxu1 }
 0xcd0   : > { %v15764_v43 = vpop.f32.mrb[47].mxu0  ;;  %v15792_v47 = vpop.f32.mrb[39].mxu1 }
 0xcd1   : > { %v14022_v15 = vadd.f32 %v15762_v57, %v15310_v62  ;;  %v15765_v28 = vadd.f32 %v15764_v43, %v15763_v40  ;;  %v15793_v46 = vadd.f32 %v15792_v47, %v15791_v36 }
 0xcd3   : > { %v14071_v50 = vadd.f32 %v15790_v48, %v14022_v15  ;;  %v14025_v52 = vadd.f32 %v15765_v28, %v15310_v62 }
 0xcd5   : > { %v14074_v34 = vadd.f32 %v15793_v46, %v14025_v52  ;;  %v15766_v9 = vpop.f32.mrb[48].mxu0  ;;  %v15794_v18 = vpop.f32.mrb[40].mxu1 }
 0xcd6   : > { %v15767_v56 = vpop.f32.mrb[49].mxu0  ;;  %v15795_v22 = vpop.f32.mrb[41].mxu1 }
 0xcd7   : > { %v15768_v16 = vadd.f32 %v15767_v56, %v15766_v9  ;;  %v15796_v5 = vadd.f32 %v15795_v22, %v15794_v18  ;;  %v15769_v21 = vpop.f32.mrb[50].mxu0  ;;  %v15797_v41 = vpop.f32.mrb[42].mxu1 }
 0xcd8   : > { %v15770_v44 = vpop.f32.mrb[51].mxu0  ;;  %v15798_v0 = vpop.f32.mrb[43].mxu1 }
 0xcd9   : > { %v14030_v12 = vadd.f32 %v15768_v16, %v15310_v62  ;;  %v15771_v54 = vadd.f32 %v15770_v44, %v15769_v21  ;;  %v15799_v32 = vadd.f32 %v15798_v0, %v15797_v41 }
 0xcdb   : > { %v14079_v7 = vadd.f32 %v15796_v5, %v14030_v12  ;;  %v14033_v23 = vadd.f32 %v15771_v54, %v15310_v62 }
 0xcdd   : > { %v14082_v10 = vadd.f32 %v15799_v32, %v14033_v23 }
 0xced   : > { %v15816_v53 = vpop.f32.mrb[52].mxu0  ;;  %v15844_v42 = vpop.f32.mrb[44].mxu1 }
 0xcee   : > { %v15817_v38 = vpop.f32.mrb[53].mxu0  ;;  %v15845_v3 = vpop.f32.mrb[45].mxu1 }
 0xcef   : > { %v15818_v11 = vadd.f32 %v15817_v38, %v15816_v53  ;;  %v15846_v33 = vadd.f32 %v15845_v3, %v15844_v42  ;;  %v15819_v6 = vpop.f32.mrb[54].mxu0  ;;  %v15847_v49 = vpop.f32.mrb[46].mxu1 }
 0xcf0   : > { %v15820_v17 = vpop.f32.mrb[55].mxu0  ;;  %v15848_v39 = vpop.f32.mrb[47].mxu1 }
 0xcf1   : > { %v14120_v35 = vadd.f32 %v15818_v11, %v14071_v50  ;;  %v15821_v25 = vadd.f32 %v15820_v17, %v15819_v6  ;;  %v15849_v19 = vadd.f32 %v15848_v39, %v15847_v49 }
 0xcf3   : > { %v14169_v55 = vadd.f32 %v15846_v33, %v14120_v35  ;;  %v14123_v13 = vadd.f32 %v15821_v25, %v14074_v34 }
 0xcf5   : > { %v14172_v24 = vadd.f32 %v15849_v19, %v14123_v13  ;;  %v15822_v60 = vpop.f32.mrb[56].mxu0  ;;  %v15850_v45 = vpop.f32.mrb[48].mxu1 }
 0xcf6   : > { %v15823_v63 = vpop.f32.mrb[57].mxu0  ;;  %v15851_v31 = vpop.f32.mrb[49].mxu1 }
 0xcf7   : > { %v15824_v59 = vadd.f32 %v15823_v63, %v15822_v60  ;;  %v15852_v58 = vadd.f32 %v15851_v31, %v15850_v45  ;;  %v15825_v4 = vpop.f32.mrb[58].mxu0  ;;  %v15853_v27 = vpop.f32.mrb[50].mxu1 }
 0xcf8   : > { %v15826_v20 = vpop.f32.mrb[59].mxu0  ;;  %v15854_v61 = vpop.f32.mrb[51].mxu1 }
 0xcf9   : > { %v14128_v1 = vadd.f32 %v15824_v59, %v14079_v7  ;;  %v15827_v2 = vadd.f32 %v15826_v20, %v15825_v4  ;;  %v15855_v62 = vadd.f32 %v15854_v61, %v15853_v27 }
 0xcfb   : > { %v14177_v51 = vadd.f32 %v15852_v58, %v14128_v1  ;;  %v14131_v29 = vadd.f32 %v15827_v2, %v14082_v10 }
 0xcfd   : > { %v14180_v57 = vadd.f32 %v15855_v62, %v14131_v29 }
 0xd0d   : > { %v15872_v48 = vpop.f32.mrb[60].mxu0  ;;  %v15900_v40 = vpop.f32.mrb[52].mxu1 }
 0xd0e   : > { %v15873_v36 = vpop.f32.mrb[61].mxu0  ;;  %v15901_v43 = vpop.f32.mrb[53].mxu1 }
 0xd0f   : > { %v15874_v47 = vadd.f32 %v15873_v36, %v15872_v48  ;;  %v15902_v15 = vadd.f32 %v15901_v43, %v15900_v40  ;;  %v15875_v28 = vpop.f32.mrb[62].mxu0  ;;  %v15903_v46 = vpop.f32.mrb[54].mxu1 }
 0xd10   : > { %v15876_v50 = vpop.f32.mrb[63].mxu0  ;;  %v15904_v52 = vpop.f32.mrb[55].mxu1 }
 0xd11   : > { %v14218_v34 = vadd.f32 %v15874_v47, %v14169_v55  ;;  %v15877_v9 = vadd.f32 %v15876_v50, %v15875_v28  ;;  %v15905_v18 = vadd.f32 %v15904_v52, %v15903_v46 }
 0xd13   : > { %v14267_v56 = vadd.f32 %v15902_v15, %v14218_v34  ;;  %v14221_v22 = vadd.f32 %v15877_v9, %v14172_v24 }
 0xd15   : > { %v14270_v16 = vadd.f32 %v15905_v18, %v14221_v22  ;;  %v15878_v5 = vpop.f32.mrb[64].mxu0  ;;  %v15906_v21 = vpop.f32.mrb[56].mxu1 }
 0xd16   : > { %v15879_v41 = vpop.f32.mrb[65].mxu0  ;;  %v15907_v44 = vpop.f32.mrb[57].mxu1 }
 0xd17   : > { %v15880_v0 = vadd.f32 %v15879_v41, %v15878_v5  ;;  %v15908_v12 = vadd.f32 %v15907_v44, %v15906_v21  ;;  %v15881_v54 = vpop.f32.mrb[66].mxu0  ;;  %v15909_v32 = vpop.f32.mrb[58].mxu1 }
 0xd18   : > { %v15882_v7 = vpop.f32.mrb[67].mxu0  ;;  %v15910_v23 = vpop.f32.mrb[59].mxu1 }
 0xd19   : > { %v14226_v10 = vadd.f32 %v15880_v0, %v14177_v51  ;;  %v15883_v53 = vadd.f32 %v15882_v7, %v15881_v54  ;;  %v15911_v42 = vadd.f32 %v15910_v23, %v15909_v32 }
 0xd1b   : > { %v14275_v38 = vadd.f32 %v15908_v12, %v14226_v10  ;;  %v14229_v3 = vadd.f32 %v15883_v53, %v14180_v57 }
 0xd1d   : > { %v14278_v11 = vadd.f32 %v15911_v42, %v14229_v3 }
 0xd2d   : > { %v15928_v33 = vpop.f32.mrb[68].mxu0  ;;  %v15956_v6 = vpop.f32.mrb[60].mxu1 }
 0xd2e   : > { %v15929_v49 = vpop.f32.mrb[69].mxu0  ;;  %v15957_v17 = vpop.f32.mrb[61].mxu1 }
 0xd2f   : > { %v15930_v39 = vadd.f32 %v15929_v49, %v15928_v33  ;;  %v15958_v35 = vadd.f32 %v15957_v17, %v15956_v6  ;;  %v15931_v25 = vpop.f32.mrb[70].mxu0  ;;  %v15959_v19 = vpop.f32.mrb[62].mxu1  ;;  %v15439_v49 = vld [vmem:[%s910_s4] ss:$0 sm:$0xff]  ;;  %s22065_s4 = sld [smem:[#allocation31_spill]] }
 0xd30   : > { %v15932_v55 = vpop.f32.mrb[71].mxu0  ;;  %v15960_v13 = vpop.f32.mrb[63].mxu1 }
 0xd31   : > { %v14316_v24 = vadd.f32 %v15930_v39, %v14267_v56  ;;  %v15933_v60 = vadd.f32 %v15932_v55, %v15931_v25  ;;  %v15961_v45 = vadd.f32 %v15960_v13, %v15959_v19 }
 0xd33   : > { %v14365_v63 = vadd.f32 %v15958_v35, %v14316_v24  ;;  %v14319_v31 = vadd.f32 %v15933_v60, %v14270_v16  ;;  %v15440_v35 = vld [vmem:[%s913_s14] ss:$0 sm:$0xff] }
 0xd35   : > { %v14368_v59 = vadd.f32 %v15961_v45, %v14319_v31  ;;  %v15934_v58 = vpop.f32.mrb[72].mxu0  ;;  %v15962_v4 = vpop.f32.mrb[64].mxu1  ;;  %v14379_v27 = vadd.f32 %v14365_v63, %v21251_v30  ;;  %p15441_p9 = scmp.ne.s32.totalorder %s22065_s4, 1 }
 0xd36   : > { %v15935_v20 = vpop.f32.mrb[73].mxu0  ;;  %v15963_v61 = vpop.f32.mrb[65].mxu1  ;;  %vm17886_vm7 = vmmov (!%p15441_p9), 0   ;;  %vm14545_vm8 = vcmask (!%p15441_p9), 1041408   ;;  %s22066_s8 = sld [smem:[#allocation98_spill]] (!%p15441_p9) }
 0xd37   : > { %v15936_v1 = vadd.f32 %v15935_v20, %v15934_v58  ;;  %v15964_v2 = vadd.f32 %v15963_v61, %v15962_v4  ;;  %v15937_v62 = vpop.f32.mrb[74].mxu0  ;;  %v15965_v51 = vpop.f32.mrb[66].mxu1  ;;  %14385 = vadd.xlane.f32.xlu1 %v14379_v27  ;;  %v14380_v29 = vadd.f32 %v14368_v59, %v21253_v8  ;;  %v17458_v20 = vld [vmem:[#allocation19] sm:$0xff] (!%p15441_p9)  }
 0xd38   : > { %v15938_v57 = vpop.f32.mrb[75].mxu0  ;;  %v15966_v48 = vpop.f32.mrb[67].mxu1 }
 0xd39   : > { %v14324_v40 = vadd.f32 %v15936_v1, %v14275_v38  ;;  %v15939_v36 = vadd.f32 %v15938_v57, %v15937_v62  ;;  %v15967_v43 = vadd.f32 %v15966_v48, %v15965_v51  ;;  %14387 = vadd.xlane.f32.xlu0 %v14380_v29  ;;  %v17459_v62 = vld [vmem:[#allocation19 + $0x8] sm:$0xff] (!%p15441_p9)  }
 0xd3b   : > { %v14373_v47 = vadd.f32 %v15964_v2, %v14324_v40  ;;  %v14327_v15 = vadd.f32 %v15939_v36, %v14278_v11  ;;  %v17885_v2 = vmov (!%p15441_p9), 0.0  }
 0xd3c   : > { %16805 = vmatprep.subr.bf16.mxu0 (!%p15441_p9), %v17885_v2  ;;  %14581 = vst [vmem:[#allocation3] sm:$0x3] (!%p15441_p9), %v17885_v2  ;;  %16821 = vmatprep.mubr.msk.bf16.mxu0 (!%p15441_p9), %vm17886_vm7, %v17885_v2 }
 0xd3d   : > { %v14376_v28 = vadd.f32 %v15967_v43, %v14327_v15  ;;  %v14381_v30 = vadd.f32 %v14373_v47, %v21281_v14  ;;  %16806 = vmatpush3.bf16.msra.mxu0 (!%p15441_p9), %v17458_v20  ;;  %v17460_v47 = vld [vmem:[#allocation19 + $0x10] sm:$0xff] (!%p15441_p9)  }
 0xd3e   : > { %16807 = vmatprep.subr.bf16.mxu0 (!%p15441_p9), %v17885_v2 }
 0xd3f   : > { %14389 = vadd.xlane.f32.xlu1 %v14381_v30  ;;  %v14382_v46 = vadd.f32 %v14376_v28, %v21273_v26 }
 0xd41   : > { %14391 = vadd.xlane.f32.xlu0 %v14382_v46  ;;  %16808 = vmatpush3.bf16.msra.mxu0 (!%p15441_p9), %v17459_v62 }
 0xd42   : > { %16809 = vmatprep.subr.bf16.mxu0 (!%p15441_p9), %v17885_v2 }
 0xd45   : > { %16810 = vmatpush3.bf16.msra.mxu0 (!%p15441_p9), %v17460_v47 }
 0xd46   : > { %16811 = vmatprep.subr.bf16.mxu0 (!%p15441_p9), %v17885_v2 }
 0xdc4   : > { %v14386_v50 = vpop.xlane.xlu1 %14385 }
 0xdc5   : > { %v14393_v52 = vmul.f32 0.0078125, %v14386_v50 }
 0xdc6   : > { %v14388_v34 = vpop.xlane.xlu0 %14387 }
 0xdc7   : > { %v14397_v9 = vsub.f32 %v14379_v27, %v14393_v52  ;;  %v14394_v8 = vmul.f32 0.0078125, %v14388_v34 }
 0xdc9   : > { %v14398_v18 = vsub.f32 %v14380_v29, %v14394_v8  ;;  %v14401_v56 = vmul.f32 %v14397_v9, %v14397_v9 }
 0xdcb   : > { %14405 = vadd.xlane.f32.xlu1 %v14401_v56  ;;  %v14402_v22 = vmul.f32 %v14398_v18, %v14398_v18 }
 0xdcc   : > { %v14390_v16 = vpop.xlane.xlu1 %14389 }
 0xdcd   : > { %v14395_v5 = vmul.f32 0.0078125, %v14390_v16  ;;  %14407 = vadd.xlane.f32.xlu0 %v14402_v22 }
 0xdce   : > { %v14392_v21 = vpop.xlane.xlu0 %14391 }
 0xdcf   : > { %v14399_v41 = vsub.f32 %v14381_v30, %v14395_v5  ;;  %v14396_v44 = vmul.f32 0.0078125, %v14392_v21 }
 0xdd1   : > { %v14400_v14 = vsub.f32 %v14382_v46, %v14396_v44  ;;  %v14403_v0 = vmul.f32 %v14399_v41, %v14399_v41 }
 0xdd3   : > { %14409 = vadd.xlane.f32.xlu1 %v14403_v0  ;;  %v14404_v26 = vmul.f32 %v14400_v14, %v14400_v14 }
 0xdd5   : > { %14411 = vadd.xlane.f32.xlu0 %v14404_v26 }
 0xe58   : > { %v14406_v12 = vpop.xlane.xlu1 %14405 }
 0xe59   : > { %v14413_v54 = vmul.f32 0.0078125, %v14406_v12 }
 0xe5a   : > { %v14408_v32 = vpop.xlane.xlu0 %14407 }
 0xe5b   : > { %v14417_v7 = vadd.f32 1e-05, %v14413_v54  ;;  %v14414_v23 = vmul.f32 0.0078125, %v14408_v32  ;;  %v17463_v32 = vld [vmem:[#allocation19 + $0x28] sm:$0xff] (!%p15441_p9)  }
 0xe5d   : > { %17446 = vrsqrt.f32 %v14417_v7  ;;  %v14418_v10 = vadd.f32 1e-05, %v14414_v23 }
 0xe5f   : > { %17448 = vrsqrt.f32 %v14418_v10 }
 0xe60   : > { %v14410_v53 = vpop.xlane.xlu1 %14409 }
 0xe61   : > { %v14415_v42 = vmul.f32 0.0078125, %v14410_v53 }
 0xe62   : > { %v14412_v38 = vpop.xlane.xlu0 %14411 }
 0xe63   : > { %v14419_v3 = vadd.f32 1e-05, %v14415_v42  ;;  %v14416_v11 = vmul.f32 0.0078125, %v14412_v38 }
 0xe65   : > { %17450 = vrsqrt.f32 %v14419_v3  ;;  %v14420_v33 = vadd.f32 1e-05, %v14416_v11  ;;  %v17464_v11 = vld [vmem:[#allocation19 + $0x30] sm:$0xff] (!%p15441_p9)  }
 0xe67   : > { %v17447_v6 = vpop.eup %17446  ;;  %17452 = vrsqrt.f32 %v14420_v33 }
 0xe68   : > { %v14425_v17 = vmul.f32 %v17447_v6, %v14397_v9  ;;  %v17461_v9 = vld [vmem:[#allocation19 + $0x18] sm:$0xff] (!%p15441_p9)  }
 0xe69   : > { %v17449_v39 = vpop.eup %17448  ;;  %16812 = vmatpush3.bf16.msra.mxu0 (!%p15441_p9), %v17461_v9 }
 0xe6a   : > { %v14435_v25 = vmul.f32 %v15439_v49, %v14425_v17  ;;  %v14426_v19 = vmul.f32 %v17449_v39, %v14398_v18  ;;  %16813 = vmatprep.subr.bf16.mxu0 (!%p15441_p9), %v17885_v2 }
 0xe6c   : > { %v14445_v55 = vadd.f32 %v15440_v35, %v14435_v25  ;;  %v14436_v13 = vmul.f32 %v15439_v49, %v14426_v19  ;;  %v17465_v25 = vld [vmem:[#allocation19 + $0x38] sm:$0xff] (!%p15441_p9)  }
 0xe6e   : > { %14449 = vst [vmem:[#allocation2] sm:$0xff] %v14445_v55  ;;  %v14446_v24 = vadd.f32 %v15440_v35, %v14436_v13  ;;  %v14461_v61 = vcombine.high (!%p15441_p9), %v14445_v55, %v14445_v55  ;;  %v14468_v1 = vrot.slane (!%p15441_p9), %v14445_v55, %v18544_v37 }
 0xe6f   : > { %v17451_v60 = vpop.eup %17450 }
 0xe70   : > { %14450 = vst [vmem:[#allocation2 + $0x8] sm:$0xff] %v14446_v24  ;;  %v14427_v45 = vmul.f32 %v17451_v60, %v14399_v41  ;;  %v14475_v51 = vrot.slane (!%p15441_p9), %v14461_v61, %v18544_v37  ;;  %v14476_v29 = vcombine.high (!%p15441_p9), %v14468_v1, %v14468_v1  ;;  %v14478_v57 = vcombine.high (!%p15441_p9), %v14446_v24, %v14446_v24  ;;  %v17462_v41 = vld [vmem:[#allocation19 + $0x20] sm:$0xff] (!%p15441_p9)   ;;  %v15442_v61 = vld [vmem:[%s22066_s8] ss:$0 sm:$0xff] (!%p15441_p9) }
 0xe71   : > { %v17453_v63 = vpop.eup %17452  ;;  %v14485_v48 = vrot.slane (!%p15441_p9), %v14446_v24, %v18544_v37  ;;  %v14546_v36 = vsel (!%p15441_p9), %vm14545_vm8, %v14468_v1, 0.0  ;;  %16814 = vmatpush3.bf16.msra.mxu0 (!%p15441_p9), %v17462_v41 }
 0xe72   : > { %v14437_v31 = vmul.f32 %v15439_v49, %v14427_v45  ;;  %v14428_v59 = vmul.f32 %v17453_v63, %v14400_v14  ;;  %14456 = sbr.rel (%p15441_p9) target bundleno = 3958 (0xf76), region = 136  ;;  %v14477_v40 = vcombine.high (!%p15441_p9), %v14475_v51, %v14475_v51  ;;  %v14547_v43 = vsel (!%p15441_p9), %vm14545_vm8, %v14476_v29, 0.0  ;;  %16815 = vmatprep.subr.bf16.mxu0 (!%p15441_p9), %v17885_v2 }
 0xe73   : > { %v14548_v15 = vadd.f32 (!%p15441_p9), %v14547_v43, %v14546_v36  ;;  %v14549_v28 = vsel (!%p15441_p9), %vm14545_vm8, %v14475_v51, 0.0  ;;  %v14492_v30 = vrot.slane (!%p15441_p9), %v14478_v57, %v18544_v37  ;;  %v14493_v46 = vcombine.high (!%p15441_p9), %v14485_v48, %v14485_v48 }
 0xe74   : > { %v14447_v58 = vadd.f32 %v15440_v35, %v14437_v31  ;;  %v14438_v4 = vmul.f32 %v15439_v49, %v14428_v59  ;;  %v14551_v50 = vsel (!%p15441_p9), %vm14545_vm8, %v14477_v40, 0.0  ;;  %v14553_v34 = vsel (!%p15441_p9), %vm14545_vm8, %v14485_v48, 0.0  ;;  %v14582_v31 = vld [vmem:[#allocation3] sm:$0x3] (!%p15441_p9) }
 0xe75   : > { %v14550_v52 = vadd.f32 (!%p15441_p9), %v14549_v28, %v14548_v15  ;;  %v14494_v18 = vcombine.high (!%p15441_p9), %v14492_v30, %v14492_v30  ;;  %v14555_v16 = vsel (!%p15441_p9), %vm14545_vm8, %v14493_v46, 0.0  ;;  %v14557_v21 = vsel (!%p15441_p9), %vm14545_vm8, %v14492_v30, 0.0  ;;  %16816 = vmatpush3.bf16.msra.mxu0 (!%p15441_p9), %v17463_v32 }
 0xe76   : > { %14451 = vst [vmem:[#allocation2 + $0x10] sm:$0xff] %v14447_v58  ;;  %v21653_v27 = vadd.f32 %v15440_v35, %v14438_v4  ;;  %v14495_v56 = vcombine.high (!%p15441_p9), %v14447_v58, %v14447_v58  ;;  %v14502_v22 = vrot.slane (!%p15441_p9), %v14447_v58, %v18544_v37  ;;  %16817 = vmatprep.subr.bf16.mxu0 (!%p15441_p9), %v17885_v2 }
 0xe77   : > { %v14552_v8 = vadd.f32 (!%p15441_p9), %v14551_v50, %v14550_v52  ;;  %v14559_v26 = vsel (!%p15441_p9), %vm14545_vm8, %v14494_v18, 0.0 }
 0xe78   : > { %14452 = vst [vmem:[#allocation2 + $0x18] sm:$0xff] %v21653_v27  ;;  %v14509_v14 = vrot.slane (!%p15441_p9), %v14495_v56, %v18544_v37  ;;  %v14510_v0 = vcombine.high (!%p15441_p9), %v14502_v22, %v14502_v22  ;;  %v14561_v54 = vsel (!%p15441_p9), %vm14545_vm8, %v14502_v22, 0.0  ;;  %v14512_v10 = vcombine.high (!%p15441_p9), %v21653_v27, %v21653_v27 }
 0xe79   : > { %v14554_v5 = vadd.f32 %v14553_v34, %v14552_v8  ;;  %v14519_v53 = vrot.slane %v21653_v27, %v18544_v37  ;;  %16818 = vmatpush3.bf16.msra.mxu0 %v17464_v11 }
 0xe7a   : > { %v14511_v23 = vcombine.high %v14509_v14, %v14509_v14  ;;  %v14563_v42 = vsel %vm14545_vm8, %v14510_v0, 0.0  ;;  %v14565_v3 = vsel %vm14545_vm8, %v14509_v14, 0.0  ;;  %v14526_v6 = vrot.slane %v14512_v10, %v18544_v37  ;;  %16819 = vmatprep.subr.bf16.mxu0 %v17885_v2 }
 0xe7b   : > { %v14556_v44 = vadd.f32 %v14555_v16, %v14554_v5  ;;  %v14527_v49 = vcombine.high %v14519_v53, %v14519_v53  ;;  %v14569_v35 = vsel %vm14545_vm8, %v14519_v53, 0.0 }
 0xe7c   : > { %v14567_v17 = vsel %vm14545_vm8, %v14511_v23, 0.0  ;;  %v14528_v55 = vcombine.high %v14526_v6, %v14526_v6  ;;  %v14573_v60 = vsel %vm14545_vm8, %v14526_v6, 0.0 }
 0xe7d   : > { %v14558_v12 = vadd.f32 %v14557_v21, %v14556_v44  ;;  %v14571_v13 = vsel %vm14545_vm8, %v14527_v49, 0.0  ;;  %16820 = vmatpush3.bf16.msra.mxu0 %v17465_v25 }
 0xe7e   : > { %v14575_v37 = vsel %vm14545_vm8, %v14528_v55, 0.0 }
 0xe7f   : > { %v14560_v7 = vadd.f32 %v14559_v26, %v14558_v12 }
 0xe81   : > { %v14562_v38 = vadd.f32 %v14561_v54, %v14560_v7 }
 0xe83   : > { %v14564_v33 = vadd.f32 %v14563_v42, %v14562_v38 }
 0xe85   : > { %v14566_v39 = vadd.f32 %v14565_v3, %v14564_v33 }
 0xe87   : > { %v14568_v19 = vadd.f32 %v14567_v17, %v14566_v39 }
 0xe89   : > { %v14570_v24 = vadd.f32 %v14569_v35, %v14568_v19 }
 0xe8b   : > { %v14572_v45 = vadd.f32 %v14571_v13, %v14570_v24 }
 0xe8d   : > { %v14574_v63 = vadd.f32 %v14573_v60, %v14572_v45 }
 0xe8f   : > { %v14576_v59 = vadd.f32 %v14575_v37, %v14574_v63 }
 0xe91   : > { %v14583_v58 = vadd.f32 %v14582_v31, %v14576_v59 }
 0xe93   : > { %14584 = vst [vmem:[#allocation3] sm:$0x3] %v14583_v58 }
 0xe9a   : > { %v14588_v4 = vld [vmem:[#allocation3] sm:$0x3] }
 0xe9b   : > { %v14589_v27 = vmul.f32 0.0625, %v14588_v4 }
 0xe9d   : > { %v14590_v20 = vpack.c.bf16 %v14589_v27, %v14589_v27 }
 0xe9f   : > { %16822 = vmatmul.mubr.bf16.vlgmr.msra.gmra.mrb[0].mxu0 %v14590_v20 }
 0xf72   : > { %v14696_v1 = vpop.f32.mrb[0].mxu0 }
 0xf73   : > { %v14697_v2 = vadd.f32 %v15442_v61, %v14696_v1  ;;  %v16823_v62 = vpop.f32.mrb[1].mxu0 }
 0xf74   : > { %v14699_v51 = vpop.f32.mrb[2].mxu0 }
 0xf75   : > { %14702 = vst [vmem:[#allocation21] sm:$0x3] %v14697_v2  ;;  %v16824_v29 = vpop.f32.mrb[3].mxu0 }
 0xf76 PF: > { %s22067_s27 = sld [smem:[#allocation33_spill]]  ;;  %s17887_s18 = smov [#allocation21]  }
 0xf77   : > { %s14710_s12 = sshll.u32 %s17887_s18, 4  ;;  %s14711_s12 = int_to_ptr.vmem [resolvable:$true] %s14710_s12 }
 0xf78   : > { %s17758_s21 = scalar_lea.vmem %s14711_s12, 32  ;;  %p17765_p8 = scmp.lt.s32.totalorder %s14711_s12, %s14711_s12 }
 0xf79   : > { %p17759_p10 = scmp.ne.s32.totalorder %s14711_s12, %s17758_s21  ;;  %p17766_p13 = scmp.lt.s32.totalorder %s17758_s21, %s17758_s21 }
 0xf7b   : > { %p17767_p2 = por %p17766_p13, %p17765_p8 }
 0xf7c   : > { %p16904_p3 = scmp.eq.s32.totalorder %s22067_s27, 1 }
 0xf7e   : > { %p17760_p11 = pnand %p17759_p10, %p16904_p3 }
 0xf80   : > { %p17761_p12 = pneg %p17760_p11 }
 0xf82   : > { %p17768_p0 = pnand %p17767_p2, %p17761_p12 }
 0xf84   : > { %17771 = shalt.err (!%p17768_p0)
}
 0xf85   : > { %s22068_s11 = sld [smem:[#allocation99_spill]] }
 0xf8b   : > { %s17772_s30 = scalar_lea.hbm %s22068_s11, 32 }
 0xf8c   : > { %p17773_p5 = scmp.ne.s32.totalorder %s22068_s11, %s17772_s30  ;;  %p17778_p7 = scmp.lt.u32.totalorder %s17772_s30, %s22068_s11 }
 0xf8e   : > { %p17774_p1 = pnand %p17773_p5, %p16904_p3 }
 0xf90   : > { %p17775_p6 = pneg %p17774_p1 }
 0xf92   : > { %p17780_p4 = pnand %p17778_p7, %p17775_p6 }
 0xf94   : > { %17783 = shalt.err (!%p17780_p4)
}
 0xf95   : > { %16860 = dma.vmem_to_hbm [thread:$0]  (%p16904_p3), %s14711_s12, 32, %s22068_s11, [#allocation6]  }
 0xf96   : > { %17833 = dma.done.wait (%p16904_p3), [#allocation6], 32  }
 0xf97   : > { %17835 = vsyncadd (%p16904_p3), [#allocation6], 4294967264 }
 0xf98 PF: > { %s22069_s24 = sld [smem:[#allocation32_spill]]  ;;  %s22071_s25 = sld [smem:[#allocation30_spill]] }
 0xf99   : > { %s22072_s26 = sld [smem:[#allocation37_spill]]  ;;  %s22073_s22 = sld [smem:[#allocation36_spill]] }
 0xf9a   : > { %s22074_s27 = smov %s17854_s28 }
 0xf9e   : > { %s40_s29 = sadd.s32 1, %s22069_s24   ;;  %s22070_s24 = sld [smem:[#allocation29_spill]] }
 0xf9f   : > { %p37_p9 = scmp.ge.s32.totalorder %s40_s29, 4   ;;  %s22075_s28 = smov %s22073_s22 }
 0xfa1   :  { %39 = sbr.rel (!%p37_p9) target bundleno = 30 (0x1e), region = 237 }
 0xfa8   :  { %14723 = vsyncpa [#allocation5], 1 }
 0xfa9   :  { %14725 = vsyncpa [#allocation5 + $0x1], 1 }
 0xfaa   :  { %14726 = vsyncpa [#allocation8], 1 }
 0xfab   :  { %14727 = vsyncpa [#allocation11], 1 }
 0xfac   :  { %14729 = vsyncpa [#allocation11 + $0x1], 1 }
 0xfad   :  { %14730 = vsyncpa [#allocation14], 1 }
 0xfae   :  { %14732 = vsyncpa [#allocation14 + $0x1], 1 }
 0xfaf   :  { %14733 = vsyncpa [#allocation17], 1 }
 0xfb0   :  { %14735 = vsyncpa [#allocation17 + $0x1], 1 }
 0xfb1   :  { %14736 = vsyncpa [#allocation20], 1 }
 0xfb2   :  { %14737 = vsyncpa [#allocation6], 1 }
 0xfb3   :  { %14739 = vsyncpa [#allocation6 + $0x1], 1 }

</bundles_post_ra>
